<compile_context>
chip_gen: v5e
topology: v5e:2x2
jax: 0.10.0
libtpu: 0.0.40
codegen_flags: <defaults>
</compile_context>

<pallas_src>
import math
from functools import partial

import jax
import jax.numpy as jnp
from jax.experimental import pallas as pl
from jax.experimental.pallas import tpu as pltpu

GN_GROUPS = 32
GN_EPS = 1e-6    # GroupNorm eps in the module
LN_EPS = 1e-5    # nn.LayerNorm default eps
KV_TILE = 512    # flash kv block size (clamped to S in the wrapper)


# ----------------------------- in-kernel helpers -----------------------------

def _gelu_tanh(x):
    # tanh-approximate gelu (EUP tanh); close to torch's exact erf gelu.
    c = math.sqrt(2.0 / math.pi)
    return 0.5 * x * (1.0 + jnp.tanh(c * (x + 0.044715 * x * x * x)))


def _layernorm(x, g, b):
    mu = jnp.mean(x, axis=-1, keepdims=True)
    var = jnp.mean((x - mu) ** 2, axis=-1, keepdims=True)
    return (x - mu) * jax.lax.rsqrt(var + LN_EPS) * g + b


def _mm(a_f32, w_bf16):
    """bf16 x bf16 matmul with f32 accumulation on the MXU."""
    return jnp.dot(a_f32.astype(jnp.bfloat16), w_bf16,
                   preferred_element_type=jnp.float32)


def _mha(z, wq_ref, wk_ref, wv_ref, wo_ref, bo, *, heads, d_head, kv_tile):
    """Self-attention, batched over heads, flash-style over kv blocks.

    wq/wk/wv: (heads, C, d_head) bf16, scale folded into wq.
    wo:       (heads, d_head, inner) bf16.
    Every per-head matmul is a batched dot_general with head on the batch axis,
    so there is no d_head-wide lane slicing and no per-head serial chain.
    """
    S, C = z.shape
    zb = jnp.broadcast_to(z.astype(jnp.bfloat16)[None], (heads, S, C))
    q = jnp.einsum('hsc,hcd->hsd', zb, wq_ref[...],
                   preferred_element_type=jnp.float32).astype(jnp.bfloat16)
    k = jnp.einsum('hsc,hcd->hsd', zb, wk_ref[...],
                   preferred_element_type=jnp.float32).astype(jnp.bfloat16)
    v = jnp.einsum('hsc,hcd->hsd', zb, wv_ref[...],
                   preferred_element_type=jnp.float32).astype(jnp.bfloat16)

    n_kv = S // kv_tile
    m = jnp.full((heads, S, 1), -jnp.inf, jnp.float32)
    l = jnp.zeros((heads, S, 1), jnp.float32)
    acc = jnp.zeros((heads, S, d_head), jnp.float32)
    # Static (trace-time) loop over kv blocks: live scores are (heads, S, kv_tile)
    # instead of the full (heads, S, S).
    for t in range(n_kv):
        kt = k[:, t * kv_tile:(t + 1) * kv_tile, :]
        vt = v[:, t * kv_tile:(t + 1) * kv_tile, :]
        s = jnp.einsum('hqd,hkd->hqk', q, kt,
                       preferred_element_type=jnp.float32)
        m_new = jnp.maximum(m, jnp.max(s, axis=-1, keepdims=True))
        alpha = jnp.exp(m - m_new)
        p = jnp.exp(s - m_new)
        l = alpha * l + jnp.sum(p, axis=-1, keepdims=True)
        acc = alpha * acc + jnp.einsum('hqk,hkd->hqd', p.astype(jnp.bfloat16),
                                       vt, preferred_element_type=jnp.float32)
        m = m_new

    o = acc * pl.reciprocal(l, approx=True)            # EUP reciprocal
    # Per-head output projection (batched), then sum over heads -> (S, inner).
    out_h = jnp.einsum('hsd,hdi->hsi', o.astype(jnp.bfloat16), wo_ref[...],
                       preferred_element_type=jnp.float32)
    out = out_h[0]
    for h in range(1, heads):                          # tiny static reduce over heads
        out = out + out_h[h]
    return out + bo


# --------------------------------- kernel ------------------------------------

def _fused_kernel(x_ref, oh_ref, gng_ref, gnb_ref, win_ref, bin_ref,
                  ln1g_ref, ln1b_ref, wq1_ref, wk1_ref, wv1_ref, wo1_ref, bo1_ref,
                  ln2g_ref, ln2b_ref, wq2_ref, wk2_ref, wv2_ref, wo2_ref, bo2_ref,
                  ln3g_ref, ln3b_ref, wgh_ref, bgh_ref, wgg_ref, bgg_ref,
                  wff_ref, bff_ref, wout_ref, bout_ref, o_ref,
                  *, heads, d_head, n_per_group, kv_tile):
    x_in = x_ref[0]                                    # (S, C) f32 original tokens

    # ---- GroupNorm(32, eps=1e-6, affine): two-pass stats via group one-hot ----
    # (M=1 one-hot matmuls; latency-only at the head of the grid step.)
    oh = oh_ref[...]                                   # (C, G)
    inv_n = 1.0 / n_per_group
    sx = jnp.sum(x_in, axis=0, keepdims=True)          # (1, C)
    mean_g = jnp.dot(sx, oh, preferred_element_type=jnp.float32) * inv_n
    mean_c = jax.lax.dot_general(mean_g, oh, (((1,), (1,)), ((), ())),
                                 preferred_element_type=jnp.float32)   # (1, C)
    xc = x_in - mean_c
    sv = jnp.sum(xc * xc, axis=0, keepdims=True)       # (1, C)
    var_g = jnp.dot(sv, oh, preferred_element_type=jnp.float32) * inv_n
    var_c = jax.lax.dot_general(var_g, oh, (((1,), (1,)), ((), ())),
                                preferred_element_type=jnp.float32)    # (1, C)
    xn = xc * jax.lax.rsqrt(var_c + GN_EPS) * gng_ref[...] + gnb_ref[...]

    # ---- proj_in (1x1 conv == channel matmul) ----
    y = _mm(xn, win_ref[...]) + bin_ref[...]

    # ---- BasicTransformerBlock (depth=1): attn1, attn2 (context=None), GEGLU FF ----
    y = _mha(_layernorm(y, ln1g_ref[...], ln1b_ref[...]),
             wq1_ref, wk1_ref, wv1_ref, wo1_ref, bo1_ref[...],
             heads=heads, d_head=d_head, kv_tile=kv_tile) + y
    y = _mha(_layernorm(y, ln2g_ref[...], ln2b_ref[...]),
             wq2_ref, wk2_ref, wv2_ref, wo2_ref, bo2_ref[...],
             heads=heads, d_head=d_head, kv_tile=kv_tile) + y

    h3 = _layernorm(y, ln3g_ref[...], ln3b_ref[...])
    hidden = _mm(h3, wgh_ref[...]) + bgh_ref[...]      # GEGLU split: two projections,
    gate = _mm(h3, wgg_ref[...]) + bgg_ref[...]        # no slice at ff_dim
    hf = hidden * _gelu_tanh(gate)
    y = _mm(hf, wff_ref[...]) + bff_ref[...] + y

    # ---- proj_out (1x1 conv) + final residual (re-read the resident input block) ----
    o_ref[0] = _mm(y, wout_ref[...]) + bout_ref[...] + x_ref[0]


# --------------------------------- wrapper -----------------------------------

def _full_spec(shape):
    return pl.BlockSpec(shape, lambda b: (0,) * len(shape))


def spatial_transformer_forward(x_nchw, P, *, n_heads, d_head):
    B, C, H, W = x_nchw.shape
    S = H * W
    inner = n_heads * d_head
    assert inner == C, "module's reshape requires inner_dim == in_channels"
    G = P["gn_onehot"].shape[1]
    assert C % G == 0
    kv_tile = min(KV_TILE, S)
    assert S % kv_tile == 0

    x_tokens = jnp.transpose(x_nchw, (0, 2, 3, 1)).reshape(B, S, C)
    n_per_group = float(S * (C // G))

    weights = [P[k] for k in (
        "gn_onehot", "gn_gamma", "gn_beta", "w_in", "b_in",
        "ln1_g", "ln1_b", "wq1", "wk1", "wv1", "wo1", "bo1",
        "ln2_g", "ln2_b", "wq2", "wk2", "wv2", "wo2", "bo2",
        "ln3_g", "ln3_b", "w_geglu_h", "b_geglu_h", "w_geglu_g", "b_geglu_g",
        "w_ff", "b_ff", "w_out", "b_out")]

    tok_spec = pl.BlockSpec((1, S, C), lambda b: (b, 0, 0))
    # TODO(synk): on v7x, single-buffer the invariant weight specs
    #             (pipeline_mode=pl.Buffered(1)) to reclaim VMEM at production sizes.
    out_tokens = pl.pallas_call(
        partial(_fused_kernel, heads=n_heads, d_head=d_head,
                n_per_group=n_per_group, kv_tile=kv_tile),
        grid=(B,),
        in_specs=[tok_spec] + [_full_spec(w.shape) for w in weights],
        out_specs=tok_spec,
        out_shape=jax.ShapeDtypeStruct((B, S, C), jnp.float32),
        compiler_params=pltpu.CompilerParams(
            dimension_semantics=("parallel",),
            vmem_limit_bytes=32 * 1024 * 1024),
    )(x_tokens, *weights)

    return out_tokens.reshape(B, H, W, C).transpose(0, 3, 1, 2)


# ------------------------------ parameters -----------------------------------

def init_raw_params(key, in_channels, n_heads, d_head):
    inner = n_heads * d_head
    ff_inner = 4 * inner
    ks = jax.random.split(key, 20)

    def w(k, shape, scale=0.05):
        return scale * jax.random.normal(k, shape, jnp.float32)

    ones = lambda s: jnp.ones(s, jnp.float32)
    zeros = lambda s: jnp.zeros(s, jnp.float32)

    return dict(
        gn_gamma=ones((1, in_channels)), gn_beta=zeros((1, in_channels)),
        w_in=w(ks[0], (in_channels, inner)), b_in=w(ks[1], (1, inner)),
        ln1_g=ones((1, inner)), ln1_b=zeros((1, inner)),
        wq1=w(ks[2], (inner, inner)), wk1=w(ks[3], (inner, inner)),
        wv1=w(ks[4], (inner, inner)), wo1=w(ks[5], (inner, inner)),
        bo1=w(ks[6], (1, inner)),
        ln2_g=ones((1, inner)), ln2_b=zeros((1, inner)),
        wq2=w(ks[7], (inner, inner)), wk2=w(ks[8], (inner, inner)),
        wv2=w(ks[9], (inner, inner)), wo2=w(ks[10], (inner, inner)),
        bo2=w(ks[11], (1, inner)),
        ln3_g=ones((1, inner)), ln3_b=zeros((1, inner)),
        w_geglu=w(ks[12], (inner, 2 * ff_inner)), b_geglu=w(ks[13], (1, 2 * ff_inner)),
        w_ff=w(ks[14], (ff_inner, inner)), b_ff=w(ks[15], (1, inner)),
        w_out=w(ks[16], (inner, in_channels)), b_out=w(ks[17], (1, in_channels)),
    )


def prepare_params(raw, in_channels, n_heads, d_head):
    """Fold 1/sqrt(d_head) into Q, split weights per head (head on a leading axis),
    split the GEGLU projection into hidden/gate, cast weights to bf16."""
    inner = n_heads * d_head
    ff_inner = 4 * inner
    scale = float(d_head) ** -0.5
    bf = lambda a: a.astype(jnp.bfloat16)

    def per_head_in(w):            # (C, inner) head-major cols -> (heads, C, d_head)
        c_in = w.shape[0]
        return bf(jnp.transpose(w.reshape(c_in, n_heads, d_head), (1, 0, 2)))

    def wo_heads(wo):              # (inner, out) head-major rows -> (heads, d_head, out)
        return bf(wo.reshape(n_heads, d_head, inner))

    G = GN_GROUPS
    onehot = jnp.repeat(jnp.eye(G, dtype=jnp.float32), in_channels // G, axis=0)

    return dict(
        gn_onehot=onehot,
        gn_gamma=raw["gn_gamma"], gn_beta=raw["gn_beta"],
        w_in=bf(raw["w_in"]), b_in=raw["b_in"],
        ln1_g=raw["ln1_g"], ln1_b=raw["ln1_b"],
        wq1=per_head_in(raw["wq1"] * scale),
        wk1=per_head_in(raw["wk1"]), wv1=per_head_in(raw["wv1"]),
        wo1=wo_heads(raw["wo1"]), bo1=raw["bo1"],
        ln2_g=raw["ln2_g"], ln2_b=raw["ln2_b"],
        wq2=per_head_in(raw["wq2"] * scale),
        wk2=per_head_in(raw["wk2"]), wv2=per_head_in(raw["wv2"]),
        wo2=wo_heads(raw["wo2"]), bo2=raw["bo2"],
        ln3_g=raw["ln3_g"], ln3_b=raw["ln3_b"],
        w_geglu_h=bf(raw["w_geglu"][:, :ff_inner]), b_geglu_h=raw["b_geglu"][:, :ff_inner],
        w_geglu_g=bf(raw["w_geglu"][:, ff_inner:]), b_geglu_g=raw["b_geglu"][:, ff_inner:],
        w_ff=bf(raw["w_ff"]), b_ff=raw["b_ff"],
        w_out=bf(raw["w_out"]), b_out=raw["b_out"],
    )


# ------------------------ pure-JAX reference (same precision) -----------------

def reference_forward(x_nchw, P, *, n_heads, d_head):
    B, C, H, W = x_nchw.shape
    S = H * W
    bf = jnp.bfloat16
    f32 = jnp.float32

    def mm(a, w):
        return jnp.einsum('bsc,ck->bsk', a.astype(bf), w, preferred_element_type=f32)

    xt0 = jnp.transpose(x_nchw, (0, 2, 3, 1)).reshape(B, S, C)

    # GroupNorm (two-pass)
    G = GN_GROUPS
    xg = xt0.reshape(B, S, G, C // G)
    mu = jnp.mean(xg, axis=(1, 3), keepdims=True)
    var = jnp.mean((xg - mu) ** 2, axis=(1, 3), keepdims=True)
    xn = ((xg - mu) * jax.lax.rsqrt(var + GN_EPS)).reshape(B, S, C)
    xn = xn * P["gn_gamma"] + P["gn_beta"]
    y = mm(xn, P["w_in"]) + P["b_in"]

    def ln(z, g, b):
        m = z.mean(-1, keepdims=True)
        v = ((z - m) ** 2).mean(-1, keepdims=True)
        return (z - m) * jax.lax.rsqrt(v + LN_EPS) * g + b

    def mha(z, wq, wk, wv, wo_h, bo):
        zb = z.astype(bf)
        q = jnp.einsum('bsc,hcd->bhsd', zb, wq, preferred_element_type=f32)
        k = jnp.einsum('bsc,hcd->bhsd', zb, wk, preferred_element_type=f32)
        v = jnp.einsum('bsc,hcd->bhsd', zb, wv, preferred_element_type=f32)
        att = jnp.einsum('bhqd,bhkd->bhqk', q.astype(bf), k.astype(bf),
                         preferred_element_type=f32)
        p = jax.nn.softmax(att, axis=-1)
        o = jnp.einsum('bhqk,bhkd->bhqd', p.astype(bf), v.astype(bf),
                       preferred_element_type=f32)
        return jnp.einsum('bhqd,hdc->bqc', o.astype(bf), wo_h,
                          preferred_element_type=f32) + bo

    y = mha(ln(y, P["ln1_g"], P["ln1_b"]),
            P["wq1"], P["wk1"], P["wv1"], P["wo1"], P["bo1"]) + y
    y = mha(ln(y, P["ln2_g"], P["ln2_b"]),
            P["wq2"], P["wk2"], P["wv2"], P["wo2"], P["bo2"]) + y

    h3 = ln(y, P["ln3_g"], P["ln3_b"])
    hidden = mm(h3, P["w_geglu_h"]) + P["b_geglu_h"]
    gate = mm(h3, P["w_geglu_g"]) + P["b_geglu_g"]
    c = math.sqrt(2.0 / math.pi)
    hf = hidden * (0.5 * gate * (1.0 + jnp.tanh(c * (gate + 0.044715 * gate ** 3))))
    y = mm(hf, P["w_ff"]) + P["b_ff"] + y

    out_t = mm(y, P["w_out"]) + P["b_out"] + xt0
    return out_t.reshape(B, H, W, C).transpose(0, 3, 1, 2)


# ----------------------------------- main -------------------------------------

if __name__ == "__main__":
    # in_channels must be divisible by 32 (GroupNorm) and equal n_heads*d_head.
    B, C, H, W = 2, 64, 8, 8
    n_heads, d_head = 4, 16

    key = jax.random.PRNGKey(0)
    k_x, k_p = jax.random.split(key)
    x = jax.random.normal(k_x, (B, C, H, W), jnp.float32)
    raw = init_raw_params(k_p, C, n_heads, d_head)
    params = prepare_params(raw, C, n_heads, d_head)

    out = spatial_transformer_forward(x, params, n_heads=n_heads, d_head=d_head)
    out = jax.block_until_ready(out)

    ref = reference_forward(x, params, n_heads=n_heads, d_head=d_head)
    assert out.shape == (B, C, H, W) and out.dtype == jnp.float32
    err = jnp.max(jnp.abs(out - ref))
    assert jnp.allclose(out, ref, atol=1e-2, rtol=1e-2), f"max abs err {err}"

    print("KERNEL_OK")
</pallas_src>

<mosaic_0001>
module attributes {stable_mosaic.version = 11 : i64} {
  func.func @_fused_kernel(%arg0: i32, %arg1: memref<1x64x64xf32, #tpu.memory_space<vmem>>, %arg2: memref<64x32xf32, #tpu.memory_space<vmem>>, %arg3: memref<1x64xf32, #tpu.memory_space<vmem>>, %arg4: memref<1x64xf32, #tpu.memory_space<vmem>>, %arg5: memref<64x64xbf16, #tpu.memory_space<vmem>>, %arg6: memref<1x64xf32, #tpu.memory_space<vmem>>, %arg7: memref<1x64xf32, #tpu.memory_space<vmem>>, %arg8: memref<1x64xf32, #tpu.memory_space<vmem>>, %arg9: memref<4x64x16xbf16, #tpu.memory_space<vmem>>, %arg10: memref<4x64x16xbf16, #tpu.memory_space<vmem>>, %arg11: memref<4x64x16xbf16, #tpu.memory_space<vmem>>, %arg12: memref<4x16x64xbf16, #tpu.memory_space<vmem>>, %arg13: memref<1x64xf32, #tpu.memory_space<vmem>>, %arg14: memref<1x64xf32, #tpu.memory_space<vmem>>, %arg15: memref<1x64xf32, #tpu.memory_space<vmem>>, %arg16: memref<4x64x16xbf16, #tpu.memory_space<vmem>>, %arg17: memref<4x64x16xbf16, #tpu.memory_space<vmem>>, %arg18: memref<4x64x16xbf16, #tpu.memory_space<vmem>>, %arg19: memref<4x16x64xbf16, #tpu.memory_space<vmem>>, %arg20: memref<1x64xf32, #tpu.memory_space<vmem>>, %arg21: memref<1x64xf32, #tpu.memory_space<vmem>>, %arg22: memref<1x64xf32, #tpu.memory_space<vmem>>, %arg23: memref<64x256xbf16, #tpu.memory_space<vmem>>, %arg24: memref<1x256xf32, #tpu.memory_space<vmem>>, %arg25: memref<64x256xbf16, #tpu.memory_space<vmem>>, %arg26: memref<1x256xf32, #tpu.memory_space<vmem>>, %arg27: memref<256x64xbf16, #tpu.memory_space<vmem>>, %arg28: memref<1x64xf32, #tpu.memory_space<vmem>>, %arg29: memref<64x64xbf16, #tpu.memory_space<vmem>>, %arg30: memref<1x64xf32, #tpu.memory_space<vmem>>, %arg31: memref<1x64x64xf32, #tpu.memory_space<vmem>>) attributes {dimension_semantics = [#tpu.dimension_semantics<parallel>], iteration_bounds = array<i64: 2>, scalar_prefetch = 0 : i64, scratch_operands = 0 : i64, tpu.core_type = #tpu.core_type<tc>, window_params = [{transform_indices = @transform_0, window_bounds = array<i64: 1, 64, 64>}, {pipeline_mode = #tpu.pipeline_mode<synchronous>, transform_indices = @transform_1, window_bounds = array<i64: 64, 32>}, {pipeline_mode = #tpu.pipeline_mode<synchronous>, transform_indices = @transform_2, window_bounds = array<i64: 1, 64>}, {pipeline_mode = #tpu.pipeline_mode<synchronous>, transform_indices = @transform_3, window_bounds = array<i64: 1, 64>}, {pipeline_mode = #tpu.pipeline_mode<synchronous>, transform_indices = @transform_4, window_bounds = array<i64: 64, 64>}, {pipeline_mode = #tpu.pipeline_mode<synchronous>, transform_indices = @transform_5, window_bounds = array<i64: 1, 64>}, {pipeline_mode = #tpu.pipeline_mode<synchronous>, transform_indices = @transform_6, window_bounds = array<i64: 1, 64>}, {pipeline_mode = #tpu.pipeline_mode<synchronous>, transform_indices = @transform_7, window_bounds = array<i64: 1, 64>}, {pipeline_mode = #tpu.pipeline_mode<synchronous>, transform_indices = @transform_8, window_bounds = array<i64: 4, 64, 16>}, {pipeline_mode = #tpu.pipeline_mode<synchronous>, transform_indices = @transform_9, window_bounds = array<i64: 4, 64, 16>}, {pipeline_mode = #tpu.pipeline_mode<synchronous>, transform_indices = @transform_10, window_bounds = array<i64: 4, 64, 16>}, {pipeline_mode = #tpu.pipeline_mode<synchronous>, transform_indices = @transform_11, window_bounds = array<i64: 4, 16, 64>}, {pipeline_mode = #tpu.pipeline_mode<synchronous>, transform_indices = @transform_12, window_bounds = array<i64: 1, 64>}, {pipeline_mode = #tpu.pipeline_mode<synchronous>, transform_indices = @transform_13, window_bounds = array<i64: 1, 64>}, {pipeline_mode = #tpu.pipeline_mode<synchronous>, transform_indices = @transform_14, window_bounds = array<i64: 1, 64>}, {pipeline_mode = #tpu.pipeline_mode<synchronous>, transform_indices = @transform_15, window_bounds = array<i64: 4, 64, 16>}, {pipeline_mode = #tpu.pipeline_mode<synchronous>, transform_indices = @transform_16, window_bounds = array<i64: 4, 64, 16>}, {pipeline_mode = #tpu.pipeline_mode<synchronous>, transform_indices = @transform_17, window_bounds = array<i64: 4, 64, 16>}, {pipeline_mode = #tpu.pipeline_mode<synchronous>, transform_indices = @transform_18, window_bounds = array<i64: 4, 16, 64>}, {pipeline_mode = #tpu.pipeline_mode<synchronous>, transform_indices = @transform_19, window_bounds = array<i64: 1, 64>}, {pipeline_mode = #tpu.pipeline_mode<synchronous>, transform_indices = @transform_20, window_bounds = array<i64: 1, 64>}, {pipeline_mode = #tpu.pipeline_mode<synchronous>, transform_indices = @transform_21, window_bounds = array<i64: 1, 64>}, {pipeline_mode = #tpu.pipeline_mode<synchronous>, transform_indices = @transform_22, window_bounds = array<i64: 64, 256>}, {pipeline_mode = #tpu.pipeline_mode<synchronous>, transform_indices = @transform_23, window_bounds = array<i64: 1, 256>}, {pipeline_mode = #tpu.pipeline_mode<synchronous>, transform_indices = @transform_24, window_bounds = array<i64: 64, 256>}, {pipeline_mode = #tpu.pipeline_mode<synchronous>, transform_indices = @transform_25, window_bounds = array<i64: 1, 256>}, {pipeline_mode = #tpu.pipeline_mode<synchronous>, transform_indices = @transform_26, window_bounds = array<i64: 256, 64>}, {pipeline_mode = #tpu.pipeline_mode<synchronous>, transform_indices = @transform_27, window_bounds = array<i64: 1, 64>}, {pipeline_mode = #tpu.pipeline_mode<synchronous>, transform_indices = @transform_28, window_bounds = array<i64: 64, 64>}, {pipeline_mode = #tpu.pipeline_mode<synchronous>, transform_indices = @transform_29, window_bounds = array<i64: 1, 64>}, {transform_indices = @transform_30, window_bounds = array<i64: 1, 64, 64>}]} {
    %c0 = arith.constant 0 : index
    %c0_0 = arith.constant 0 : index
    %c0_1 = arith.constant 0 : index
    %0 = vector.load %arg1[%c0, %c0_0, %c0_1] : memref<1x64x64xf32, #tpu.memory_space<vmem>>, vector<1x64x64xf32>
    %1 = vector.shape_cast %0 : vector<1x64x64xf32> to vector<64x64xf32>
    %c0_2 = arith.constant 0 : index
    %c0_3 = arith.constant 0 : index
    %2 = vector.load %arg2[%c0_2, %c0_3] : memref<64x32xf32, #tpu.memory_space<vmem>>, vector<64x32xf32>
    %cst = arith.constant dense<0.000000e+00> : vector<64xf32>
    %3 = vector.multi_reduction <add>, %1, %cst [0] : vector<64x64xf32> to vector<64xf32>
    %4 = vector.shape_cast %3 : vector<64xf32> to vector<1x64xf32>
    %cst_4 = arith.constant dense<0.000000e+00> : vector<1x32xf32>
    %5 = tpu.matmul %4, %2, %cst_4 {dimension_numbers = #tpu.dot_dimension_numbers<[1], [0], [0], [1], [0, 0, 1, 1], [], []>} : vector<1x64xf32>, vector<64x32xf32>, vector<1x32xf32> -> vector<1x32xf32>
    %cst_5 = arith.constant 7.812500e-03 : f32
    %6 = vector.broadcast %cst_5 : f32 to vector<1x32xf32>
    %7 = arith.mulf %5, %6 : vector<1x32xf32>
    %cst_6 = arith.constant dense<0.000000e+00> : vector<1x64xf32>
    %8 = tpu.matmul %7, %2, %cst_6 {dimension_numbers = #tpu.dot_dimension_numbers<[1], [1], [0], [0], [0, 0, 1, 0], [], []>} : vector<1x32xf32>, vector<64x32xf32>, vector<1x64xf32> -> vector<1x64xf32>
    %9 = vector.broadcast %8 : vector<1x64xf32> to vector<64x64xf32>
    %10 = arith.subf %1, %9 : vector<64x64xf32>
    %11 = arith.mulf %10, %10 : vector<64x64xf32>
    %cst_7 = arith.constant dense<0.000000e+00> : vector<64xf32>
    %12 = vector.multi_reduction <add>, %11, %cst_7 [0] : vector<64x64xf32> to vector<64xf32>
    %13 = vector.shape_cast %12 : vector<64xf32> to vector<1x64xf32>
    %cst_8 = arith.constant dense<0.000000e+00> : vector<1x32xf32>
    %14 = tpu.matmul %13, %2, %cst_8 {dimension_numbers = #tpu.dot_dimension_numbers<[1], [0], [0], [1], [0, 0, 1, 1], [], []>} : vector<1x64xf32>, vector<64x32xf32>, vector<1x32xf32> -> vector<1x32xf32>
    %cst_9 = arith.constant 7.812500e-03 : f32
    %15 = vector.broadcast %cst_9 : f32 to vector<1x32xf32>
    %16 = arith.mulf %14, %15 : vector<1x32xf32>
    %cst_10 = arith.constant dense<0.000000e+00> : vector<1x64xf32>
    %17 = tpu.matmul %16, %2, %cst_10 {dimension_numbers = #tpu.dot_dimension_numbers<[1], [1], [0], [0], [0, 0, 1, 0], [], []>} : vector<1x32xf32>, vector<64x32xf32>, vector<1x64xf32> -> vector<1x64xf32>
    %cst_11 = arith.constant 9.99999997E-7 : f32
    %18 = vector.broadcast %cst_11 : f32 to vector<1x64xf32>
    %19 = arith.addf %17, %18 : vector<1x64xf32>
    %20 = math.rsqrt %19 : vector<1x64xf32>
    %21 = vector.broadcast %20 : vector<1x64xf32> to vector<64x64xf32>
    %22 = arith.mulf %10, %21 : vector<64x64xf32>
    %c0_12 = arith.constant 0 : index
    %c0_13 = arith.constant 0 : index
    %23 = vector.load %arg3[%c0_12, %c0_13] : memref<1x64xf32, #tpu.memory_space<vmem>>, vector<1x64xf32>
    %24 = vector.broadcast %23 : vector<1x64xf32> to vector<64x64xf32>
    %25 = arith.mulf %22, %24 : vector<64x64xf32>
    %c0_14 = arith.constant 0 : index
    %c0_15 = arith.constant 0 : index
    %26 = vector.load %arg4[%c0_14, %c0_15] : memref<1x64xf32, #tpu.memory_space<vmem>>, vector<1x64xf32>
    %27 = vector.broadcast %26 : vector<1x64xf32> to vector<64x64xf32>
    %28 = arith.addf %25, %27 : vector<64x64xf32>
    %c0_16 = arith.constant 0 : index
    %c0_17 = arith.constant 0 : index
    %29 = vector.load %arg5[%c0_16, %c0_17] : memref<64x64xbf16, #tpu.memory_space<vmem>>, vector<64x64xbf16>
    %30 = arith.truncf %28 : vector<64x64xf32> to vector<64x64xbf16>
    %cst_18 = arith.constant dense<0.000000e+00> : vector<64x64xf32>
    %31 = tpu.matmul %30, %29, %cst_18 {dimension_numbers = #tpu.dot_dimension_numbers<[1], [0], [0], [1], [0, 0, 1, 1], [], []>} : vector<64x64xbf16>, vector<64x64xbf16>, vector<64x64xf32> -> vector<64x64xf32>
    %c0_19 = arith.constant 0 : index
    %c0_20 = arith.constant 0 : index
    %32 = vector.load %arg6[%c0_19, %c0_20] : memref<1x64xf32, #tpu.memory_space<vmem>>, vector<1x64xf32>
    %33 = vector.broadcast %32 : vector<1x64xf32> to vector<64x64xf32>
    %34 = arith.addf %31, %33 : vector<64x64xf32>
    %c0_21 = arith.constant 0 : index
    %c0_22 = arith.constant 0 : index
    %35 = vector.load %arg7[%c0_21, %c0_22] : memref<1x64xf32, #tpu.memory_space<vmem>>, vector<1x64xf32>
    %c0_23 = arith.constant 0 : index
    %c0_24 = arith.constant 0 : index
    %36 = vector.load %arg8[%c0_23, %c0_24] : memref<1x64xf32, #tpu.memory_space<vmem>>, vector<1x64xf32>
    %cst_25 = arith.constant dense<0.000000e+00> : vector<64xf32>
    %37 = vector.multi_reduction <add>, %34, %cst_25 [1] : vector<64x64xf32> to vector<64xf32>
    %38 = vector.shape_cast %37 : vector<64xf32> to vector<64x1xf32>
    %cst_26 = arith.constant 6.400000e+01 : f32
    %39 = vector.broadcast %cst_26 : f32 to vector<64x1xf32>
    %40 = arith.divf %38, %39 : vector<64x1xf32>
    %41 = vector.broadcast %40 : vector<64x1xf32> to vector<64x64xf32>
    %42 = arith.subf %34, %41 : vector<64x64xf32>
    %43 = arith.mulf %42, %42 : vector<64x64xf32>
    %cst_27 = arith.constant dense<0.000000e+00> : vector<64xf32>
    %44 = vector.multi_reduction <add>, %43, %cst_27 [1] : vector<64x64xf32> to vector<64xf32>
    %45 = vector.shape_cast %44 : vector<64xf32> to vector<64x1xf32>
    %cst_28 = arith.constant 6.400000e+01 : f32
    %46 = vector.broadcast %cst_28 : f32 to vector<64x1xf32>
    %47 = arith.divf %45, %46 : vector<64x1xf32>
    %48 = vector.broadcast %40 : vector<64x1xf32> to vector<64x64xf32>
    %49 = arith.subf %34, %48 : vector<64x64xf32>
    %cst_29 = arith.constant 9.99999974E-6 : f32
    %50 = vector.broadcast %cst_29 : f32 to vector<64x1xf32>
    %51 = arith.addf %47, %50 : vector<64x1xf32>
    %52 = math.rsqrt %51 : vector<64x1xf32>
    %53 = vector.broadcast %52 : vector<64x1xf32> to vector<64x64xf32>
    %54 = arith.mulf %49, %53 : vector<64x64xf32>
    %55 = vector.broadcast %35 : vector<1x64xf32> to vector<64x64xf32>
    %56 = arith.mulf %54, %55 : vector<64x64xf32>
    %57 = vector.broadcast %36 : vector<1x64xf32> to vector<64x64xf32>
    %58 = arith.addf %56, %57 : vector<64x64xf32>
    %c0_30 = arith.constant 0 : index
    %c0_31 = arith.constant 0 : index
    %59 = vector.load %arg13[%c0_30, %c0_31] : memref<1x64xf32, #tpu.memory_space<vmem>>, vector<1x64xf32>
    %60 = arith.truncf %58 : vector<64x64xf32> to vector<64x64xbf16>
    %61 = vector.shape_cast %60 : vector<64x64xbf16> to vector<1x64x64xbf16>
    %62 = vector.shape_cast %61 : vector<1x64x64xbf16> to vector<1x64x64xbf16>
    %63 = vector.broadcast %62 : vector<1x64x64xbf16> to vector<4x64x64xbf16>
    %c0_32 = arith.constant 0 : index
    %c0_33 = arith.constant 0 : index
    %c0_34 = arith.constant 0 : index
    %64 = vector.load %arg9[%c0_32, %c0_33, %c0_34] : memref<4x64x16xbf16, #tpu.memory_space<vmem>>, vector<4x64x16xbf16>
    "tpu.trace_start"() <{level = 10 : i32, message = "hsc,hcd->hsd"}> : () -> ()
    %cst_35 = arith.constant dense<0.000000e+00> : vector<4x64x16xf32>
    %65 = tpu.matmul %63, %64, %cst_35 {dimension_numbers = #tpu.dot_dimension_numbers<[2], [1], [1], [2], [0, 0, 0, 1, 1, 2], [0], [0]>} : vector<4x64x64xbf16>, vector<4x64x16xbf16>, vector<4x64x16xf32> -> vector<4x64x16xf32>
    "tpu.trace_stop"() : () -> ()
    %66 = arith.truncf %65 : vector<4x64x16xf32> to vector<4x64x16xbf16>
    %c0_36 = arith.constant 0 : index
    %c0_37 = arith.constant 0 : index
    %c0_38 = arith.constant 0 : index
    %67 = vector.load %arg10[%c0_36, %c0_37, %c0_38] : memref<4x64x16xbf16, #tpu.memory_space<vmem>>, vector<4x64x16xbf16>
    "tpu.trace_start"() <{level = 10 : i32, message = "hsc,hcd->hsd"}> : () -> ()
    %cst_39 = arith.constant dense<0.000000e+00> : vector<4x64x16xf32>
    %68 = tpu.matmul %63, %67, %cst_39 {dimension_numbers = #tpu.dot_dimension_numbers<[2], [1], [1], [2], [0, 0, 0, 1, 1, 2], [0], [0]>} : vector<4x64x64xbf16>, vector<4x64x16xbf16>, vector<4x64x16xf32> -> vector<4x64x16xf32>
    "tpu.trace_stop"() : () -> ()
    %69 = arith.truncf %68 : vector<4x64x16xf32> to vector<4x64x16xbf16>
    %c0_40 = arith.constant 0 : index
    %c0_41 = arith.constant 0 : index
    %c0_42 = arith.constant 0 : index
    %70 = vector.load %arg11[%c0_40, %c0_41, %c0_42] : memref<4x64x16xbf16, #tpu.memory_space<vmem>>, vector<4x64x16xbf16>
    "tpu.trace_start"() <{level = 10 : i32, message = "hsc,hcd->hsd"}> : () -> ()
    %cst_43 = arith.constant dense<0.000000e+00> : vector<4x64x16xf32>
    %71 = tpu.matmul %63, %70, %cst_43 {dimension_numbers = #tpu.dot_dimension_numbers<[2], [1], [1], [2], [0, 0, 0, 1, 1, 2], [0], [0]>} : vector<4x64x64xbf16>, vector<4x64x16xbf16>, vector<4x64x16xf32> -> vector<4x64x16xf32>
    "tpu.trace_stop"() : () -> ()
    %72 = arith.truncf %71 : vector<4x64x16xf32> to vector<4x64x16xbf16>
    %cst_44 = arith.constant 0xFF800000 : f32
    %73 = vector.broadcast %cst_44 : f32 to vector<4x64x1xf32>
    %cst_45 = arith.constant 0.000000e+00 : f32
    %74 = vector.broadcast %cst_45 : f32 to vector<4x64x1xf32>
    %cst_46 = arith.constant 0.000000e+00 : f32
    %75 = vector.broadcast %cst_46 : f32 to vector<4x64x16xf32>
    "tpu.trace_start"() <{level = 10 : i32, message = "hqd,hkd->hqk"}> : () -> ()
    %cst_47 = arith.constant dense<0.000000e+00> : vector<4x64x64xf32>
    %76 = tpu.matmul %66, %69, %cst_47 {dimension_numbers = #tpu.dot_dimension_numbers<[2], [2], [1], [1], [0, 0, 0, 1, 1, 1], [0], [0]>} : vector<4x64x16xbf16>, vector<4x64x16xbf16>, vector<4x64x64xf32> -> vector<4x64x64xf32>
    "tpu.trace_stop"() : () -> ()
    %cst_48 = arith.constant dense<0xFF800000> : vector<4x64xf32>
    %77 = vector.multi_reduction <maximumf>, %76, %cst_48 [2] : vector<4x64x64xf32> to vector<4x64xf32>
    %78 = vector.shape_cast %77 : vector<4x64xf32> to vector<4x64x1xf32>
    %79 = arith.maximumf %73, %78 : vector<4x64x1xf32>
    %80 = arith.subf %73, %79 : vector<4x64x1xf32>
    %81 = math.exp %80 : vector<4x64x1xf32>
    %82 = vector.broadcast %79 : vector<4x64x1xf32> to vector<4x64x64xf32>
    %83 = arith.subf %76, %82 : vector<4x64x64xf32>
    %84 = math.exp %83 : vector<4x64x64xf32>
    %85 = arith.mulf %81, %74 : vector<4x64x1xf32>
    %cst_49 = arith.constant dense<0.000000e+00> : vector<4x64xf32>
    %86 = vector.multi_reduction <add>, %84, %cst_49 [2] : vector<4x64x64xf32> to vector<4x64xf32>
    %87 = vector.shape_cast %86 : vector<4x64xf32> to vector<4x64x1xf32>
    %88 = arith.addf %85, %87 : vector<4x64x1xf32>
    %89 = vector.broadcast %81 : vector<4x64x1xf32> to vector<4x64x16xf32>
    %90 = arith.mulf %89, %75 : vector<4x64x16xf32>
    %91 = arith.truncf %84 : vector<4x64x64xf32> to vector<4x64x64xbf16>
    "tpu.trace_start"() <{level = 10 : i32, message = "hqk,hkd->hqd"}> : () -> ()
    %cst_50 = arith.constant dense<0.000000e+00> : vector<4x64x16xf32>
    %92 = tpu.matmul %91, %72, %cst_50 {dimension_numbers = #tpu.dot_dimension_numbers<[2], [1], [1], [2], [0, 0, 0, 1, 1, 2], [0], [0]>} : vector<4x64x64xbf16>, vector<4x64x16xbf16>, vector<4x64x16xf32> -> vector<4x64x16xf32>
    "tpu.trace_stop"() : () -> ()
    %93 = arith.addf %90, %92 : vector<4x64x16xf32>
    %94 = tpu.reciprocal %88 {approx = true} : vector<4x64x1xf32> -> vector<4x64x1xf32>
    %95 = vector.broadcast %94 : vector<4x64x1xf32> to vector<4x64x16xf32>
    %96 = arith.mulf %93, %95 : vector<4x64x16xf32>
    %97 = arith.truncf %96 : vector<4x64x16xf32> to vector<4x64x16xbf16>
    %c0_51 = arith.constant 0 : index
    %c0_52 = arith.constant 0 : index
    %c0_53 = arith.constant 0 : index
    %98 = vector.load %arg12[%c0_51, %c0_52, %c0_53] : memref<4x16x64xbf16, #tpu.memory_space<vmem>>, vector<4x16x64xbf16>
    "tpu.trace_start"() <{level = 10 : i32, message = "hsd,hdi->hsi"}> : () -> ()
    %cst_54 = arith.constant dense<0.000000e+00> : vector<4x64x64xf32>
    %99 = tpu.matmul %97, %98, %cst_54 {dimension_numbers = #tpu.dot_dimension_numbers<[2], [1], [1], [2], [0, 0, 0, 1, 1, 2], [0], [0]>} : vector<4x64x16xbf16>, vector<4x16x64xbf16>, vector<4x64x64xf32> -> vector<4x64x64xf32>
    "tpu.trace_stop"() : () -> ()
    %100 = vector.extract_strided_slice %99 {offsets = [0, 0, 0], sizes = [1, 64, 64], strides = [1, 1, 1]} : vector<4x64x64xf32> to vector<1x64x64xf32>
    %101 = vector.shape_cast %100 : vector<1x64x64xf32> to vector<64x64xf32>
    %102 = vector.extract_strided_slice %99 {offsets = [1, 0, 0], sizes = [1, 64, 64], strides = [1, 1, 1]} : vector<4x64x64xf32> to vector<1x64x64xf32>
    %103 = vector.shape_cast %102 : vector<1x64x64xf32> to vector<64x64xf32>
    %104 = arith.addf %101, %103 : vector<64x64xf32>
    %105 = vector.extract_strided_slice %99 {offsets = [2, 0, 0], sizes = [1, 64, 64], strides = [1, 1, 1]} : vector<4x64x64xf32> to vector<1x64x64xf32>
    %106 = vector.shape_cast %105 : vector<1x64x64xf32> to vector<64x64xf32>
    %107 = arith.addf %104, %106 : vector<64x64xf32>
    %108 = vector.extract_strided_slice %99 {offsets = [3, 0, 0], sizes = [1, 64, 64], strides = [1, 1, 1]} : vector<4x64x64xf32> to vector<1x64x64xf32>
    %109 = vector.shape_cast %108 : vector<1x64x64xf32> to vector<64x64xf32>
    %110 = arith.addf %107, %109 : vector<64x64xf32>
    %111 = vector.broadcast %59 : vector<1x64xf32> to vector<64x64xf32>
    %112 = arith.addf %110, %111 : vector<64x64xf32>
    %113 = arith.addf %112, %34 : vector<64x64xf32>
    %c0_55 = arith.constant 0 : index
    %c0_56 = arith.constant 0 : index
    %114 = vector.load %arg14[%c0_55, %c0_56] : memref<1x64xf32, #tpu.memory_space<vmem>>, vector<1x64xf32>
    %c0_57 = arith.constant 0 : index
    %c0_58 = arith.constant 0 : index
    %115 = vector.load %arg15[%c0_57, %c0_58] : memref<1x64xf32, #tpu.memory_space<vmem>>, vector<1x64xf32>
    %cst_59 = arith.constant dense<0.000000e+00> : vector<64xf32>
    %116 = vector.multi_reduction <add>, %113, %cst_59 [1] : vector<64x64xf32> to vector<64xf32>
    %117 = vector.shape_cast %116 : vector<64xf32> to vector<64x1xf32>
    %cst_60 = arith.constant 6.400000e+01 : f32
    %118 = vector.broadcast %cst_60 : f32 to vector<64x1xf32>
    %119 = arith.divf %117, %118 : vector<64x1xf32>
    %120 = vector.broadcast %119 : vector<64x1xf32> to vector<64x64xf32>
    %121 = arith.subf %113, %120 : vector<64x64xf32>
    %122 = arith.mulf %121, %121 : vector<64x64xf32>
    %cst_61 = arith.constant dense<0.000000e+00> : vector<64xf32>
    %123 = vector.multi_reduction <add>, %122, %cst_61 [1] : vector<64x64xf32> to vector<64xf32>
    %124 = vector.shape_cast %123 : vector<64xf32> to vector<64x1xf32>
    %cst_62 = arith.constant 6.400000e+01 : f32
    %125 = vector.broadcast %cst_62 : f32 to vector<64x1xf32>
    %126 = arith.divf %124, %125 : vector<64x1xf32>
    %127 = vector.broadcast %119 : vector<64x1xf32> to vector<64x64xf32>
    %128 = arith.subf %113, %127 : vector<64x64xf32>
    %cst_63 = arith.constant 9.99999974E-6 : f32
    %129 = vector.broadcast %cst_63 : f32 to vector<64x1xf32>
    %130 = arith.addf %126, %129 : vector<64x1xf32>
    %131 = math.rsqrt %130 : vector<64x1xf32>
    %132 = vector.broadcast %131 : vector<64x1xf32> to vector<64x64xf32>
    %133 = arith.mulf %128, %132 : vector<64x64xf32>
    %134 = vector.broadcast %114 : vector<1x64xf32> to vector<64x64xf32>
    %135 = arith.mulf %133, %134 : vector<64x64xf32>
    %136 = vector.broadcast %115 : vector<1x64xf32> to vector<64x64xf32>
    %137 = arith.addf %135, %136 : vector<64x64xf32>
    %c0_64 = arith.constant 0 : index
    %c0_65 = arith.constant 0 : index
    %138 = vector.load %arg20[%c0_64, %c0_65] : memref<1x64xf32, #tpu.memory_space<vmem>>, vector<1x64xf32>
    %139 = arith.truncf %137 : vector<64x64xf32> to vector<64x64xbf16>
    %140 = vector.shape_cast %139 : vector<64x64xbf16> to vector<1x64x64xbf16>
    %141 = vector.shape_cast %140 : vector<1x64x64xbf16> to vector<1x64x64xbf16>
    %142 = vector.broadcast %141 : vector<1x64x64xbf16> to vector<4x64x64xbf16>
    %c0_66 = arith.constant 0 : index
    %c0_67 = arith.constant 0 : index
    %c0_68 = arith.constant 0 : index
    %143 = vector.load %arg16[%c0_66, %c0_67, %c0_68] : memref<4x64x16xbf16, #tpu.memory_space<vmem>>, vector<4x64x16xbf16>
    "tpu.trace_start"() <{level = 10 : i32, message = "hsc,hcd->hsd"}> : () -> ()
    %cst_69 = arith.constant dense<0.000000e+00> : vector<4x64x16xf32>
    %144 = tpu.matmul %142, %143, %cst_69 {dimension_numbers = #tpu.dot_dimension_numbers<[2], [1], [1], [2], [0, 0, 0, 1, 1, 2], [0], [0]>} : vector<4x64x64xbf16>, vector<4x64x16xbf16>, vector<4x64x16xf32> -> vector<4x64x16xf32>
    "tpu.trace_stop"() : () -> ()
    %145 = arith.truncf %144 : vector<4x64x16xf32> to vector<4x64x16xbf16>
    %c0_70 = arith.constant 0 : index
    %c0_71 = arith.constant 0 : index
    %c0_72 = arith.constant 0 : index
    %146 = vector.load %arg17[%c0_70, %c0_71, %c0_72] : memref<4x64x16xbf16, #tpu.memory_space<vmem>>, vector<4x64x16xbf16>
    "tpu.trace_start"() <{level = 10 : i32, message = "hsc,hcd->hsd"}> : () -> ()
    %cst_73 = arith.constant dense<0.000000e+00> : vector<4x64x16xf32>
    %147 = tpu.matmul %142, %146, %cst_73 {dimension_numbers = #tpu.dot_dimension_numbers<[2], [1], [1], [2], [0, 0, 0, 1, 1, 2], [0], [0]>} : vector<4x64x64xbf16>, vector<4x64x16xbf16>, vector<4x64x16xf32> -> vector<4x64x16xf32>
    "tpu.trace_stop"() : () -> ()
    %148 = arith.truncf %147 : vector<4x64x16xf32> to vector<4x64x16xbf16>
    %c0_74 = arith.constant 0 : index
    %c0_75 = arith.constant 0 : index
    %c0_76 = arith.constant 0 : index
    %149 = vector.load %arg18[%c0_74, %c0_75, %c0_76] : memref<4x64x16xbf16, #tpu.memory_space<vmem>>, vector<4x64x16xbf16>
    "tpu.trace_start"() <{level = 10 : i32, message = "hsc,hcd->hsd"}> : () -> ()
    %cst_77 = arith.constant dense<0.000000e+00> : vector<4x64x16xf32>
    %150 = tpu.matmul %142, %149, %cst_77 {dimension_numbers = #tpu.dot_dimension_numbers<[2], [1], [1], [2], [0, 0, 0, 1, 1, 2], [0], [0]>} : vector<4x64x64xbf16>, vector<4x64x16xbf16>, vector<4x64x16xf32> -> vector<4x64x16xf32>
    "tpu.trace_stop"() : () -> ()
    %151 = arith.truncf %150 : vector<4x64x16xf32> to vector<4x64x16xbf16>
    %cst_78 = arith.constant 0xFF800000 : f32
    %152 = vector.broadcast %cst_78 : f32 to vector<4x64x1xf32>
    %cst_79 = arith.constant 0.000000e+00 : f32
    %153 = vector.broadcast %cst_79 : f32 to vector<4x64x1xf32>
    %cst_80 = arith.constant 0.000000e+00 : f32
    %154 = vector.broadcast %cst_80 : f32 to vector<4x64x16xf32>
    "tpu.trace_start"() <{level = 10 : i32, message = "hqd,hkd->hqk"}> : () -> ()
    %cst_81 = arith.constant dense<0.000000e+00> : vector<4x64x64xf32>
    %155 = tpu.matmul %145, %148, %cst_81 {dimension_numbers = #tpu.dot_dimension_numbers<[2], [2], [1], [1], [0, 0, 0, 1, 1, 1], [0], [0]>} : vector<4x64x16xbf16>, vector<4x64x16xbf16>, vector<4x64x64xf32> -> vector<4x64x64xf32>
    "tpu.trace_stop"() : () -> ()
    %cst_82 = arith.constant dense<0xFF800000> : vector<4x64xf32>
    %156 = vector.multi_reduction <maximumf>, %155, %cst_82 [2] : vector<4x64x64xf32> to vector<4x64xf32>
    %157 = vector.shape_cast %156 : vector<4x64xf32> to vector<4x64x1xf32>
    %158 = arith.maximumf %152, %157 : vector<4x64x1xf32>
    %159 = arith.subf %152, %158 : vector<4x64x1xf32>
    %160 = math.exp %159 : vector<4x64x1xf32>
    %161 = vector.broadcast %158 : vector<4x64x1xf32> to vector<4x64x64xf32>
    %162 = arith.subf %155, %161 : vector<4x64x64xf32>
    %163 = math.exp %162 : vector<4x64x64xf32>
    %164 = arith.mulf %160, %153 : vector<4x64x1xf32>
    %cst_83 = arith.constant dense<0.000000e+00> : vector<4x64xf32>
    %165 = vector.multi_reduction <add>, %163, %cst_83 [2] : vector<4x64x64xf32> to vector<4x64xf32>
    %166 = vector.shape_cast %165 : vector<4x64xf32> to vector<4x64x1xf32>
    %167 = arith.addf %164, %166 : vector<4x64x1xf32>
    %168 = vector.broadcast %160 : vector<4x64x1xf32> to vector<4x64x16xf32>
    %169 = arith.mulf %168, %154 : vector<4x64x16xf32>
    %170 = arith.truncf %163 : vector<4x64x64xf32> to vector<4x64x64xbf16>
    "tpu.trace_start"() <{level = 10 : i32, message = "hqk,hkd->hqd"}> : () -> ()
    %cst_84 = arith.constant dense<0.000000e+00> : vector<4x64x16xf32>
    %171 = tpu.matmul %170, %151, %cst_84 {dimension_numbers = #tpu.dot_dimension_numbers<[2], [1], [1], [2], [0, 0, 0, 1, 1, 2], [0], [0]>} : vector<4x64x64xbf16>, vector<4x64x16xbf16>, vector<4x64x16xf32> -> vector<4x64x16xf32>
    "tpu.trace_stop"() : () -> ()
    %172 = arith.addf %169, %171 : vector<4x64x16xf32>
    %173 = tpu.reciprocal %167 {approx = true} : vector<4x64x1xf32> -> vector<4x64x1xf32>
    %174 = vector.broadcast %173 : vector<4x64x1xf32> to vector<4x64x16xf32>
    %175 = arith.mulf %172, %174 : vector<4x64x16xf32>
    %176 = arith.truncf %175 : vector<4x64x16xf32> to vector<4x64x16xbf16>
    %c0_85 = arith.constant 0 : index
    %c0_86 = arith.constant 0 : index
    %c0_87 = arith.constant 0 : index
    %177 = vector.load %arg19[%c0_85, %c0_86, %c0_87] : memref<4x16x64xbf16, #tpu.memory_space<vmem>>, vector<4x16x64xbf16>
    "tpu.trace_start"() <{level = 10 : i32, message = "hsd,hdi->hsi"}> : () -> ()
    %cst_88 = arith.constant dense<0.000000e+00> : vector<4x64x64xf32>
    %178 = tpu.matmul %176, %177, %cst_88 {dimension_numbers = #tpu.dot_dimension_numbers<[2], [1], [1], [2], [0, 0, 0, 1, 1, 2], [0], [0]>} : vector<4x64x16xbf16>, vector<4x16x64xbf16>, vector<4x64x64xf32> -> vector<4x64x64xf32>
    "tpu.trace_stop"() : () -> ()
    %179 = vector.extract_strided_slice %178 {offsets = [0, 0, 0], sizes = [1, 64, 64], strides = [1, 1, 1]} : vector<4x64x64xf32> to vector<1x64x64xf32>
    %180 = vector.shape_cast %179 : vector<1x64x64xf32> to vector<64x64xf32>
    %181 = vector.extract_strided_slice %178 {offsets = [1, 0, 0], sizes = [1, 64, 64], strides = [1, 1, 1]} : vector<4x64x64xf32> to vector<1x64x64xf32>
    %182 = vector.shape_cast %181 : vector<1x64x64xf32> to vector<64x64xf32>
    %183 = arith.addf %180, %182 : vector<64x64xf32>
    %184 = vector.extract_strided_slice %178 {offsets = [2, 0, 0], sizes = [1, 64, 64], strides = [1, 1, 1]} : vector<4x64x64xf32> to vector<1x64x64xf32>
    %185 = vector.shape_cast %184 : vector<1x64x64xf32> to vector<64x64xf32>
    %186 = arith.addf %183, %185 : vector<64x64xf32>
    %187 = vector.extract_strided_slice %178 {offsets = [3, 0, 0], sizes = [1, 64, 64], strides = [1, 1, 1]} : vector<4x64x64xf32> to vector<1x64x64xf32>
    %188 = vector.shape_cast %187 : vector<1x64x64xf32> to vector<64x64xf32>
    %189 = arith.addf %186, %188 : vector<64x64xf32>
    %190 = vector.broadcast %138 : vector<1x64xf32> to vector<64x64xf32>
    %191 = arith.addf %189, %190 : vector<64x64xf32>
    %192 = arith.addf %191, %113 : vector<64x64xf32>
    %c0_89 = arith.constant 0 : index
    %c0_90 = arith.constant 0 : index
    %193 = vector.load %arg21[%c0_89, %c0_90] : memref<1x64xf32, #tpu.memory_space<vmem>>, vector<1x64xf32>
    %c0_91 = arith.constant 0 : index
    %c0_92 = arith.constant 0 : index
    %194 = vector.load %arg22[%c0_91, %c0_92] : memref<1x64xf32, #tpu.memory_space<vmem>>, vector<1x64xf32>
    %cst_93 = arith.constant dense<0.000000e+00> : vector<64xf32>
    %195 = vector.multi_reduction <add>, %192, %cst_93 [1] : vector<64x64xf32> to vector<64xf32>
    %196 = vector.shape_cast %195 : vector<64xf32> to vector<64x1xf32>
    %cst_94 = arith.constant 6.400000e+01 : f32
    %197 = vector.broadcast %cst_94 : f32 to vector<64x1xf32>
    %198 = arith.divf %196, %197 : vector<64x1xf32>
    %199 = vector.broadcast %198 : vector<64x1xf32> to vector<64x64xf32>
    %200 = arith.subf %192, %199 : vector<64x64xf32>
    %201 = arith.mulf %200, %200 : vector<64x64xf32>
    %cst_95 = arith.constant dense<0.000000e+00> : vector<64xf32>
    %202 = vector.multi_reduction <add>, %201, %cst_95 [1] : vector<64x64xf32> to vector<64xf32>
    %203 = vector.shape_cast %202 : vector<64xf32> to vector<64x1xf32>
    %cst_96 = arith.constant 6.400000e+01 : f32
    %204 = vector.broadcast %cst_96 : f32 to vector<64x1xf32>
    %205 = arith.divf %203, %204 : vector<64x1xf32>
    %206 = vector.broadcast %198 : vector<64x1xf32> to vector<64x64xf32>
    %207 = arith.subf %192, %206 : vector<64x64xf32>
    %cst_97 = arith.constant 9.99999974E-6 : f32
    %208 = vector.broadcast %cst_97 : f32 to vector<64x1xf32>
    %209 = arith.addf %205, %208 : vector<64x1xf32>
    %210 = math.rsqrt %209 : vector<64x1xf32>
    %211 = vector.broadcast %210 : vector<64x1xf32> to vector<64x64xf32>
    %212 = arith.mulf %207, %211 : vector<64x64xf32>
    %213 = vector.broadcast %193 : vector<1x64xf32> to vector<64x64xf32>
    %214 = arith.mulf %212, %213 : vector<64x64xf32>
    %215 = vector.broadcast %194 : vector<1x64xf32> to vector<64x64xf32>
    %216 = arith.addf %214, %215 : vector<64x64xf32>
    %c0_98 = arith.constant 0 : index
    %c0_99 = arith.constant 0 : index
    %217 = vector.load %arg23[%c0_98, %c0_99] : memref<64x256xbf16, #tpu.memory_space<vmem>>, vector<64x256xbf16>
    %218 = arith.truncf %216 : vector<64x64xf32> to vector<64x64xbf16>
    %cst_100 = arith.constant dense<0.000000e+00> : vector<64x256xf32>
    %219 = tpu.matmul %218, %217, %cst_100 {dimension_numbers = #tpu.dot_dimension_numbers<[1], [0], [0], [1], [0, 0, 1, 1], [], []>} : vector<64x64xbf16>, vector<64x256xbf16>, vector<64x256xf32> -> vector<64x256xf32>
    %c0_101 = arith.constant 0 : index
    %c0_102 = arith.constant 0 : index
    %220 = vector.load %arg24[%c0_101, %c0_102] : memref<1x256xf32, #tpu.memory_space<vmem>>, vector<1x256xf32>
    %221 = vector.broadcast %220 : vector<1x256xf32> to vector<64x256xf32>
    %222 = arith.addf %219, %221 : vector<64x256xf32>
    %c0_103 = arith.constant 0 : index
    %c0_104 = arith.constant 0 : index
    %223 = vector.load %arg25[%c0_103, %c0_104] : memref<64x256xbf16, #tpu.memory_space<vmem>>, vector<64x256xbf16>
    %224 = arith.truncf %216 : vector<64x64xf32> to vector<64x64xbf16>
    %cst_105 = arith.constant dense<0.000000e+00> : vector<64x256xf32>
    %225 = tpu.matmul %224, %223, %cst_105 {dimension_numbers = #tpu.dot_dimension_numbers<[1], [0], [0], [1], [0, 0, 1, 1], [], []>} : vector<64x64xbf16>, vector<64x256xbf16>, vector<64x256xf32> -> vector<64x256xf32>
    %c0_106 = arith.constant 0 : index
    %c0_107 = arith.constant 0 : index
    %226 = vector.load %arg26[%c0_106, %c0_107] : memref<1x256xf32, #tpu.memory_space<vmem>>, vector<1x256xf32>
    %227 = vector.broadcast %226 : vector<1x256xf32> to vector<64x256xf32>
    %228 = arith.addf %225, %227 : vector<64x256xf32>
    %cst_108 = arith.constant 5.000000e-01 : f32
    %229 = vector.broadcast %cst_108 : f32 to vector<64x256xf32>
    %230 = arith.mulf %229, %228 : vector<64x256xf32>
    %cst_109 = arith.constant 4.471500e-02 : f32
    %231 = vector.broadcast %cst_109 : f32 to vector<64x256xf32>
    %232 = arith.mulf %231, %228 : vector<64x256xf32>
    %233 = arith.mulf %232, %228 : vector<64x256xf32>
    %234 = arith.mulf %233, %228 : vector<64x256xf32>
    %235 = arith.addf %228, %234 : vector<64x256xf32>
    %cst_110 = arith.constant 0.797884583 : f32
    %236 = vector.broadcast %cst_110 : f32 to vector<64x256xf32>
    %237 = arith.mulf %236, %235 : vector<64x256xf32>
    %238 = math.tanh %237 : vector<64x256xf32>
    %cst_111 = arith.constant 1.000000e+00 : f32
    %239 = vector.broadcast %cst_111 : f32 to vector<64x256xf32>
    %240 = arith.addf %239, %238 : vector<64x256xf32>
    %241 = arith.mulf %230, %240 : vector<64x256xf32>
    %242 = arith.mulf %222, %241 : vector<64x256xf32>
    %c0_112 = arith.constant 0 : index
    %c0_113 = arith.constant 0 : index
    %243 = vector.load %arg27[%c0_112, %c0_113] : memref<256x64xbf16, #tpu.memory_space<vmem>>, vector<256x64xbf16>
    %244 = arith.truncf %242 : vector<64x256xf32> to vector<64x256xbf16>
    %cst_114 = arith.constant dense<0.000000e+00> : vector<64x64xf32>
    %245 = tpu.matmul %244, %243, %cst_114 {dimension_numbers = #tpu.dot_dimension_numbers<[1], [0], [0], [1], [0, 0, 1, 1], [], []>} : vector<64x256xbf16>, vector<256x64xbf16>, vector<64x64xf32> -> vector<64x64xf32>
    %c0_115 = arith.constant 0 : index
    %c0_116 = arith.constant 0 : index
    %246 = vector.load %arg28[%c0_115, %c0_116] : memref<1x64xf32, #tpu.memory_space<vmem>>, vector<1x64xf32>
    %247 = vector.broadcast %246 : vector<1x64xf32> to vector<64x64xf32>
    %248 = arith.addf %245, %247 : vector<64x64xf32>
    %249 = arith.addf %248, %192 : vector<64x64xf32>
    %c0_117 = arith.constant 0 : index
    %c0_118 = arith.constant 0 : index
    %250 = vector.load %arg29[%c0_117, %c0_118] : memref<64x64xbf16, #tpu.memory_space<vmem>>, vector<64x64xbf16>
    %251 = arith.truncf %249 : vector<64x64xf32> to vector<64x64xbf16>
    %cst_119 = arith.constant dense<0.000000e+00> : vector<64x64xf32>
    %252 = tpu.matmul %251, %250, %cst_119 {dimension_numbers = #tpu.dot_dimension_numbers<[1], [0], [0], [1], [0, 0, 1, 1], [], []>} : vector<64x64xbf16>, vector<64x64xbf16>, vector<64x64xf32> -> vector<64x64xf32>
    %c0_120 = arith.constant 0 : index
    %c0_121 = arith.constant 0 : index
    %253 = vector.load %arg30[%c0_120, %c0_121] : memref<1x64xf32, #tpu.memory_space<vmem>>, vector<1x64xf32>
    %254 = vector.broadcast %253 : vector<1x64xf32> to vector<64x64xf32>
    %255 = arith.addf %252, %254 : vector<64x64xf32>
    %c0_122 = arith.constant 0 : index
    %c0_123 = arith.constant 0 : index
    %c0_124 = arith.constant 0 : index
    %256 = vector.load %arg1[%c0_122, %c0_123, %c0_124] : memref<1x64x64xf32, #tpu.memory_space<vmem>>, vector<1x64x64xf32>
    %257 = vector.shape_cast %256 : vector<1x64x64xf32> to vector<64x64xf32>
    %258 = arith.addf %255, %257 : vector<64x64xf32>
    %c0_125 = arith.constant 0 : index
    %c0_126 = arith.constant 0 : index
    %c0_127 = arith.constant 0 : index
    %259 = vector.load %arg31[%c0_125, %c0_126, %c0_127] : memref<1x64x64xf32, #tpu.memory_space<vmem>>, vector<1x64x64xf32>
    %260 = vector.shape_cast %259 : vector<1x64x64xf32> to vector<64x64xf32>
    %261 = vector.shape_cast %258 : vector<64x64xf32> to vector<1x64x64xf32>
    tpu.vector_store %arg31[%c0_125, %c0_126, %c0_127], %261 {strides = array<i32>} : memref<1x64x64xf32, #tpu.memory_space<vmem>>, vector<1x64x64xf32>,
    return
  }
  func.func @transform_0(%arg0: i32) -> (i32, i32, i32) {
    %c0_i32 = arith.constant 0 : i32
    %c0_i32_0 = arith.constant 0 : i32
    %c0_i32_1 = arith.constant 0 : i32
    return %arg0, %c0_i32, %c0_i32_0 : i32, i32, i32
  }
  func.func @transform_1(%arg0: i32) -> (i32, i32) {
    %c0_i32 = arith.constant 0 : i32
    %c0_i32_0 = arith.constant 0 : i32
    %c0_i32_1 = arith.constant 0 : i32
    return %c0_i32, %c0_i32_0 : i32, i32
  }
  func.func @transform_2(%arg0: i32) -> (i32, i32) {
    %c0_i32 = arith.constant 0 : i32
    %c0_i32_0 = arith.constant 0 : i32
    %c0_i32_1 = arith.constant 0 : i32
    return %c0_i32, %c0_i32_0 : i32, i32
  }
  func.func @transform_3(%arg0: i32) -> (i32, i32) {
    %c0_i32 = arith.constant 0 : i32
    %c0_i32_0 = arith.constant 0 : i32
    %c0_i32_1 = arith.constant 0 : i32
    return %c0_i32, %c0_i32_0 : i32, i32
  }
  func.func @transform_4(%arg0: i32) -> (i32, i32) {
    %c0_i32 = arith.constant 0 : i32
    %c0_i32_0 = arith.constant 0 : i32
    %c0_i32_1 = arith.constant 0 : i32
    return %c0_i32, %c0_i32_0 : i32, i32
  }
  func.func @transform_5(%arg0: i32) -> (i32, i32) {
    %c0_i32 = arith.constant 0 : i32
    %c0_i32_0 = arith.constant 0 : i32
    %c0_i32_1 = arith.constant 0 : i32
    return %c0_i32, %c0_i32_0 : i32, i32
  }
  func.func @transform_6(%arg0: i32) -> (i32, i32) {
    %c0_i32 = arith.constant 0 : i32
    %c0_i32_0 = arith.constant 0 : i32
    %c0_i32_1 = arith.constant 0 : i32
    return %c0_i32, %c0_i32_0 : i32, i32
  }
  func.func @transform_7(%arg0: i32) -> (i32, i32) {
    %c0_i32 = arith.constant 0 : i32
    %c0_i32_0 = arith.constant 0 : i32
    %c0_i32_1 = arith.constant 0 : i32
    return %c0_i32, %c0_i32_0 : i32, i32
  }
  func.func @transform_8(%arg0: i32) -> (i32, i32, i32) {
    %c0_i32 = arith.constant 0 : i32
    %c0_i32_0 = arith.constant 0 : i32
    %c0_i32_1 = arith.constant 0 : i32
    %c0_i32_2 = arith.constant 0 : i32
    return %c0_i32, %c0_i32_0, %c0_i32_1 : i32, i32, i32
  }
  func.func @transform_9(%arg0: i32) -> (i32, i32, i32) {
    %c0_i32 = arith.constant 0 : i32
    %c0_i32_0 = arith.constant 0 : i32
    %c0_i32_1 = arith.constant 0 : i32
    %c0_i32_2 = arith.constant 0 : i32
    return %c0_i32, %c0_i32_0, %c0_i32_1 : i32, i32, i32
  }
  func.func @transform_10(%arg0: i32) -> (i32, i32, i32) {
    %c0_i32 = arith.constant 0 : i32
    %c0_i32_0 = arith.constant 0 : i32
    %c0_i32_1 = arith.constant 0 : i32
    %c0_i32_2 = arith.constant 0 : i32
    return %c0_i32, %c0_i32_0, %c0_i32_1 : i32, i32, i32
  }
  func.func @transform_11(%arg0: i32) -> (i32, i32, i32) {
    %c0_i32 = arith.constant 0 : i32
    %c0_i32_0 = arith.constant 0 : i32
    %c0_i32_1 = arith.constant 0 : i32
    %c0_i32_2 = arith.constant 0 : i32
    return %c0_i32, %c0_i32_0, %c0_i32_1 : i32, i32, i32
  }
  func.func @transform_12(%arg0: i32) -> (i32, i32) {
    %c0_i32 = arith.constant 0 : i32
    %c0_i32_0 = arith.constant 0 : i32
    %c0_i32_1 = arith.constant 0 : i32
    return %c0_i32, %c0_i32_0 : i32, i32
  }
  func.func @transform_13(%arg0: i32) -> (i32, i32) {
    %c0_i32 = arith.constant 0 : i32
    %c0_i32_0 = arith.constant 0 : i32
    %c0_i32_1 = arith.constant 0 : i32
    return %c0_i32, %c0_i32_0 : i32, i32
  }
  func.func @transform_14(%arg0: i32) -> (i32, i32) {
    %c0_i32 = arith.constant 0 : i32
    %c0_i32_0 = arith.constant 0 : i32
    %c0_i32_1 = arith.constant 0 : i32
    return %c0_i32, %c0_i32_0 : i32, i32
  }
  func.func @transform_15(%arg0: i32) -> (i32, i32, i32) {
    %c0_i32 = arith.constant 0 : i32
    %c0_i32_0 = arith.constant 0 : i32
    %c0_i32_1 = arith.constant 0 : i32
    %c0_i32_2 = arith.constant 0 : i32
    return %c0_i32, %c0_i32_0, %c0_i32_1 : i32, i32, i32
  }
  func.func @transform_16(%arg0: i32) -> (i32, i32, i32) {
    %c0_i32 = arith.constant 0 : i32
    %c0_i32_0 = arith.constant 0 : i32
    %c0_i32_1 = arith.constant 0 : i32
    %c0_i32_2 = arith.constant 0 : i32
    return %c0_i32, %c0_i32_0, %c0_i32_1 : i32, i32, i32
  }
  func.func @transform_17(%arg0: i32) -> (i32, i32, i32) {
    %c0_i32 = arith.constant 0 : i32
    %c0_i32_0 = arith.constant 0 : i32
    %c0_i32_1 = arith.constant 0 : i32
    %c0_i32_2 = arith.constant 0 : i32
    return %c0_i32, %c0_i32_0, %c0_i32_1 : i32, i32, i32
  }
  func.func @transform_18(%arg0: i32) -> (i32, i32, i32) {
    %c0_i32 = arith.constant 0 : i32
    %c0_i32_0 = arith.constant 0 : i32
    %c0_i32_1 = arith.constant 0 : i32
    %c0_i32_2 = arith.constant 0 : i32
    return %c0_i32, %c0_i32_0, %c0_i32_1 : i32, i32, i32
  }
  func.func @transform_19(%arg0: i32) -> (i32, i32) {
    %c0_i32 = arith.constant 0 : i32
    %c0_i32_0 = arith.constant 0 : i32
    %c0_i32_1 = arith.constant 0 : i32
    return %c0_i32, %c0_i32_0 : i32, i32
  }
  func.func @transform_20(%arg0: i32) -> (i32, i32) {
    %c0_i32 = arith.constant 0 : i32
    %c0_i32_0 = arith.constant 0 : i32
    %c0_i32_1 = arith.constant 0 : i32
    return %c0_i32, %c0_i32_0 : i32, i32
  }
  func.func @transform_21(%arg0: i32) -> (i32, i32) {
    %c0_i32 = arith.constant 0 : i32
    %c0_i32_0 = arith.constant 0 : i32
    %c0_i32_1 = arith.constant 0 : i32
    return %c0_i32, %c0_i32_0 : i32, i32
  }
  func.func @transform_22(%arg0: i32) -> (i32, i32) {
    %c0_i32 = arith.constant 0 : i32
    %c0_i32_0 = arith.constant 0 : i32
    %c0_i32_1 = arith.constant 0 : i32
    return %c0_i32, %c0_i32_0 : i32, i32
  }
  func.func @transform_23(%arg0: i32) -> (i32, i32) {
    %c0_i32 = arith.constant 0 : i32
    %c0_i32_0 = arith.constant 0 : i32
    %c0_i32_1 = arith.constant 0 : i32
    return %c0_i32, %c0_i32_0 : i32, i32
  }
  func.func @transform_24(%arg0: i32) -> (i32, i32) {
    %c0_i32 = arith.constant 0 : i32
    %c0_i32_0 = arith.constant 0 : i32
    %c0_i32_1 = arith.constant 0 : i32
    return %c0_i32, %c0_i32_0 : i32, i32
  }
  func.func @transform_25(%arg0: i32) -> (i32, i32) {
    %c0_i32 = arith.constant 0 : i32
    %c0_i32_0 = arith.constant 0 : i32
    %c0_i32_1 = arith.constant 0 : i32
    return %c0_i32, %c0_i32_0 : i32, i32
  }
  func.func @transform_26(%arg0: i32) -> (i32, i32) {
    %c0_i32 = arith.constant 0 : i32
    %c0_i32_0 = arith.constant 0 : i32
    %c0_i32_1 = arith.constant 0 : i32
    return %c0_i32, %c0_i32_0 : i32, i32
  }
  func.func @transform_27(%arg0: i32) -> (i32, i32) {
    %c0_i32 = arith.constant 0 : i32
    %c0_i32_0 = arith.constant 0 : i32
    %c0_i32_1 = arith.constant 0 : i32
    return %c0_i32, %c0_i32_0 : i32, i32
  }
  func.func @transform_28(%arg0: i32) -> (i32, i32) {
    %c0_i32 = arith.constant 0 : i32
    %c0_i32_0 = arith.constant 0 : i32
    %c0_i32_1 = arith.constant 0 : i32
    return %c0_i32, %c0_i32_0 : i32, i32
  }
  func.func @transform_29(%arg0: i32) -> (i32, i32) {
    %c0_i32 = arith.constant 0 : i32
    %c0_i32_0 = arith.constant 0 : i32
    %c0_i32_1 = arith.constant 0 : i32
    return %c0_i32, %c0_i32_0 : i32, i32
  }
  func.func @transform_30(%arg0: i32) -> (i32, i32, i32) {
    %c0_i32 = arith.constant 0 : i32
    %c0_i32_0 = arith.constant 0 : i32
    %c0_i32_1 = arith.constant 0 : i32
    return %arg0, %c0_i32, %c0_i32_0 : i32, i32, i32
  }
}

</mosaic_0001>

<bundles_post_ra>
// kernel: tpu_custom_call.1
= control target key start
LH: loop header
LB: loop body
LE: loop exit
PB: predicated region body
PF: predicated region fallthrough
CT: control target
= control target key end

     0   :  { %s9279_s6 = smov 1   ;;  %s9280_s10 = smov 2   ;;  %s12259_s0 = inlined_call_operand.smem [shape: u32[31], index: -1, kind: input, shape index: {}] }
   0x1   :  { %s9320_s5 = sld [smem:[%s12259_s0]]   ;;  %s9281_s14 = smov 3  }
   0x2   :  { %s9325_s9 = sld [smem:[%s12259_s0 + %s9279_s6]]   ;;  %s9282_s18 = smov 4  }
   0x3   :  { %s9330_s13 = sld [smem:[%s12259_s0 + %s9280_s10]]   ;;  %s9283_s22 = smov 5  }
   0x4   :  { %s9335_s17 = sld [smem:[%s12259_s0 + %s9281_s14]]   ;;  %s9284_s26 = smov 6  }
   0x5   :  { %s9340_s21 = sld [smem:[%s12259_s0 + %s9282_s18]]   ;;  %s9285_s30 = smov 7  }
   0x6   :  { %s9345_s25 = sld [smem:[%s12259_s0 + %s9283_s22]]   ;;  %s9286_s4 = smov 8  }
   0x7   :  { %12299 = sst [smem:[#allocation5_spill]] %s9320_s5  ;;  %s9287_s10 = smov 9  }
   0x8   :  { %12300 = sst [smem:[#allocation6_spill]] %s9325_s9  ;;  %s9288_s15 = smov 10  }
   0x9   :  { %s9350_s29 = sld [smem:[%s12259_s0 + %s9284_s26]]   ;;  %s9289_s20 = smov 11  }
   0xa   :  { %s9355_s3 = sld [smem:[%s12259_s0 + %s9285_s30]]   ;;  %s9290_s26 = smov 12  }
   0xb   :  { %s9360_s8 = sld [smem:[%s12259_s0 + %s9286_s4]]   ;;  %s9291_s1 = smov 13  }
   0xc   :  { %s9365_s14 = sld [smem:[%s12259_s0 + %s9287_s10]]   ;;  %s9292_s7 = smov 14  }
   0xd   :  { %s9370_s19 = sld [smem:[%s12259_s0 + %s9288_s15]]   ;;  %s9293_s15 = smov 15  }
   0xe   :  { %s9375_s24 = sld [smem:[%s12259_s0 + %s9289_s20]]   ;;  %s9294_s22 = smov 16  }
   0xf   :  { %s9380_s30 = sld [smem:[%s12259_s0 + %s9290_s26]]   ;;  %s9295_s28 = smov 17  }
  0x10   :  { %12301 = sst [smem:[#allocation7_spill]] %s9355_s3 }
  0x11   :  { %12302 = sst [smem:[#allocation8_spill]] %s9360_s8 }
  0x12   :  { %s9385_s6 = sld [smem:[%s12259_s0 + %s9291_s1]]  }
  0x13   :  { %s9390_s12 = sld [smem:[%s12259_s0 + %s9292_s7]]   ;;  %s9296_s7 = smov 18  }
  0x14   :  { %s9395_s20 = sld [smem:[%s12259_s0 + %s9293_s15]]   ;;  %s9297_s15 = smov 19  }
  0x15   :  { %s9400_s27 = sld [smem:[%s12259_s0 + %s9294_s22]]   ;;  %s9298_s22 = smov 20  }
  0x16   :  { %s9405_s4 = sld [smem:[%s12259_s0 + %s9295_s28]]   ;;  %s9299_s28 = smov 21  }
  0x18   :  { %12303 = sst [smem:[#allocation9_spill]] %s9385_s6 }
  0x19   :  { %12304 = sst [smem:[#allocation10_spill]] %s9390_s12 }
  0x1a   :  { %12305 = sst [smem:[#allocation11_spill]] %s9395_s20 }
  0x1b   :  { %12306 = sst [smem:[#allocation12_spill]] %s9400_s27 }
  0x1c   :  { %12307 = sst [smem:[#allocation13_spill]] %s9405_s4 }
  0x1d   :  { %s9410_s12 = sld [smem:[%s12259_s0 + %s9296_s7]]   ;;  %s9300_s7 = smov 22  }
  0x1e   :  { %s9415_s20 = sld [smem:[%s12259_s0 + %s9297_s15]]   ;;  %s9301_s15 = smov 23  }
  0x1f   :  { %s9420_s27 = sld [smem:[%s12259_s0 + %s9298_s22]]   ;;  %s9302_s22 = smov 24  }
  0x20   :  { %s9425_s4 = sld [smem:[%s12259_s0 + %s9299_s28]]   ;;  %s9303_s28 = smov 25  }
  0x23   :  { %12308 = sst [smem:[#allocation14_spill]] %s9410_s12 }
  0x24   :  { %12309 = sst [smem:[#allocation15_spill]] %s9415_s20 }
  0x25   :  { %12310 = sst [smem:[#allocation16_spill]] %s9420_s27 }
  0x26   :  { %12311 = sst [smem:[#allocation17_spill]] %s9425_s4 }
  0x27   :  { %s9430_s12 = sld [smem:[%s12259_s0 + %s9300_s7]]   ;;  %s9304_s7 = smov 26  }
  0x28   :  { %s9435_s20 = sld [smem:[%s12259_s0 + %s9301_s15]]   ;;  %s9305_s15 = smov 27  }
  0x29   :  { %s9440_s27 = sld [smem:[%s12259_s0 + %s9302_s22]]   ;;  %s9306_s22 = smov 28  }
  0x2a   :  { %s9445_s4 = sld [smem:[%s12259_s0 + %s9303_s28]]   ;;  %s9307_s28 = smov 29  }
  0x2d   :  { %12312 = sst [smem:[#allocation18_spill]] %s9430_s12 }
  0x2e   :  { %12313 = sst [smem:[#allocation19_spill]] %s9435_s20 }
  0x2f   :  { %12314 = sst [smem:[#allocation20_spill]] %s9440_s27 }
  0x30   :  { %12315 = sst [smem:[#allocation21_spill]] %s9445_s4 }
  0x31   :  { %s9450_s12 = sld [smem:[%s12259_s0 + %s9304_s7]]   ;;  %s9308_s7 = smov 30  }
  0x32   :  { %s9455_s20 = sld [smem:[%s12259_s0 + %s9305_s15]]  }
  0x33   :  { %s9460_s27 = sld [smem:[%s12259_s0 + %s9306_s22]]  }
  0x34   :  { %s9465_s4 = sld [smem:[%s12259_s0 + %s9307_s28]]  }
  0x37   :  { %12316 = sst [smem:[#allocation22_spill]] %s9450_s12 }
  0x38   :  { %s9470_s12 = sld [smem:[%s12259_s0 + %s9308_s7]]  }
  0x3a   :  { %12317 = sst [smem:[#allocation23_spill]] %s9465_s4 }
  0x3b   :  { %66 = vsyncpa [#allocation3], 0 }
  0x3c   :  { %68 = vsyncpa [#allocation3 + $0x1], 0  ;;  %s9472_s15 = smov 0   ;;  %s9474_s16 = smov 0  }
  0x3d   :  { %s9476_s18 = smov 0   ;;  %s9478_s22 = smov 0  }
  0x3e LB: > { %s12318_s9 = sld [smem:[#allocation6_spill]]  ;;  %s9493_s0 = sadd.s32 4294967295, %s9277_s22   ;;  %s9269_s16 = sphi %s9474_s16, %s12444_s16   ;;  %s9265_s15 = sphi %s9472_s15, %s12443_s15   ;;  %s9277_s22 = sphi %s9478_s22, %s12446_s22   ;;  %s9273_s18 = sphi %s9476_s18, %s12445_s18  }
  0x3f   : > { %s12319_s8 = sld [smem:[#allocation8_spill]]  ;;  %s7692_s23 = sadd.s32 4294967294, %s9277_s22  }
  0x40   : > { %s9497_s26 = sadd.s32 1, %s9277_s22   ;;  %s716_s28 = sadd.s32 1, %s9273_s18 }
  0x41   : > { %s713_s1 = ssub.s32 %s9277_s22, %s9497_s26  ;;  %p726_p0 = scmp.ne.s32.totalorder %s9273_s18, %s9269_s16 }
  0x42   : > { %p714_p1 = scmp.eq.s32.totalorder %s713_s1, 0  ;;  %p727_p2 = scmp.eq.s32.totalorder %s9493_s0, 1 }
  0x43   : > { %p732_p3 = scmp.ne.s32.totalorder %s9269_s16, %s9265_s15  ;;  %p733_p4 = scmp.eq.s32.totalorder %s7692_s23, 1 }
  0x44   : > { %s9508_s2 = scalar_select %p714_p1, %s9273_s18, %s716_s28  }
  0x45   : > { %p9510_p5 = por %p727_p2, %p726_p0  ;;  %p9514_p6 = por %p733_p4, %p732_p3 }
  0x46   : > { %p7695_p7 = scmp.ge.s32.totalorder %s9277_s22, 1  ;;  %p846_p8 = scmp.lt.s32.totalorder %s9277_s22, 3 }
  0x48   : > { %p847_p9 = pnand %p7695_p7, %p846_p8 }
  0x4a   : > { %850 = sbr.rel (%p847_p9) target bundleno = 4138 (0x102a), region = 140 }
  0x4f   : > { %v945_v0 = vld [vmem:[%s12318_s9 + $0x38] sm:$0xff]  ;;  %v944_v1 = vld [vmem:[%s12318_s9 + $0x30] sm:$0xff]  ;;  %s12322_s5 = sld [smem:[#allocation5_spill]]  ;;  %p924_p10 = scmp.lt.s32.totalorder %s9493_s0, 1  ;;  %v943_v2 = vld [vmem:[%s12318_s9 + $0x28] sm:$0xff]  ;;  %vm946_vm0 = vcmask 523264  }
  0x50   : > { %979 = vmatpush.msra.mxu0 %v945_v0  ;;  %1089 = vmatpush.msra.mxu2 %v945_v0  ;;  %v942_v3 = vld [vmem:[%s12318_s9 + $0x20] sm:$0xff]  ;;  %vm992_vm1 = vcmask 261120   ;;  %v941_v4 = vld [vmem:[%s12318_s9 + $0x18] sm:$0xff]  ;;  %v940_v12 = vld [vmem:[%s12318_s9 + $0x10] sm:$0xff]  ;;  %s12332_s3 = sld [smem:[#allocation7_spill]] }
  0x51   : > { %s925_s11 = scalar_select %p924_p10, %s9493_s0, 1  ;;  %7700 = vmatpush.xpose.msk.msra.mxu1 %vm992_vm1, %v945_v0  ;;  %7710 = vmatpush.xpose.msk.msra.mxu3 %vm992_vm1, %v945_v0  ;;  %v939_v15 = vld [vmem:[%s12318_s9 + $0x8] sm:$0xff]  ;;  %v938_v20 = vld [vmem:[%s12318_s9] sm:$0xff] }
  0x52   : > { %980 = vmatpush.msra.mxu0 %v944_v1  ;;  %1090 = vmatpush.msra.mxu2 %v944_v1  ;;  %s12382_s6 = sld [smem:[#allocation9_spill]] }
  0x53   : > { %s8516_s23 = sshll.u32 %s925_s11, 6  ;;  %s12383_s1 = sld [smem:[#allocation11_spill]] }
  0x54   : > { %981 = vmatpush.msra.mxu0 %v943_v2  ;;  %1091 = vmatpush.msra.mxu2 %v943_v2  ;;  %s12384_s11 = sld [smem:[#allocation10_spill]] }
  0x55   : > { %s9530_s28 = scalar_lea.vmem %s12322_s5, %s8516_s23  ;;  %7701 = vmatpush.xpose.msk.msra.mxu1 %vm992_vm1, %v944_v1  ;;  %7711 = vmatpush.xpose.msk.msra.mxu3 %vm992_vm1, %v944_v1  ;;  %s12385_s23 = sld [smem:[#allocation12_spill]] }
  0x56   : > { %v9533_v5 = vld [vmem:[%s9530_s28] sm:$0xff]  ;;  %v9536_v6 = vld [vmem:[%s9530_s28 + $0x8] sm:$0xff]  ;;  %v9539_v7 = vld [vmem:[%s9530_s28 + $0x10] sm:$0xff]  ;;  %982 = vmatpush.msra.mxu0 %v942_v3  ;;  %1092 = vmatpush.msra.mxu2 %v942_v3  ;;  %s12434_s5 = sld [smem:[#allocation16_spill]] }
  0x57   : > { %v933_v8 = vld [vmem:[%s9530_s28 + $0x18] sm:$0xff]  ;;  %v947_v9 = vsel %vm946_vm0, %v9533_v5, 0.0  ;;  %v948_v10 = vsel %vm946_vm0, %v9536_v6, 0.0  ;;  %v950_v11 = vsel %vm946_vm0, %v9539_v7, 0.0  ;;  %v934_v13 = vld [vmem:[%s9530_s28 + $0x20] sm:$0xff]  ;;  %v935_v17 = vld [vmem:[%s9530_s28 + $0x28] sm:$0xff] }
  0x58   : > { %v949_v14 = vadd.f32 %v948_v10, %v947_v9  ;;  %983 = vmatpush.msra.mxu0 %v941_v4  ;;  %v952_v16 = vsel %vm946_vm0, %v933_v8, 0.0  ;;  %1093 = vmatpush.msra.mxu2 %v941_v4  ;;  %v954_v19 = vsel %vm946_vm0, %v934_v13, 0.0  ;;  %v936_v21 = vld [vmem:[%s9530_s28 + $0x30] sm:$0xff]  ;;  %v956_v23 = vsel %vm946_vm0, %v935_v17, 0.0  ;;  %v937_v24 = vld [vmem:[%s9530_s28 + $0x38] sm:$0xff]  ;;  %s12441_s4 = sld [smem:[#allocation23_spill]] }
  0x59   : > { %7702 = vmatpush.xpose.msk.msra.mxu1 %vm992_vm1, %v943_v2  ;;  %7712 = vmatpush.xpose.msk.msra.mxu3 %vm992_vm1, %v943_v2  ;;  %v958_v26 = vsel %vm946_vm0, %v936_v21, 0.0  ;;  %v960_v28 = vsel %vm946_vm0, %v937_v24, 0.0 }
  0x5a   : > { %v951_v18 = vadd.f32 %v950_v11, %v949_v14  ;;  %984 = vmatpush.msra.mxu0 %v940_v12  ;;  %1094 = vmatpush.msra.mxu2 %v940_v12 }
  0x5c   : > { %v953_v22 = vadd.f32 %v952_v16, %v951_v18  ;;  %985 = vmatpush.msra.mxu0 %v939_v15  ;;  %1095 = vmatpush.msra.mxu2 %v939_v15  ;;  %v8520_v16 = vld [vmem:[%s9340_s21 + $0x18] sm:$0xff]  ;;  %v8518_v18 = vld [vmem:[%s9340_s21 + $0x8] sm:$0xff] }
  0x5d   : > { %7703 = vmatpush.xpose.msk.msra.mxu1 %vm992_vm1, %v942_v3  ;;  %7713 = vmatpush.xpose.msk.msra.mxu3 %vm992_vm1, %v942_v3 }
  0x5e   : > { %v955_v25 = vadd.f32 %v954_v19, %v953_v22  ;;  %986 = vmatpush.msra.mxu0 %v938_v20  ;;  %1096 = vmatpush.msra.mxu2 %v938_v20  ;;  %v8517_v19 = vld [vmem:[%s9340_s21] sm:$0xff] }
  0x60   : > { %v957_v27 = vadd.f32 %v956_v23, %v955_v25  ;;  %1224 = vmatpush.bf16.msrb.mxu0 %v8520_v16 }
  0x61   : > { %7704 = vmatpush.xpose.msk.msra.mxu1 %vm992_vm1, %v941_v4  ;;  %7714 = vmatpush.xpose.msk.msra.mxu3 %vm992_vm1, %v941_v4 }
  0x62   : > { %v959_v29 = vadd.f32 %v958_v26, %v957_v27 }
  0x64   : > { %v961_v30 = vadd.f32 %v960_v28, %v959_v29 }
  0x65   : > { %7705 = vmatpush.xpose.msk.msra.mxu1 %vm992_vm1, %v940_v12  ;;  %7715 = vmatpush.xpose.msk.msra.mxu3 %vm992_vm1, %v940_v12 }
  0x66   : > { %v962_v31 = vrot.slane %v961_v30, 4 }
  0x68   : > { %v963_v32 = vadd.f32 %v962_v31, %v961_v30  ;;  %v8734_v30 = vld [vmem:[%s9330_s13] ss:$0 sm:$0xff] }
  0x69   : > { %7706 = vmatpush.xpose.msk.msra.mxu1 %vm992_vm1, %v939_v15  ;;  %7716 = vmatpush.xpose.msk.msra.mxu3 %vm992_vm1, %v939_v15 }
  0x6a   : > { %v964_v33 = vrot.slane %v963_v32, 2 }
  0x6c   : > { %v965_v34 = vadd.f32 %v964_v33, %v963_v32  ;;  %v8735_v33 = vld [vmem:[%s9335_s17] ss:$0 sm:$0xff] }
  0x6d   : > { %7707 = vmatpush.xpose.msk.msra.mxu1 %vm992_vm1, %v938_v20  ;;  %7717 = vmatpush.xpose.msk.msra.mxu3 %vm992_vm1, %v938_v20 }
  0x6e   : > { %v966_v35 = vrot.slane %v965_v34, 1 }
  0x70   : > { %v967_v36 = vadd.f32 %v966_v35, %v965_v34 }
  0x72   : > { %7699 = vmatmul.msk.f32.vlgmr.msra.gmra.mxu0 %vm946_vm0, %v967_v36 }
  0xef   : > { %v988_v37 = vpop.f32.mrf.mxu0 }
  0xf0   : > { %v991_v38 = vmul.f32 0.0078125, %v988_v37 }
  0xf2   : > { %7708 = vmatmul.msk.f32.vlgmr.msra.gmra.mxu1 %vm992_vm1, %v991_v38 }
 0x16f   : > { %v1037_v39 = vpop.f32.mrf.mxu1 }
 0x170   : > { %v1040_v40 = vperm.slane %v1037_v39, 0 }
 0x172   : > { %v9577_v41 = vsub.f32 %v9533_v5, %v1040_v40  ;;  %v9580_v42 = vsub.f32 %v9536_v6, %v1040_v40  ;;  %v9583_v43 = vsub.f32 %v9539_v7, %v1040_v40  ;;  %v9585_v44 = vsub.f32 %v933_v8, %v1040_v40 }
 0x173   : > { %v9587_v45 = vsub.f32 %v934_v13, %v1040_v40  ;;  %v9595_v49 = vsub.f32 %v935_v17, %v1040_v40  ;;  %v9601_v54 = vsub.f32 %v936_v21, %v1040_v40  ;;  %v9606_v58 = vsub.f32 %v937_v24, %v1040_v40  ;;  %v8519_v17 = vld [vmem:[%s9340_s21 + $0x10] sm:$0xff] }
 0x174   : > { %v1049_v46 = vmul.f32 %v9577_v41, %v9577_v41  ;;  %v1050_v47 = vmul.f32 %v9580_v42, %v9580_v42  ;;  %v1051_v48 = vmul.f32 %v9583_v43, %v9583_v43  ;;  %v1052_v50 = vmul.f32 %v9585_v44, %v9585_v44  ;;  %1225 = vmatpush.bf16.msrb.mxu0 %v8519_v17 }
 0x175   : > { %v1053_v55 = vmul.f32 %v9587_v45, %v9587_v45  ;;  %v1054_v59 = vmul.f32 %v9595_v49, %v9595_v49  ;;  %v1055_v62 = vmul.f32 %v9601_v54, %v9601_v54  ;;  %v1056_v1 = vmul.f32 %v9606_v58, %v9606_v58 }
 0x176   : > { %v1057_v51 = vsel %vm946_vm0, %v1049_v46, 0.0  ;;  %v1058_v52 = vsel %vm946_vm0, %v1050_v47, 0.0  ;;  %v1060_v56 = vsel %vm946_vm0, %v1051_v48, 0.0  ;;  %v1062_v60 = vsel %vm946_vm0, %v1052_v50, 0.0 }
 0x177   : > { %v1059_v53 = vadd.f32 %v1058_v52, %v1057_v51  ;;  %v1064_v63 = vsel %vm946_vm0, %v1053_v55, 0.0  ;;  %v1066_v2 = vsel %vm946_vm0, %v1054_v59, 0.0  ;;  %v1068_v4 = vsel %vm946_vm0, %v1055_v62, 0.0 }
 0x178   : > { %v1070_v6 = vsel %vm946_vm0, %v1056_v1, 0.0  ;;  %1226 = vmatpush.bf16.msrb.mxu0 %v8518_v18  ;;  %v9309_v18 = vmov 64.0  }
 0x179   : > { %v1061_v57 = vadd.f32 %v1060_v56, %v1059_v53 }
 0x17b   : > { %v1063_v61 = vadd.f32 %v1062_v60, %v1061_v57 }
 0x17c   : > { %1227 = vmatpush.bf16.msrb.mxu0 %v8517_v19 }
 0x17d   : > { %v1065_v0 = vadd.f32 %v1064_v63, %v1063_v61 }
 0x17f   : > { %v1067_v3 = vadd.f32 %v1066_v2, %v1065_v0 }
 0x181   : > { %v1069_v5 = vadd.f32 %v1068_v4, %v1067_v3 }
 0x183   : > { %v1071_v7 = vadd.f32 %v1070_v6, %v1069_v5 }
 0x185   : > { %v1072_v8 = vrot.slane %v1071_v7, 4 }
 0x187   : > { %v1073_v9 = vadd.f32 %v1072_v8, %v1071_v7 }
 0x189   : > { %v1074_v10 = vrot.slane %v1073_v9, 2 }
 0x18b   : > { %v1075_v11 = vadd.f32 %v1074_v10, %v1073_v9 }
 0x18d   : > { %v1076_v12 = vrot.slane %v1075_v11, 1 }
 0x18f   : > { %v1077_v13 = vadd.f32 %v1076_v12, %v1075_v11 }
 0x191   : > { %7709 = vmatmul.msk.f32.vlgmr.msra.gmra.mxu2 %vm946_vm0, %v1077_v13 }
 0x214   : > { %v1098_v14 = vpop.f32.mrf.mxu2 }
 0x215   : > { %v1101_v15 = vmul.f32 0.0078125, %v1098_v14 }
 0x217   : > { %7718 = vmatmul.msk.f32.vlgmr.msra.gmra.mxu3 %vm992_vm1, %v1101_v15 }
 0x29a   : > { %v1122_v20 = vpop.f32.mrf.mxu3 }
 0x29b   : > { %v1123_v21 = vadd.f32 1e-06, %v1122_v20 }
 0x29d   : > { %8747 = vrsqrt.f32 %v1123_v21  ;;  %vm1131_vm3 = vweird.f32 %v1123_v21 }
 0x29e   : > { %8749 = vrcp.f32 %v9309_v18  ;;  %v8526_v18 = vld [vmem:[%s12319_s8 + $0x28] sm:$0xff] }
 0x2a3   : > { %v8748_v22 = vpop.eup %8747 }
 0x2a4   : > { %v1126_v23 = vmul.f32 %v8748_v22, %v1123_v21  ;;  %vm1132_vm2 = vweird.f32 %v8748_v22  ;;  %v8750_v19 = vpop.eup %8749 }
 0x2a5   : > { %vm1133_vm4 = vmor %vm1131_vm3, %vm1132_vm2  ;;  %v1276_v20 = vmul.f32 64.0, %v8750_v19  ;;  %vm1280_vm5 = vweird.f32 %v8750_v19 }
 0x2a6   : > { %v1127_v24 = vmul.f32 %v8748_v22, %v1126_v23 }
 0x2a7   : > { %v1277_v21 = vsub.f32 1.0, %v1276_v20  ;;  %v8534_v20 = vld [vmem:[%s12319_s8 + $0x68] sm:$0xff] }
 0x2a8   : > { %v1128_v25 = vmul.f32 0.5, %v1127_v24 }
 0x2aa   : > { %v1129_v26 = vsub.f32 1.5, %v1128_v25 }
 0x2ac   : > { %v1130_v27 = vmul.f32 %v8748_v22, %v1129_v26 }
 0x2ae   : > { %v1134_v28 = vsel %vm1133_vm4, %v8748_v22, %v1130_v27  ;;  %v1278_v22 = vmul.f32 %v8750_v19, %v1277_v21 }
 0x2af   : > { %v1135_v29 = vperm.slane %v1134_v28, 0 }
 0x2b0   : > { %v1279_v23 = vadd.f32 %v8750_v19, %v1278_v22 }
 0x2b1   : > { %v1136_v31 = vmul.f32 %v1135_v29, %v9577_v41  ;;  %v1137_v32 = vmul.f32 %v1135_v29, %v9580_v42  ;;  %v1138_v39 = vmul.f32 %v1135_v29, %v9583_v43  ;;  %v1139_v40 = vmul.f32 %v1135_v29, %v9585_v44 }
 0x2b2   : > { %v1140_v41 = vmul.f32 %v1135_v29, %v9587_v45  ;;  %v1141_v42 = vmul.f32 %v1135_v29, %v9595_v49  ;;  %v1142_v43 = vmul.f32 %v1135_v29, %v9601_v54  ;;  %v1143_v44 = vmul.f32 %v1135_v29, %v9606_v58  ;;  %v8736_v45 = vld [vmem:[%s9345_s25] ss:$0 sm:$0xff] }
 0x2b3   : > { %v1148_v34 = vmul.f32 %v8734_v30, %v1136_v31  ;;  %v1149_v35 = vmul.f32 %v8734_v30, %v1137_v32  ;;  %v1150_v46 = vmul.f32 %v8734_v30, %v1138_v39  ;;  %v1151_v47 = vmul.f32 %v8734_v30, %v1139_v40 }
 0x2b4   : > { %v1152_v52 = vmul.f32 %v8734_v30, %v1140_v41  ;;  %v1153_v53 = vmul.f32 %v8734_v30, %v1141_v42  ;;  %v1154_v59 = vmul.f32 %v8734_v30, %v1142_v43  ;;  %v1155_v60 = vmul.f32 %v8734_v30, %v1143_v44 }
 0x2b5   : > { %v1160_v36 = vadd.f32 %v8735_v33, %v1148_v34  ;;  %v1161_v37 = vadd.f32 %v8735_v33, %v1149_v35  ;;  %v1162_v48 = vadd.f32 %v8735_v33, %v1150_v46  ;;  %v1163_v50 = vadd.f32 %v8735_v33, %v1151_v47 }
 0x2b6   : > { %v1164_v55 = vadd.f32 %v8735_v33, %v1152_v52  ;;  %v1165_v56 = vadd.f32 %v8735_v33, %v1153_v53  ;;  %v1166_v61 = vadd.f32 %v8735_v33, %v1154_v59  ;;  %v1167_v62 = vadd.f32 %v8735_v33, %v1155_v60 }
 0x2b7   : > { %v1176_v38 = vpack.c.bf16 %v1161_v37, %v1160_v36  ;;  %v1177_v51 = vpack.c.bf16 %v1163_v50, %v1162_v48  ;;  %v9668_v24 = vsel %vm1280_vm5, %v8750_v19, %v1279_v23  ;;  %v8530_v19 = vld [vmem:[%s12319_s8 + $0x48] sm:$0xff]  ;;  %v8521_v23 = vld [vmem:[%s12319_s8] sm:$0xff] }
 0x2b8   : > { %v1178_v57 = vpack.c.bf16 %v1165_v56, %v1164_v55  ;;  %v1179_v63 = vpack.c.bf16 %v1167_v62, %v1166_v61  ;;  %12330 = vst [vmem:[#allocation31_spill] sm:$0xff] %v9668_v24 }
 0x2b9   : > { %7735 = vmatmul.msk.bf16.vlgmr.msrb.gmra.mxu0 %vm946_vm0, %v1176_v38 }
 0x2c9   : > { %7736 = vmatmul.msk.bf16.gmra.mxu0 %vm946_vm0, %v1177_v51 }
 0x2d9   : > { %7737 = vmatmul.msk.bf16.gmra.mxu0 %vm946_vm0, %v1178_v57 }
 0x2e9   : > { %7738 = vmatmul.msk.bf16.gmra.mxu0 %vm946_vm0, %v1179_v63 }
 0x336   : > { %v1229_v49 = vpop.f32.mrf.mxu0 }
 0x337   : > { %v9640_v0 = vadd.f32 %v8736_v45, %v1229_v49 }
 0x339   : > { %12323 = vst [vmem:[#allocation24_spill] sm:$0xff] %v9640_v0  ;;  %v1251_v1 = vsel %vm946_vm0, %v9640_v0, 0.0 }
 0x33a   : > { %1252 = vadd.xlane.f32.xlu0 %v1251_v1 }
 0x33e   : > { %v1231_v2 = vpop.f32.mrf.mxu0 }
 0x33f   : > { %v9644_v3 = vadd.f32 %v8736_v45, %v1231_v2  ;;  %v8524_v2 = vld [vmem:[%s12319_s8 + $0x18] sm:$0xff] }
 0x340   : > { %1557 = vmatpush.bf16.msrb.mxu2 %v8524_v2 }
 0x341   : > { %12324 = vst [vmem:[#allocation25_spill] sm:$0xff] %v9644_v3  ;;  %v1254_v54 = vsel %vm946_vm0, %v9644_v3, 0.0 }
 0x342   : > { %1255 = vadd.xlane.f32.xlu0 %v1254_v54  ;;  %v8528_v54 = vld [vmem:[%s12319_s8 + $0x38] sm:$0xff] }
 0x343   : > { %1610 = vmatpush.bf16.msrb.mxu1 %v8528_v54 }
 0x346   : > { %v1234_v58 = vpop.f32.mrf.mxu0 }
 0x347   : > { %v9648_v4 = vadd.f32 %v8736_v45, %v1234_v58  ;;  %v8532_v58 = vld [vmem:[%s12319_s8 + $0x58] sm:$0xff] }
 0x348   : > { %1663 = vmatpush.bf16.msrb.mxu3 %v8532_v58 }
 0x349   : > { %12325 = vst [vmem:[#allocation26_spill] sm:$0xff] %v9648_v4  ;;  %v1257_v5 = vsel %vm946_vm0, %v9648_v4, 0.0 }
 0x34a   : > { %1258 = vadd.xlane.f32.xlu1 %v1257_v5  ;;  %v8536_v5 = vld [vmem:[%s12319_s8 + $0x78] sm:$0xff] }
 0x34b   : > { %1716 = vmatpush.bf16.msra.mxu0 %v8536_v5 }
 0x34e   : > { %v1236_v6 = vpop.f32.mrf.mxu0 }
 0x34f   : > { %v9652_v7 = vadd.f32 %v8736_v45, %v1236_v6 }
 0x351   : > { %12326 = vst [vmem:[#allocation27_spill] sm:$0xff] %v9652_v7  ;;  %v1260_v8 = vsel %vm946_vm0, %v9652_v7, 0.0 }
 0x352   : > { %1261 = vadd.xlane.f32.xlu1 %v1260_v8  ;;  %v8523_v8 = vld [vmem:[%s12319_s8 + $0x10] sm:$0xff] }
 0x353   : > { %1558 = vmatpush.bf16.msrb.mxu2 %v8523_v8 }
 0x356   : > { %v1239_v9 = vpop.f32.mrf.mxu0 }
 0x357   : > { %v9656_v10 = vadd.f32 %v8736_v45, %v1239_v9  ;;  %v8527_v9 = vld [vmem:[%s12319_s8 + $0x30] sm:$0xff] }
 0x358   : > { %1611 = vmatpush.bf16.msrb.mxu1 %v8527_v9 }
 0x359   : > { %12327 = vst [vmem:[#allocation28_spill] sm:$0xff] %v9656_v10  ;;  %v1263_v11 = vsel %vm946_vm0, %v9656_v10, 0.0 }
 0x35a   : > { %1264 = vadd.xlane.f32.xlu2 %v1263_v11  ;;  %v8531_v11 = vld [vmem:[%s12319_s8 + $0x50] sm:$0xff] }
 0x35b   : > { %1664 = vmatpush.bf16.msrb.mxu3 %v8531_v11 }
 0x35c   : > { %1612 = vmatpush.bf16.msrb.mxu1 %v8526_v18 }
 0x35e   : > { %v1241_v12 = vpop.f32.mrf.mxu0 }
 0x35f   : > { %v9660_v13 = vadd.f32 %v8736_v45, %v1241_v12  ;;  %1665 = vmatpush.bf16.msrb.mxu3 %v8530_v19 }
 0x361   : > { %12328 = vst [vmem:[#allocation29_spill] sm:$0xff] %v9660_v13  ;;  %v1266_v14 = vsel %vm946_vm0, %v9660_v13, 0.0 }
 0x362   : > { %1267 = vadd.xlane.f32.xlu2 %v1266_v14  ;;  %v8535_v14 = vld [vmem:[%s12319_s8 + $0x70] sm:$0xff] }
 0x363   : > { %1717 = vmatpush.bf16.msra.mxu0 %v8535_v14 }
 0x366   : > { %v1244_v15 = vpop.f32.mrf.mxu0 }
 0x367   : > { %v9664_v16 = vadd.f32 %v8736_v45, %v1244_v15  ;;  %1718 = vmatpush.bf16.msra.mxu0 %v8534_v20 }
 0x369   : > { %12329 = vst [vmem:[#allocation30_spill] sm:$0xff] %v9664_v16  ;;  %v1269_v17 = vsel %vm946_vm0, %v9664_v16, 0.0 }
 0x36a   : > { %1270 = vadd.xlane.f32.xlu2 %v1269_v17  ;;  %v8522_v17 = vld [vmem:[%s12319_s8 + $0x8] sm:$0xff] }
 0x36b   : > { %1559 = vmatpush.bf16.msrb.mxu2 %v8522_v17 }
 0x36e   : > { %v1246_v30 = vpop.f32.mrf.mxu0 }
 0x36f   : > { %v9678_v33 = vadd.f32 %v8736_v45, %v1246_v30  ;;  %v8533_v30 = vld [vmem:[%s12319_s8 + $0x60] sm:$0xff]  ;;  %1560 = vmatpush.bf16.msrb.mxu2 %v8521_v23 }
 0x370   : > { %1719 = vmatpush.bf16.msra.mxu0 %v8533_v30 }
 0x371   : > { %12331 = vst [vmem:[#allocation32_spill] sm:$0xff] %v9678_v33  ;;  %v1272_v36 = vsel %vm946_vm0, %v9678_v33, 0.0 }
 0x3ad   : > { %v1253_v25 = vpop.xlane.xlu0 %1252 }
 0x3ae   : > { %v1282_v26 = vmul.f32 %v9668_v24, %v1253_v25  ;;  %v8525_v25 = vld [vmem:[%s12319_s8 + $0x20] sm:$0xff] }
 0x3af   : > { %1613 = vmatpush.bf16.msrb.mxu1 %v8525_v25 }
 0x3b0   : > { %v9672_v27 = vsub.f32 %v9640_v0, %v1282_v26  ;;  %v8529_v26 = vld [vmem:[%s12319_s8 + $0x40] sm:$0xff]  ;;  %s12442_s8 = sand.u32 1, %s9269_s16  }
 0x3b1   : > { %1666 = vmatpush.bf16.msrb.mxu3 %v8529_v26  ;;  %s7585_s9 = scalar_lea.sflag [#allocation3], %s12442_s8 }
 0x3b2   : > { %v1298_v28 = vmul.f32 %v9672_v27, %v9672_v27 }
 0x3b4   : > { %v1306_v29 = vsel %vm946_vm0, %v1298_v28, 0.0 }
 0x3b5   : > { %1307 = vadd.xlane.f32.xlu0 %v1306_v29  ;;  %v1256_v31 = vpop.xlane.xlu0 %1255 }
 0x3b6   : > { %v1283_v32 = vmul.f32 %v9668_v24, %v1256_v31 }
 0x3b8   : > { %v9681_v34 = vsub.f32 %v9644_v3, %v1283_v32 }
 0x3ba   : > { %v1299_v35 = vmul.f32 %v9681_v34, %v9681_v34 }
 0x3bc   : > { %v1309_v37 = vsel %vm946_vm0, %v1299_v35, 0.0 }
 0x3bd   : > { %v1259_v38 = vpop.xlane.xlu1 %1258  ;;  %1273 = vadd.xlane.f32.xlu0 %v1272_v36  ;;  %1310 = vadd.xlane.f32.xlu1 %v1309_v37 }
 0x3be   : > { %v1284_v39 = vmul.f32 %v9668_v24, %v1259_v38 }
 0x3c0   : > { %v9690_v40 = vsub.f32 %v9648_v4, %v1284_v39 }
 0x3c2   : > { %v1300_v46 = vmul.f32 %v9690_v40, %v9690_v40 }
 0x3c4   : > { %v1312_v47 = vsel %vm946_vm0, %v1300_v46, 0.0 }
 0x3c5   : > { %v1262_v48 = vpop.xlane.xlu1 %1261  ;;  %1313 = vadd.xlane.f32.xlu1 %v1312_v47 }
 0x3c6   : > { %v1285_v50 = vmul.f32 %v9668_v24, %v1262_v48 }
 0x3c8   : > { %v9697_v51 = vsub.f32 %v9652_v7, %v1285_v50 }
 0x3ca   : > { %v1301_v41 = vmul.f32 %v9697_v51, %v9697_v51 }
 0x3cc   : > { %v1315_v42 = vsel %vm946_vm0, %v1301_v41, 0.0 }
 0x3cd   : > { %v1265_v52 = vpop.xlane.xlu2 %1264  ;;  %1316 = vadd.xlane.f32.xlu2 %v1315_v42 }
 0x3ce   : > { %v1286_v53 = vmul.f32 %v9668_v24, %v1265_v52 }
 0x3d0   : > { %v9704_v55 = vsub.f32 %v9656_v10, %v1286_v53 }
 0x3d2   : > { %v1302_v56 = vmul.f32 %v9704_v55, %v9704_v55 }
 0x3d4   : > { %v1318_v57 = vsel %vm946_vm0, %v1302_v56, 0.0 }
 0x3d5   : > { %v1268_v43 = vpop.xlane.xlu2 %1267  ;;  %1319 = vadd.xlane.f32.xlu0 %v1318_v57 }
 0x3d6   : > { %v1287_v44 = vmul.f32 %v9668_v24, %v1268_v43  ;;  %v9750_v43 = vld [vmem:[%s9350_s29] ss:$0 sm:$0xff] }
 0x3d8   : > { %v9711_v59 = vsub.f32 %v9660_v13, %v1287_v44 }
 0x3da   : > { %v1303_v60 = vmul.f32 %v9711_v59, %v9711_v59 }
 0x3dc   : > { %v1321_v61 = vsel %vm946_vm0, %v1303_v60, 0.0 }
 0x3dd   : > { %v1271_v62 = vpop.xlane.xlu2 %1270  ;;  %1322 = vadd.xlane.f32.xlu1 %v1321_v61 }
 0x3de   : > { %v1288_v63 = vmul.f32 %v9668_v24, %v1271_v62 }
 0x3e0   : > { %v9718_v45 = vsub.f32 %v9664_v16, %v1288_v63 }
 0x3e2   : > { %v1304_v49 = vmul.f32 %v9718_v45, %v9718_v45 }
 0x3e4   : > { %v1324_v1 = vsel %vm946_vm0, %v1304_v49, 0.0 }
 0x3e5   : > { %1325 = vadd.xlane.f32.xlu2 %v1324_v1  ;;  %v9755_v1 = vld [vmem:[%s12332_s3] ss:$0 sm:$0xff]  ;;  %s12433_s3 = sld [smem:[#allocation20_spill]] }
 0x428   : > { %v1308_v6 = vpop.xlane.xlu0 %1307 }
 0x429   : > { %v1330_v12 = vmul.f32 %v1308_v6, %v9668_v24 }
 0x42b   : > { %v1338_v15 = vadd.f32 1e-05, %v1330_v12 }
 0x42d   : > { %8751 = vrsqrt.f32 %v1338_v15  ;;  %vm1352_vm7 = vweird.f32 %v1338_v15 }
 0x430   : > { %v1311_v21 = vpop.xlane.xlu1 %1310  ;;  %v1274_v22 = vpop.xlane.xlu0 %1273 }
 0x431   : > { %v1331_v28 = vmul.f32 %v1311_v21, %v9668_v24  ;;  %v1289_v29 = vmul.f32 %v9668_v24, %v1274_v22 }
 0x433   : > { %v8752_v31 = vpop.eup %8751  ;;  %v1339_v32 = vadd.f32 1e-05, %v1331_v28  ;;  %v9743_v35 = vsub.f32 %v9678_v33, %v1289_v29 }
 0x434   : > { %v1347_v36 = vmul.f32 %v8752_v31, %v1338_v15  ;;  %vm1353_vm6 = vweird.f32 %v8752_v31 }
 0x435   : > { %8753 = vrsqrt.f32 %v1339_v32  ;;  %v1305_v37 = vmul.f32 %v9743_v35, %v9743_v35  ;;  %vm1354_vm8 = vmor %vm1352_vm7, %vm1353_vm6  ;;  %vm1362_vm10 = vweird.f32 %v1339_v32 }
 0x436   : > { %v1348_v38 = vmul.f32 %v8752_v31, %v1347_v36 }
 0x437   : > { %v1327_v39 = vsel %vm946_vm0, %v1305_v37, 0.0 }
 0x438   : > { %v1349_v46 = vmul.f32 0.5, %v1348_v38  ;;  %v1314_v47 = vpop.xlane.xlu1 %1313  ;;  %1328 = vadd.xlane.f32.xlu0 %v1327_v39 }
 0x439   : > { %v1332_v48 = vmul.f32 %v1314_v47, %v9668_v24 }
 0x43a   : > { %v1350_v50 = vsub.f32 1.5, %v1349_v46 }
 0x43b   : > { %v8754_v41 = vpop.eup %8753  ;;  %v1340_v42 = vadd.f32 1e-05, %v1332_v48 }
 0x43c   : > { %v1351_v52 = vmul.f32 %v8752_v31, %v1350_v50  ;;  %v1357_v53 = vmul.f32 %v8754_v41, %v1339_v32  ;;  %vm1363_vm9 = vweird.f32 %v8754_v41 }
 0x43d   : > { %8755 = vrsqrt.f32 %v1340_v42  ;;  %vm1364_vm11 = vmor %vm1362_vm10, %vm1363_vm9  ;;  %vm1372_vm13 = vweird.f32 %v1340_v42 }
 0x43e   : > { %v1355_v56 = vsel %vm1354_vm8, %v8752_v31, %v1351_v52  ;;  %v1358_v57 = vmul.f32 %v8754_v41, %v1357_v53 }
 0x43f   : > { %v1426_v44 = vmul.f32 %v1355_v56, %v9672_v27 }
 0x440   : > { %v1359_v60 = vmul.f32 0.5, %v1358_v57  ;;  %v1317_v61 = vpop.xlane.xlu2 %1316 }
 0x441   : > { %v1333_v62 = vmul.f32 %v1317_v61, %v9668_v24  ;;  %v1437_v2 = vmul.f32 %v9750_v43, %v1426_v44 }
 0x442   : > { %v1360_v63 = vsub.f32 1.5, %v1359_v60 }
 0x443   : > { %v8756_v49 = vpop.eup %8755  ;;  %v1341_v54 = vadd.f32 1e-05, %v1333_v62  ;;  %v1448_v27 = vadd.f32 %v9755_v1, %v1437_v2 }
 0x444   : > { %v1361_v58 = vmul.f32 %v8754_v41, %v1360_v63  ;;  %v1367_v5 = vmul.f32 %v8756_v49, %v1340_v42  ;;  %vm1373_vm12 = vweird.f32 %v8756_v49 }
 0x445   : > { %8757 = vrsqrt.f32 %v1341_v54  ;;  %v1457_v19 = vpack.c.bf16 %v1448_v27, %v1448_v27  ;;  %vm1374_vm14 = vmor %vm1372_vm13, %vm1373_vm12  ;;  %vm1382_vm1 = vweird.f32 %v1341_v54 }
 0x446   : > { %v1365_v6 = vsel %vm1364_vm11, %v8754_v41, %v1361_v58  ;;  %v1368_v8 = vmul.f32 %v8756_v49, %v1367_v5 }
 0x447   : > { %v1427_v9 = vmul.f32 %v1365_v6, %v9681_v34  ;;  %v1505_v28 = vunpack.c.l.b16 %v1457_v19 }
 0x448   : > { %v1369_v11 = vmul.f32 0.5, %v1368_v8  ;;  %v1320_v12 = vpop.xlane.xlu0 %1319 }
 0x449   : > { %v1438_v14 = vmul.f32 %v9750_v43, %v1427_v9  ;;  %v1334_v15 = vmul.f32 %v1320_v12, %v9668_v24 }
 0x44a   : > { %v1370_v17 = vsub.f32 1.5, %v1369_v11 }
 0x44b   : > { %v8758_v18 = vpop.eup %8757  ;;  %v1449_v20 = vadd.f32 %v9755_v1, %v1438_v14  ;;  %v1342_v21 = vadd.f32 1e-05, %v1334_v15 }
 0x44c   : > { %v1371_v22 = vmul.f32 %v8756_v49, %v1370_v17  ;;  %v1377_v23 = vmul.f32 %v8758_v18, %v1341_v54  ;;  %vm1383_vm15 = vweird.f32 %v8758_v18 }
 0x44d   : > { %v1458_v25 = vpack.c.bf16 %v1449_v20, %v1449_v20  ;;  %8759 = vrsqrt.f32 %v1342_v21  ;;  %vm1384_vm2 = vmor %vm1382_vm1, %vm1383_vm15  ;;  %vm1392_vm4 = vweird.f32 %v1342_v21  ;;  %vm2365_vm15 = vcmask 130048  }
 0x44e   : > { %v1375_v34 = vsel %vm1374_vm14, %v8756_v49, %v1371_v22  ;;  %v1378_v26 = vmul.f32 %v8758_v18, %v1377_v23 }
 0x44f   : > { %v1506_v29 = vunpack.c.l.b16 %v1458_v25  ;;  %v1428_v30 = vmul.f32 %v1375_v34, %v9690_v40 }
 0x450   : > { %v1379_v31 = vmul.f32 0.5, %v1378_v26  ;;  %v1323_v32 = vpop.xlane.xlu1 %1322 }
 0x451   : > { %v9764_v36 = vpack.c.b16 %v1506_v29, %v1505_v28  ;;  %v1335_v37 = vmul.f32 %v1323_v32, %v9668_v24  ;;  %v1439_v46 = vmul.f32 %v9750_v43, %v1428_v30  ;;  %v8552_v32 = vld [vmem:[%s9365_s14 + $0x78] sm:$0xff] }
 0x452   : > { %v1380_v38 = vsub.f32 1.5, %v1379_v31  ;;  %1992 = vmatpush.bf16.msrb.mxu0 %v8552_v32  ;;  %v8561_v32 = vld [vmem:[%s9370_s19 + $0x40] sm:$0xff] }
 0x453   : > { %v8760_v39 = vpop.eup %8759  ;;  %v1343_v47 = vadd.f32 1e-05, %v1335_v37  ;;  %7755 = vmatmul.msk.bf16.vlgmr.msrb.gmra.mxu2 %vm946_vm0, %v9764_v36  ;;  %7775 = vmatmul.msk.bf16.vlgmr.msrb.gmra.mxu1 %vm946_vm0, %v9764_v36  ;;  %v1450_v42 = vadd.f32 %v9755_v1, %v1439_v46  ;;  %v8540_v37 = vld [vmem:[%s9365_s14 + $0x18] sm:$0xff] }
 0x454   : > { %v1381_v48 = vmul.f32 %v8758_v18, %v1380_v38  ;;  %v1387_v40 = vmul.f32 %v8760_v39, %v1342_v21  ;;  %7795 = vmatmul.msk.bf16.vlgmr.msrb.gmra.mxu3 %vm946_vm0, %v9764_v36  ;;  %7815 = vmatmul.msk.bf16.vlgmr.msra.gmra.mxu0 %vm946_vm0, %v9764_v36  ;;  %vm1393_vm3 = vweird.f32 %v8760_v39  ;;  %v8544_v38 = vld [vmem:[%s9365_s14 + $0x38] sm:$0xff] }
 0x455   : > { %8761 = vrsqrt.f32 %v1343_v47  ;;  %v1459_v60 = vpack.c.bf16 %v1450_v42, %v1450_v42  ;;  %vm1394_vm5 = vmor %vm1392_vm4, %vm1393_vm3  ;;  %vm1402_vm7 = vweird.f32 %v1343_v47  ;;  %1833 = vmatpush.bf16.msra.mxu2 %v8540_v37  ;;  %1886 = vmatpush.bf16.msra.mxu1 %v8544_v38  ;;  %v8547_v42 = vld [vmem:[%s9365_s14 + $0x50] sm:$0xff]  ;;  %v8565_v37 = vld [vmem:[%s9370_s19 + $0x60] sm:$0xff] }
 0x456   : > { %v1385_v50 = vsel %vm1384_vm2, %v8758_v18, %v1381_v48  ;;  %v1388_v41 = vmul.f32 %v8760_v39, %v1387_v40  ;;  %v8551_v48 = vld [vmem:[%s9365_s14 + $0x70] sm:$0xff] }
 0x457   : > { %v1429_v52 = vmul.f32 %v1385_v50, %v9697_v51  ;;  %v1507_v58 = vunpack.c.l.b16 %v1459_v60  ;;  %1993 = vmatpush.bf16.msrb.mxu0 %v8551_v48  ;;  %v8539_v50 = vld [vmem:[%s9365_s14 + $0x10] sm:$0xff]  ;;  %v8546_v60 = vld [vmem:[%s9365_s14 + $0x48] sm:$0xff] }
 0x458   : > { %v1389_v53 = vmul.f32 0.5, %v1388_v41  ;;  %v8543_v41 = vld [vmem:[%s9365_s14 + $0x30] sm:$0xff] }
 0x459   : > { %v1440_v56 = vmul.f32 %v9750_v43, %v1429_v52  ;;  %1834 = vmatpush.bf16.msra.mxu2 %v8539_v50  ;;  %1887 = vmatpush.bf16.msra.mxu1 %v8543_v41 }
 0x45a   : > { %v1390_v57 = vsub.f32 1.5, %v1389_v53 }
 0x45b   : > { %v8762_v44 = vpop.eup %8761  ;;  %v1451_v61 = vadd.f32 %v9755_v1, %v1440_v56 }
 0x45c   : > { %v1391_v62 = vmul.f32 %v8760_v39, %v1390_v57  ;;  %v1397_v63 = vmul.f32 %v8762_v44, %v1343_v47  ;;  %vm1403_vm6 = vweird.f32 %v8762_v44  ;;  %v8538_v57 = vld [vmem:[%s9365_s14 + $0x8] sm:$0xff] }
 0x45d   : > { %v1460_v49 = vpack.c.bf16 %v1451_v61, %v1451_v61  ;;  %vm1404_vm8 = vmor %vm1402_vm7, %vm1403_vm6  ;;  %v8550_v61 = vld [vmem:[%s9365_s14 + $0x68] sm:$0xff]  ;;  %1835 = vmatpush.bf16.msra.mxu2 %v8538_v57 }
 0x45e   : > { %v1395_v2 = vsel %vm1394_vm5, %v8760_v39, %v1391_v62  ;;  %v1398_v54 = vmul.f32 %v8762_v44, %v1397_v63  ;;  %v8548_v39 = vld [vmem:[%s9365_s14 + $0x58] sm:$0xff]  ;;  %1994 = vmatpush.bf16.msrb.mxu0 %v8550_v61 }
 0x45f   : > { %v1508_v5 = vunpack.c.l.b16 %v1460_v49  ;;  %v1430_v51 = vmul.f32 %v1395_v2, %v9704_v55  ;;  %1939 = vmatpush.bf16.msra.mxu3 %v8548_v39  ;;  %v8537_v2 = vld [vmem:[%s9365_s14] sm:$0xff] }
 0x460   : > { %v1399_v6 = vmul.f32 0.5, %v1398_v54  ;;  %v8541_v54 = vld [vmem:[%s9365_s14 + $0x20] sm:$0xff] }
 0x461   : > { %v9781_v8 = vpack.c.b16 %v1508_v5, %v1507_v58  ;;  %v1441_v9 = vmul.f32 %v9750_v43, %v1430_v51  ;;  %v8545_v58 = vld [vmem:[%s9365_s14 + $0x40] sm:$0xff]  ;;  %1836 = vmatpush.bf16.msra.mxu2 %v8537_v2 }
 0x462   : > { %v1400_v27 = vsub.f32 1.5, %v1399_v6  ;;  %v8549_v5 = vld [vmem:[%s9365_s14 + $0x60] sm:$0xff] }
 0x463   : > { %7756 = vmatmul.msk.bf16.gmra.mxu2 %vm946_vm0, %v9781_v8  ;;  %7776 = vmatmul.msk.bf16.gmra.mxu1 %vm946_vm0, %v9781_v8  ;;  %v1452_v12 = vadd.f32 %v9755_v1, %v1441_v9 }
 0x464   : > { %v1401_v11 = vmul.f32 %v8762_v44, %v1400_v27  ;;  %7796 = vmatmul.msk.bf16.gmra.mxu3 %vm946_vm0, %v9781_v8  ;;  %7816 = vmatmul.msk.bf16.gmra.mxu0 %vm946_vm0, %v9781_v8 }
 0x465   : > { %v1461_v17 = vpack.c.bf16 %v1452_v12, %v1452_v12  ;;  %1940 = vmatpush.bf16.msra.mxu3 %v8547_v42  ;;  %1995 = vmatpush.bf16.msrb.mxu0 %v8549_v5 }
 0x466   : > { %v1405_v55 = vsel %vm1404_vm8, %v8762_v44, %v1401_v11  ;;  %v8542_v44 = vld [vmem:[%s9365_s14 + $0x28] sm:$0xff] }
 0x467   : > { %v1431_v14 = vmul.f32 %v1405_v55, %v9711_v59  ;;  %v1509_v20 = vunpack.c.l.b16 %v1461_v17  ;;  %v1326_v59 = vpop.xlane.xlu2 %1325  ;;  %1888 = vmatpush.bf16.msra.mxu1 %v8542_v44 }
 0x468   : > { %v1336_v23 = vmul.f32 %v1326_v59, %v9668_v24  ;;  %v8559_v59 = vld [vmem:[%s9370_s19 + $0x30] sm:$0xff] }
 0x469   : > { %v1442_v15 = vmul.f32 %v9750_v43, %v1431_v14  ;;  %1941 = vmatpush.bf16.msra.mxu3 %v8546_v60 }
 0x46a   : > { %v1344_v25 = vadd.f32 1e-05, %v1336_v23  ;;  %v8563_v23 = vld [vmem:[%s9370_s19 + $0x50] sm:$0xff] }
 0x46b   : > { %v1453_v18 = vadd.f32 %v9755_v1, %v1442_v15  ;;  %1889 = vmatpush.bf16.msra.mxu1 %v8541_v54 }
 0x46c   : > { %8763 = vrsqrt.f32 %v1344_v25  ;;  %vm1412_vm10 = vweird.f32 %v1344_v25 }
 0x46d   : > { %v1462_v19 = vpack.c.bf16 %v1453_v18, %v1453_v18  ;;  %1942 = vmatpush.bf16.msra.mxu3 %v8545_v58 }
 0x46f   : > { %v1510_v21 = vunpack.c.l.b16 %v1462_v19 }
 0x471   : > { %v9796_v22 = vpack.c.b16 %v1510_v21, %v1509_v20  ;;  %v8568_v20 = vld [vmem:[%s9370_s19 + $0x78] sm:$0xff]  ;;  %v8555_v21 = vld [vmem:[%s9370_s19 + $0x10] sm:$0xff] }
 0x472   : > { %v8764_v34 = vpop.eup %8763  ;;  %2268 = vmatpush.bf16.msra.mxu0 %v8568_v20 }
 0x473   : > { %7757 = vmatmul.msk.bf16.gmra.mxu2 %vm946_vm0, %v9796_v22  ;;  %7777 = vmatmul.msk.bf16.gmra.mxu1 %vm946_vm0, %v9796_v22  ;;  %v1407_v26 = vmul.f32 %v8764_v34, %v1344_v25  ;;  %vm1413_vm9 = vweird.f32 %v8764_v34  ;;  %v8567_v25 = vld [vmem:[%s9370_s19 + $0x70] sm:$0xff] }
 0x474   : > { %7797 = vmatmul.msk.bf16.gmra.mxu3 %vm946_vm0, %v9796_v22  ;;  %7817 = vmatmul.msk.bf16.gmra.mxu0 %vm946_vm0, %v9796_v22  ;;  %vm1414_vm11 = vmor %vm1412_vm10, %vm1413_vm9 }
 0x475   : > { %v1408_v28 = vmul.f32 %v8764_v34, %v1407_v26  ;;  %v8558_v26 = vld [vmem:[%s9370_s19 + $0x28] sm:$0xff] }
 0x476   : > { %2269 = vmatpush.bf16.msra.mxu0 %v8567_v25 }
 0x477   : > { %v1409_v29 = vmul.f32 0.5, %v1408_v28  ;;  %v8562_v28 = vld [vmem:[%s9370_s19 + $0x48] sm:$0xff] }
 0x479   : > { %v1410_v47 = vsub.f32 1.5, %v1409_v29  ;;  %v8566_v29 = vld [vmem:[%s9370_s19 + $0x68] sm:$0xff] }
 0x47a   : > { %2270 = vmatpush.bf16.msra.mxu0 %v8566_v29 }
 0x47b   : > { %v1411_v40 = vmul.f32 %v8764_v34, %v1410_v47 }
 0x47d   : > { %v1415_v53 = vsel %vm1414_vm11, %v8764_v34, %v1411_v40  ;;  %v8554_v34 = vld [vmem:[%s9370_s19 + $0x8] sm:$0xff] }
 0x47e   : > { %v1432_v63 = vmul.f32 %v1415_v53, %v9718_v45  ;;  %2271 = vmatpush.bf16.msra.mxu0 %v8565_v37 }
 0x480   : > { %v1443_v6 = vmul.f32 %v9750_v43, %v1432_v63 }
 0x482   : > { %v1454_v45 = vadd.f32 %v9755_v1, %v1443_v6 }
 0x484   : > { %v1463_v12 = vpack.c.bf16 %v1454_v45, %v1454_v45 }
 0x486   : > { %v1511_v17 = vunpack.c.l.b16 %v1463_v12 }
 0x4ab   : > { %v1329_v30 = vpop.xlane.xlu0 %1328 }
 0x4ac   : > { %v1337_v31 = vmul.f32 %v1329_v30, %v9668_v24  ;;  %v8553_v30 = vld [vmem:[%s9370_s19] sm:$0xff] }
 0x4ae   : > { %v1345_v46 = vadd.f32 1e-05, %v1337_v31  ;;  %v8557_v31 = vld [vmem:[%s9370_s19 + $0x20] sm:$0xff] }
 0x4b0   : > { %8765 = vrsqrt.f32 %v1345_v46  ;;  %vm1422_vm13 = vweird.f32 %v1345_v46 }
 0x4b6   : > { %v8766_v52 = vpop.eup %8765 }
 0x4b7   : > { %v1417_v56 = vmul.f32 %v8766_v52, %v1345_v46  ;;  %vm1423_vm12 = vweird.f32 %v8766_v52 }
 0x4b8   : > { %vm1424_vm14 = vmor %vm1422_vm13, %vm1423_vm12 }
 0x4b9   : > { %v1418_v62 = vmul.f32 %v8766_v52, %v1417_v56 }
 0x4bb   : > { %v1419_v49 = vmul.f32 0.5, %v1418_v62 }
 0x4bd   : > { %v1420_v51 = vsub.f32 1.5, %v1419_v49 }
 0x4bf   : > { %v1421_v27 = vmul.f32 %v8766_v52, %v1420_v51 }
 0x4c1   : > { %v1425_v9 = vsel %vm1424_vm14, %v8766_v52, %v1421_v27 }
 0x4c2   : > { %v1433_v11 = vmul.f32 %v1425_v9, %v9743_v35  ;;  %v8556_v35 = vld [vmem:[%s9370_s19 + $0x18] sm:$0xff] }
 0x4c3   : > { %2109 = vmatpush.bf16.msrb.mxu2 %v8556_v35 }
 0x4c4   : > { %v1444_v55 = vmul.f32 %v9750_v43, %v1433_v11  ;;  %v8560_v43 = vld [vmem:[%s9370_s19 + $0x38] sm:$0xff] }
 0x4c5   : > { %2162 = vmatpush.bf16.msrb.mxu1 %v8560_v43 }
 0x4c6   : > { %v1455_v14 = vadd.f32 %v9755_v1, %v1444_v55  ;;  %v8564_v1 = vld [vmem:[%s9370_s19 + $0x58] sm:$0xff] }
 0x4c7   : > { %2215 = vmatpush.bf16.msrb.mxu3 %v8564_v1  ;;  %2110 = vmatpush.bf16.msrb.mxu2 %v8555_v21 }
 0x4c8   : > { %v1464_v15 = vpack.c.bf16 %v1455_v14, %v1455_v14 }
 0x4c9   : > { %2163 = vmatpush.bf16.msrb.mxu1 %v8559_v59 }
 0x4ca   : > { %v1512_v18 = vunpack.c.l.b16 %v1464_v15 }
 0x4cb   : > { %2216 = vmatpush.bf16.msrb.mxu3 %v8563_v23  ;;  %2111 = vmatpush.bf16.msrb.mxu2 %v8554_v34 }
 0x4cc   : > { %v9830_v19 = vpack.c.b16 %v1512_v18, %v1511_v17 }
 0x4cd   : > { %2164 = vmatpush.bf16.msrb.mxu1 %v8558_v26 }
 0x4ce   : > { %7758 = vmatmul.msk.bf16.gmra.mxu2 %vm946_vm0, %v9830_v19  ;;  %7778 = vmatmul.msk.bf16.gmra.mxu1 %vm946_vm0, %v9830_v19 }
 0x4cf   : > { %7798 = vmatmul.msk.bf16.gmra.mxu3 %vm946_vm0, %v9830_v19  ;;  %7818 = vmatmul.msk.bf16.gmra.mxu0 %vm946_vm0, %v9830_v19 }
 0x4d0   : > { %2217 = vmatpush.bf16.msrb.mxu3 %v8562_v28  ;;  %2112 = vmatpush.bf16.msrb.mxu2 %v8553_v30  ;;  %v9888_v38 = vpop.f32.mrf.mxu1 }
 0x4d1   : > { %2165 = vmatpush.bf16.msrb.mxu1 %v8557_v31  ;;  %v9890_v39 = vpop.f32.mrf.mxu0 }
 0x4d4   : > { %2218 = vmatpush.bf16.msrb.mxu3 %v8561_v32 }
 0x4d6   : > { %v9892_v46 = vpop.f32.mrf.mxu2 }
 0x4d7   : > { %v9894_v47 = vpop.f32.mrf.mxu3 }
 0x4d8   : > { %v9896_v48 = vpop.f32.mrf.mxu1 }
 0x4d9   : > { %v9898_v40 = vpop.f32.mrf.mxu0 }
 0x4de   : > { %7835 = vmatmul.msk.bf16.vlgmr.msra.gmra.mxu2 %vm946_vm0, %v9764_v36  ;;  %7855 = vmatmul.msk.bf16.vlgmr.msra.gmra.mxu1 %vm946_vm0, %v9764_v36  ;;  %v9908_v50 = vpop.f32.mrf.mxu2 }
 0x4df   : > { %7875 = vmatmul.msk.bf16.vlgmr.msra.gmra.mxu3 %vm946_vm0, %v9764_v36  ;;  %7895 = vmatmul.msk.bf16.vlgmr.msrb.gmra.mxu0 %vm946_vm0, %v9764_v36  ;;  %v9910_v41 = vpop.f32.mrf.mxu3 }
 0x4e0   : > { %v9912_v42 = vpop.f32.mrf.mxu1 }
 0x4e1   : > { %v9914_v52 = vpop.f32.mrf.mxu0 }
 0x4e6   : > { %v9916_v53 = vpop.f32.mrf.mxu2 }
 0x4e7   : > { %v9918_v56 = vpop.f32.mrf.mxu3 }
 0x4e8   : > { %v9924_v57 = vpop.f32.mrf.mxu1 }
 0x4ee   : > { %7836 = vmatmul.msk.bf16.gmra.mxu2 %vm946_vm0, %v9781_v8  ;;  %7856 = vmatmul.msk.bf16.gmra.mxu1 %vm946_vm0, %v9781_v8  ;;  %v9932_v44 = vpop.f32.mrf.mxu2 }
 0x4ef   : > { %7876 = vmatmul.msk.bf16.gmra.mxu3 %vm946_vm0, %v9781_v8  ;;  %7896 = vmatmul.msk.bf16.gmra.mxu0 %vm946_vm0, %v9781_v8  ;;  %v9934_v60 = vpop.f32.mrf.mxu3 }
 0x4f0   : > { %v9936_v61 = vpop.f32.mrf.mxu1 }
 0x4f1   : > { %12333 = vst [vmem:[#allocation33_spill] sm:$0xff] %v9936_v61 }
 0x4f6   : > { %v9944_v63 = vpop.f32.mrf.mxu2 }
 0x4f7   : > { %12335 = vst [vmem:[#allocation35_spill] sm:$0xff] %v9944_v63 }
 0x4f8   : > { %v9952_v49 = vpop.f32.mrf.mxu1 }
 0x4f9   : > { %12337 = vst [vmem:[#allocation37_spill] sm:$0xff] %v9952_v49 }
 0x4fe   : > { %7837 = vmatmul.msk.bf16.gmra.mxu2 %vm946_vm0, %v9796_v22  ;;  %7857 = vmatmul.msk.bf16.gmra.mxu1 %vm946_vm0, %v9796_v22  ;;  %v9956_v54 = vpop.f32.mrf.mxu2 }
 0x4ff   : > { %7877 = vmatmul.msk.bf16.gmra.mxu3 %vm946_vm0, %v9796_v22  ;;  %7897 = vmatmul.msk.bf16.gmra.mxu0 %vm946_vm0, %v9796_v22  ;;  %12339 = vst [vmem:[#allocation39_spill] sm:$0xff] %v9956_v54 }
 0x50e   : > { %7838 = vmatmul.msk.bf16.gmra.mxu2 %vm946_vm0, %v9830_v19  ;;  %7858 = vmatmul.msk.bf16.gmra.mxu1 %vm946_vm0, %v9830_v19 }
 0x50f   : > { %7878 = vmatmul.msk.bf16.gmra.mxu3 %vm946_vm0, %v9830_v19  ;;  %7898 = vmatmul.msk.bf16.gmra.mxu0 %vm946_vm0, %v9830_v19 }
 0x51e   : > { %7915 = vmatmul.msk.bf16.vlgmr.msrb.gmra.mxu2 %vm946_vm0, %v9764_v36  ;;  %7935 = vmatmul.msk.bf16.vlgmr.msrb.gmra.mxu1 %vm946_vm0, %v9764_v36 }
 0x51f   : > { %7955 = vmatmul.msk.bf16.vlgmr.msrb.gmra.mxu3 %vm946_vm0, %v9764_v36  ;;  %7975 = vmatmul.msk.bf16.vlgmr.msra.gmra.mxu0 %vm946_vm0, %v9764_v36  ;;  %v9930_v36 = vpop.f32.mrf.mxu0 }
 0x527   : > { %v9938_v62 = vpop.f32.mrf.mxu0 }
 0x528   : > { %12334 = vst [vmem:[#allocation34_spill] sm:$0xff] %v9938_v62 }
 0x52e   : > { %7916 = vmatmul.msk.bf16.gmra.mxu2 %vm946_vm0, %v9781_v8  ;;  %7936 = vmatmul.msk.bf16.gmra.mxu1 %vm946_vm0, %v9781_v8 }
 0x52f   : > { %7956 = vmatmul.msk.bf16.gmra.mxu3 %vm946_vm0, %v9781_v8  ;;  %7976 = vmatmul.msk.bf16.gmra.mxu0 %vm946_vm0, %v9781_v8  ;;  %v9950_v8 = vpop.f32.mrf.mxu3  ;;  %v9954_v2 = vpop.f32.mrf.mxu0 }
 0x530   : > { %12336 = vst [vmem:[#allocation36_spill] sm:$0xff] %v9950_v8 }
 0x531   : > { %12338 = vst [vmem:[#allocation38_spill] sm:$0xff] %v9954_v2 }
 0x537   : > { %v9958_v58 = vpop.f32.mrf.mxu3 }
 0x538   : > { %12340 = vst [vmem:[#allocation40_spill] sm:$0xff] %v9958_v58 }
 0x53e   : > { %7917 = vmatmul.msk.bf16.gmra.mxu2 %vm946_vm0, %v9796_v22  ;;  %7937 = vmatmul.msk.bf16.gmra.mxu1 %vm946_vm0, %v9796_v22 }
 0x53f   : > { %7957 = vmatmul.msk.bf16.gmra.mxu3 %vm946_vm0, %v9796_v22  ;;  %7977 = vmatmul.msk.bf16.gmra.mxu0 %vm946_vm0, %v9796_v22 }
 0x54b   : > { %v9960_v5 = vpop.f32.mrf.mxu1 }
 0x54c   : > { %12341 = vst [vmem:[#allocation41_spill] sm:$0xff] %v9960_v5  ;;  %v9962_v51 = vpop.f32.mrf.mxu0 }
 0x54d   : > { %12342 = vst [vmem:[#allocation42_spill] sm:$0xff] %v9962_v51 }
 0x54e   : > { %7918 = vmatmul.msk.bf16.gmra.mxu2 %vm946_vm0, %v9830_v19  ;;  %7938 = vmatmul.msk.bf16.gmra.mxu1 %vm946_vm0, %v9830_v19 }
 0x54f   : > { %7958 = vmatmul.msk.bf16.gmra.mxu3 %vm946_vm0, %v9830_v19  ;;  %7978 = vmatmul.msk.bf16.gmra.mxu0 %vm946_vm0, %v9830_v19 }
 0x551   : > { %v9972_v22 = vpop.f32.mrf.mxu2 }
 0x552   : > { %12343 = vst [vmem:[#allocation43_spill] sm:$0xff] %v9972_v22  ;;  %v9974_v6 = vpop.f32.mrf.mxu3 }
 0x553   : > { %12344 = vst [vmem:[#allocation44_spill] sm:$0xff] %v9974_v6  ;;  %v9976_v27 = vpop.f32.mrf.mxu1 }
 0x554   : > { %12345 = vst [vmem:[#allocation45_spill] sm:$0xff] %v9976_v27  ;;  %v9978_v9 = vpop.f32.mrf.mxu0 }
 0x555   : > { %12346 = vst [vmem:[#allocation46_spill] sm:$0xff] %v9978_v9 }
 0x559   : > { %v9980_v45 = vpop.f32.mrf.mxu2 }
 0x55a   : > { %12347 = vst [vmem:[#allocation47_spill] sm:$0xff] %v9980_v45  ;;  %v9982_v11 = vpop.f32.mrf.mxu3 }
 0x55b   : > { %12348 = vst [vmem:[#allocation48_spill] sm:$0xff] %v9982_v11  ;;  %v9984_v55 = vpop.f32.mrf.mxu1 }
 0x55c   : > { %v9986_v12 = vpop.f32.mrf.mxu0 }
 0x561   : > { %v9988_v14 = vpop.f32.mrf.mxu2 }
 0x562   : > { %v9990_v15 = vpop.f32.mrf.mxu3 }
 0x563   : > { %v9992_v17 = vpop.f32.mrf.mxu1 }
 0x564   : > { %v9994_v18 = vpop.f32.mrf.mxu0 }
 0x569   : > { %v9996_v19 = vpop.f32.mrf.mxu2 }
 0x56a   : > { %v9998_v35 = vpop.f32.mrf.mxu3 }
 0x56b   : > { %v10000_v43 = vpop.f32.mrf.mxu1 }
 0x56c   : > { %v10002_v1 = vpop.f32.mrf.mxu0 }
 0x571   : > { %v10004_v20 = vpop.f32.mrf.mxu2 }
 0x572   : > { %v10006_v21 = vpop.f32.mrf.mxu3 }
 0x573   : > { %v10008_v59 = vpop.f32.mrf.mxu1 }
 0x574   : > { %v10010_v23 = vpop.f32.mrf.mxu0 }
 0x579   : > { %v10012_v25 = vpop.f32.mrf.mxu2 }
 0x57a   : > { %v10014_v34 = vpop.f32.mrf.mxu3 }
 0x57b   : > { %v1901_v26 = vpop.f32.mrf.mxu1 }
 0x57c   : > { %v2007_v28 = vpop.f32.mrf.mxu0  ;;  %v2029_v8 = vpack.c.bf16 %v1901_v26, %v1901_v26 }
 0x57d   : > { %v2045_v61 = vpack.c.bf16 %v2007_v28, %v2007_v28 }
 0x581   : > { %v10016_v29 = vpop.f32.mrf.mxu2 }
 0x582   : > { %v10018_v30 = vpop.f32.mrf.mxu3 }
 0x583   : > { %v1903_v31 = vpop.f32.mrf.mxu1 }
 0x584   : > { %v2009_v32 = vpop.f32.mrf.mxu0  ;;  %v2030_v11 = vpack.c.bf16 %v1903_v31, %v1903_v31 }
 0x585   : > { %v2046_v51 = vpack.c.bf16 %v2009_v32, %v2009_v32 }
 0x589   : > { %v1850_v37 = vpop.f32.mrf.mxu2 }
 0x58a   : > { %v1956_v33 = vpop.f32.mrf.mxu3 }
 0x58b   : > { %v1906_v24 = vpop.f32.mrf.mxu1 }
 0x58c   : > { %v2012_v16 = vpop.f32.mrf.mxu0  ;;  %v2031_v10 = vpack.c.bf16 %v1906_v24, %v1906_v24  ;;  %v2452_v24 = vunpack.c.l.b16 %v2030_v11 }
 0x58d   : > { %v2047_v4 = vpack.c.bf16 %v2012_v16, %v2012_v16 }
 0x58e   : > { %v2453_v45 = vunpack.c.l.b16 %v2031_v10 }
 0x58f   : > { %v2639_v27 = vunpack.c.l.b16 %v2047_v4  ;;  %v2451_v4 = vunpack.c.l.b16 %v2029_v8  ;;  %v2044_v8 = vpack.c.bf16 %v10010_v23, %v10010_v23 }
 0x591   : > { %v1853_v13 = vpop.f32.mrf.mxu2  ;;  %v2457_v11 = vpack.c.b16 %v2452_v24, %v2451_v4 }
 0x592   : > { %v1959_v7 = vpop.f32.mrf.mxu3  ;;  %v2023_v63 = vpack.c.bf16 %v1853_v13, %v1853_v13  ;;  %v2022_v13 = vpack.c.bf16 %v1850_v37, %v1850_v37 }
 0x593   : > { %v1908_v3 = vpop.f32.mrf.mxu1  ;;  %v2039_v58 = vpack.c.bf16 %v1959_v7, %v1959_v7  ;;  %v2478_v24 = vsel %vm2365_vm15, %v2457_v11, 0 }
 0x594   : > { %v2032_v0 = vpack.c.bf16 %v1908_v3, %v1908_v3  ;;  %v2014_v6 = vpop.f32.mrf.mxu0 }
 0x595   : > { %v2048_v22 = vpack.c.bf16 %v2014_v6, %v2014_v6  ;;  %v2638_v6 = vunpack.c.l.b16 %v2046_v51 }
 0x596   : > { %v2454_v9 = vunpack.c.l.b16 %v2032_v0 }
 0x597   : > { %v2640_v5 = vunpack.c.l.b16 %v2048_v22  ;;  %v2359_v22 = vunpack.c.l.b16 %v2023_v63  ;;  %v2037_v63 = vpack.c.bf16 %v10018_v30, %v10018_v30 }
 0x598   : > { %v2458_v62 = vpack.c.b16 %v2454_v9, %v2453_v45 }
 0x599   : > { %v2644_v54 = vpack.c.b16 %v2640_v5, %v2639_v27  ;;  %v1855_v2 = vpop.f32.mrf.mxu2  ;;  %v2637_v5 = vunpack.c.l.b16 %v2045_v61  ;;  %v2038_v27 = vpack.c.bf16 %v1956_v33, %v1956_v33  ;;  %v2027_v33 = vpack.c.bf16 %v10000_v43, %v10000_v43 }
 0x59a   : > { %v2024_v16 = vpack.c.bf16 %v1855_v2, %v1855_v2  ;;  %v1961_v49 = vpop.f32.mrf.mxu3  ;;  %v2481_v3 = vsel %vm2365_vm15, %v2458_v62, 0  ;;  %v2546_v2 = vunpack.c.l.b16 %v2039_v58  ;;  %v2028_v62 = vpack.c.bf16 %v10008_v59, %v10008_v59 }
 0x59b   : > { %v2040_v31 = vpack.c.bf16 %v1961_v49, %v1961_v49  ;;  %v10021_v10 = vpop.f32.mrf.mxu1  ;;  %2487 = vmatpush.bf16.xpose.msra.mxu1 %v2481_v3  ;;  %v2667_v0 = vsel %vm2365_vm15, %v2644_v54, 0  ;;  %v2021_v49 = vpack.c.bf16 %v10016_v29, %v10016_v29  ;;  %v2643_v26 = vpack.c.b16 %v2638_v6, %v2637_v5 }
 0x59c   : > { %v2360_v9 = vunpack.c.l.b16 %v2024_v16  ;;  %v10024_v7 = vpop.f32.mrf.mxu0  ;;  %2673 = vmatpush.bf16.xpose.msrb.mxu0 %v2667_v0  ;;  %v2358_v61 = vunpack.c.l.b16 %v2022_v13  ;;  %v2043_v59 = vpack.c.bf16 %v10002_v1, %v10002_v1  ;;  %v2545_v28 = vunpack.c.l.b16 %v2038_v27 }
 0x59d   : > { %v2547_v45 = vunpack.c.l.b16 %v2040_v31  ;;  %v2450_v32 = vunpack.c.l.b16 %v2028_v62  ;;  %v2357_v37 = vunpack.c.l.b16 %v2021_v49  ;;  %v2636_v43 = vunpack.c.l.b16 %v2044_v8 }
 0x59e   : > { %v2364_v51 = vpack.c.b16 %v2360_v9, %v2359_v22  ;;  %v2544_v16 = vunpack.c.l.b16 %v2037_v63  ;;  %v2664_v1 = vsel %vm2365_vm15, %v2643_v26, 0  ;;  %v2449_v6 = vunpack.c.l.b16 %v2027_v33 }
 0x59f   : > { %v2551_v54 = vpack.c.b16 %v2547_v45, %v2546_v2  ;;  %v2020_v31 = vpack.c.bf16 %v10012_v25, %v10012_v25  ;;  %v2363_v4 = vpack.c.b16 %v2358_v61, %v2357_v37  ;;  %v2635_v13 = vunpack.c.l.b16 %v2043_v59 }
 0x5a0   : > { %v2388_v58 = vsel %vm2365_vm15, %v2364_v51, 0  ;;  %v2036_v22 = vpack.c.bf16 %v10014_v34, %v10014_v34  ;;  %v2550_v9 = vpack.c.b16 %v2545_v28, %v2544_v16  ;;  %v2026_v5 = vpack.c.bf16 %v9992_v17, %v9992_v17 }
 0x5a1   : > { %v10039_v29 = vpop.f32.mrf.mxu2  ;;  %2394 = vmatpush.bf16.xpose.msra.mxu2 %v2388_v58  ;;  %v2574_v23 = vsel %vm2365_vm15, %v2551_v54, 0  ;;  %v2019_v27 = vpack.c.bf16 %v10004_v20, %v10004_v20  ;;  %v2456_v2 = vpack.c.b16 %v2450_v32, %v2449_v6  ;;  %v2042_v45 = vpack.c.bf16 %v9994_v18, %v9994_v18 }
 0x5a2   : > { %v10042_v30 = vpop.f32.mrf.mxu3  ;;  %2580 = vmatpush.bf16.xpose.msra.mxu3 %v2574_v23  ;;  %v2035_v25 = vpack.c.bf16 %v10006_v21, %v10006_v21  ;;  %v2642_v62 = vpack.c.b16 %v2636_v43, %v2635_v13  ;;  %v2025_v49 = vpack.c.bf16 %v9984_v55, %v9984_v55  ;;  %v2356_v51 = vunpack.c.l.b16 %v2020_v31 }
 0x5a3   : > { %v10045_v3 = vpop.f32.mrf.mxu1  ;;  %2488 = vmatpush.bf16.xpose.msra.mxu1 %v2478_v24  ;;  %v2385_v34 = vsel %vm2365_vm15, %v2363_v4, 0  ;;  %v2041_v17 = vpack.c.bf16 %v9986_v12, %v9986_v12  ;;  %v2543_v11 = vunpack.c.l.b16 %v2036_v22  ;;  %v2571_v20 = vsel %vm2365_vm15, %v2550_v9, 0 }
 0x5a4   : > { %v10050_v0 = vpop.f32.mrf.mxu0  ;;  %2674 = vmatpush.bf16.xpose.msrb.mxu0 %v2664_v1  ;;  %v2448_v18 = vunpack.c.l.b16 %v2026_v5  ;;  %v2355_v63 = vunpack.c.l.b16 %v2019_v27  ;;  %v2475_v21 = vsel %vm2365_vm15, %v2456_v2, 0  ;;  %v2634_v55 = vunpack.c.l.b16 %v2042_v45 }
 0x5a5   : > { %v2542_v26 = vunpack.c.l.b16 %v2035_v25  ;;  %v2661_v12 = vsel %vm2365_vm15, %v2642_v62, 0  ;;  %v2447_v61 = vunpack.c.l.b16 %v2025_v49  ;;  %v2018_v58 = vpack.c.bf16 %v9996_v19, %v9996_v19 }
 0x5a6   : > { %v2362_v28 = vpack.c.b16 %v2356_v51, %v2355_v63  ;;  %v2633_v23 = vunpack.c.l.b16 %v2041_v17  ;;  %v2034_v32 = vpack.c.bf16 %v9998_v35, %v9998_v35  ;;  %v2017_v24 = vpack.c.bf16 %v9988_v14, %v9988_v14 }
 0x5a7   : > { %v2549_v37 = vpack.c.b16 %v2543_v11, %v2542_v26  ;;  %v2455_v43 = vpack.c.b16 %v2448_v18, %v2447_v61  ;;  %v2033_v16 = vpack.c.bf16 %v9990_v15, %v9990_v15  ;;  %v1750_v19 = vpack.c.bf16 %v9896_v48, %v9896_v48 }
 0x5a8   : > { %v2641_v1 = vpack.c.b16 %v2634_v55, %v2633_v23  ;;  %v2354_v6 = vunpack.c.l.b16 %v2018_v58  ;;  %v2382_v31 = vsel %vm2365_vm15, %v2362_v28, 0  ;;  %v1766_v4 = vpack.c.bf16 %v9898_v40, %v9898_v40 }
 0x5a9   : > { %v10067_v8 = vpop.f32.mrf.mxu2  ;;  %2395 = vmatpush.bf16.xpose.msra.mxu2 %v2385_v34  ;;  %v2541_v13 = vunpack.c.l.b16 %v2034_v32  ;;  %v2568_v14 = vsel %vm2365_vm15, %v2549_v37, 0  ;;  %v1749_v22 = vpack.c.bf16 %v9888_v38, %v9888_v38  ;;  %v2353_v15 = vunpack.c.l.b16 %v2017_v24 }
 0x5aa   : > { %v10070_v54 = vpop.f32.mrf.mxu3  ;;  %2581 = vmatpush.bf16.xpose.msra.mxu3 %v2571_v20  ;;  %v2472_v48 = vsel %vm2365_vm15, %v2455_v43, 0  ;;  %v1765_v5 = vpack.c.bf16 %v9890_v39, %v9890_v39  ;;  %v2540_v27 = vunpack.c.l.b16 %v2033_v16  ;;  %v2658_v2 = vsel %vm2365_vm15, %v2641_v1, 0 }
 0x5ab   : > { %v10073_v33 = vpop.f32.mrf.mxu1  ;;  %2489 = vmatpush.bf16.xpose.msra.mxu1 %v2475_v21  ;;  %v2428_v45 = vunpack.c.l.b16 %v1750_v19  ;;  %v2361_v38 = vpack.c.b16 %v2354_v6, %v2353_v15  ;;  %v2614_v62 = vunpack.c.l.b16 %v1766_v4  ;;  %v2427_v51 = vunpack.c.l.b16 %v1749_v22 }
 0x5ac   : > { %v10078_v59 = vpop.f32.mrf.mxu0  ;;  %2675 = vmatpush.bf16.xpose.msrb.mxu0 %v2661_v12  ;;  %v2548_v49 = vpack.c.b16 %v2541_v13, %v2540_v27  ;;  %v1742_v34 = vpack.c.bf16 %v9908_v50, %v9908_v50  ;;  %v2613_v17 = vunpack.c.l.b16 %v1765_v5  ;;  %v1758_v39 = vpack.c.bf16 %v9910_v41, %v9910_v41  ;;  %v12349_v27 = vld [vmem:[#allocation37_spill] sm:$0xff] }
 0x5ad   : > { %v1741_v11 = vpack.c.bf16 %v9892_v46, %v9892_v46  ;;  %v2435_v20 = vpack.c.b16 %v2428_v45, %v2427_v51  ;;  %v2379_v18 = vsel %vm2365_vm15, %v2361_v38, 0  ;;  %v1757_v63 = vpack.c.bf16 %v9894_v47, %v9894_v47 }
 0x5ae   : > { %v2621_v21 = vpack.c.b16 %v2614_v62, %v2613_v17  ;;  %v2565_v26 = vsel %vm2365_vm15, %v2548_v49, 0  ;;  %v2334_v50 = vunpack.c.l.b16 %v1742_v34  ;;  %v2521_v41 = vunpack.c.l.b16 %v1758_v39  ;;  %v12352_v49 = vld [vmem:[#allocation40_spill] sm:$0xff]  ;;  %v12353_v17 = vld [vmem:[#allocation33_spill] sm:$0xff] }
 0x5af   : > { %v2333_v61 = vunpack.c.l.b16 %v1741_v11  ;;  %v2520_v47 = vunpack.c.l.b16 %v1757_v63  ;;  %v1752_v32 = vpack.c.bf16 %v9924_v57, %v9924_v57  ;;  %v1768_v37 = vpack.c.bf16 %v9930_v36, %v9930_v36 }
 0x5b0   : > { %v1751_v43 = vpack.c.bf16 %v9912_v42, %v9912_v42  ;;  %v1767_v1 = vpack.c.bf16 %v9914_v52, %v9914_v52  ;;  %v1744_v36 = vpack.c.bf16 %v9932_v44, %v9932_v44  ;;  %v1743_v42 = vpack.c.bf16 %v9916_v53, %v9916_v53  ;;  %v12351_v53 = vld [vmem:[#allocation39_spill] sm:$0xff] }
 0x5b1   : > { %v10091_v35 = vpop.f32.mrf.mxu2  ;;  %2396 = vmatpush.bf16.xpose.msra.mxu2 %v2382_v31  ;;  %v2341_v28 = vpack.c.b16 %v2334_v50, %v2333_v61  ;;  %v2528_v23 = vpack.c.b16 %v2521_v41, %v2520_v47  ;;  %v2430_v57 = vunpack.c.l.b16 %v1752_v32  ;;  %v2616_v31 = vunpack.c.l.b16 %v1768_v37  ;;  %v12356_v50 = vld [vmem:[#allocation36_spill] sm:$0xff] }
 0x5b2   : > { %v10096_v9 = vpop.f32.mrf.mxu3  ;;  %2582 = vmatpush.bf16.xpose.msra.mxu3 %v2568_v14  ;;  %v2429_v4 = vunpack.c.l.b16 %v1751_v43  ;;  %v2615_v13 = vunpack.c.l.b16 %v1767_v1  ;;  %v1760_v14 = vpack.c.bf16 %v9934_v60, %v9934_v60  ;;  %v1759_v52 = vpack.c.bf16 %v9918_v56, %v9918_v56  ;;  %v12350_v60 = vld [vmem:[#allocation38_spill] sm:$0xff]  ;;  %v12357_v1 = vld [vmem:[#allocation41_spill] sm:$0xff] }
 0x5b3   : > { %v10101_v40 = vpop.f32.mrf.mxu1  ;;  %2490 = vmatpush.bf16.xpose.msra.mxu1 %v2472_v48  ;;  %v2336_v5 = vunpack.c.l.b16 %v1744_v36  ;;  %v1770_v38 = vpack.c.bf16 %v12350_v60, %v12350_v60  ;;  %v1746_v62 = vpack.c.bf16 %v12351_v53, %v12351_v53  ;;  %v1762_v56 = vpack.c.bf16 %v12352_v49, %v12352_v49  ;;  %v12359_v53 = vld [vmem:[#allocation42_spill] sm:$0xff] }
 0x5b4   : > { %v10104_v25 = vpop.f32.mrf.mxu0  ;;  %2676 = vmatpush.bf16.xpose.msrb.mxu0 %v2658_v2  ;;  %v2436_v22 = vpack.c.b16 %v2430_v57, %v2429_v4  ;;  %v2622_v15 = vpack.c.b16 %v2616_v31, %v2615_v13  ;;  %v1754_v2 = vpack.c.bf16 %v12349_v27, %v12349_v27  ;;  %v2523_v44 = vunpack.c.l.b16 %v1760_v14  ;;  %v12358_v13 = vld [vmem:[#allocation45_spill] sm:$0xff]  ;;  %v12360_v49 = vld [vmem:[#allocation46_spill] sm:$0xff] }
 0x5b5   : > { %v2335_v34 = vunpack.c.l.b16 %v1743_v42  ;;  %v1753_v39 = vpack.c.bf16 %v12353_v17, %v12353_v17  ;;  %v1761_v41 = vpack.c.bf16 %v12356_v50, %v12356_v50  ;;  %v10174_v32 = vunpack.c.l.b16 %v1746_v62 }
 0x5b6   : > { %v2432_v47 = vunpack.c.l.b16 %v1754_v2  ;;  %v10176_v37 = vunpack.c.l.b16 %v1762_v56  ;;  %v1755_v57 = vpack.c.bf16 %v12357_v1, %v12357_v1  ;;  %v1756_v14 = vpack.c.bf16 %v12358_v13, %v12358_v13 }
 0x5b7   : > { %v2342_v61 = vpack.c.b16 %v2336_v5, %v2335_v34  ;;  %v2431_v43 = vunpack.c.l.b16 %v1753_v39  ;;  %v10183_v36 = vunpack.c.l.b16 %v1761_v41  ;;  %v1771_v62 = vpack.c.bf16 %v12359_v53, %v12359_v53 }
 0x5b8   : > { %v1772_v56 = vpack.c.bf16 %v12360_v49, %v12360_v49  ;;  %v10198_v17 = vunpack.c.l.b16 %v1756_v14  ;;  %v2301_v39 = vpack.c.bf16 %v10021_v10, %v10021_v10  ;;  %v2304_v50 = vpack.c.bf16 %v10101_v40, %v10101_v40 }
 0x5b9   : > { %v10115_v55 = vpop.f32.mrf.mxu2  ;;  %2397 = vmatpush.bf16.xpose.msra.mxu2 %v2379_v18  ;;  %v12354_v18 = vld [vmem:[#allocation34_spill] sm:$0xff]  ;;  %v2530_v2 = vpack.c.b16 %v10176_v37, %v10183_v36  ;;  %v2293_v10 = vpack.c.bf16 %v10039_v29, %v10039_v29  ;;  %v2619_v49 = vunpack.c.l.b16 %v1771_v62 }
 0x5ba   : > { %v10118_v12 = vpop.f32.mrf.mxu3  ;;  %2583 = vmatpush.bf16.xpose.msra.mxu3 %v2565_v26  ;;  %7983 = vmatmul.msk.bf16.vlgmr.msra.gmra.mxu1 %vm2365_vm15, %v2435_v20  ;;  %v2522_v20 = vunpack.c.l.b16 %v1759_v52  ;;  %v1769_v63 = vpack.c.bf16 %v12354_v18, %v12354_v18  ;;  %v2302_v18 = vpack.c.bf16 %v10045_v3, %v10045_v3 }
 0x5bb   : > { %7991 = vmatmul.msk.bf16.vlgmr.msrb.gmra.mxu0 %vm2365_vm15, %v2621_v21  ;;  %v10122_v46 = vpop.f32.mrf.mxu1  ;;  %v12355_v21 = vld [vmem:[#allocation35_spill] sm:$0xff]  ;;  %v3206_v62 = vunpack.c.l.b16 %v2293_v10 }
 0x5bc   : > { %v10124_v58 = vpop.f32.mrf.mxu0  ;;  %v1745_v26 = vpack.c.bf16 %v12355_v21, %v12355_v21  ;;  %v2617_v31 = vunpack.c.l.b16 %v1769_v63  ;;  %v2305_v41 = vpack.c.bf16 %v10122_v46, %v10122_v46  ;;  %v2319_v46 = vpack.c.bf16 %v10078_v59, %v10078_v59 }
 0x5be   : > { %v10181_v4 = vunpack.c.l.b16 %v1745_v26 }
 0x5c0   : > { %7979 = vmatmul.msk.bf16.vlgmr.msra.gmra.mxu2 %vm2365_vm15, %v2341_v28  ;;  %v2529_v28 = vpack.c.b16 %v2523_v44, %v2522_v20  ;;  %v2343_v27 = vpack.c.b16 %v10174_v32, %v10181_v4  ;;  %v3291_v4 = vunpack.c.l.b16 %v2301_v39 }
 0x5c1   : > { %7987 = vmatmul.msk.bf16.vlgmr.msra.gmra.mxu3 %vm2365_vm15, %v2528_v23  ;;  %v10132_v24 = vpop.f32.mrf.mxu2  ;;  %v2618_v23 = vunpack.c.l.b16 %v1770_v38  ;;  %v10192_v38 = vunpack.c.l.b16 %v1755_v57 }
 0x5c2   : > { %v10136_v16 = vpop.f32.mrf.mxu3 }
 0x5c3   : > { %v10140_v19 = vpop.f32.mrf.mxu1  ;;  %v2623_v5 = vpack.c.b16 %v2618_v23, %v2617_v31  ;;  %v2320_v31 = vpack.c.bf16 %v10104_v25, %v10104_v25 }
 0x5c4   : > { %v10142_v6 = vpop.f32.mrf.mxu0  ;;  %v2306_v20 = vpack.c.bf16 %v10140_v19, %v10140_v19  ;;  %v2318_v19 = vpack.c.bf16 %v10050_v0, %v10050_v0 }
 0x5c5   : > { %v2322_v63 = vpack.c.bf16 %v10142_v6, %v10142_v6  ;;  %v2303_v6 = vpack.c.bf16 %v10073_v33, %v10073_v33 }
 0x5c7   : > { %v3466_v13 = vunpack.c.l.b16 %v2322_v63  ;;  %v3293_v63 = vunpack.c.l.b16 %v2303_v6 }
 0x5c9   : > { %v10152_v48 = vpop.f32.mrf.mxu2 }
 0x5ca   : > { %v10156_v45 = vpop.f32.mrf.mxu3  ;;  %7984 = vmatmul.msk.bf16.gmra.mxu1 %vm2365_vm15, %v2436_v22  ;;  %v2437_v22 = vpack.c.b16 %v2432_v47, %v2431_v43  ;;  %v3296_v43 = vunpack.c.l.b16 %v2306_v20  ;;  %v2298_v33 = vpack.c.bf16 %v10152_v48, %v10152_v48  ;;  %v3464_v20 = vunpack.c.l.b16 %v2320_v31 }
 0x5cb   : > { %7992 = vmatmul.msk.bf16.gmra.mxu0 %vm2365_vm15, %v2622_v15  ;;  %v2182_v51 = vpop.f32.mrf.mxu1  ;;  %v2314_v59 = vpack.c.bf16 %v10156_v45, %v10156_v45  ;;  %v2313_v48 = vpack.c.bf16 %v10136_v16, %v10136_v16  ;;  %v3292_v16 = vunpack.c.l.b16 %v2302_v18 }
 0x5cc   : > { %v2288_v11 = vpop.f32.mrf.mxu0  ;;  %v2307_v52 = vpack.c.bf16 %v2182_v51, %v2182_v51  ;;  %v3211_v45 = vunpack.c.l.b16 %v2298_v33 }
 0x5cd   : > { %v2323_v44 = vpack.c.bf16 %v2288_v11, %v2288_v11 }
 0x5ce   : > { %v3297_v21 = vunpack.c.l.b16 %v2307_v52 }
 0x5d0   : > { %7980 = vmatmul.msk.bf16.gmra.mxu2 %vm2365_vm15, %v2342_v61  ;;  %v3467_v61 = vunpack.c.l.b16 %v2323_v44 }
 0x5d1   : > { %7988 = vmatmul.msk.bf16.gmra.mxu3 %vm2365_vm15, %v2529_v28  ;;  %v2129_v42 = vpop.f32.mrf.mxu2  ;;  %v2321_v28 = vpack.c.bf16 %v10124_v58, %v10124_v58  ;;  %v3294_v58 = vunpack.c.l.b16 %v2304_v50  ;;  %v2317_v50 = vpack.c.bf16 %v10024_v7, %v10024_v7 }
 0x5d2   : > { %v2235_v15 = vpop.f32.mrf.mxu3  ;;  %v2299_v3 = vpack.c.bf16 %v2129_v42, %v2129_v42  ;;  %v3295_v42 = vunpack.c.l.b16 %v2305_v41  ;;  %v2312_v41 = vpack.c.bf16 %v10118_v12, %v10118_v12  ;;  %v3462_v12 = vunpack.c.l.b16 %v2318_v19 }
 0x5d3   : > { %v2184_v60 = vpop.f32.mrf.mxu1  ;;  %v2315_v1 = vpack.c.bf16 %v2235_v15, %v2235_v15  ;;  %v3465_v15 = vunpack.c.l.b16 %v2321_v28  ;;  %v3300_v7 = vpack.c.b16 %v3294_v58, %v3293_v63  ;;  %v2311_v28 = vpack.c.bf16 %v10096_v9, %v10096_v9 }
 0x5d4   : > { %v2308_v34 = vpack.c.bf16 %v2184_v60, %v2184_v60  ;;  %v2290_v51 = vpop.f32.mrf.mxu0  ;;  %v3212_v44 = vunpack.c.l.b16 %v2299_v3  ;;  %v2297_v60 = vpack.c.bf16 %v10132_v24, %v10132_v24  ;;  %v3463_v24 = vunpack.c.l.b16 %v2319_v46  ;;  %v12363_v46 = vld [vmem:[#allocation43_spill] sm:$0xff] }
 0x5d5   : > { %v2324_v11 = vpack.c.bf16 %v2290_v51, %v2290_v51  ;;  %v3301_v51 = vpack.c.b16 %v3296_v43, %v3295_v42  ;;  %v3380_v3 = vunpack.c.l.b16 %v2313_v48  ;;  %v3461_v36 = vunpack.c.l.b16 %v2317_v50 }
 0x5d6   : > { %v3298_v26 = vunpack.c.l.b16 %v2308_v34  ;;  %v3470_v32 = vpack.c.b16 %v3464_v20, %v3463_v24  ;;  %v3379_v18 = vunpack.c.l.b16 %v2312_v41  ;;  %v2620_v19 = vunpack.c.l.b16 %v1772_v56  ;;  %v12362_v56 = vld [vmem:[#allocation48_spill] sm:$0xff] }
 0x5d7   : > { %v3468_v47 = vunpack.c.l.b16 %v2324_v11  ;;  %v2309_v43 = vpack.c.bf16 %v10042_v30, %v10042_v30  ;;  %v1747_v31 = vpack.c.bf16 %v12363_v46, %v12363_v46 }
 0x5d8   : > { %v3302_v23 = vpack.c.b16 %v3298_v26, %v3297_v21  ;;  %v2296_v21 = vpack.c.bf16 %v10115_v55, %v10115_v55  ;;  %v2295_v55 = vpack.c.bf16 %v10091_v35, %v10091_v35  ;;  %v2294_v35 = vpack.c.bf16 %v10067_v8, %v10067_v8 }
 0x5d9   : > { %v3472_v57 = vpack.c.b16 %v3468_v47, %v3467_v61  ;;  %v2131_v40 = vpop.f32.mrf.mxu2  ;;  %v3381_v61 = vunpack.c.l.b16 %v2314_v59  ;;  %v3210_v47 = vunpack.c.l.b16 %v2297_v60  ;;  %v3299_v8 = vpack.c.b16 %v3292_v16, %v3291_v4 }
 0x5da   : > { %v2300_v0 = vpack.c.bf16 %v2131_v40, %v2131_v40  ;;  %v2237_v14 = vpop.f32.mrf.mxu3  ;;  %7985 = vmatmul.msk.bf16.gmra.mxu1 %vm2365_vm15, %v2437_v22  ;;  %v3382_v22 = vunpack.c.l.b16 %v2315_v1  ;;  %v3208_v39 = vunpack.c.l.b16 %v2295_v55  ;;  %v3469_v1 = vpack.c.b16 %v3462_v12, %v3461_v36 }
 0x5db   : > { %v2316_v52 = vpack.c.bf16 %v2237_v14, %v2237_v14  ;;  %7993 = vmatmul.msk.bf16.gmra.mxu0 %vm2365_vm15, %v2623_v5  ;;  %3323 = vmatpush.bf16.msrb.mxu1 %v3302_v23  ;;  %v3471_v5 = vpack.c.b16 %v3466_v13, %v3465_v15  ;;  %v3216_v37 = vpack.c.b16 %v3211_v45, %v3210_v47  ;;  %v12361_v23 = vld [vmem:[#allocation47_spill] sm:$0xff]  ;;  %v3207_v29 = vunpack.c.l.b16 %v2294_v35  ;;  %v12364_v14 = vld [vmem:[#allocation44_spill] sm:$0xff] }
 0x5dc   : > { %v3213_v25 = vunpack.c.l.b16 %v2300_v0  ;;  %3493 = vmatpush.bf16.msra.mxu0 %v3472_v57  ;;  %v3386_v9 = vpack.c.b16 %v3381_v61, %v3380_v3  ;;  %v1748_v6 = vpack.c.bf16 %v12361_v23, %v12361_v23  ;;  %v1764_v57 = vpack.c.bf16 %v12362_v56, %v12362_v56 }
 0x5dd   : > { %v3383_v34 = vunpack.c.l.b16 %v2316_v52  ;;  %v2438_v13 = vpack.c.b16 %v10198_v17, %v10192_v38  ;;  %v1763_v58 = vpack.c.bf16 %v12364_v14, %v12364_v14  ;;  %v2624_v53 = vpack.c.b16 %v2620_v19, %v2619_v49 }
 0x5de   : > { %v3217_v11 = vpack.c.b16 %v3213_v25, %v3212_v44  ;;  %v2340_v42 = vunpack.c.l.b16 %v1748_v6  ;;  %v3376_v33 = vunpack.c.l.b16 %v2309_v43  ;;  %v2527_v52 = vunpack.c.l.b16 %v1764_v57 }
 0x5df   : > { %v3387_v26 = vpack.c.b16 %v3383_v34, %v3382_v22  ;;  %3324 = vmatpush.bf16.msrb.mxu1 %v3301_v51  ;;  %v3214_v15 = vpack.c.b16 %v3207_v29, %v3206_v62  ;;  %v2339_v59 = vunpack.c.l.b16 %v1747_v31  ;;  %v2526_v17 = vunpack.c.l.b16 %v1763_v58 }
 0x5e0   : > { %3494 = vmatpush.bf16.msra.mxu0 %v3471_v5  ;;  %7981 = vmatmul.msk.bf16.gmra.mxu2 %vm2365_vm15, %v2343_v27  ;;  %v3209_v27 = vunpack.c.l.b16 %v2296_v21 }
 0x5e1   : > { %7989 = vmatmul.msk.bf16.gmra.mxu3 %vm2365_vm15, %v2530_v2  ;;  %3238 = vmatpush.bf16.msrb.mxu2 %v3217_v11  ;;  %v2310_v2 = vpack.c.bf16 %v10070_v54, %v10070_v54  ;;  %v3378_v54 = vunpack.c.l.b16 %v2311_v28  ;;  %v2344_v44 = vpack.c.b16 %v2340_v42, %v2339_v59  ;;  %v2531_v25 = vpack.c.b16 %v2527_v52, %v2526_v17 }
 0x5e2   : > { %3408 = vmatpush.bf16.msrb.mxu3 %v3387_v26  ;;  %v3215_v40 = vpack.c.b16 %v3209_v27, %v3208_v39 }
 0x5e3   : > { %3325 = vmatpush.bf16.msrb.mxu1 %v3300_v7  ;;  %v3377_v30 = vunpack.c.l.b16 %v2310_v2  ;;  %v3385_v0 = vpack.c.b16 %v3379_v18, %v3378_v54 }
 0x5e4   : > { %3495 = vmatpush.bf16.msra.mxu0 %v3470_v32 }
 0x5e5   : > { %3239 = vmatpush.bf16.msrb.mxu2 %v3216_v37  ;;  %v3384_v38 = vpack.c.b16 %v3377_v30, %v3376_v33 }
 0x5e6   : > { %3409 = vmatpush.bf16.msrb.mxu3 %v3386_v9 }
 0x5e7   : > { %3326 = vmatpush.bf16.msrb.mxu1 %v3299_v8 }
 0x5e8   : > { %3496 = vmatpush.bf16.msra.mxu0 %v3469_v1 }
 0x5e9   : > { %3240 = vmatpush.bf16.msrb.mxu2 %v3215_v40 }
 0x5ea   : > { %3410 = vmatpush.bf16.msrb.mxu3 %v3385_v0  ;;  %7986 = vmatmul.msk.bf16.gmra.mxu1 %vm2365_vm15, %v2438_v13 }
 0x5eb   : > { %7994 = vmatmul.msk.bf16.gmra.mxu0 %vm2365_vm15, %v2624_v53 }
 0x5ed   : > { %3241 = vmatpush.bf16.msrb.mxu2 %v3214_v15 }
 0x5ee   : > { %3411 = vmatpush.bf16.msrb.mxu3 %v3384_v38 }
 0x5f0   : > { %7982 = vmatmul.msk.bf16.gmra.mxu2 %vm2365_vm15, %v2344_v44 }
 0x5f1   : > { %7990 = vmatmul.msk.bf16.gmra.mxu3 %vm2365_vm15, %v2531_v25 }
 0x637   : > { %v10281_v60 = vpop.f32.mrf.mxu1 }
 0x638   : > { %v10283_v22 = vpop.f32.mrf.mxu0  ;;  %v2722_v34 = vsel %vm946_vm0, %v10281_v60, -inf }
 0x639   : > { %v2770_v51 = vsel %vm946_vm0, %v10283_v22, -inf  ;;  %2723 = vmax.xlane.f32.xlu2 %v2722_v34 }
 0x63a   : > { %2771 = vmax.xlane.f32.xlu0 %v2770_v51 }
 0x63f   : > { %v10289_v20 = vpop.f32.mrf.mxu1 }
 0x640   : > { %v10291_v48 = vpop.f32.mrf.mxu0  ;;  %v2725_v11 = vsel %vm946_vm0, %v10289_v20, -inf }
 0x641   : > { %v2773_v5 = vsel %vm946_vm0, %v10291_v48, -inf }
 0x642   : > { %2774 = vmax.xlane.f32.xlu1 %v2773_v5  ;;  %2726 = vmax.xlane.f32.xlu0 %v2725_v11 }
 0x643   : > { %v10297_v63 = vpop.f32.mrf.mxu2 }
 0x644   : > { %v10299_v21 = vpop.f32.mrf.mxu3  ;;  %v2698_v24 = vsel %vm946_vm0, %v10297_v63, -inf }
 0x645   : > { %v2746_v50 = vsel %vm946_vm0, %v10299_v21, -inf }
 0x647   : > { %v10301_v45 = vpop.f32.mrf.mxu1 }
 0x648   : > { %v10303_v26 = vpop.f32.mrf.mxu0  ;;  %v2728_v12 = vsel %vm946_vm0, %v10301_v45, -inf }
 0x649   : > { %v2776_v6 = vsel %vm946_vm0, %v10303_v26, -inf }
 0x64a   : > { %2747 = vmax.xlane.f32.xlu0 %v2746_v50  ;;  %2699 = vmax.xlane.f32.xlu1 %v2698_v24 }
 0x64b   : > { %v10309_v41 = vpop.f32.mrf.mxu2 }
 0x64c   : > { %v10311_v61 = vpop.f32.mrf.mxu3  ;;  %v2701_v16 = vsel %vm946_vm0, %v10309_v41, -inf }
 0x64d   : > { %2702 = vmax.xlane.f32.xlu2 %v2701_v16  ;;  %v2749_v4 = vsel %vm946_vm0, %v10311_v61, -inf }
 0x64f   : > { %v10317_v47 = vpop.f32.mrf.mxu1 }
 0x650   : > { %v10315_v55 = vpop.f32.mrf.mxu0  ;;  %v2731_v32 = vsel %vm946_vm0, %v10317_v47, -inf }
 0x651   : > { %v2779_v7 = vsel %vm946_vm0, %v10315_v55, -inf }
 0x652   : > { %2780 = vmax.xlane.f32.xlu0 %v2779_v7  ;;  %2729 = vmax.xlane.f32.xlu1 %v2728_v12 }
 0x653   : > { %v10323_v28 = vpop.f32.mrf.mxu2 }
 0x654   : > { %v10325_v3 = vpop.f32.mrf.mxu3  ;;  %v2704_v2 = vsel %vm946_vm0, %v10323_v28, -inf }
 0x655   : > { %2732 = vmax.xlane.f32.xlu2 %v2731_v32  ;;  %v2752_v37 = vsel %vm946_vm0, %v10325_v3, -inf }
 0x657   : > { %v10351_v8 = vpop.f32.mrf.mxu1 }
 0x658   : > { %v2734_v43 = vsel %vm946_vm0, %v10351_v8, -inf  ;;  %v10359_v54 = vpop.f32.mrf.mxu0 }
 0x659   : > { %v2782_v58 = vsel %vm946_vm0, %v10359_v54, -inf }
 0x65a   : > { %2750 = vmax.xlane.f32.xlu1 %v2749_v4 }
 0x65b   : > { %v10331_v35 = vpop.f32.mrf.mxu2 }
 0x65c   : > { %v10333_v27 = vpop.f32.mrf.mxu3  ;;  %v2707_v9 = vsel %vm946_vm0, %v10331_v35, -inf }
 0x65d   : > { %v2755_v36 = vsel %vm946_vm0, %v10333_v27, -inf  ;;  %2753 = vmax.xlane.f32.xlu2 %v2752_v37 }
 0x65e   : > { %2756 = vmax.xlane.f32.xlu0 %v2755_v36 }
 0x65f   : > { %v10369_v29 = vpop.f32.mrf.mxu1 }
 0x660   : > { %v10371_v40 = vpop.f32.mrf.mxu0  ;;  %v2737_v46 = vsel %vm946_vm0, %v10369_v29, -inf }
 0x661   : > { %v2785_v30 = vsel %vm946_vm0, %v10371_v40, -inf }
 0x662   : > { %2705 = vmax.xlane.f32.xlu1 %v2704_v2 }
 0x663   : > { %v10341_v18 = vpop.f32.mrf.mxu2 }
 0x664   : > { %v2710_v19 = vsel %vm946_vm0, %v10341_v18, -inf  ;;  %v10347_v10 = vpop.f32.mrf.mxu3 }
 0x665   : > { %2708 = vmax.xlane.f32.xlu2 %v2707_v9  ;;  %v2758_v39 = vsel %vm946_vm0, %v10347_v10, -inf }
 0x666   : > { %2711 = vmax.xlane.f32.xlu0 %v2710_v19 }
 0x667   : > { %v10383_v14 = vpop.f32.mrf.mxu1 }
 0x668   : > { %v10393_v33 = vpop.f32.mrf.mxu0  ;;  %v2740_v59 = vsel %vm946_vm0, %v10383_v14, -inf }
 0x669   : > { %v2788_v44 = vsel %vm946_vm0, %v10393_v33, -inf }
 0x66a   : > { %2759 = vmax.xlane.f32.xlu1 %v2758_v39 }
 0x66b   : > { %v10353_v23 = vpop.f32.mrf.mxu2 }
 0x66c   : > { %v10361_v1 = vpop.f32.mrf.mxu3  ;;  %v2713_v49 = vsel %vm946_vm0, %v10353_v23, -inf }
 0x66d   : > { %2777 = vmax.xlane.f32.xlu2 %v2776_v6  ;;  %v2761_v57 = vsel %vm946_vm0, %v10361_v1, -inf }
 0x66e   : > { %2735 = vmax.xlane.f32.xlu0 %v2734_v43 }
 0x66f   : > { %v10395_v52 = vpop.f32.mrf.mxu1 }
 0x670   : > { %v2743_v38 = vsel %vm946_vm0, %v10395_v52, -inf  ;;  %v10403_v17 = vpop.f32.mrf.mxu0 }
 0x671   : > { %v2791_v25 = vsel %vm946_vm0, %v10403_v17, -inf }
 0x672   : > { %2714 = vmax.xlane.f32.xlu1 %v2713_v49 }
 0x673   : > { %v10365_v56 = vpop.f32.mrf.mxu2 }
 0x674   : > { %v10377_v13 = vpop.f32.mrf.mxu3  ;;  %v2716_v53 = vsel %vm946_vm0, %v10365_v56, -inf }
 0x675   : > { %2762 = vmax.xlane.f32.xlu2 %v2761_v57  ;;  %v2764_v62 = vsel %vm946_vm0, %v10377_v13, -inf }
 0x67a   : > { %2738 = vmax.xlane.f32.xlu1 %v2737_v46 }
 0x67b   : > { %v10375_v31 = vpop.f32.mrf.mxu2 }
 0x67c   : > { %v2719_v0 = vsel %vm946_vm0, %v10375_v31, -inf  ;;  %v10391_v42 = vpop.f32.mrf.mxu3 }
 0x67d   : > { %2786 = vmax.xlane.f32.xlu2 %v2785_v30  ;;  %2720 = vmax.xlane.f32.xlu0 %v2719_v0  ;;  %v2767_v15 = vsel %vm946_vm0, %v10391_v42, -inf }
 0x682   : > { %2783 = vmax.xlane.f32.xlu1 %v2782_v58 }
 0x685   : > { %2717 = vmax.xlane.f32.xlu2 %v2716_v53  ;;  %2765 = vmax.xlane.f32.xlu0 %v2764_v62 }
 0x68a   : > { %2768 = vmax.xlane.f32.xlu1 %v2767_v15 }
 0x68d   : > { %2741 = vmax.xlane.f32.xlu2 %v2740_v59  ;;  %2744 = vmax.xlane.f32.xlu0 %v2743_v38 }
 0x692   : > { %2789 = vmax.xlane.f32.xlu1 %v2788_v44 }
 0x695   : > { %2792 = vmax.xlane.f32.xlu2 %v2791_v25 }
 0x6ac   : > { %v10409_v34 = vpop.xlane.xlu2 %2723 }
 0x6ad   : > { %v10411_v51 = vpop.xlane.xlu0 %2771  ;;  %v2898_v11 = vsub.f32 %v10281_v60, %v10409_v34 }
 0x6ae   : > { %v2914_v5 = vsub.f32 %v10283_v22, %v10411_v51 }
 0x6af   : > { %v2938_v50 = vmul.f32 1.442695, %v2898_v11 }
 0x6b0   : > { %v2970_v24 = vmul.f32 1.442695, %v2914_v5 }
 0x6b1   : > { %8767 = vpow2.f32 %v2938_v50 }
 0x6b2   : > { %8769 = vpow2.f32 %v2970_v24 }
 0x6b5   : > { %v10417_v16 = vpop.xlane.xlu1 %2774  ;;  %v10419_v7 = vpop.xlane.xlu0 %2726 }
 0x6b6   : > { %v2915_v12 = vsub.f32 %v10291_v48, %v10417_v16  ;;  %v2899_v32 = vsub.f32 %v10289_v20, %v10419_v7 }
 0x6b7   : > { %v8768_v4 = vpop.eup %8767 }
 0x6b8   : > { %v8770_v37 = vpop.eup %8769  ;;  %v2972_v60 = vmul.f32 1.442695, %v2915_v12  ;;  %v2940_v36 = vmul.f32 1.442695, %v2899_v32  ;;  %v3042_v22 = vsel %vm946_vm0, %v8768_v4, 0.0  ;;  %v3154_v43 = vpack.c.bf16 %v8768_v4, %v8768_v4 }
 0x6b9   : > { %v3090_v2 = vsel %vm946_vm0, %v8770_v37, 0.0  ;;  %3043 = vadd.xlane.f32.xlu1 %v3042_v22  ;;  %v3170_v39 = vpack.c.bf16 %v8770_v37, %v8770_v37 }
 0x6ba   : > { %8771 = vpow2.f32 %v2972_v60  ;;  %3091 = vadd.xlane.f32.xlu0 %v3090_v2  ;;  %v3271_v38 = vunpack.c.l.b16 %v3154_v43 }
 0x6bb   : > { %8773 = vpow2.f32 %v2940_v36  ;;  %v3441_v15 = vunpack.c.l.b16 %v3170_v39 }
 0x6bd   : > { %v10427_v9 = vpop.xlane.xlu0 %2747  ;;  %v10429_v19 = vpop.xlane.xlu1 %2699 }
 0x6be   : > { %v2906_v48 = vsub.f32 %v10299_v21, %v10427_v9  ;;  %v2890_v20 = vsub.f32 %v10297_v63, %v10429_v19 }
 0x6c0   : > { %v8772_v6 = vpop.eup %8771  ;;  %v2954_v49 = vmul.f32 1.442695, %v2906_v48  ;;  %v10435_v57 = vpop.xlane.xlu2 %2702  ;;  %v2922_v0 = vmul.f32 1.442695, %v2890_v20 }
 0x6c1   : > { %v8774_v46 = vpop.eup %8773  ;;  %v3171_v30 = vpack.c.bf16 %v8772_v6, %v8772_v6  ;;  %v2891_v58 = vsub.f32 %v10309_v41, %v10435_v57  ;;  %v3093_v62 = vsel %vm946_vm0, %v8772_v6, 0.0 }
 0x6c2   : > { %v3155_v53 = vpack.c.bf16 %v8774_v46, %v8774_v46  ;;  %8775 = vpow2.f32 %v2954_v49  ;;  %v3045_v21 = vsel %vm946_vm0, %v8774_v46, 0.0  ;;  %3094 = vadd.xlane.f32.xlu1 %v3093_v62 }
 0x6c3   : > { %v3442_v63 = vunpack.c.l.b16 %v3171_v30  ;;  %8777 = vpow2.f32 %v2922_v0  ;;  %v2924_v59 = vmul.f32 1.442695, %v2891_v58  ;;  %3046 = vadd.xlane.f32.xlu2 %v3045_v21 }
 0x6c4   : > { %v3272_v44 = vunpack.c.l.b16 %v3155_v53 }
 0x6c5   : > { %v3449_v25 = vpack.c.b16 %v3442_v63, %v3441_v15  ;;  %8779 = vpow2.f32 %v2924_v59  ;;  %v10441_v11 = vpop.xlane.xlu1 %2729  ;;  %v10449_v32 = vpop.xlane.xlu0 %2780 }
 0x6c6   : > { %v3279_v5 = vpack.c.b16 %v3272_v44, %v3271_v38  ;;  %v2900_v41 = vsub.f32 %v10301_v45, %v10441_v11 }
 0x6c7   : > { %8007 = vmatmul.msk.bf16.vlgmr.msra.gmra.mxu0 %vm946_vm0, %v3449_v25 }
 0x6c8   : > { %v8776_v50 = vpop.eup %8775  ;;  %7999 = vmatmul.msk.bf16.vlgmr.msrb.gmra.mxu1 %vm946_vm0, %v3279_v5  ;;  %v10447_v24 = vpop.xlane.xlu2 %2732  ;;  %v2942_v4 = vmul.f32 1.442695, %v2900_v41 }
 0x6c9   : > { %v8778_v12 = vpop.eup %8777  ;;  %v2901_v37 = vsub.f32 %v10317_v47, %v10447_v24  ;;  %v3066_v36 = vsel %vm946_vm0, %v8776_v50, 0.0  ;;  %v3162_v41 = vpack.c.bf16 %v8776_v50, %v8776_v50  ;;  %v2917_v50 = vsub.f32 %v10315_v55, %v10449_v32 }
 0x6ca   : > { %v3146_v60 = vpack.c.bf16 %v8778_v12, %v8778_v12  ;;  %v3018_v22 = vsel %vm946_vm0, %v8778_v12, 0.0  ;;  %8781 = vpow2.f32 %v2942_v4 }
 0x6cb   : > { %v8780_v45 = vpop.eup %8779  ;;  %v2944_v2 = vmul.f32 1.442695, %v2901_v37  ;;  %3067 = vadd.xlane.f32.xlu2 %v3066_v36  ;;  %3019 = vadd.xlane.f32.xlu0 %v3018_v22 }
 0x6cc   : > { %v3147_v48 = vpack.c.bf16 %v8780_v45, %v8780_v45  ;;  %v3021_v20 = vsel %vm946_vm0, %v8780_v45, 0.0  ;;  %v3186_v6 = vunpack.c.l.b16 %v3146_v60 }
 0x6cd   : > { %8783 = vpow2.f32 %v2944_v2  ;;  %v10456_v39 = vpop.xlane.xlu1 %2750  ;;  %3022 = vadd.xlane.f32.xlu1 %v3021_v20 }
 0x6ce   : > { %v3187_v43 = vunpack.c.l.b16 %v3147_v48  ;;  %v2907_v47 = vsub.f32 %v10311_v61, %v10456_v39  ;;  %v3356_v48 = vunpack.c.l.b16 %v3162_v41 }
 0x6d0   : > { %v3194_v49 = vpack.c.b16 %v3187_v43, %v3186_v6  ;;  %v2956_v46 = vmul.f32 1.442695, %v2907_v47  ;;  %v10460_v30 = vpop.xlane.xlu2 %2753  ;;  %v8782_v0 = vpop.eup %8781 }
 0x6d1   : > { %v10462_v58 = vpop.xlane.xlu0 %2756  ;;  %v2908_v53 = vsub.f32 %v10325_v3, %v10460_v30  ;;  %v3048_v62 = vsel %vm946_vm0, %v8782_v0, 0.0  ;;  %v3156_v63 = vpack.c.bf16 %v8782_v0, %v8782_v0 }
 0x6d2   : > { %8785 = vpow2.f32 %v2956_v46  ;;  %7995 = vmatmul.msk.bf16.vlgmr.msrb.gmra.mxu2 %vm946_vm0, %v3194_v49  ;;  %v2909_v61 = vsub.f32 %v10333_v27, %v10462_v58  ;;  %v2976_v49 = vmul.f32 1.442695, %v2917_v50 }
 0x6d3   : > { %v8784_v21 = vpop.eup %8783  ;;  %v2958_v15 = vmul.f32 1.442695, %v2908_v53  ;;  %3049 = vadd.xlane.f32.xlu0 %v3048_v62  ;;  %v3273_v25 = vunpack.c.l.b16 %v3156_v63 }
 0x6d4   : > { %v3051_v59 = vsel %vm946_vm0, %v8784_v21, 0.0  ;;  %v3157_v38 = vpack.c.bf16 %v8784_v21, %v8784_v21  ;;  %v2960_v4 = vmul.f32 1.442695, %v2909_v61 }
 0x6d5   : > { %8787 = vpow2.f32 %v2958_v15  ;;  %v10471_v44 = vpop.xlane.xlu1 %2705  ;;  %3052 = vadd.xlane.f32.xlu1 %v3051_v59 }
 0x6d6   : > { %v2892_v3 = vsub.f32 %v10323_v28, %v10471_v44  ;;  %v3274_v5 = vunpack.c.l.b16 %v3157_v38 }
 0x6d8   : > { %v8786_v12 = vpop.eup %8785  ;;  %v2926_v37 = vmul.f32 1.442695, %v2892_v3  ;;  %v10475_v60 = vpop.xlane.xlu2 %2708  ;;  %v3280_v36 = vpack.c.b16 %v3274_v5, %v3273_v25 }
 0x6d9   : > { %v3163_v27 = vpack.c.bf16 %v8786_v12, %v8786_v12  ;;  %v2893_v22 = vsub.f32 %v10331_v35, %v10475_v60  ;;  %v3069_v45 = vsel %vm946_vm0, %v8786_v12, 0.0  ;;  %v10480_v2 = vpop.xlane.xlu0 %2711 }
 0x6da   : > { %8789 = vpow2.f32 %v2926_v37  ;;  %8000 = vmatmul.msk.bf16.gmra.mxu1 %vm946_vm0, %v3280_v36  ;;  %v2894_v62 = vsub.f32 %v10341_v18, %v10480_v2 }
 0x6db   : > { %v8788_v28 = vpop.eup %8787  ;;  %v3357_v20 = vunpack.c.l.b16 %v3163_v27  ;;  %v2928_v6 = vmul.f32 1.442695, %v2893_v22  ;;  %3070 = vadd.xlane.f32.xlu0 %v3069_v45  ;;  %8791 = vpow2.f32 %v2960_v4 }
 0x6dc   : > { %v3072_v43 = vsel %vm946_vm0, %v8788_v28, 0.0  ;;  %v3164_v59 = vpack.c.bf16 %v8788_v28, %v8788_v28  ;;  %v2930_v5 = vmul.f32 1.442695, %v2894_v62 }
 0x6dd   : > { %v3364_v47 = vpack.c.b16 %v3357_v20, %v3356_v48  ;;  %v10486_v35 = vpop.xlane.xlu1 %2759  ;;  %3073 = vadd.xlane.f32.xlu1 %v3072_v43  ;;  %8793 = vpow2.f32 %v2928_v6 }
 0x6de   : > { %8795 = vpow2.f32 %v2976_v49  ;;  %v3358_v22 = vunpack.c.l.b16 %v3164_v59 }
 0x6df   : > { %8003 = vmatmul.msk.bf16.vlgmr.msrb.gmra.mxu3 %vm946_vm0, %v3364_v47 }
 0x6e0   : > { %v10489_v46 = vpop.eup %8789  ;;  %v10491_v0 = vpop.xlane.xlu2 %2777 }
 0x6e1   : > { %v2916_v55 = vsub.f32 %v10303_v26, %v10491_v0  ;;  %v10495_v53 = vpop.eup %8791  ;;  %v3148_v15 = vpack.c.bf16 %v10489_v46, %v10489_v46  ;;  %v10501_v61 = vpop.xlane.xlu0 %2735  ;;  %v2910_v26 = vsub.f32 %v10347_v10, %v10486_v35 }
 0x6e2   : > { %v3165_v38 = vpack.c.bf16 %v10495_v53, %v10495_v53  ;;  %v2902_v12 = vsub.f32 %v10351_v8, %v10501_v61 }
 0x6e3   : > { %v2974_v21 = vmul.f32 1.442695, %v2916_v55  ;;  %v8794_v63 = vpop.eup %8793  ;;  %v3188_v4 = vunpack.c.l.b16 %v3148_v15  ;;  %v2962_v45 = vmul.f32 1.442695, %v2910_v26 }
 0x6e4   : > { %v3149_v3 = vpack.c.bf16 %v8794_v63, %v8794_v63  ;;  %v3027_v18 = vsel %vm946_vm0, %v8794_v63, 0.0  ;;  %v8796_v10 = vpop.eup %8795  ;;  %v3359_v50 = vunpack.c.l.b16 %v3165_v38  ;;  %v2946_v20 = vmul.f32 1.442695, %v2902_v12 }
 0x6e5   : > { %v10507_v25 = vpop.xlane.xlu1 %2714  ;;  %8797 = vpow2.f32 %v2974_v21  ;;  %3028 = vadd.xlane.f32.xlu0 %v3027_v18  ;;  %v3099_v6 = vsel %vm946_vm0, %v8796_v10, 0.0  ;;  %v3173_v43 = vpack.c.bf16 %v8796_v10, %v8796_v10 }
 0x6e6   : > { %v2895_v41 = vsub.f32 %v10353_v23, %v10507_v25  ;;  %v3189_v37 = vunpack.c.l.b16 %v3149_v3  ;;  %8799 = vpow2.f32 %v2930_v5  ;;  %v3365_v62 = vpack.c.b16 %v3359_v50, %v3358_v22 }
 0x6e7   : > { %v3444_v3 = vunpack.c.l.b16 %v3173_v43 }
 0x6e8   : > { %v2932_v36 = vmul.f32 1.442695, %v2895_v41  ;;  %v10514_v27 = vpop.xlane.xlu2 %2762  ;;  %v3195_v48 = vpack.c.b16 %v3189_v37, %v3188_v4 }
 0x6e9   : > { %v2911_v28 = vsub.f32 %v10361_v1, %v10514_v27 }
 0x6ea   : > { %8801 = vpow2.f32 %v2932_v36  ;;  %7996 = vmatmul.msk.bf16.gmra.mxu2 %vm946_vm0, %v3195_v48 }
 0x6eb   : > { %v2964_v23 = vmul.f32 1.442695, %v2911_v28  ;;  %v8798_v8 = vpop.eup %8797  ;;  %8803 = vpow2.f32 %v2962_v45 }
 0x6ec   : > { %v3172_v47 = vpack.c.bf16 %v8798_v8, %v8798_v8  ;;  %v3096_v55 = vsel %vm946_vm0, %v8798_v8, 0.0  ;;  %v10526_v15 = vpop.eup %8799 }
 0x6ed   : > { %v10520_v49 = vpop.xlane.xlu1 %2738  ;;  %8805 = vpow2.f32 %v2964_v23  ;;  %3097 = vadd.xlane.f32.xlu2 %v3096_v55  ;;  %3100 = vadd.xlane.f32.xlu0 %v3099_v6  ;;  %v3150_v4 = vpack.c.bf16 %v10526_v15, %v10526_v15 }
 0x6ee   : > { %v2903_v1 = vsub.f32 %v10369_v29, %v10520_v49  ;;  %8807 = vpow2.f32 %v2946_v20  ;;  %v3443_v21 = vunpack.c.l.b16 %v3172_v47 }
 0x6ef   : > { %8004 = vmatmul.msk.bf16.gmra.mxu3 %vm946_vm0, %v3365_v62  ;;  %v3190_v20 = vunpack.c.l.b16 %v3150_v4 }
 0x6f0   : > { %v2948_v63 = vmul.f32 1.442695, %v2903_v1  ;;  %v10528_v59 = vpop.xlane.xlu2 %2786  ;;  %v10530_v38 = vpop.xlane.xlu0 %2720  ;;  %v3450_v41 = vpack.c.b16 %v3444_v3, %v3443_v21 }
 0x6f1   : > { %v10532_v26 = vpop.eup %8801  ;;  %v2919_v18 = vsub.f32 %v10371_v40, %v10528_v59  ;;  %v2897_v5 = vsub.f32 %v10375_v31, %v10530_v38  ;;  %v3024_v31 = vsel %vm946_vm0, %v10489_v46, 0.0 }
 0x6f2   : > { %v3151_v29 = vpack.c.bf16 %v10532_v26, %v10532_v26  ;;  %v8804_v12 = vpop.eup %8803  ;;  %8809 = vpow2.f32 %v2948_v63  ;;  %8008 = vmatmul.msk.bf16.gmra.mxu0 %vm946_vm0, %v3450_v41 }
 0x6f3   : > { %v2980_v37 = vmul.f32 1.442695, %v2919_v18  ;;  %v10542_v36 = vpop.eup %8805  ;;  %v2936_v28 = vmul.f32 1.442695, %v2897_v5  ;;  %v3166_v50 = vpack.c.bf16 %v8804_v12, %v8804_v12 }
 0x6f4   : > { %v10545_v22 = vpop.eup %8807  ;;  %v3167_v40 = vpack.c.bf16 %v10542_v36, %v10542_v36  ;;  %v3191_v45 = vunpack.c.l.b16 %v3151_v29 }
 0x6f5   : > { %v10549_v10 = vpop.xlane.xlu1 %2783  ;;  %3025 = vadd.xlane.f32.xlu2 %v3024_v31  ;;  %8811 = vpow2.f32 %v2980_v37  ;;  %v3158_v23 = vpack.c.bf16 %v10545_v22, %v10545_v22  ;;  %v3360_v3 = vunpack.c.l.b16 %v3166_v50 }
 0x6f6   : > { %v2918_v48 = vsub.f32 %v10359_v54, %v10549_v10  ;;  %v3196_v54 = vpack.c.b16 %v3191_v45, %v3190_v20  ;;  %v3361_v62 = vunpack.c.l.b16 %v3167_v40  ;;  %8813 = vpow2.f32 %v2936_v28 }
 0x6f7   : > { %v3275_v29 = vunpack.c.l.b16 %v3158_v23 }
 0x6f8   : > { %v2978_v8 = vmul.f32 1.442695, %v2918_v48  ;;  %v10557_v6 = vpop.xlane.xlu2 %2717  ;;  %v10559_v43 = vpop.xlane.xlu0 %2765  ;;  %v3366_v4 = vpack.c.b16 %v3361_v62, %v3360_v3 }
 0x6f9   : > { %v8810_v47 = vpop.eup %8809  ;;  %v2896_v46 = vsub.f32 %v10365_v56, %v10557_v6  ;;  %v2912_v55 = vsub.f32 %v10377_v13, %v10559_v43  ;;  %v3075_v13 = vsel %vm946_vm0, %v10495_v53, 0.0 }
 0x6fa   : > { %v3159_v1 = vpack.c.bf16 %v8810_v47, %v8810_v47  ;;  %v3057_v21 = vsel %vm946_vm0, %v8810_v47, 0.0  ;;  %8815 = vpow2.f32 %v2978_v8  ;;  %7997 = vmatmul.msk.bf16.gmra.mxu2 %vm946_vm0, %v3196_v54  ;;  %v3078_v47 = vsel %vm946_vm0, %v8804_v12, 0.0 }
 0x6fb   : > { %v2934_v63 = vmul.f32 1.442695, %v2896_v46  ;;  %3058 = vadd.xlane.f32.xlu0 %v3057_v21  ;;  %v2966_v18 = vmul.f32 1.442695, %v2912_v55  ;;  %v10567_v41 = vpop.eup %8811 }
 0x6fc   : > { %v3276_v5 = vunpack.c.l.b16 %v3159_v1  ;;  %v10576_v31 = vpop.eup %8813  ;;  %v3175_v45 = vpack.c.bf16 %v10567_v41, %v10567_v41 }
 0x6fd   : > { %v10569_v56 = vpop.xlane.xlu1 %2768  ;;  %8817 = vpow2.f32 %v2934_v63  ;;  %3076 = vadd.xlane.f32.xlu2 %v3075_v13  ;;  %v3153_v46 = vpack.c.bf16 %v10576_v31, %v10576_v31 }
 0x6fe   : > { %v2913_v37 = vsub.f32 %v10391_v42, %v10569_v56  ;;  %v3281_v40 = vpack.c.b16 %v3276_v5, %v3275_v29  ;;  %8819 = vpow2.f32 %v2966_v18  ;;  %v3446_v21 = vunpack.c.l.b16 %v3175_v45 }
 0x6ff   : > { %8005 = vmatmul.msk.bf16.gmra.mxu3 %vm946_vm0, %v3366_v4  ;;  %v3193_v5 = vunpack.c.l.b16 %v3153_v46 }
 0x700   : > { %v2968_v28 = vmul.f32 1.442695, %v2913_v37  ;;  %8001 = vmatmul.msk.bf16.gmra.mxu1 %vm946_vm0, %v3281_v40  ;;  %v10581_v48 = vpop.xlane.xlu2 %2741  ;;  %v10583_v53 = vpop.xlane.xlu0 %2744 }
 0x701   : > { %v8816_v50 = vpop.eup %8815  ;;  %v2904_v42 = vsub.f32 %v10383_v14, %v10581_v48  ;;  %v2905_v20 = vsub.f32 %v10395_v52, %v10583_v53  ;;  %v3054_v52 = vsel %vm946_vm0, %v10545_v22, 0.0 }
 0x702   : > { %v3174_v23 = vpack.c.bf16 %v8816_v50, %v8816_v50  ;;  %v3102_v8 = vsel %vm946_vm0, %v8816_v50, 0.0  ;;  %8821 = vpow2.f32 %v2968_v28 }
 0x703   : > { %v2950_v55 = vmul.f32 1.442695, %v2904_v42  ;;  %3103 = vadd.xlane.f32.xlu1 %v3102_v8  ;;  %3079 = vadd.xlane.f32.xlu0 %v3078_v47  ;;  %v8818_v54 = vpop.eup %8817  ;;  %v2952_v62 = vmul.f32 1.442695, %v2905_v20 }
 0x704   : > { %v3445_v1 = vunpack.c.l.b16 %v3174_v23  ;;  %v3152_v14 = vpack.c.bf16 %v8818_v54, %v8818_v54  ;;  %v8820_v3 = vpop.eup %8819  ;;  %v3036_v50 = vsel %vm946_vm0, %v8818_v54, 0.0 }
 0x705   : > { %v10593_v63 = vpop.xlane.xlu1 %2789  ;;  %8823 = vpow2.f32 %v2950_v55  ;;  %3055 = vadd.xlane.f32.xlu2 %v3054_v52  ;;  %v3168_v13 = vpack.c.bf16 %v8820_v3, %v8820_v3 }
 0x706   : > { %v2920_v12 = vsub.f32 %v10393_v33, %v10593_v63  ;;  %v3451_v18 = vpack.c.b16 %v3446_v21, %v3445_v1  ;;  %v3192_v29 = vunpack.c.l.b16 %v3152_v14  ;;  %8825 = vpow2.f32 %v2952_v62 }
 0x707   : > { %v3030_v33 = vsel %vm946_vm0, %v10526_v15, 0.0  ;;  %v3362_v23 = vunpack.c.l.b16 %v3168_v13  ;;  %v3081_v21 = vsel %vm946_vm0, %v10542_v36, 0.0  ;;  %v3039_v36 = vsel %vm946_vm0, %v10576_v31, 0.0 }
 0x708   : > { %v2982_v4 = vmul.f32 1.442695, %v2920_v12  ;;  %8009 = vmatmul.msk.bf16.gmra.mxu0 %vm946_vm0, %v3451_v18  ;;  %v10600_v37 = vpop.xlane.xlu2 %2792  ;;  %v8822_v40 = vpop.eup %8821  ;;  %v3197_v45 = vpack.c.b16 %v3193_v5, %v3192_v29  ;;  %v3105_v29 = vsel %vm946_vm0, %v10567_v41, 0.0  ;;  %v2818_v31 = vsub.f32 -inf, %v10411_v51 }
 0x709   : > { %v2921_v22 = vsub.f32 %v10403_v17, %v10600_v37  ;;  %v3169_v28 = vpack.c.bf16 %v8822_v40, %v8822_v40  ;;  %v3033_v17 = vsel %vm946_vm0, %v10532_v26, 0.0  ;;  %v3087_v14 = vsel %vm946_vm0, %v8822_v40, 0.0 }
 0x70a   : > { %8827 = vpow2.f32 %v2982_v4  ;;  %7998 = vmatmul.msk.bf16.gmra.mxu2 %vm946_vm0, %v3197_v45  ;;  %v3084_v40 = vsel %vm946_vm0, %v8820_v3, 0.0  ;;  %v2819_v3 = vsub.f32 -inf, %v10417_v16  ;;  %v8571_v16 = vld [vmem:[%s9375_s24 + $0x10] sm:$0xff] }
 0x70b   : > { %v2984_v42 = vmul.f32 1.442695, %v2921_v22  ;;  %3031 = vadd.xlane.f32.xlu1 %v3030_v33  ;;  %3037 = vadd.xlane.f32.xlu0 %v3036_v50  ;;  %v8824_v20 = vpop.eup %8823  ;;  %v3363_v8 = vunpack.c.l.b16 %v3169_v28  ;;  %v2802_v33 = vsub.f32 -inf, %v10409_v34  ;;  %v2874_v50 = vmul.f32 1.442695, %v2818_v31 }
 0x70c   : > { %v3160_v47 = vpack.c.bf16 %v8824_v20, %v8824_v20  ;;  %v8826_v46 = vpop.eup %8825  ;;  %v3060_v45 = vsel %vm946_vm0, %v8824_v20, 0.0  ;;  %v2803_v20 = vsub.f32 -inf, %v10419_v7  ;;  %v2794_v7 = vsub.f32 -inf, %v10429_v19  ;;  %3833 = vmatpush.bf16.msra.mxu3 %v8571_v16 }
 0x70d   : > { %8829 = vpow2.f32 %v2984_v42  ;;  %3034 = vadd.xlane.f32.xlu2 %v3033_v17  ;;  %v3367_v55 = vpack.c.b16 %v3363_v8, %v3362_v23  ;;  %v3161_v15 = vpack.c.bf16 %v8826_v46, %v8826_v46  ;;  %v3063_v41 = vsel %vm946_vm0, %v8826_v46, 0.0  ;;  %v8570_v17 = vld [vmem:[%s9375_s24 + $0x8] sm:$0xff]  ;;  %v8572_v46 = vld [vmem:[%s9375_s24 + $0x18] sm:$0xff] }
 0x70e   : > { %v3277_v62 = vunpack.c.l.b16 %v3160_v47  ;;  %v2842_v42 = vmul.f32 1.442695, %v2802_v33  ;;  %v2876_v23 = vmul.f32 1.442695, %v2819_v3  ;;  %8831 = vpow2.f32 %v2874_v50  ;;  %v8569_v47 = vld [vmem:[%s9375_s24] sm:$0xff]  ;;  %3766 = vmatpush.bf16.msra.mxu1 %v8570_v17  ;;  %3900 = vmatpush.bf16.msrb.mxu0 %v8572_v46 }
 0x70f   : > { %8006 = vmatmul.msk.bf16.gmra.mxu3 %vm946_vm0, %v3367_v55  ;;  %v3278_v1 = vunpack.c.l.b16 %v3161_v15  ;;  %v2844_v8 = vmul.f32 1.442695, %v2803_v20  ;;  %3699 = vmatpush.bf16.msra.mxu2 %v8569_v47  ;;  %v2805_v19 = vsub.f32 -inf, %v10447_v24  ;;  %v2810_v3 = vsub.f32 -inf, %v10427_v9 }
 0x710   : > { %v8828_v54 = vpop.eup %8827  ;;  %8833 = vpow2.f32 %v2842_v42  ;;  %v2811_v16 = vsub.f32 -inf, %v10456_v39 }
 0x711   : > { %v3176_v52 = vpack.c.bf16 %v8828_v54, %v8828_v54  ;;  %v3282_v12 = vpack.c.b16 %v3278_v1, %v3277_v62  ;;  %v3108_v22 = vsel %vm946_vm0, %v8828_v54, 0.0  ;;  %8835 = vpow2.f32 %v2876_v23 }
 0x712   : > { %8837 = vpow2.f32 %v2844_v8  ;;  %v2804_v1 = vsub.f32 -inf, %v10441_v11  ;;  %v2848_v33 = vmul.f32 1.442695, %v2805_v19 }
 0x713   : > { %3082 = vadd.xlane.f32.xlu1 %v3081_v21  ;;  %3088 = vadd.xlane.f32.xlu0 %v3087_v14  ;;  %v8830_v26 = vpop.eup %8829  ;;  %v3447_v5 = vunpack.c.l.b16 %v3176_v52 }
 0x714   : > { %v3177_v18 = vpack.c.bf16 %v8830_v26, %v8830_v26  ;;  %8002 = vmatmul.msk.bf16.gmra.mxu1 %vm946_vm0, %v3282_v12  ;;  %v3111_v28 = vsel %vm946_vm0, %v8830_v26, 0.0  ;;  %v8832_v34 = vpop.eup %8831 }
 0x715   : > { %3106 = vadd.xlane.f32.xlu2 %v3105_v29  ;;  %v3010_v62 = vmul.f32 0.0, %v8832_v34  ;;  %v2826_v29 = vmul.f32 1.442695, %v2794_v7 }
 0x716   : > { %v3448_v13 = vunpack.c.l.b16 %v3177_v18  ;;  %v8834_v51 = vpop.eup %8833 }
 0x717   : > { %v8836_v54 = vpop.eup %8835  ;;  %v2994_v21 = vmul.f32 0.0, %v8834_v51  ;;  %v2858_v51 = vmul.f32 1.442695, %v2810_v3  ;;  %v2796_v3 = vsub.f32 -inf, %v10471_v44 }
 0x718   : > { %v3452_v4 = vpack.c.b16 %v3448_v13, %v3447_v5  ;;  %v8838_v14 = vpop.eup %8837  ;;  %v2795_v5 = vsub.f32 -inf, %v10435_v57  ;;  %v3011_v13 = vmul.f32 0.0, %v8836_v54 }
 0x71a   : > { %8010 = vmatmul.msk.bf16.gmra.mxu0 %vm946_vm0, %v3452_v4 }
 0x71b   : > { %3109 = vadd.xlane.f32.xlu0 %v3108_v22  ;;  %3040 = vadd.xlane.f32.xlu1 %v3039_v36  ;;  %v2846_v22 = vmul.f32 1.442695, %v2804_v1  ;;  %v2995_v36 = vmul.f32 0.0, %v8838_v14 }
 0x71d   : > { %3085 = vadd.xlane.f32.xlu2 %v3084_v40 }
 0x723   : > { %3061 = vadd.xlane.f32.xlu1 %v3060_v45 }
 0x725   : > { %3064 = vadd.xlane.f32.xlu2 %v3063_v41 }
 0x72b   : > { %3112 = vadd.xlane.f32.xlu1 %v3111_v28  ;;  %v2828_v28 = vmul.f32 1.442695, %v2795_v5 }
 0x72c   : > { %v3044_v55 = vpop.xlane.xlu1 %3043 }
 0x72d   : > { %v3092_v15 = vpop.xlane.xlu0 %3091  ;;  %v3122_v26 = vadd.f32 %v3044_v55, %v2994_v21 }
 0x72e   : > { %v3138_v52 = vadd.f32 %v3092_v15, %v3010_v62 }
 0x730   : > { %8839 = vrcp.f32 %v3138_v52 }
 0x731   : > { %8841 = vrcp.f32 %v3122_v26 }
 0x732   : > { %8843 = vpow2.f32 %v2826_v29 }
 0x733   : > { %8845 = vpow2.f32 %v2846_v22 }
 0x735   : > { %v3095_v18 = vpop.xlane.xlu1 %3094 }
 0x736   : > { %v3047_v4 = vpop.xlane.xlu2 %3046  ;;  %v3139_v40 = vadd.f32 %v3095_v18, %v3011_v13  ;;  %v8840_v57 = vpop.eup %8839 }
 0x737   : > { %v3123_v11 = vadd.f32 %v3047_v4, %v2995_v36  ;;  %v8842_v20 = vpop.eup %8841  ;;  %v2860_v4 = vmul.f32 1.442695, %v2811_v16 }
 0x738   : > { %8847 = vrcp.f32 %v3139_v40  ;;  %v8844_v8 = vpop.eup %8843 }
 0x739   : > { %8849 = vrcp.f32 %v3123_v11  ;;  %v8846_v46 = vpop.eup %8845  ;;  %v2986_v54 = vmul.f32 0.0, %v8844_v8  ;;  %v2820_v8 = vsub.f32 -inf, %v10491_v0  ;;  %v2821_v0 = vsub.f32 -inf, %v10449_v32 }
 0x73a   : > { %8851 = vpow2.f32 %v2828_v28  ;;  %v2996_v18 = vmul.f32 0.0, %v8846_v46 }
 0x73b   : > { %8853 = vpow2.f32 %v2848_v33  ;;  %v2880_v32 = vmul.f32 1.442695, %v2821_v0 }
 0x73c   : > { %8855 = vpow2.f32 %v2858_v51  ;;  %v2878_v51 = vmul.f32 1.442695, %v2820_v8 }
 0x73e   : > { %v3020_v12 = vpop.xlane.xlu0 %3019  ;;  %v8848_v34 = vpop.eup %8847 }
 0x73f   : > { %v3114_v26 = vadd.f32 %v3020_v12, %v2986_v54  ;;  %v2812_v12 = vsub.f32 -inf, %v10460_v30 }
 0x740   : > { %v3023_v42 = vpop.xlane.xlu1 %3022 }
 0x741   : > { %8857 = vrcp.f32 %v3114_v26 }
 0x742   : > { %8859 = vpow2.f32 %v2860_v4 }
 0x744   : > { %v3498_v45 = vpop.f32.mrf.mxu0 }
 0x745   : > { %v3328_v41 = vpop.f32.mrf.mxu1  ;;  %v3542_v31 = vadd.f32 %v3498_v45, %v3010_v62  ;;  %v8850_v62 = vpop.eup %8849 }
 0x746   : > { %v3526_v50 = vadd.f32 %v3328_v41, %v2994_v21  ;;  %v3050_v24 = vpop.xlane.xlu0 %3049  ;;  %v8852_v21 = vpop.eup %8851 }
 0x747   : > { %v3606_v23 = vmul.f32 %v8840_v57, %v3542_v31  ;;  %v8854_v5 = vpop.eup %8853  ;;  %v3124_v40 = vadd.f32 %v3050_v24, %v2996_v18 }
 0x748   : > { %v3590_v47 = vmul.f32 %v8842_v20, %v3526_v50  ;;  %v2997_v31 = vmul.f32 0.0, %v8854_v5 }
 0x749   : > { %v3638_v9 = vpack.c.bf16 %v3606_v23, %v3606_v23  ;;  %8861 = vrcp.f32 %v3124_v40  ;;  %v8856_v23 = vpop.eup %8855  ;;  %v2814_v40 = vsub.f32 -inf, %v10486_v35 }
 0x74a   : > { %v3622_v14 = vpack.c.bf16 %v3590_v47, %v3590_v47  ;;  %v8858_v30 = vpop.eup %8857  ;;  %v3002_v44 = vmul.f32 0.0, %v8856_v23 }
 0x74b   : > { %v3863_v19 = vunpack.c.l.b16 %v3638_v9  ;;  %v2866_v35 = vmul.f32 1.442695, %v2814_v40 }
 0x74c   : > { %v3500_v17 = vpop.f32.mrf.mxu0  ;;  %v3729_v39 = vunpack.c.l.b16 %v3622_v14 }
 0x74d   : > { %v3330_v55 = vpop.f32.mrf.mxu1  ;;  %v3543_v15 = vadd.f32 %v3500_v17, %v3011_v13  ;;  %v2987_v13 = vmul.f32 0.0, %v8852_v21  ;;  %v2862_v17 = vmul.f32 1.442695, %v2812_v12  ;;  %v2799_v12 = vsub.f32 -inf, %v10507_v25 }
 0x74e   : > { %v3527_v7 = vadd.f32 %v3330_v55, %v2995_v36  ;;  %v3053_v36 = vpop.xlane.xlu1 %3052  ;;  %v3071_v41 = vpop.xlane.xlu0 %3070  ;;  %v2830_v55 = vmul.f32 1.442695, %v2796_v3  ;;  %v2807_v25 = vsub.f32 -inf, %v10520_v49 }
 0x74f   : > { %v3607_v1 = vmul.f32 %v8848_v34, %v3543_v15  ;;  %v3115_v28 = vadd.f32 %v3023_v42, %v2987_v13  ;;  %v3125_v20 = vadd.f32 %v3053_v36, %v2997_v31  ;;  %v3068_v42 = vpop.xlane.xlu2 %3067  ;;  %v2797_v15 = vsub.f32 -inf, %v10475_v60  ;;  %v8860_v34 = vpop.eup %8859 }
 0x750   : > { %v3591_v52 = vmul.f32 %v8850_v62, %v3527_v7  ;;  %v8862_v62 = vpop.eup %8861  ;;  %v2798_v60 = vsub.f32 -inf, %v10480_v2 }
 0x751   : > { %v3639_v29 = vpack.c.bf16 %v3607_v1, %v3607_v1  ;;  %8863 = vrcp.f32 %v3115_v28  ;;  %v2813_v1 = vsub.f32 -inf, %v10462_v58  ;;  %v2832_v26 = vmul.f32 1.442695, %v2797_v15 }
 0x752   : > { %v3623_v22 = vpack.c.bf16 %v3591_v52, %v3591_v52  ;;  %8865 = vrcp.f32 %v3125_v20  ;;  %v2834_v2 = vmul.f32 1.442695, %v2798_v60 }
 0x753   : > { %v3864_v45 = vunpack.c.l.b16 %v3639_v29  ;;  %8867 = vpow2.f32 %v2862_v17  ;;  %v2864_v28 = vmul.f32 1.442695, %v2813_v1 }
 0x754   : > { %v3730_v11 = vunpack.c.l.b16 %v3623_v22  ;;  %8869 = vpow2.f32 %v2830_v55 }
 0x755   : > { %v3871_v33 = vpack.c.b16 %v3864_v45, %v3863_v19  ;;  %v3243_v50 = vpop.f32.mrf.mxu2  ;;  %8871 = vpow2.f32 %v2878_v51 }
 0x756   : > { %v3737_v57 = vpack.c.b16 %v3730_v11, %v3729_v39  ;;  %v3518_v47 = vadd.f32 %v3243_v50, %v2986_v54  ;;  %v3130_v54 = vadd.f32 %v3068_v42, %v3002_v44 }
 0x757   : > { %8039 = vmatmul.msk.bf16.vlgmr.msrb.gmra.mxu0 %vm2365_vm15, %v3871_v33  ;;  %v3333_v24 = vpop.f32.mrf.mxu1  ;;  %v8864_v52 = vpop.eup %8863  ;;  %v2806_v33 = vsub.f32 -inf, %v10501_v61 }
 0x758   : > { %8023 = vmatmul.msk.bf16.vlgmr.msra.gmra.mxu1 %vm2365_vm15, %v3737_v57  ;;  %v3528_v46 = vadd.f32 %v3333_v24, %v2996_v18  ;;  %v3582_v16 = vmul.f32 %v8858_v30, %v3518_v47  ;;  %v10645_v7 = vpop.xlane.xlu0 %3028  ;;  %v3003_v18 = vmul.f32 0.0, %v8860_v34  ;;  %v8866_v19 = vpop.eup %8865  ;;  %8873 = vrcp.f32 %v3130_v54 }
 0x759   : > { %8875 = vpow2.f32 %v2832_v26  ;;  %v8868_v50 = vpop.eup %8867  ;;  %v2815_v24 = vsub.f32 -inf, %v10514_v27  ;;  %v2850_v61 = vmul.f32 1.442695, %v2806_v33  ;;  %v2836_v30 = vmul.f32 1.442695, %v2799_v12 }
 0x75a   : > { %v3592_v21 = vmul.f32 %v8862_v62, %v3528_v46  ;;  %v3614_v5 = vpack.c.bf16 %v3582_v16, %v3582_v16  ;;  %v3131_v45 = vadd.f32 %v3071_v41, %v3003_v18  ;;  %v8870_v20 = vpop.eup %8869  ;;  %8877 = vpow2.f32 %v2880_v32 }
 0x75b   : > { %v8872_v23 = vpop.eup %8871  ;;  %v2988_v15 = vmul.f32 0.0, %v8870_v20  ;;  %v2868_v51 = vmul.f32 1.442695, %v2815_v24  ;;  %v3004_v54 = vmul.f32 0.0, %v8868_v50 }
 0x75c   : > { %v3624_v39 = vpack.c.bf16 %v3592_v21, %v3592_v21  ;;  %8879 = vrcp.f32 %v3131_v45  ;;  %v3012_v1 = vmul.f32 0.0, %v8872_v23  ;;  %v2801_v45 = vsub.f32 -inf, %v10530_v38 }
 0x75d   : > { %v3245_v9 = vpop.f32.mrf.mxu2  ;;  %8881 = vpow2.f32 %v2864_v28 }
 0x75e   : > { %v3519_v14 = vadd.f32 %v3245_v9, %v2987_v13  ;;  %v3731_v8 = vunpack.c.l.b16 %v3624_v39  ;;  %v8874_v46 = vpop.eup %8873  ;;  %8883 = vpow2.f32 %v2834_v2  ;;  %v3074_v9 = vpop.xlane.xlu1 %3073  ;;  %v2840_v20 = vmul.f32 1.442695, %v2801_v45 }
 0x75f   : > { %v3335_v29 = vpop.f32.mrf.mxu1  ;;  %v8876_v34 = vpop.eup %8875  ;;  %8885 = vpow2.f32 %v2866_v35  ;;  %v2800_v35 = vsub.f32 -inf, %v10557_v6 }
 0x760   : > { %v3583_v4 = vmul.f32 %v8864_v52, %v3519_v14  ;;  %v3529_v22 = vadd.f32 %v3335_v29, %v2997_v31  ;;  %v3098_v58 = vpop.xlane.xlu2 %3097  ;;  %v3662_v31 = vunpack.c.l.b16 %v3614_v5  ;;  %v3101_v17 = vpop.xlane.xlu0 %3100  ;;  %8887 = vpow2.f32 %v2850_v61 }
 0x761   : > { %v8878_v0 = vpop.eup %8877  ;;  %8889 = vpow2.f32 %v2836_v30  ;;  %v2852_v14 = vmul.f32 1.442695, %v2807_v25  ;;  %v2823_v52 = vsub.f32 -inf, %v10528_v59  ;;  %v2989_v26 = vmul.f32 0.0, %v8876_v34 }
 0x762   : > { %v3615_v13 = vpack.c.bf16 %v3583_v4, %v3583_v4  ;;  %v3593_v36 = vmul.f32 %v8866_v19, %v3529_v22  ;;  %v3413_v11 = vpop.f32.mrf.mxu3  ;;  %v8880_v21 = vpop.eup %8879  ;;  %v3140_v29 = vadd.f32 %v3098_v58, %v3012_v1  ;;  %v3132_v22 = vadd.f32 %v3074_v9, %v3004_v54 }
 0x763   : > { %v3534_v41 = vadd.f32 %v3413_v11, %v3002_v44  ;;  %v8882_v60 = vpop.eup %8881  ;;  %v3013_v39 = vmul.f32 0.0, %v8878_v0  ;;  %v2884_v59 = vmul.f32 1.442695, %v2823_v52  ;;  %v2822_v58 = vsub.f32 -inf, %v10549_v10 }
 0x764   : > { %v3663_v57 = vunpack.c.l.b16 %v3615_v13  ;;  %v3625_v3 = vpack.c.bf16 %v3593_v36, %v3593_v36  ;;  %v8884_v40 = vpop.eup %8883  ;;  %v3005_v11 = vmul.f32 0.0, %v8882_v60  ;;  %v2838_v30 = vmul.f32 1.442695, %v2800_v35 }
 0x765   : > { %v3598_v27 = vmul.f32 %v8874_v46, %v3534_v41  ;;  %v8886_v36 = vpop.eup %8885  ;;  %v3141_v2 = vadd.f32 %v3101_v17, %v3013_v39  ;;  %v2882_v10 = vmul.f32 1.442695, %v2822_v58  ;;  %v10672_v34 = vmul.f32 0.0, %v8884_v40 }
 0x766   : > { %v3670_v47 = vpack.c.b16 %v3663_v57, %v3662_v31  ;;  %v3732_v42 = vunpack.c.l.b16 %v3625_v3  ;;  %v8888_v28 = vpop.eup %8887  ;;  %v10670_v25 = vmul.f32 0.0, %v8886_v36  ;;  %v2817_v0 = vsub.f32 -inf, %v10569_v56 }
 0x767   : > { %v3630_v5 = vpack.c.bf16 %v3598_v27, %v3598_v27  ;;  %v8890_v57 = vpop.eup %8889 }
 0x768   : > { %v3738_v55 = vpack.c.b16 %v3732_v42, %v3731_v8  ;;  %8015 = vmatmul.msk.bf16.vlgmr.msra.gmra.mxu2 %vm2365_vm15, %v3670_v47  ;;  %v3026_v44 = vpop.xlane.xlu2 %3025  ;;  %v2816_v47 = vsub.f32 -inf, %v10559_v43 }
 0x769   : > { %v3116_v16 = vadd.f32 %v3026_v44, %v2988_v15  ;;  %v3796_v33 = vunpack.c.l.b16 %v3630_v5 }
 0x76a   : > { %v3415_v62 = vpop.f32.mrf.mxu3  ;;  %8024 = vmatmul.msk.bf16.gmra.mxu1 %vm2365_vm15, %v3738_v55 }
 0x76b   : > { %v3535_v49 = vadd.f32 %v3415_v62, %v3003_v18  ;;  %8891 = vrcp.f32 %v3116_v16  ;;  %v3117_v18 = vadd.f32 %v10645_v7, %v2989_v26  ;;  %v2870_v62 = vmul.f32 1.442695, %v2816_v47 }
 0x76c   : > { %8893 = vpow2.f32 %v2868_v51  ;;  %v2998_v51 = vmul.f32 0.0, %v8888_v28 }
 0x76d   : > { %v3599_v4 = vmul.f32 %v8880_v21, %v3535_v49  ;;  %v3248_v32 = vpop.f32.mrf.mxu2  ;;  %8895 = vpow2.f32 %v2852_v14 }
 0x76e   : > { %v10658_v19 = vpop.xlane.xlu0 %3058  ;;  %8897 = vrcp.f32 %v3140_v29  ;;  %v3520_v23 = vadd.f32 %v3248_v32, %v2988_v15  ;;  %v10681_v32 = vmul.f32 0.0, %v8890_v57 }
 0x76f   : > { %v3631_v13 = vpack.c.bf16 %v3599_v4, %v3599_v4  ;;  %v3503_v12 = vpop.f32.mrf.mxu0  ;;  %8899 = vrcp.f32 %v3132_v22 }
 0x770   : > { %v3077_v31 = vpop.xlane.xlu2 %3076  ;;  %8901 = vrcp.f32 %v3117_v18  ;;  %v3544_v8 = vadd.f32 %v3503_v12, %v3012_v1  ;;  %v2809_v12 = vsub.f32 -inf, %v10583_v53 }
 0x771   : > { %v3797_v50 = vunpack.c.l.b16 %v3631_v13  ;;  %v3133_v38 = vadd.f32 %v3077_v31, %v3005_v11  ;;  %v8892_v7 = vpop.eup %8891  ;;  %8903 = vpow2.f32 %v2884_v59 }
 0x772   : > { %v3418_v3 = vpop.f32.mrf.mxu3  ;;  %v10664_v41 = vpop.eup %8893  ;;  %8905 = vrcp.f32 %v3141_v2  ;;  %v3584_v46 = vmul.f32 %v8892_v7, %v3520_v23  ;;  %v2872_v2 = vmul.f32 1.442695, %v2817_v0 }
 0x773   : > { %v3804_v24 = vpack.c.b16 %v3797_v50, %v3796_v33  ;;  %v3536_v42 = vadd.f32 %v3418_v3, %v3004_v54  ;;  %v8896_v17 = vpop.eup %8895  ;;  %8907 = vrcp.f32 %v3133_v38 }
 0x774   : > { %v8898_v6 = vpop.eup %8897  ;;  %8909 = vpow2.f32 %v2840_v20  ;;  %v10675_v54 = vmul.f32 0.0, %v8896_v17  ;;  %v3616_v14 = vpack.c.bf16 %v3584_v46, %v3584_v46 }
 0x775   : > { %8031 = vmatmul.msk.bf16.vlgmr.msra.gmra.mxu3 %vm2365_vm15, %v3804_v24  ;;  %v3250_v55 = vpop.f32.mrf.mxu2  ;;  %v8900_v15 = vpop.eup %8899  ;;  %8911 = vpow2.f32 %v2882_v10  ;;  %v3608_v43 = vmul.f32 %v8898_v6, %v3544_v8 }
 0x776   : > { %v10668_v61 = vpop.xlane.xlu1 %3103  ;;  %v3080_v27 = vpop.xlane.xlu0 %3079  ;;  %v3521_v44 = vadd.f32 %v3250_v55, %v2989_v26  ;;  %v3600_v9 = vmul.f32 %v8900_v15, %v3536_v42  ;;  %8913 = vpow2.f32 %v2838_v30  ;;  %v3127_v26 = vadd.f32 %v10658_v19, %v10675_v54 }
 0x777   : > { %v8902_v16 = vpop.eup %8901  ;;  %v3505_v1 = vpop.f32.mrf.mxu0  ;;  %v3640_v40 = vpack.c.bf16 %v3608_v43, %v3608_v43  ;;  %v3664_v33 = vunpack.c.l.b16 %v3616_v14  ;;  %v3134_v31 = vadd.f32 %v3080_v27, %v10670_v25  ;;  %v2824_v15 = vsub.f32 -inf, %v10593_v63 }
 0x778   : > { %v3056_v49 = vpop.xlane.xlu2 %3055  ;;  %v10677_v21 = vpop.eup %8903  ;;  %v3585_v52 = vmul.f32 %v8902_v16, %v3521_v44  ;;  %v3545_v60 = vadd.f32 %v3505_v1, %v3013_v39  ;;  %v2808_v39 = vsub.f32 -inf, %v10581_v48  ;;  %v3632_v36 = vpack.c.bf16 %v3600_v9, %v3600_v9 }
 0x779   : > { %v3126_v29 = vadd.f32 %v3056_v49, %v2998_v51  ;;  %v8906_v4 = vpop.eup %8905  ;;  %v3865_v7 = vunpack.c.l.b16 %v3640_v40  ;;  %v2856_v9 = vmul.f32 1.442695, %v2809_v12  ;;  %v2886_v14 = vmul.f32 1.442695, %v2824_v15 }
 0x77a   : > { %v3420_v5 = vpop.f32.mrf.mxu3  ;;  %v8908_v56 = vpop.eup %8907  ;;  %v3617_v45 = vpack.c.bf16 %v3585_v52, %v3585_v52  ;;  %v3609_v18 = vmul.f32 %v8906_v4, %v3545_v60  ;;  %v2854_v24 = vmul.f32 1.442695, %v2808_v39  ;;  %v3798_v10 = vunpack.c.l.b16 %v3632_v36 }
 0x77b   : > { %v3537_v22 = vadd.f32 %v3420_v5, %v3005_v11  ;;  %8915 = vrcp.f32 %v3126_v29  ;;  %v10683_v13 = vpop.eup %8909 }
 0x77c   : > { %8917 = vpow2.f32 %v2870_v62  ;;  %v8912_v28 = vpop.eup %8911  ;;  %v3665_v19 = vunpack.c.l.b16 %v3617_v45  ;;  %v3641_v11 = vpack.c.bf16 %v3609_v18, %v3609_v18  ;;  %v3007_v62 = vmul.f32 0.0, %v10664_v41 }
 0x77d   : > { %v3601_v59 = vmul.f32 %v8908_v56, %v3537_v22  ;;  %v3338_v58 = vpop.f32.mrf.mxu1  ;;  %v3253_v3 = vpop.f32.mrf.mxu2  ;;  %8919 = vrcp.f32 %v3127_v26  ;;  %v3014_v42 = vmul.f32 0.0, %v8912_v28  ;;  %v2825_v56 = vsub.f32 -inf, %v10600_v37 }
 0x77e   : > { %v3032_v50 = vpop.xlane.xlu1 %3031  ;;  %v3671_v48 = vpack.c.b16 %v3665_v19, %v3664_v33  ;;  %v3866_v20 = vunpack.c.l.b16 %v3641_v11  ;;  %v8914_v35 = vpop.eup %8913  ;;  %v3530_v53 = vadd.f32 %v3338_v58, %v2998_v51  ;;  %v3522_v63 = vadd.f32 %v3253_v3, %v10672_v34 }
 0x77f   : > { %v3633_v57 = vpack.c.bf16 %v3601_v59, %v3601_v59  ;;  %v3118_v38 = vadd.f32 %v3032_v50, %v10672_v34  ;;  %v3038_v46 = vpop.xlane.xlu0 %3037  ;;  %v3142_v27 = vadd.f32 %v10668_v61, %v3014_v42  ;;  %v2992_v52 = vmul.f32 0.0, %v8914_v35 }
 0x780   : > { %v3035_v8 = vpop.xlane.xlu2 %3034  ;;  %v3872_v17 = vpack.c.b16 %v3866_v20, %v3865_v7  ;;  %8016 = vmatmul.msk.bf16.gmra.mxu2 %vm2365_vm15, %v3671_v48 }
 0x781   : > { %v3799_v23 = vunpack.c.l.b16 %v3633_v57  ;;  %8921 = vrcp.f32 %v3118_v38  ;;  %v8916_v47 = vpop.eup %8915  ;;  %v3119_v6 = vadd.f32 %v3035_v8, %v10681_v32  ;;  %v3120_v18 = vadd.f32 %v3038_v46, %v2992_v52 }
 0x782   : > { %v3423_v30 = vpop.f32.mrf.mxu3  ;;  %v10691_v55 = vpop.eup %8917  ;;  %8923 = vrcp.f32 %v3134_v31  ;;  %v3594_v44 = vmul.f32 %v8916_v47, %v3530_v53  ;;  %8040 = vmatmul.msk.bf16.gmra.mxu0 %vm2365_vm15, %v3872_v17 }
 0x783   : > { %v3805_v43 = vpack.c.b16 %v3799_v23, %v3798_v10  ;;  %8925 = vrcp.f32 %v3119_v6  ;;  %v8920_v0 = vpop.eup %8919  ;;  %v3538_v60 = vadd.f32 %v3423_v30, %v10670_v25  ;;  %v3008_v17 = vmul.f32 0.0, %v10691_v55 }
 0x784   : > { %8927 = vpow2.f32 %v2872_v2  ;;  %v3626_v4 = vpack.c.bf16 %v3594_v44, %v3594_v44 }
 0x785   : > { %v3340_v51 = vpop.f32.mrf.mxu1  ;;  %v3508_v16 = vpop.f32.mrf.mxu0  ;;  %8032 = vmatmul.msk.bf16.gmra.mxu3 %vm2365_vm15, %v3805_v43  ;;  %8929 = vpow2.f32 %v2854_v24 }
 0x786   : > { %v3531_v1 = vadd.f32 %v3340_v51, %v10675_v54  ;;  %v3083_v49 = vpop.xlane.xlu1 %3082  ;;  %v3255_v5 = vpop.f32.mrf.mxu2  ;;  %8931 = vrcp.f32 %v3142_v27  ;;  %v3015_v54 = vmul.f32 0.0, %v10677_v21  ;;  %v3733_v19 = vunpack.c.l.b16 %v3626_v4 }
 0x787   : > { %v8922_v61 = vpop.eup %8921  ;;  %v3135_v29 = vadd.f32 %v3083_v49, %v3007_v62  ;;  %v3523_v34 = vadd.f32 %v3255_v5, %v10681_v32  ;;  %v3546_v11 = vadd.f32 %v3508_v16, %v3014_v42  ;;  %v3089_v50 = vpop.xlane.xlu0 %3088  ;;  %v2888_v32 = vmul.f32 1.442695, %v2825_v56 }
 0x788   : > { %v3586_v41 = vmul.f32 %v8922_v61, %v3522_v63  ;;  %v3595_v26 = vmul.f32 %v8920_v0, %v3531_v1  ;;  %v8924_v22 = vpop.eup %8923  ;;  %v3107_v40 = vpop.xlane.xlu2 %3106  ;;  %v2993_v21 = vmul.f32 0.0, %v10683_v13 }
 0x789   : > { %8933 = vrcp.f32 %v3135_v29  ;;  %v8926_v45 = vpop.eup %8925  ;;  %v3602_v58 = vmul.f32 %v8924_v22, %v3538_v60  ;;  %v3143_v2 = vadd.f32 %v3107_v40, %v3015_v54 }
 0x78a   : > { %8935 = vpow2.f32 %v2856_v9  ;;  %v3627_v39 = vpack.c.bf16 %v3595_v26, %v3595_v26  ;;  %v3425_v25 = vpop.f32.mrf.mxu3  ;;  %v8928_v36 = vpop.eup %8927  ;;  %v3618_v59 = vpack.c.bf16 %v3586_v41, %v3586_v41  ;;  %v3587_v28 = vmul.f32 %v8926_v45, %v3523_v34 }
 0x78b   : > { %v8930_v33 = vpop.eup %8929  ;;  %8937 = vpow2.f32 %v2886_v14  ;;  %v3539_v38 = vadd.f32 %v3425_v25, %v3007_v62  ;;  %v3634_v20 = vpack.c.bf16 %v3602_v58, %v3602_v58  ;;  %v3009_v13 = vmul.f32 0.0, %v8928_v36 }
 0x78c   : > { %v3734_v37 = vunpack.c.l.b16 %v3627_v39  ;;  %v3619_v12 = vpack.c.bf16 %v3587_v28, %v3587_v28  ;;  %8939 = vrcp.f32 %v3143_v2  ;;  %v8932_v31 = vpop.eup %8931  ;;  %v3666_v48 = vunpack.c.l.b16 %v3618_v59 }
 0x78d   : > { %8941 = vrcp.f32 %v3120_v18  ;;  %v3510_v24 = vpop.f32.mrf.mxu0  ;;  %v3610_v47 = vmul.f32 %v8932_v31, %v3546_v11  ;;  %v3800_v51 = vunpack.c.l.b16 %v3634_v20  ;;  %v3137_v16 = vadd.f32 %v3089_v50, %v3009_v13 }
 0x78e   : > { %v3739_v57 = vpack.c.b16 %v3734_v37, %v3733_v19  ;;  %v3041_v3 = vpop.xlane.xlu1 %3040  ;;  %v3667_v35 = vunpack.c.l.b16 %v3619_v12  ;;  %v3258_v23 = vpop.f32.mrf.mxu2  ;;  %8943 = vpow2.f32 %v2888_v32  ;;  %v3547_v15 = vadd.f32 %v3510_v24, %v3015_v54 }
 0x78f   : > { %v8934_v7 = vpop.eup %8933  ;;  %v3121_v10 = vadd.f32 %v3041_v3, %v2993_v21  ;;  %v3524_v43 = vadd.f32 %v3258_v23, %v2992_v52  ;;  %v3642_v9 = vpack.c.bf16 %v3610_v47, %v3610_v47  ;;  %v3000_v49 = vmul.f32 0.0, %v8930_v33  ;;  %v3110_v60 = vpop.xlane.xlu0 %3109 }
 0x790   : > { %v8936_v8 = vpop.eup %8935  ;;  %v3603_v42 = vmul.f32 %v8934_v7, %v3539_v38  ;;  %8025 = vmatmul.msk.bf16.gmra.mxu1 %vm2365_vm15, %v3739_v57  ;;  %v3672_v53 = vpack.c.b16 %v3667_v35, %v3666_v48  ;;  %v3086_v46 = vpop.xlane.xlu2 %3085 }
 0x791   : > { %v8938_v6 = vpop.eup %8937  ;;  %v3136_v27 = vadd.f32 %v3086_v46, %v3008_v17  ;;  %8945 = vrcp.f32 %v3121_v10  ;;  %v3343_v1 = vpop.f32.mrf.mxu1  ;;  %v3867_v22 = vunpack.c.l.b16 %v3642_v9  ;;  %v3001_v54 = vmul.f32 0.0, %v8936_v8 }
 0x792   : > { %v3635_v30 = vpack.c.bf16 %v3603_v42, %v3603_v42  ;;  %v8940_v44 = vpop.eup %8939  ;;  %v3428_v62 = vpop.f32.mrf.mxu3  ;;  %8017 = vmatmul.msk.bf16.gmra.mxu2 %vm2365_vm15, %v3672_v53  ;;  %v3016_v4 = vmul.f32 0.0, %v8938_v6  ;;  %v3532_v32 = vadd.f32 %v3343_v1, %v3000_v49 }
 0x793   : > { %v8942_v0 = vpop.eup %8941  ;;  %v3611_v55 = vmul.f32 %v8940_v44, %v3547_v15  ;;  %8947 = vrcp.f32 %v3136_v27  ;;  %v3540_v18 = vadd.f32 %v3428_v62, %v3008_v17 }
 0x794   : > { %v3801_v63 = vunpack.c.l.b16 %v3635_v30  ;;  %v3588_v29 = vmul.f32 %v8942_v0, %v3524_v43  ;;  %v8944_v5 = vpop.eup %8943  ;;  %8949 = vrcp.f32 %v3137_v16  ;;  %v3144_v45 = vadd.f32 %v3110_v60, %v3016_v4 }
 0x795   : > { %v3643_v14 = vpack.c.bf16 %v3611_v55, %v3611_v55  ;;  %v3017_v12 = vmul.f32 0.0, %v8944_v5 }
 0x796   : > { %v3806_v61 = vpack.c.b16 %v3801_v63, %v3800_v51  ;;  %v3062_v52 = vpop.xlane.xlu1 %3061  ;;  %v3260_v26 = vpop.f32.mrf.mxu2  ;;  %v3620_v58 = vpack.c.bf16 %v3588_v29, %v3588_v29 }
 0x797   : > { %v3128_v41 = vadd.f32 %v3062_v52, %v3000_v49  ;;  %v3868_v56 = vunpack.c.l.b16 %v3643_v14  ;;  %v3525_v34 = vadd.f32 %v3260_v26, %v2993_v21  ;;  %v8946_v40 = vpop.eup %8945  ;;  %v3513_v39 = vpop.f32.mrf.mxu0 }
 0x798   : > { %8033 = vmatmul.msk.bf16.gmra.mxu3 %vm2365_vm15, %v3806_v61  ;;  %v3065_v25 = vpop.xlane.xlu2 %3064  ;;  %v3668_v21 = vunpack.c.l.b16 %v3620_v58  ;;  %v3548_v10 = vadd.f32 %v3513_v39, %v3016_v4  ;;  %v10715_v4 = vld [vmem:[%s9380_s30] ss:$0 sm:$0xff] }
 0x799   : > { %8951 = vrcp.f32 %v3128_v41  ;;  %v8948_v36 = vpop.eup %8947  ;;  %v3873_v59 = vpack.c.b16 %v3868_v56, %v3867_v22  ;;  %v3589_v28 = vmul.f32 %v8946_v40, %v3525_v34  ;;  %v3129_v2 = vadd.f32 %v3065_v25, %v3001_v54  ;;  %v3345_v38 = vpop.f32.mrf.mxu1 }
 0x79a   : > { %v3604_v33 = vmul.f32 %v8948_v36, %v3540_v18  ;;  %v3430_v19 = vpop.f32.mrf.mxu3  ;;  %v8950_v50 = vpop.eup %8949  ;;  %v3533_v8 = vadd.f32 %v3345_v38, %v3001_v54  ;;  %v12365_v54 = vld [vmem:[#allocation24_spill] sm:$0xff] }
 0x79b   : > { %v3621_v37 = vpack.c.bf16 %v3589_v28, %v3589_v28  ;;  %8953 = vrcp.f32 %v3129_v2  ;;  %v3541_v11 = vadd.f32 %v3430_v19, %v3009_v13  ;;  %8041 = vmatmul.msk.bf16.gmra.mxu0 %vm2365_vm15, %v3873_v59 }
 0x79c   : > { %8955 = vrcp.f32 %v3144_v45  ;;  %v3636_v31 = vpack.c.bf16 %v3604_v33, %v3604_v33  ;;  %v12367_v33 = vld [vmem:[#allocation25_spill] sm:$0xff] }
 0x79d   : > { %v3669_v57 = vunpack.c.l.b16 %v3621_v37  ;;  %v3605_v3 = vmul.f32 %v8950_v50, %v3541_v11 }
 0x79e   : > { %v3113_v7 = vpop.xlane.xlu1 %3112  ;;  %v3802_v42 = vunpack.c.l.b16 %v3636_v31 }
 0x79f   : > { %v8952_v48 = vpop.eup %8951  ;;  %v3145_v20 = vadd.f32 %v3113_v7, %v3017_v12  ;;  %v3673_v24 = vpack.c.b16 %v3669_v57, %v3668_v21  ;;  %v3637_v23 = vpack.c.bf16 %v3605_v3, %v3605_v3  ;;  %v3515_v6 = vpop.f32.mrf.mxu0  ;;  %v12369_v3 = vld [vmem:[#allocation26_spill] sm:$0xff] }
 0x7a0   : > { %v3596_v35 = vmul.f32 %v8952_v48, %v3532_v32  ;;  %v3549_v27 = vadd.f32 %v3515_v6, %v3017_v12 }
 0x7a1   : > { %8957 = vrcp.f32 %v3145_v20  ;;  %v8954_v47 = vpop.eup %8953  ;;  %v3803_v17 = vunpack.c.l.b16 %v3637_v23 }
 0x7a2   : > { %v8956_v13 = vpop.eup %8955  ;;  %v3628_v53 = vpack.c.bf16 %v3596_v35, %v3596_v35  ;;  %v3597_v46 = vmul.f32 %v8954_v47, %v3533_v8  ;;  %8018 = vmatmul.msk.bf16.gmra.mxu2 %vm2365_vm15, %v3673_v24 }
 0x7a3   : > { %v3612_v30 = vmul.f32 %v8956_v13, %v3548_v10  ;;  %v3807_v15 = vpack.c.b16 %v3803_v17, %v3802_v42  ;;  %v12371_v42 = vld [vmem:[#allocation27_spill] sm:$0xff] }
 0x7a4   : > { %v3629_v43 = vpack.c.bf16 %v3597_v46, %v3597_v46  ;;  %v3735_v51 = vunpack.c.l.b16 %v3628_v53 }
 0x7a5   : > { %v3644_v62 = vpack.c.bf16 %v3612_v30, %v3612_v30 }
 0x7a6   : > { %v3736_v16 = vunpack.c.l.b16 %v3629_v43 }
 0x7a7   : > { %v8958_v44 = vpop.eup %8957  ;;  %v3869_v55 = vunpack.c.l.b16 %v3644_v62 }
 0x7a8   : > { %v3613_v0 = vmul.f32 %v8958_v44, %v3549_v27  ;;  %8034 = vmatmul.msk.bf16.gmra.mxu3 %vm2365_vm15, %v3807_v15  ;;  %v3740_v9 = vpack.c.b16 %v3736_v16, %v3735_v51  ;;  %v12373_v16 = vld [vmem:[#allocation28_spill] sm:$0xff] }
 0x7aa   : > { %v3645_v63 = vpack.c.bf16 %v3613_v0, %v3613_v0  ;;  %8026 = vmatmul.msk.bf16.gmra.mxu1 %vm2365_vm15, %v3740_v9 }
 0x7ac   : > { %v3870_v1 = vunpack.c.l.b16 %v3645_v63 }
 0x7ae   : > { %v3874_v49 = vpack.c.b16 %v3870_v1, %v3869_v55 }
 0x7b0   : > { %8042 = vmatmul.msk.bf16.gmra.mxu0 %vm2365_vm15, %v3874_v49 }
 0x7d4   : > { %v3902_v60 = vpop.f32.mrf.mxu0 }
 0x7d5   : > { %v3768_v61 = vpop.f32.mrf.mxu1 }
 0x7dc   : > { %v3904_v45 = vpop.f32.mrf.mxu0 }
 0x7dd   : > { %v3770_v26 = vpop.f32.mrf.mxu1 }
 0x7e7   : > { %v3773_v59 = vpop.f32.mrf.mxu1 }
 0x7eb   : > { %v3701_v14 = vpop.f32.mrf.mxu2 }
 0x7ec   : > { %v3922_v29 = vadd.f32 %v3768_v61, %v3701_v14 }
 0x7ef   : > { %v3775_v57 = vpop.f32.mrf.mxu1 }
 0x7f3   : > { %v3703_v22 = vpop.f32.mrf.mxu2 }
 0x7f4   : > { %v3923_v34 = vadd.f32 %v3770_v26, %v3703_v22 }
 0x7f8   : > { %v3835_v52 = vpop.f32.mrf.mxu3 }
 0x7f9   : > { %v3930_v5 = vadd.f32 %v3922_v29, %v3835_v52  ;;  %v12375_v29 = vld [vmem:[#allocation29_spill] sm:$0xff] }
 0x7fb   : > { %v3938_v41 = vadd.f32 %v3930_v5, %v3902_v60 }
 0x7fd   : > { %v3949_v56 = vadd.f32 %v10715_v4, %v3938_v41 }
 0x7ff   : > { %v10719_v40 = vadd.f32 %v3949_v56, %v12365_v54  ;;  %v3907_v37 = vpop.f32.mrf.mxu0  ;;  %v12377_v54 = vld [vmem:[#allocation30_spill] sm:$0xff] }
 0x800   : > { %v3837_v18 = vpop.f32.mrf.mxu3 }
 0x801   : > { %12366 = vst [vmem:[#allocation37_spill] sm:$0xff] %v10719_v40  ;;  %v3931_v39 = vadd.f32 %v3923_v34, %v3837_v18  ;;  %v3967_v25 = vsel %vm946_vm0, %v10719_v40, 0.0 }
 0x802   : > { %3968 = vadd.xlane.f32.xlu2 %v3967_v25 }
 0x803   : > { %v3939_v36 = vadd.f32 %v3931_v39, %v3904_v45  ;;  %v3706_v28 = vpop.f32.mrf.mxu2 }
 0x804   : > { %v3924_v2 = vadd.f32 %v3773_v59, %v3706_v28 }
 0x805   : > { %v3950_v58 = vadd.f32 %v10715_v4, %v3939_v36 }
 0x807   : > { %v10725_v19 = vadd.f32 %v3950_v58, %v12367_v33  ;;  %v3909_v24 = vpop.f32.mrf.mxu0  ;;  %v12379_v33 = vld [vmem:[#allocation31_spill] sm:$0xff] }
 0x808   : > { %v3840_v11 = vpop.f32.mrf.mxu3 }
 0x809   : > { %12368 = vst [vmem:[#allocation38_spill] sm:$0xff] %v10725_v19  ;;  %v3932_v50 = vadd.f32 %v3924_v2, %v3840_v11  ;;  %v3970_v32 = vsel %vm946_vm0, %v10725_v19, 0.0 }
 0x80a   : > { %3971 = vadd.xlane.f32.xlu0 %v3970_v32 }
 0x80b   : > { %v3940_v12 = vadd.f32 %v3932_v50, %v3907_v37  ;;  %v3708_v31 = vpop.f32.mrf.mxu2 }
 0x80c   : > { %v3925_v38 = vadd.f32 %v3775_v57, %v3708_v31 }
 0x80d   : > { %v3951_v21 = vadd.f32 %v10715_v4, %v3940_v12  ;;  %v3778_v8 = vpop.f32.mrf.mxu1 }
 0x80f   : > { %v10731_v7 = vadd.f32 %v3951_v21, %v12369_v3  ;;  %v12380_v3 = vld [vmem:[#allocation32_spill] sm:$0xff] }
 0x810   : > { %v3842_v48 = vpop.f32.mrf.mxu3 }
 0x811   : > { %12370 = vst [vmem:[#allocation39_spill] sm:$0xff] %v10731_v7  ;;  %v3933_v20 = vadd.f32 %v3925_v38, %v3842_v48  ;;  %v3973_v35 = vsel %vm946_vm0, %v10731_v7, 0.0 }
 0x812   : > { %3974 = vadd.xlane.f32.xlu1 %v3973_v35 }
 0x813   : > { %v3941_v10 = vadd.f32 %v3933_v20, %v3909_v24 }
 0x815   : > { %v3952_v23 = vadd.f32 %v10715_v4, %v3941_v10  ;;  %v3711_v47 = vpop.f32.mrf.mxu2  ;;  %v3780_v27 = vpop.f32.mrf.mxu1 }
 0x816   : > { %v3926_v53 = vadd.f32 %v3778_v8, %v3711_v47 }
 0x817   : > { %v10737_v17 = vadd.f32 %v3952_v23, %v12371_v42 }
 0x818   : > { %v3912_v46 = vpop.f32.mrf.mxu0 }
 0x819   : > { %12372 = vst [vmem:[#allocation40_spill] sm:$0xff] %v10737_v17  ;;  %v3976_v13 = vsel %vm946_vm0, %v10737_v17, 0.0 }
 0x81a   : > { %3977 = vadd.xlane.f32.xlu2 %v3976_v13 }
 0x81b   : > { %v3845_v6 = vpop.f32.mrf.mxu3 }
 0x81c   : > { %v3934_v30 = vadd.f32 %v3926_v53, %v3845_v6 }
 0x81d   : > { %v3713_v43 = vpop.f32.mrf.mxu2 }
 0x81e   : > { %v3942_v15 = vadd.f32 %v3934_v30, %v3912_v46  ;;  %v3927_v51 = vadd.f32 %v3780_v27, %v3713_v43 }
 0x820   : > { %v3953_v44 = vadd.f32 %v10715_v4, %v3942_v15  ;;  %v3914_v55 = vpop.f32.mrf.mxu0 }
 0x822   : > { %v10743_v62 = vadd.f32 %v3953_v44, %v12373_v16 }
 0x823   : > { %v3847_v0 = vpop.f32.mrf.mxu3 }
 0x824   : > { %12374 = vst [vmem:[#allocation33_spill] sm:$0xff] %v10743_v62  ;;  %v3935_v9 = vadd.f32 %v3927_v51, %v3847_v0  ;;  %v3979_v63 = vsel %vm946_vm0, %v10743_v62, 0.0 }
 0x825   : > { %3980 = vadd.xlane.f32.xlu0 %v3979_v63  ;;  %v3716_v61 = vpop.f32.mrf.mxu2 }
 0x826   : > { %v3943_v1 = vadd.f32 %v3935_v9, %v3914_v55 }
 0x827   : > { %v3783_v14 = vpop.f32.mrf.mxu1 }
 0x828   : > { %v3954_v49 = vadd.f32 %v10715_v4, %v3943_v1  ;;  %v3928_v60 = vadd.f32 %v3783_v14, %v3716_v61 }
 0x82a   : > { %v10749_v52 = vadd.f32 %v3954_v49, %v12375_v29 }
 0x82b   : > { %v3850_v5 = vpop.f32.mrf.mxu3 }
 0x82c   : > { %12376 = vst [vmem:[#allocation34_spill] sm:$0xff] %v10749_v52  ;;  %v3936_v41 = vadd.f32 %v3928_v60, %v3850_v5  ;;  %v3982_v26 = vsel %vm946_vm0, %v10749_v52, 0.0 }
 0x82d   : > { %3983 = vadd.xlane.f32.xlu1 %v3982_v26  ;;  %v3917_v22 = vpop.f32.mrf.mxu0  ;;  %v3718_v25 = vpop.f32.mrf.mxu2 }
 0x82e   : > { %v3944_v56 = vadd.f32 %v3936_v41, %v3917_v22 }
 0x82f   : > { %v3785_v39 = vpop.f32.mrf.mxu1 }
 0x830   : > { %v3955_v34 = vadd.f32 %v10715_v4, %v3944_v56  ;;  %v3929_v36 = vadd.f32 %v3785_v39, %v3718_v25 }
 0x832   : > { %v10755_v45 = vadd.f32 %v3955_v34, %v12377_v54 }
 0x833   : > { %v3852_v59 = vpop.f32.mrf.mxu3 }
 0x834   : > { %12378 = vst [vmem:[#allocation35_spill] sm:$0xff] %v10755_v45  ;;  %v3985_v18 = vsel %vm946_vm0, %v10755_v45, 0.0  ;;  %v3937_v58 = vadd.f32 %v3929_v36, %v3852_v59 }
 0x835   : > { %3986 = vadd.xlane.f32.xlu1 %v3985_v18  ;;  %v3919_v28 = vpop.f32.mrf.mxu0 }
 0x836   : > { %v3945_v11 = vadd.f32 %v3937_v58, %v3919_v28 }
 0x838   : > { %v3956_v12 = vadd.f32 %v10715_v4, %v3945_v11 }
 0x83a   : > { %v10772_v48 = vadd.f32 %v3956_v12, %v12380_v3  ;;  %v10828_v3 = vld [vmem:[%s12382_s6] ss:$0 sm:$0xff] }
 0x83c   : > { %12381 = vst [vmem:[#allocation36_spill] sm:$0xff] %v10772_v48  ;;  %v3988_v35 = vsel %vm946_vm0, %v10772_v48, 0.0 }
 0x875   : > { %v3969_v2 = vpop.xlane.xlu2 %3968 }
 0x876   : > { %v3991_v37 = vmul.f32 %v3969_v2, %v12379_v33 }
 0x878   : > { %v10761_v50 = vsub.f32 %v10719_v40, %v3991_v37 }
 0x87a   : > { %v4007_v32 = vmul.f32 %v10761_v50, %v10761_v50 }
 0x87c   : > { %v4015_v21 = vsel %vm946_vm0, %v4007_v32, 0.0 }
 0x87d   : > { %4016 = vadd.xlane.f32.xlu2 %v4015_v21  ;;  %v3972_v31 = vpop.xlane.xlu0 %3971 }
 0x87e   : > { %v3992_v57 = vmul.f32 %v3972_v31, %v12379_v33 }
 0x880   : > { %v10769_v38 = vsub.f32 %v10725_v19, %v3992_v57 }
 0x882   : > { %v4008_v20 = vmul.f32 %v10769_v38, %v10769_v38 }
 0x884   : > { %v4018_v4 = vsel %vm946_vm0, %v4008_v20, 0.0 }
 0x885   : > { %v3975_v24 = vpop.xlane.xlu1 %3974  ;;  %3989 = vadd.xlane.f32.xlu2 %v3988_v35  ;;  %4019 = vadd.xlane.f32.xlu0 %v4018_v4 }
 0x886   : > { %v3993_v10 = vmul.f32 %v3975_v24, %v12379_v33 }
 0x888   : > { %v10781_v23 = vsub.f32 %v10731_v7, %v3993_v10  ;;  %v8576_v10 = vld [vmem:[%s12383_s1 + $0x18] sm:$0xff] }
 0x889   : > { %4266 = vmatpush.bf16.msrb.mxu2 %v8576_v10 }
 0x88a   : > { %v4009_v8 = vmul.f32 %v10781_v23, %v10781_v23 }
 0x88c   : > { %v4021_v47 = vsel %vm946_vm0, %v4009_v8, 0.0  ;;  %v8580_v8 = vld [vmem:[%s12383_s1 + $0x38] sm:$0xff] }
 0x88d   : > { %v3978_v42 = vpop.xlane.xlu2 %3977  ;;  %4022 = vadd.xlane.f32.xlu0 %v4021_v47  ;;  %v8584_v47 = vld [vmem:[%s12383_s1 + $0x58] sm:$0xff]  ;;  %4319 = vmatpush.bf16.msrb.mxu1 %v8580_v8 }
 0x88e   : > { %v3994_v13 = vmul.f32 %v3978_v42, %v12379_v33  ;;  %4372 = vmatpush.bf16.msrb.mxu3 %v8584_v47 }
 0x890   : > { %v10788_v53 = vsub.f32 %v10737_v17, %v3994_v13  ;;  %v8588_v13 = vld [vmem:[%s12383_s1 + $0x78] sm:$0xff] }
 0x891   : > { %4425 = vmatpush.bf16.msra.mxu0 %v8588_v13 }
 0x892   : > { %v4010_v46 = vmul.f32 %v10788_v53, %v10788_v53 }
 0x894   : > { %v4024_v6 = vsel %vm946_vm0, %v4010_v46, 0.0 }
 0x895   : > { %4025 = vadd.xlane.f32.xlu1 %v4024_v6  ;;  %v10837_v6 = vld [vmem:[%s12384_s11] ss:$0 sm:$0xff]  ;;  %s12386_s11 = sld [smem:[#allocation13_spill]] }
 0x898   : > { %v3981_v30 = vpop.xlane.xlu0 %3980 }
 0x899   : > { %v3995_v15 = vmul.f32 %v3981_v30, %v12379_v33 }
 0x89b   : > { %v10795_v43 = vsub.f32 %v10743_v62, %v3995_v15  ;;  %v8575_v15 = vld [vmem:[%s12383_s1 + $0x10] sm:$0xff] }
 0x89c   : > { %4267 = vmatpush.bf16.msrb.mxu2 %v8575_v15 }
 0x89d   : > { %v4011_v27 = vmul.f32 %v10795_v43, %v10795_v43 }
 0x89f   : > { %v4027_v44 = vsel %vm946_vm0, %v4011_v27, 0.0  ;;  %v8579_v27 = vld [vmem:[%s12383_s1 + $0x30] sm:$0xff] }
 0x8a0   : > { %v3984_v51 = vpop.xlane.xlu1 %3983  ;;  %4028 = vadd.xlane.f32.xlu2 %v4027_v44  ;;  %4320 = vmatpush.bf16.msrb.mxu1 %v8579_v27 }
 0x8a1   : > { %v3996_v16 = vmul.f32 %v3984_v51, %v12379_v33 }
 0x8a3   : > { %v10802_v0 = vsub.f32 %v10749_v52, %v3996_v16  ;;  %v8583_v16 = vld [vmem:[%s12383_s1 + $0x50] sm:$0xff] }
 0x8a4   : > { %4373 = vmatpush.bf16.msrb.mxu3 %v8583_v16 }
 0x8a5   : > { %v4012_v9 = vmul.f32 %v10802_v0, %v10802_v0 }
 0x8a7   : > { %v4030_v63 = vsel %vm946_vm0, %v4012_v9, 0.0  ;;  %v8587_v9 = vld [vmem:[%s12383_s1 + $0x70] sm:$0xff] }
 0x8a8   : > { %v3987_v55 = vpop.xlane.xlu1 %3986  ;;  %4031 = vadd.xlane.f32.xlu0 %v4030_v63  ;;  %4426 = vmatpush.bf16.msra.mxu0 %v8587_v9 }
 0x8a9   : > { %v3997_v1 = vmul.f32 %v3987_v55, %v12379_v33 }
 0x8ab   : > { %v10809_v49 = vsub.f32 %v10755_v45, %v3997_v1 }
 0x8ad   : > { %v4013_v61 = vmul.f32 %v10809_v49, %v10809_v49 }
 0x8af   : > { %v4033_v14 = vsel %vm946_vm0, %v4013_v61, 0.0 }
 0x8b0   : > { %4034 = vadd.xlane.f32.xlu1 %v4033_v14 }
 0x8f0   : > { %v4017_v60 = vpop.xlane.xlu2 %4016 }
 0x8f1   : > { %v4039_v29 = vmul.f32 %v4017_v60, %v12379_v33 }
 0x8f3   : > { %v4047_v5 = vadd.f32 1e-05, %v4039_v29 }
 0x8f5   : > { %8959 = vrsqrt.f32 %v4047_v5  ;;  %vm4061_vm2 = vweird.f32 %v4047_v5 }
 0x8f8   : > { %v3990_v41 = vpop.xlane.xlu2 %3989  ;;  %v4020_v26 = vpop.xlane.xlu0 %4019 }
 0x8f9   : > { %v3998_v22 = vmul.f32 %v3990_v41, %v12379_v33  ;;  %v4040_v56 = vmul.f32 %v4020_v26, %v12379_v33  ;;  %v8578_v41 = vld [vmem:[%s12383_s1 + $0x28] sm:$0xff] }
 0x8fa   : > { %v8582_v26 = vld [vmem:[%s12383_s1 + $0x48] sm:$0xff]  ;;  %4321 = vmatpush.bf16.msrb.mxu1 %v8578_v41 }
 0x8fb   : > { %v8960_v34 = vpop.eup %8959  ;;  %v10818_v54 = vsub.f32 %v10772_v48, %v3998_v22  ;;  %v4048_v18 = vadd.f32 1e-05, %v4040_v56  ;;  %4374 = vmatpush.bf16.msrb.mxu3 %v8582_v26 }
 0x8fc   : > { %v4056_v39 = vmul.f32 %v8960_v34, %v4047_v5  ;;  %vm4062_vm1 = vweird.f32 %v8960_v34  ;;  %v8574_v5 = vld [vmem:[%s12383_s1 + $0x8] sm:$0xff] }
 0x8fd   : > { %8961 = vrsqrt.f32 %v4048_v18  ;;  %v4014_v25 = vmul.f32 %v10818_v54, %v10818_v54  ;;  %vm4063_vm3 = vmor %vm4061_vm2, %vm4062_vm1  ;;  %vm4071_vm5 = vweird.f32 %v4048_v18  ;;  %4268 = vmatpush.bf16.msrb.mxu2 %v8574_v5 }
 0x8fe   : > { %v4057_v36 = vmul.f32 %v8960_v34, %v4056_v39 }
 0x8ff   : > { %v4036_v59 = vsel %vm946_vm0, %v4014_v25, 0.0 }
 0x900   : > { %v4058_v58 = vmul.f32 0.5, %v4057_v36  ;;  %4037 = vadd.xlane.f32.xlu2 %v4036_v59  ;;  %v4023_v28 = vpop.xlane.xlu0 %4022  ;;  %v8573_v59 = vld [vmem:[%s12383_s1] sm:$0xff] }
 0x901   : > { %v4041_v2 = vmul.f32 %v4023_v28, %v12379_v33  ;;  %4269 = vmatpush.bf16.msrb.mxu2 %v8573_v59 }
 0x902   : > { %v4059_v37 = vsub.f32 1.5, %v4058_v58  ;;  %v8577_v58 = vld [vmem:[%s12383_s1 + $0x20] sm:$0xff] }
 0x903   : > { %v8962_v11 = vpop.eup %8961  ;;  %v10824_v32 = vadd.f32 1e-05, %v4041_v2  ;;  %v8581_v2 = vld [vmem:[%s12383_s1 + $0x40] sm:$0xff]  ;;  %4322 = vmatpush.bf16.msrb.mxu1 %v8577_v58 }
 0x904   : > { %v4060_v12 = vmul.f32 %v8960_v34, %v4059_v37  ;;  %v4066_v21 = vmul.f32 %v8962_v11, %v4048_v18  ;;  %vm4072_vm4 = vweird.f32 %v8962_v11  ;;  %v8586_v18 = vld [vmem:[%s12383_s1 + $0x68] sm:$0xff]  ;;  %v8585_v37 = vld [vmem:[%s12383_s1 + $0x60] sm:$0xff]  ;;  %4375 = vmatpush.bf16.msrb.mxu3 %v8581_v2  ;;  %s12421_s1 = sld [smem:[#allocation14_spill]] }
 0x905   : > { %8963 = vrsqrt.f32 %v10824_v32  ;;  %vm4073_vm6 = vmor %vm4071_vm5, %vm4072_vm4  ;;  %vm4081_vm8 = vweird.f32 %v10824_v32  ;;  %4427 = vmatpush.bf16.msra.mxu0 %v8586_v18 }
 0x906   : > { %v4064_v31 = vsel %vm4063_vm3, %v8960_v34, %v4060_v12  ;;  %v4067_v57 = vmul.f32 %v8962_v11, %v4066_v21 }
 0x907   : > { %v4135_v20 = vmul.f32 %v4064_v31, %v10761_v50 }
 0x908   : > { %v4068_v35 = vmul.f32 0.5, %v4067_v57  ;;  %v4026_v4 = vpop.xlane.xlu1 %4025 }
 0x909   : > { %v4042_v24 = vmul.f32 %v4026_v4, %v12379_v33  ;;  %v4146_v30 = vmul.f32 %v10828_v3, %v4135_v20  ;;  %4428 = vmatpush.bf16.msra.mxu0 %v8585_v37 }
 0x90a   : > { %v4069_v42 = vsub.f32 1.5, %v4068_v35 }
 0x90b   : > { %v8964_v46 = vpop.eup %8963  ;;  %v10840_v50 = vadd.f32 1e-05, %v4042_v24  ;;  %v4157_v1 = vadd.f32 %v10837_v6, %v4146_v30 }
 0x90c   : > { %v4070_v44 = vmul.f32 %v8962_v11, %v4069_v42  ;;  %v4076_v51 = vmul.f32 %v8964_v46, %v10824_v32  ;;  %vm4082_vm7 = vweird.f32 %v8964_v46 }
 0x90d   : > { %8965 = vrsqrt.f32 %v10840_v50  ;;  %v4166_v56 = vpack.c.bf16 %v4157_v1, %v4157_v1  ;;  %vm4083_vm9 = vmor %vm4081_vm8, %vm4082_vm7  ;;  %vm4091_vm11 = vweird.f32 %v10840_v50 }
 0x90e   : > { %v4074_v63 = vsel %vm4073_vm6, %v8962_v11, %v4070_v44  ;;  %v4077_v55 = vmul.f32 %v8964_v46, %v4076_v51 }
 0x90f   : > { %v4136_v61 = vmul.f32 %v4074_v63, %v10769_v38  ;;  %v4214_v31 = vunpack.c.l.b16 %v4166_v56 }
 0x910   : > { %v4078_v14 = vmul.f32 0.5, %v4077_v55 }
 0x911   : > { %v4147_v60 = vmul.f32 %v10828_v3, %v4136_v61 }
 0x912   : > { %v4079_v29 = vsub.f32 1.5, %v4078_v14 }
 0x913   : > { %v8966_v22 = vpop.eup %8965  ;;  %v4158_v38 = vadd.f32 %v10837_v6, %v4147_v60  ;;  %v4029_v34 = vpop.xlane.xlu2 %4028 }
 0x914   : > { %v4080_v39 = vmul.f32 %v8964_v46, %v4079_v29  ;;  %v4086_v25 = vmul.f32 %v8966_v22, %v10840_v50  ;;  %v4043_v36 = vmul.f32 %v4029_v34, %v12379_v33  ;;  %vm4092_vm10 = vweird.f32 %v8966_v22 }
 0x915   : > { %v4167_v28 = vpack.c.bf16 %v4158_v38, %v4158_v38  ;;  %vm4093_vm12 = vmor %vm4091_vm11, %vm4092_vm10 }
 0x916   : > { %v4084_v11 = vsel %vm4083_vm9, %v8964_v46, %v4080_v39  ;;  %v4087_v12 = vmul.f32 %v8966_v22, %v4086_v25  ;;  %v4051_v21 = vadd.f32 1e-05, %v4043_v36 }
 0x917   : > { %v4215_v32 = vunpack.c.l.b16 %v4167_v28  ;;  %v4137_v57 = vmul.f32 %v4084_v11, %v10781_v23 }
 0x918   : > { %v4088_v20 = vmul.f32 0.5, %v4087_v12  ;;  %8967 = vrsqrt.f32 %v4051_v21  ;;  %vm4101_vm14 = vweird.f32 %v4051_v21 }
 0x919   : > { %v10866_v35 = vpack.c.b16 %v4215_v32, %v4214_v31  ;;  %v4148_v24 = vmul.f32 %v10828_v3, %v4137_v57 }
 0x91a   : > { %v4089_v4 = vsub.f32 1.5, %v4088_v20 }
 0x91b   : > { %v4032_v10 = vpop.xlane.xlu0 %4031  ;;  %8059 = vmatmul.msk.bf16.vlgmr.msrb.gmra.mxu2 %vm946_vm0, %v10866_v35  ;;  %8079 = vmatmul.msk.bf16.vlgmr.msrb.gmra.mxu1 %vm946_vm0, %v10866_v35  ;;  %v4159_v46 = vadd.f32 %v10837_v6, %v4148_v24  ;;  %v8592_v24 = vld [vmem:[%s12385_s23 + $0x18] sm:$0xff] }
 0x91c   : > { %v4090_v23 = vmul.f32 %v8966_v22, %v4089_v4  ;;  %v4044_v8 = vmul.f32 %v4032_v10, %v12379_v33  ;;  %8099 = vmatmul.msk.bf16.vlgmr.msrb.gmra.mxu3 %vm946_vm0, %v10866_v35  ;;  %8119 = vmatmul.msk.bf16.vlgmr.msra.gmra.mxu0 %vm946_vm0, %v10866_v35  ;;  %v8604_v4 = vld [vmem:[%s12385_s23 + $0x78] sm:$0xff] }
 0x91d   : > { %v4168_v44 = vpack.c.bf16 %v4159_v46, %v4159_v46  ;;  %v8596_v10 = vld [vmem:[%s12385_s23 + $0x38] sm:$0xff]  ;;  %4701 = vmatpush.bf16.msrb.mxu0 %v8604_v4  ;;  %4542 = vmatpush.bf16.msra.mxu2 %v8592_v24  ;;  %v8591_v46 = vld [vmem:[%s12385_s23 + $0x10] sm:$0xff]  ;;  %v8613_v4 = vld [vmem:[%s12386_s11 + $0x40] sm:$0xff] }
 0x91e   : > { %v8968_v47 = vpop.eup %8967  ;;  %v4094_v42 = vsel %vm4093_vm12, %v8966_v22, %v4090_v23  ;;  %v4052_v13 = vadd.f32 1e-05, %v4044_v8  ;;  %v8600_v23 = vld [vmem:[%s12385_s23 + $0x58] sm:$0xff]  ;;  %4595 = vmatpush.bf16.msra.mxu1 %v8596_v10  ;;  %v8617_v24 = vld [vmem:[%s12386_s11 + $0x60] sm:$0xff] }
 0x91f   : > { %v4138_v30 = vmul.f32 %v4094_v42, %v10788_v53  ;;  %v4096_v15 = vmul.f32 %v8968_v47, %v4051_v21  ;;  %vm4102_vm13 = vweird.f32 %v8968_v47  ;;  %v4216_v1 = vunpack.c.l.b16 %v4168_v44  ;;  %4648 = vmatpush.bf16.msra.mxu3 %v8600_v23  ;;  %v8603_v42 = vld [vmem:[%s12385_s23 + $0x70] sm:$0xff] }
 0x920   : > { %8969 = vrsqrt.f32 %v4052_v13  ;;  %vm4103_vm1 = vmor %vm4101_vm14, %vm4102_vm13  ;;  %vm4111_vm3 = vweird.f32 %v4052_v13 }
 0x921   : > { %v4149_v50 = vmul.f32 %v10828_v3, %v4138_v30  ;;  %v4097_v27 = vmul.f32 %v8968_v47, %v4096_v15  ;;  %4702 = vmatpush.bf16.msrb.mxu0 %v8603_v42  ;;  %v8595_v30 = vld [vmem:[%s12385_s23 + $0x30] sm:$0xff]  ;;  %4543 = vmatpush.bf16.msra.mxu2 %v8591_v46 }
 0x922   : > { %v8599_v15 = vld [vmem:[%s12385_s23 + $0x50] sm:$0xff]  ;;  %4596 = vmatpush.bf16.msra.mxu1 %v8595_v30 }
 0x923   : > { %v4160_v51 = vadd.f32 %v10837_v6, %v4149_v50  ;;  %v4098_v16 = vmul.f32 0.5, %v4097_v27  ;;  %4649 = vmatpush.bf16.msra.mxu3 %v8599_v15 }
 0x925   : > { %v4169_v9 = vpack.c.bf16 %v4160_v51, %v4160_v51  ;;  %v4099_v63 = vsub.f32 1.5, %v4098_v16 }
 0x926   : > { %v8970_v55 = vpop.eup %8969 }
 0x927   : > { %v4217_v61 = vunpack.c.l.b16 %v4169_v9  ;;  %v4100_v14 = vmul.f32 %v8968_v47, %v4099_v63  ;;  %v4106_v60 = vmul.f32 %v8970_v55, %v4052_v13  ;;  %vm4112_vm2 = vweird.f32 %v8970_v55  ;;  %v8590_v9 = vld [vmem:[%s12385_s23 + $0x8] sm:$0xff] }
 0x928   : > { %vm4113_vm4 = vmor %vm4111_vm3, %vm4112_vm2  ;;  %v8594_v63 = vld [vmem:[%s12385_s23 + $0x28] sm:$0xff]  ;;  %4544 = vmatpush.bf16.msra.mxu2 %v8590_v9 }
 0x929   : > { %v10883_v53 = vpack.c.b16 %v4217_v61, %v4216_v1  ;;  %v4104_v29 = vsel %vm4103_vm1, %v8968_v47, %v4100_v14  ;;  %v4107_v5 = vmul.f32 %v8970_v55, %v4106_v60  ;;  %v8602_v61 = vld [vmem:[%s12385_s23 + $0x68] sm:$0xff]  ;;  %4597 = vmatpush.bf16.msra.mxu1 %v8594_v63 }
 0x92a   : > { %v4139_v41 = vmul.f32 %v4104_v29, %v10795_v43  ;;  %4703 = vmatpush.bf16.msrb.mxu0 %v8602_v61  ;;  %v8589_v29 = vld [vmem:[%s12385_s23] sm:$0xff] }
 0x92b   : > { %v4108_v26 = vmul.f32 0.5, %v4107_v5  ;;  %8060 = vmatmul.msk.bf16.gmra.mxu2 %vm946_vm0, %v10883_v53  ;;  %8080 = vmatmul.msk.bf16.gmra.mxu1 %vm946_vm0, %v10883_v53  ;;  %v8593_v5 = vld [vmem:[%s12385_s23 + $0x20] sm:$0xff] }
 0x92c   : > { %8100 = vmatmul.msk.bf16.gmra.mxu3 %vm946_vm0, %v10883_v53  ;;  %8120 = vmatmul.msk.bf16.gmra.mxu0 %vm946_vm0, %v10883_v53  ;;  %v4150_v56 = vmul.f32 %v10828_v3, %v4139_v41  ;;  %v8597_v41 = vld [vmem:[%s12385_s23 + $0x40] sm:$0xff] }
 0x92d   : > { %v4109_v22 = vsub.f32 1.5, %v4108_v26  ;;  %4545 = vmatpush.bf16.msra.mxu2 %v8589_v29  ;;  %4598 = vmatpush.bf16.msra.mxu1 %v8593_v5 }
 0x92e   : > { %v4161_v34 = vadd.f32 %v10837_v6, %v4150_v56 }
 0x92f   : > { %v4110_v38 = vmul.f32 %v8970_v55, %v4109_v22 }
 0x930   : > { %v4170_v25 = vpack.c.bf16 %v4161_v34, %v4161_v34 }
 0x931   : > { %v4114_v43 = vsel %vm4113_vm4, %v8970_v55, %v4110_v38  ;;  %v8598_v55 = vld [vmem:[%s12385_s23 + $0x48] sm:$0xff] }
 0x932   : > { %v4140_v18 = vmul.f32 %v4114_v43, %v10802_v0  ;;  %v4218_v58 = vunpack.c.l.b16 %v4170_v25  ;;  %v4035_v0 = vpop.xlane.xlu1 %4034  ;;  %4650 = vmatpush.bf16.msra.mxu3 %v8598_v55 }
 0x933   : > { %v4045_v37 = vmul.f32 %v4035_v0, %v12379_v33  ;;  %v8611_v0 = vld [vmem:[%s12386_s11 + $0x30] sm:$0xff] }
 0x934   : > { %v4151_v39 = vmul.f32 %v10828_v3, %v4140_v18 }
 0x935   : > { %v4053_v11 = vadd.f32 1e-05, %v4045_v37  ;;  %v8615_v37 = vld [vmem:[%s12386_s11 + $0x50] sm:$0xff] }
 0x936   : > { %v4162_v36 = vadd.f32 %v10837_v6, %v4151_v39  ;;  %4651 = vmatpush.bf16.msra.mxu3 %v8597_v41 }
 0x937   : > { %8971 = vrsqrt.f32 %v4053_v11  ;;  %vm4121_vm6 = vweird.f32 %v4053_v11 }
 0x938   : > { %v4171_v59 = vpack.c.bf16 %v4162_v36, %v4162_v36 }
 0x93a   : > { %v4219_v28 = vunpack.c.l.b16 %v4171_v59 }
 0x93c   : > { %v10899_v2 = vpack.c.b16 %v4219_v28, %v4218_v58  ;;  %v8620_v58 = vld [vmem:[%s12386_s11 + $0x78] sm:$0xff]  ;;  %v8607_v28 = vld [vmem:[%s12386_s11 + $0x10] sm:$0xff] }
 0x93d   : > { %v8972_v12 = vpop.eup %8971 }
 0x93e   : > { %8061 = vmatmul.msk.bf16.gmra.mxu2 %vm946_vm0, %v10899_v2  ;;  %8081 = vmatmul.msk.bf16.gmra.mxu1 %vm946_vm0, %v10899_v2  ;;  %v4116_v21 = vmul.f32 %v8972_v12, %v4053_v11  ;;  %vm4122_vm5 = vweird.f32 %v8972_v12  ;;  %v8619_v11 = vld [vmem:[%s12386_s11 + $0x70] sm:$0xff] }
 0x93f   : > { %8101 = vmatmul.msk.bf16.gmra.mxu3 %vm946_vm0, %v10899_v2  ;;  %8121 = vmatmul.msk.bf16.gmra.mxu0 %vm946_vm0, %v10899_v2  ;;  %vm4123_vm7 = vmor %vm4121_vm6, %vm4122_vm5 }
 0x940   : > { %v4117_v31 = vmul.f32 %v8972_v12, %v4116_v21  ;;  %v8610_v21 = vld [vmem:[%s12386_s11 + $0x28] sm:$0xff] }
 0x942   : > { %v4118_v32 = vmul.f32 0.5, %v4117_v31  ;;  %v8614_v31 = vld [vmem:[%s12386_s11 + $0x48] sm:$0xff] }
 0x944   : > { %v4119_v47 = vsub.f32 1.5, %v4118_v32  ;;  %v8618_v32 = vld [vmem:[%s12386_s11 + $0x68] sm:$0xff] }
 0x946   : > { %v4120_v13 = vmul.f32 %v8972_v12, %v4119_v47 }
 0x948   : > { %v4124_v27 = vsel %vm4123_vm7, %v8972_v12, %v4120_v13  ;;  %v8606_v12 = vld [vmem:[%s12386_s11 + $0x8] sm:$0xff] }
 0x949   : > { %v4141_v16 = vmul.f32 %v4124_v27, %v10809_v49  ;;  %v8601_v49 = vld [vmem:[%s12385_s23 + $0x60] sm:$0xff] }
 0x94a   : > { %4704 = vmatpush.bf16.msrb.mxu0 %v8601_v49 }
 0x94b   : > { %v4152_v60 = vmul.f32 %v10828_v3, %v4141_v16 }
 0x94d   : > { %v4163_v56 = vadd.f32 %v10837_v6, %v4152_v60 }
 0x94e   : > { %4977 = vmatpush.bf16.msra.mxu0 %v8620_v58 }
 0x94f   : > { %v4172_v34 = vpack.c.bf16 %v4163_v56, %v4163_v56 }
 0x951   : > { %v4220_v25 = vunpack.c.l.b16 %v4172_v34 }
 0x952   : > { %4978 = vmatpush.bf16.msra.mxu0 %v8619_v11 }
 0x956   : > { %4979 = vmatpush.bf16.msra.mxu0 %v8618_v32 }
 0x95a   : > { %4980 = vmatpush.bf16.msra.mxu0 %v8617_v24 }
 0x973   : > { %v4038_v57 = vpop.xlane.xlu2 %4037 }
 0x974   : > { %v4046_v20 = vmul.f32 %v4038_v57, %v12379_v33  ;;  %v8605_v57 = vld [vmem:[%s12386_s11] sm:$0xff] }
 0x976   : > { %v4054_v8 = vadd.f32 1e-05, %v4046_v20  ;;  %v8609_v20 = vld [vmem:[%s12386_s11 + $0x20] sm:$0xff] }
 0x978   : > { %8973 = vrsqrt.f32 %v4054_v8  ;;  %vm4131_vm9 = vweird.f32 %v4054_v8 }
 0x97e   : > { %v8974_v50 = vpop.eup %8973 }
 0x97f   : > { %v4126_v44 = vmul.f32 %v8974_v50, %v4054_v8  ;;  %vm4132_vm8 = vweird.f32 %v8974_v50 }
 0x980   : > { %vm4133_vm10 = vmor %vm4131_vm9, %vm4132_vm8 }
 0x981   : > { %v4127_v51 = vmul.f32 %v8974_v50, %v4126_v44 }
 0x983   : > { %v4128_v1 = vmul.f32 0.5, %v4127_v51 }
 0x985   : > { %v4129_v14 = vsub.f32 1.5, %v4128_v1 }
 0x987   : > { %v4130_v26 = vmul.f32 %v8974_v50, %v4129_v14 }
 0x989   : > { %v4134_v22 = vsel %vm4133_vm10, %v8974_v50, %v4130_v26 }
 0x98a   : > { %v4142_v38 = vmul.f32 %v4134_v22, %v10818_v54  ;;  %v8608_v54 = vld [vmem:[%s12386_s11 + $0x18] sm:$0xff] }
 0x98b   : > { %4818 = vmatpush.bf16.msrb.mxu2 %v8608_v54 }
 0x98c   : > { %v4153_v43 = vmul.f32 %v10828_v3, %v4142_v38  ;;  %v8612_v3 = vld [vmem:[%s12386_s11 + $0x38] sm:$0xff] }
 0x98d   : > { %4871 = vmatpush.bf16.msrb.mxu1 %v8612_v3 }
 0x98e   : > { %v4164_v18 = vadd.f32 %v10837_v6, %v4153_v43  ;;  %v8616_v6 = vld [vmem:[%s12386_s11 + $0x58] sm:$0xff] }
 0x98f   : > { %4924 = vmatpush.bf16.msrb.mxu3 %v8616_v6  ;;  %4819 = vmatpush.bf16.msrb.mxu2 %v8607_v28 }
 0x990   : > { %v4173_v39 = vpack.c.bf16 %v4164_v18, %v4164_v18 }
 0x991   : > { %4872 = vmatpush.bf16.msrb.mxu1 %v8611_v0 }
 0x992   : > { %v4221_v36 = vunpack.c.l.b16 %v4173_v39 }
 0x993   : > { %4925 = vmatpush.bf16.msrb.mxu3 %v8615_v37  ;;  %4820 = vmatpush.bf16.msrb.mxu2 %v8606_v12 }
 0x994   : > { %v10933_v59 = vpack.c.b16 %v4221_v36, %v4220_v25 }
 0x995   : > { %4873 = vmatpush.bf16.msrb.mxu1 %v8610_v21 }
 0x996   : > { %8062 = vmatmul.msk.bf16.gmra.mxu2 %vm946_vm0, %v10933_v59  ;;  %8082 = vmatmul.msk.bf16.gmra.mxu1 %vm946_vm0, %v10933_v59 }
 0x997   : > { %8102 = vmatmul.msk.bf16.gmra.mxu3 %vm946_vm0, %v10933_v59  ;;  %8122 = vmatmul.msk.bf16.gmra.mxu0 %vm946_vm0, %v10933_v59 }
 0x998   : > { %4926 = vmatpush.bf16.msrb.mxu3 %v8614_v31  ;;  %4821 = vmatpush.bf16.msrb.mxu2 %v8605_v57  ;;  %v10991_v10 = vpop.f32.mrf.mxu1 }
 0x999   : > { %4874 = vmatpush.bf16.msrb.mxu1 %v8609_v20  ;;  %v10993_v23 = vpop.f32.mrf.mxu0 }
 0x99c   : > { %4927 = vmatpush.bf16.msrb.mxu3 %v8613_v4 }
 0x99e   : > { %v10995_v8 = vpop.f32.mrf.mxu2 }
 0x99f   : > { %v10997_v47 = vpop.f32.mrf.mxu3 }
 0x9a0   : > { %v10999_v42 = vpop.f32.mrf.mxu1 }
 0x9a1   : > { %v11001_v13 = vpop.f32.mrf.mxu0 }
 0x9a6   : > { %8139 = vmatmul.msk.bf16.vlgmr.msra.gmra.mxu2 %vm946_vm0, %v10866_v35  ;;  %8159 = vmatmul.msk.bf16.vlgmr.msra.gmra.mxu1 %vm946_vm0, %v10866_v35  ;;  %v11011_v46 = vpop.f32.mrf.mxu2 }
 0x9a7   : > { %8179 = vmatmul.msk.bf16.vlgmr.msra.gmra.mxu3 %vm946_vm0, %v10866_v35  ;;  %8199 = vmatmul.msk.bf16.vlgmr.msrb.gmra.mxu0 %vm946_vm0, %v10866_v35  ;;  %v11013_v30 = vpop.f32.mrf.mxu3 }
 0x9a8   : > { %v11015_v15 = vpop.f32.mrf.mxu1 }
 0x9a9   : > { %v11017_v50 = vpop.f32.mrf.mxu0 }
 0x9ae   : > { %v11019_v27 = vpop.f32.mrf.mxu2 }
 0x9af   : > { %v11021_v44 = vpop.f32.mrf.mxu3 }
 0x9b0   : > { %12387 = vst [vmem:[#allocation41_spill] sm:$0xff] %v11021_v44 }
 0x9b1   : > { %v11033_v51 = vpop.f32.mrf.mxu0 }
 0x9b6   : > { %8140 = vmatmul.msk.bf16.gmra.mxu2 %vm946_vm0, %v10883_v53  ;;  %8160 = vmatmul.msk.bf16.gmra.mxu1 %vm946_vm0, %v10883_v53  ;;  %v11035_v16 = vpop.f32.mrf.mxu2 }
 0x9b7   : > { %8180 = vmatmul.msk.bf16.gmra.mxu3 %vm946_vm0, %v10883_v53  ;;  %8200 = vmatmul.msk.bf16.gmra.mxu0 %vm946_vm0, %v10883_v53  ;;  %v11037_v9 = vpop.f32.mrf.mxu3 }
 0x9bc   : > { %v11041_v55 = vpop.f32.mrf.mxu0 }
 0x9bd   : > { %12389 = vst [vmem:[#allocation42_spill] sm:$0xff] %v11041_v55 }
 0x9c1   : > { %v11047_v1 = vpop.f32.mrf.mxu2 }
 0x9c2   : > { %12390 = vst [vmem:[#allocation46_spill] sm:$0xff] %v11047_v1 }
 0x9c4   : > { %v11057_v14 = vpop.f32.mrf.mxu0 }
 0x9c5   : > { %12393 = vst [vmem:[#allocation43_spill] sm:$0xff] %v11057_v14 }
 0x9c6   : > { %8141 = vmatmul.msk.bf16.gmra.mxu2 %vm946_vm0, %v10899_v2  ;;  %8161 = vmatmul.msk.bf16.gmra.mxu1 %vm946_vm0, %v10899_v2 }
 0x9c7   : > { %8181 = vmatmul.msk.bf16.gmra.mxu3 %vm946_vm0, %v10899_v2  ;;  %8201 = vmatmul.msk.bf16.gmra.mxu0 %vm946_vm0, %v10899_v2 }
 0x9c9   : > { %v11059_v60 = vpop.f32.mrf.mxu2 }
 0x9ca   : > { %12394 = vst [vmem:[#allocation44_spill] sm:$0xff] %v11059_v60 }
 0x9d6   : > { %8142 = vmatmul.msk.bf16.gmra.mxu2 %vm946_vm0, %v10933_v59  ;;  %8162 = vmatmul.msk.bf16.gmra.mxu1 %vm946_vm0, %v10933_v59 }
 0x9d7   : > { %8182 = vmatmul.msk.bf16.gmra.mxu3 %vm946_vm0, %v10933_v59  ;;  %8202 = vmatmul.msk.bf16.gmra.mxu0 %vm946_vm0, %v10933_v59 }
 0x9e6   : > { %8219 = vmatmul.msk.bf16.vlgmr.msrb.gmra.mxu2 %vm946_vm0, %v10866_v35  ;;  %8239 = vmatmul.msk.bf16.vlgmr.msrb.gmra.mxu1 %vm946_vm0, %v10866_v35 }
 0x9e7   : > { %8259 = vmatmul.msk.bf16.vlgmr.msrb.gmra.mxu3 %vm946_vm0, %v10866_v35  ;;  %8279 = vmatmul.msk.bf16.vlgmr.msra.gmra.mxu0 %vm946_vm0, %v10866_v35  ;;  %v11031_v35 = vpop.f32.mrf.mxu1 }
 0x9ef   : > { %v11039_v63 = vpop.f32.mrf.mxu1 }
 0x9f0   : > { %12388 = vst [vmem:[#allocation45_spill] sm:$0xff] %v11039_v63 }
 0x9f6   : > { %8220 = vmatmul.msk.bf16.gmra.mxu2 %vm946_vm0, %v10883_v53  ;;  %8240 = vmatmul.msk.bf16.gmra.mxu1 %vm946_vm0, %v10883_v53 }
 0x9f7   : > { %8260 = vmatmul.msk.bf16.gmra.mxu3 %vm946_vm0, %v10883_v53  ;;  %8280 = vmatmul.msk.bf16.gmra.mxu0 %vm946_vm0, %v10883_v53  ;;  %v11053_v53 = vpop.f32.mrf.mxu3  ;;  %v11055_v61 = vpop.f32.mrf.mxu1 }
 0x9f8   : > { %12391 = vst [vmem:[#allocation47_spill] sm:$0xff] %v11053_v53 }
 0x9f9   : > { %12392 = vst [vmem:[#allocation48_spill] sm:$0xff] %v11055_v61 }
 0x9ff   : > { %v11061_v29 = vpop.f32.mrf.mxu3 }
 0xa00   : > { %12395 = vst [vmem:[#allocation24_spill] sm:$0xff] %v11061_v29 }
 0xa06   : > { %8221 = vmatmul.msk.bf16.gmra.mxu2 %vm946_vm0, %v10899_v2  ;;  %8241 = vmatmul.msk.bf16.gmra.mxu1 %vm946_vm0, %v10899_v2 }
 0xa07   : > { %8261 = vmatmul.msk.bf16.gmra.mxu3 %vm946_vm0, %v10899_v2  ;;  %8281 = vmatmul.msk.bf16.gmra.mxu0 %vm946_vm0, %v10899_v2 }
 0xa13   : > { %v11063_v5 = vpop.f32.mrf.mxu1 }
 0xa14   : > { %12396 = vst [vmem:[#allocation25_spill] sm:$0xff] %v11063_v5  ;;  %v11065_v41 = vpop.f32.mrf.mxu0 }
 0xa15   : > { %12397 = vst [vmem:[#allocation26_spill] sm:$0xff] %v11065_v41 }
 0xa16   : > { %8222 = vmatmul.msk.bf16.gmra.mxu2 %vm946_vm0, %v10933_v59  ;;  %8242 = vmatmul.msk.bf16.gmra.mxu1 %vm946_vm0, %v10933_v59 }
 0xa17   : > { %8262 = vmatmul.msk.bf16.gmra.mxu3 %vm946_vm0, %v10933_v59  ;;  %8282 = vmatmul.msk.bf16.gmra.mxu0 %vm946_vm0, %v10933_v59 }
 0xa19   : > { %v11075_v2 = vpop.f32.mrf.mxu2 }
 0xa1a   : > { %12398 = vst [vmem:[#allocation27_spill] sm:$0xff] %v11075_v2  ;;  %v11077_v26 = vpop.f32.mrf.mxu3 }
 0xa1b   : > { %12399 = vst [vmem:[#allocation28_spill] sm:$0xff] %v11077_v26  ;;  %v11079_v49 = vpop.f32.mrf.mxu1 }
 0xa1c   : > { %12400 = vst [vmem:[#allocation29_spill] sm:$0xff] %v11079_v49  ;;  %v11081_v22 = vpop.f32.mrf.mxu0 }
 0xa1d   : > { %12401 = vst [vmem:[#allocation30_spill] sm:$0xff] %v11081_v22 }
 0xa21   : > { %v11083_v56 = vpop.f32.mrf.mxu2 }
 0xa22   : > { %12402 = vst [vmem:[#allocation32_spill] sm:$0xff] %v11083_v56  ;;  %v11085_v38 = vpop.f32.mrf.mxu3 }
 0xa23   : > { %12403 = vst [vmem:[#allocation49_spill] sm:$0xff] %v11085_v38  ;;  %v11087_v43 = vpop.f32.mrf.mxu1 }
 0xa24   : > { %v11089_v34 = vpop.f32.mrf.mxu0 }
 0xa29   : > { %v11091_v18 = vpop.f32.mrf.mxu2 }
 0xa2a   : > { %v11093_v39 = vpop.f32.mrf.mxu3 }
 0xa2b   : > { %v11095_v25 = vpop.f32.mrf.mxu1 }
 0xa2c   : > { %v11097_v36 = vpop.f32.mrf.mxu0 }
 0xa31   : > { %v11099_v59 = vpop.f32.mrf.mxu2 }
 0xa32   : > { %v11101_v54 = vpop.f32.mrf.mxu3 }
 0xa33   : > { %v11103_v3 = vpop.f32.mrf.mxu1 }
 0xa34   : > { %v11105_v6 = vpop.f32.mrf.mxu0 }
 0xa39   : > { %v11107_v58 = vpop.f32.mrf.mxu2 }
 0xa3a   : > { %v11109_v28 = vpop.f32.mrf.mxu3 }
 0xa3b   : > { %v11111_v0 = vpop.f32.mrf.mxu1 }
 0xa3c   : > { %v11113_v37 = vpop.f32.mrf.mxu0 }
 0xa41   : > { %v11115_v11 = vpop.f32.mrf.mxu2 }
 0xa42   : > { %v11117_v12 = vpop.f32.mrf.mxu3 }
 0xa43   : > { %v4610_v21 = vpop.f32.mrf.mxu1 }
 0xa44   : > { %v4716_v31 = vpop.f32.mrf.mxu0  ;;  %v4738_v53 = vpack.c.bf16 %v4610_v21, %v4610_v21 }
 0xa45   : > { %v4754_v63 = vpack.c.bf16 %v4716_v31, %v4716_v31 }
 0xa49   : > { %v11119_v32 = vpop.f32.mrf.mxu2 }
 0xa4a   : > { %v11121_v57 = vpop.f32.mrf.mxu3 }
 0xa4b   : > { %v4612_v20 = vpop.f32.mrf.mxu1 }
 0xa4c   : > { %v4718_v4 = vpop.f32.mrf.mxu0  ;;  %v4739_v38 = vpack.c.bf16 %v4612_v20, %v4612_v20 }
 0xa4d   : > { %v4755_v41 = vpack.c.bf16 %v4718_v4, %v4718_v4 }
 0xa4f   : > { %v5346_v44 = vunpack.c.l.b16 %v4755_v41  ;;  %v4730_v41 = vpack.c.bf16 %v11119_v32, %v11119_v32 }
 0xa51   : > { %v4559_v24 = vpop.f32.mrf.mxu2  ;;  %v5066_v4 = vunpack.c.l.b16 %v4730_v41 }
 0xa52   : > { %v4665_v48 = vpop.f32.mrf.mxu3 }
 0xa53   : > { %v4615_v33 = vpop.f32.mrf.mxu1 }
 0xa54   : > { %v4721_v45 = vpop.f32.mrf.mxu0  ;;  %v4740_v62 = vpack.c.bf16 %v4615_v33, %v4615_v33  ;;  %v5160_v33 = vunpack.c.l.b16 %v4739_v38 }
 0xa55   : > { %v4756_v7 = vpack.c.bf16 %v4721_v45, %v4721_v45 }
 0xa56   : > { %v5161_v56 = vunpack.c.l.b16 %v4740_v62  ;;  %v4731_v62 = vpack.c.bf16 %v4559_v24, %v4559_v24 }
 0xa57   : > { %v5347_v49 = vunpack.c.l.b16 %v4756_v7  ;;  %v5159_v7 = vunpack.c.l.b16 %v4738_v53  ;;  %v4753_v53 = vpack.c.bf16 %v11113_v37, %v11113_v37 }
 0xa59   : > { %v4562_v52 = vpop.f32.mrf.mxu2  ;;  %v5165_v38 = vpack.c.b16 %v5160_v33, %v5159_v7 }
 0xa5a   : > { %v4668_v17 = vpop.f32.mrf.mxu3  ;;  %v4732_v1 = vpack.c.bf16 %v4562_v52, %v4562_v52 }
 0xa5b   : > { %v4617_v19 = vpop.f32.mrf.mxu1  ;;  %v4748_v29 = vpack.c.bf16 %v4668_v17, %v4668_v17  ;;  %v5345_v17 = vunpack.c.l.b16 %v4754_v63  ;;  %v5067_v63 = vunpack.c.l.b16 %v4731_v62  ;;  %v4745_v62 = vpack.c.bf16 %v11117_v12, %v11117_v12 }
 0xa5c   : > { %v4741_v40 = vpack.c.bf16 %v4617_v19, %v4617_v19  ;;  %v4723_v26 = vpop.f32.mrf.mxu0  ;;  %v5068_v52 = vunpack.c.l.b16 %v4732_v1  ;;  %v4746_v1 = vpack.c.bf16 %v11121_v57, %v11121_v57 }
 0xa5d   : > { %v4757_v2 = vpack.c.bf16 %v4723_v26, %v4723_v26 }
 0xa5e   : > { %v5162_v22 = vunpack.c.l.b16 %v4741_v40  ;;  %v5252_v24 = vunpack.c.l.b16 %v4746_v1 }
 0xa5f   : > { %v5348_v5 = vunpack.c.l.b16 %v4757_v2 }
 0xa60   : > { %v5166_v55 = vpack.c.b16 %v5162_v22, %v5161_v56 }
 0xa61   : > { %v5352_v60 = vpack.c.b16 %v5348_v5, %v5347_v49  ;;  %v4564_v14 = vpop.f32.mrf.mxu2  ;;  %v4747_v5 = vpack.c.bf16 %v4665_v48, %v4665_v48  ;;  %v4736_v48 = vpack.c.bf16 %v11103_v3, %v11103_v3  ;;  %v5344_v3 = vunpack.c.l.b16 %v4753_v53 }
 0xa62   : > { %v4733_v61 = vpack.c.bf16 %v4564_v14, %v4564_v14  ;;  %v4670_v45 = vpop.f32.mrf.mxu3  ;;  %v5189_v19 = vsel %vm2365_vm15, %v5166_v55, 0  ;;  %v5254_v14 = vunpack.c.l.b16 %v4748_v29  ;;  %v4737_v55 = vpack.c.bf16 %v11111_v0, %v11111_v0 }
 0xa63   : > { %v4749_v26 = vpack.c.bf16 %v4670_v45, %v4670_v45  ;;  %v11124_v20 = vpop.f32.mrf.mxu1  ;;  %5195 = vmatpush.bf16.xpose.msra.mxu1 %v5189_v19  ;;  %v5375_v40 = vsel %vm2365_vm15, %v5352_v60, 0  ;;  %v5351_v60 = vpack.c.b16 %v5346_v44, %v5345_v17  ;;  %v4752_v0 = vpack.c.bf16 %v11105_v6, %v11105_v6 }
 0xa64   : > { %v5069_v2 = vunpack.c.l.b16 %v4733_v61  ;;  %v11127_v22 = vpop.f32.mrf.mxu0  ;;  %5381 = vmatpush.bf16.xpose.msrb.mxu0 %v5375_v40  ;;  %v5253_v21 = vunpack.c.l.b16 %v4747_v5  ;;  %v5158_v32 = vunpack.c.l.b16 %v4737_v55  ;;  %v5186_v44 = vsel %vm2365_vm15, %v5165_v38, 0 }
 0xa65   : > { %v5255_v49 = vunpack.c.l.b16 %v4749_v26  ;;  %v5372_v6 = vsel %vm2365_vm15, %v5351_v60, 0  ;;  %v5157_v45 = vunpack.c.l.b16 %v4736_v48  ;;  %v4729_v19 = vpack.c.bf16 %v11115_v11, %v11115_v11 }
 0xa66   : > { %v5073_v56 = vpack.c.b16 %v5069_v2, %v5068_v52  ;;  %v5072_v40 = vpack.c.b16 %v5067_v63, %v5066_v4  ;;  %v5343_v7 = vunpack.c.l.b16 %v4752_v0  ;;  %v5258_v52 = vpack.c.b16 %v5253_v21, %v5252_v24 }
 0xa67   : > { %v5259_v61 = vpack.c.b16 %v5255_v49, %v5254_v14  ;;  %v4735_v2 = vpack.c.bf16 %v11095_v25, %v11095_v25  ;;  %v4728_v17 = vpack.c.bf16 %v11107_v58, %v11107_v58  ;;  %v5164_v5 = vpack.c.b16 %v5158_v32, %v5157_v45 }
 0xa68   : > { %v5096_v29 = vsel %vm2365_vm15, %v5073_v56, 0  ;;  %v4751_v14 = vpack.c.bf16 %v11097_v36, %v11097_v36  ;;  %v4744_v11 = vpack.c.bf16 %v11109_v28, %v11109_v28  ;;  %v5350_v49 = vpack.c.b16 %v5344_v3, %v5343_v7 }
 0xa69   : > { %v11142_v31 = vpop.f32.mrf.mxu2  ;;  %5102 = vmatpush.bf16.xpose.msra.mxu2 %v5096_v29  ;;  %v5282_v37 = vsel %vm2365_vm15, %v5259_v61, 0  ;;  %v4734_v55 = vpack.c.bf16 %v11087_v43, %v11087_v43  ;;  %v5065_v41 = vunpack.c.l.b16 %v4729_v19  ;;  %v5093_v12 = vsel %vm2365_vm15, %v5072_v40, 0 }
 0xa6a   : > { %v11145_v57 = vpop.f32.mrf.mxu3  ;;  %5288 = vmatpush.bf16.xpose.msra.mxu3 %v5282_v37  ;;  %v4750_v25 = vpack.c.bf16 %v11089_v34, %v11089_v34  ;;  %v5251_v56 = vunpack.c.l.b16 %v4745_v62  ;;  %v5279_v58 = vsel %vm2365_vm15, %v5258_v52, 0  ;;  %v5156_v36 = vunpack.c.l.b16 %v4735_v2 }
 0xa6b   : > { %v11148_v33 = vpop.f32.mrf.mxu1  ;;  %5196 = vmatpush.bf16.xpose.msra.mxu1 %v5186_v44  ;;  %v5064_v53 = vunpack.c.l.b16 %v4728_v17  ;;  %v5183_v28 = vsel %vm2365_vm15, %v5164_v5, 0  ;;  %v5342_v43 = vunpack.c.l.b16 %v4751_v14  ;;  %v5250_v61 = vunpack.c.l.b16 %v4744_v11 }
 0xa6c   : > { %v11153_v26 = vpop.f32.mrf.mxu0  ;;  %5382 = vmatpush.bf16.xpose.msrb.mxu0 %v5372_v6  ;;  %v5369_v34 = vsel %vm2365_vm15, %v5350_v49, 0  ;;  %v5155_v48 = vunpack.c.l.b16 %v4734_v55  ;;  %v4727_v63 = vpack.c.bf16 %v11099_v59, %v11099_v59  ;;  %v5341_v21 = vunpack.c.l.b16 %v4750_v25 }
 0xa6d   : > { %v5071_v0 = vpack.c.b16 %v5065_v41, %v5064_v53  ;;  %v4743_v37 = vpack.c.bf16 %v11101_v54, %v11101_v54  ;;  %v5257_v32 = vpack.c.b16 %v5251_v56, %v5250_v61  ;;  %v4726_v4 = vpack.c.bf16 %v11091_v18, %v11091_v18 }
 0xa6e   : > { %v5163_v44 = vpack.c.b16 %v5156_v36, %v5155_v48  ;;  %v4742_v3 = vpack.c.bf16 %v11093_v39, %v11093_v39  ;;  %v5349_v24 = vpack.c.b16 %v5342_v43, %v5341_v21  ;;  %v4459_v59 = vpack.c.bf16 %v10999_v42, %v10999_v42 }
 0xa6f   : > { %v5063_v6 = vunpack.c.l.b16 %v4727_v63  ;;  %v5090_v45 = vsel %vm2365_vm15, %v5071_v0, 0  ;;  %v4475_v19 = vpack.c.bf16 %v11001_v13, %v11001_v13  ;;  %v5249_v40 = vunpack.c.l.b16 %v4743_v37 }
 0xa70   : > { %v5276_v18 = vsel %vm2365_vm15, %v5257_v32, 0  ;;  %v4458_v7 = vpack.c.bf16 %v10991_v10, %v10991_v10  ;;  %v5062_v39 = vunpack.c.l.b16 %v4726_v4  ;;  %v5180_v42 = vsel %vm2365_vm15, %v5163_v44, 0 }
 0xa71   : > { %v11170_v38 = vpop.f32.mrf.mxu2  ;;  %5103 = vmatpush.bf16.xpose.msra.mxu2 %v5093_v12  ;;  %v4474_v52 = vpack.c.bf16 %v10993_v23, %v10993_v23  ;;  %v5248_v2 = vunpack.c.l.b16 %v4742_v3  ;;  %v5366_v17 = vsel %vm2365_vm15, %v5349_v24, 0  ;;  %v5136_v5 = vunpack.c.l.b16 %v4459_v59 }
 0xa72   : > { %v11173_v1 = vpop.f32.mrf.mxu3  ;;  %5289 = vmatpush.bf16.xpose.msra.mxu3 %v5279_v58  ;;  %v5070_v10 = vpack.c.b16 %v5063_v6, %v5062_v39  ;;  %v5322_v11 = vunpack.c.l.b16 %v4475_v19  ;;  %v5135_v55 = vunpack.c.l.b16 %v4458_v7  ;;  %v4451_v41 = vpack.c.bf16 %v11011_v46, %v11011_v46  ;;  %v12404_v7 = vld [vmem:[#allocation41_spill] sm:$0xff] }
 0xa73   : > { %v11176_v60 = vpop.f32.mrf.mxu1  ;;  %5197 = vmatpush.bf16.xpose.msra.mxu1 %v5183_v28  ;;  %v5256_v49 = vpack.c.b16 %v5249_v40, %v5248_v2  ;;  %v5321_v12 = vunpack.c.l.b16 %v4474_v52  ;;  %v4467_v23 = vpack.c.bf16 %v11013_v30, %v11013_v30  ;;  %v4450_v25 = vpack.c.bf16 %v10995_v8, %v10995_v8  ;;  %v12405_v2 = vld [vmem:[#allocation48_spill] sm:$0xff] }
 0xa74   : > { %v11181_v29 = vpop.f32.mrf.mxu0  ;;  %5383 = vmatpush.bf16.xpose.msrb.mxu0 %v5369_v34  ;;  %v5143_v56 = vpack.c.b16 %v5136_v5, %v5135_v55  ;;  %v5087_v58 = vsel %vm2365_vm15, %v5070_v10, 0  ;;  %v4466_v36 = vpack.c.bf16 %v10997_v47, %v10997_v47  ;;  %v5043_v46 = vunpack.c.l.b16 %v4451_v41 }
 0xa75   : > { %v5329_v53 = vpack.c.b16 %v5322_v11, %v5321_v12  ;;  %v5273_v43 = vsel %vm2365_vm15, %v5256_v49, 0  ;;  %v5229_v30 = vunpack.c.l.b16 %v4467_v23  ;;  %v5042_v34 = vunpack.c.l.b16 %v4450_v25  ;;  %v12408_v49 = vld [vmem:[#allocation24_spill] sm:$0xff]  ;;  %v12409_v23 = vld [vmem:[#allocation45_spill] sm:$0xff] }
 0xa76   : > { %v5228_v47 = vunpack.c.l.b16 %v4466_v36  ;;  %v4461_v21 = vpack.c.bf16 %v11031_v35, %v11031_v35  ;;  %v4477_v37 = vpack.c.bf16 %v11033_v51, %v11033_v51  ;;  %v4460_v4 = vpack.c.bf16 %v11015_v15, %v11015_v15  ;;  %v12410_v36 = vld [vmem:[#allocation42_spill] sm:$0xff] }
 0xa77   : > { %v5050_v63 = vpack.c.b16 %v5043_v46, %v5042_v34  ;;  %v4476_v3 = vpack.c.bf16 %v11017_v50, %v11017_v50  ;;  %v4453_v51 = vpack.c.bf16 %v11035_v16, %v11035_v16  ;;  %v4469_v40 = vpack.c.bf16 %v11037_v9, %v11037_v9  ;;  %v12406_v9 = vld [vmem:[#allocation43_spill] sm:$0xff] }
 0xa78   : > { %v5236_v0 = vpack.c.b16 %v5229_v30, %v5228_v47  ;;  %v5138_v35 = vunpack.c.l.b16 %v4461_v21  ;;  %v5324_v6 = vunpack.c.l.b16 %v4477_v37  ;;  %v4452_v15 = vpack.c.bf16 %v11019_v27, %v11019_v27  ;;  %v12407_v27 = vld [vmem:[#allocation44_spill] sm:$0xff]  ;;  %v12412_v30 = vld [vmem:[#allocation47_spill] sm:$0xff] }
 0xa79   : > { %v11194_v54 = vpop.f32.mrf.mxu2  ;;  %5104 = vmatpush.bf16.xpose.msra.mxu2 %v5090_v45  ;;  %v5137_v45 = vunpack.c.l.b16 %v4460_v4  ;;  %v5323_v19 = vunpack.c.l.b16 %v4476_v3  ;;  %v4468_v50 = vpack.c.bf16 %v12404_v7, %v12404_v7  ;;  %v5045_v52 = vunpack.c.l.b16 %v4453_v51 }
 0xa7a   : > { %v11199_v62 = vpop.f32.mrf.mxu3  ;;  %5290 = vmatpush.bf16.xpose.msra.mxu3 %v5276_v18  ;;  %v5231_v16 = vunpack.c.l.b16 %v4469_v40  ;;  %v4479_v10 = vpack.c.bf16 %v12406_v9, %v12406_v9  ;;  %v4455_v11 = vpack.c.bf16 %v12407_v27, %v12407_v27  ;;  %v4471_v55 = vpack.c.bf16 %v12408_v49, %v12408_v49  ;;  %v12414_v40 = vld [vmem:[#allocation29_spill] sm:$0xff]  ;;  %v12415_v27 = vld [vmem:[#allocation26_spill] sm:$0xff] }
 0xa7b   : > { %v11204_v13 = vpop.f32.mrf.mxu1  ;;  %5198 = vmatpush.bf16.xpose.msra.mxu1 %v5180_v42  ;;  %v5144_v18 = vpack.c.b16 %v5138_v35, %v5137_v45  ;;  %v5330_v39 = vpack.c.b16 %v5324_v6, %v5323_v19  ;;  %v5044_v12 = vunpack.c.l.b16 %v4452_v15  ;;  %v4462_v25 = vpack.c.bf16 %v12409_v23, %v12409_v23  ;;  %v12413_v35 = vld [vmem:[#allocation25_spill] sm:$0xff]  ;;  %v12416_v49 = vld [vmem:[#allocation30_spill] sm:$0xff] }
 0xa7c   : > { %v11207_v14 = vpop.f32.mrf.mxu0  ;;  %5384 = vmatpush.bf16.xpose.msrb.mxu0 %v5366_v17  ;;  %v4463_v17 = vpack.c.bf16 %v12405_v2, %v12405_v2  ;;  %v4470_v34 = vpack.c.bf16 %v12412_v30, %v12412_v30  ;;  %v5326_v21 = vunpack.c.l.b16 %v4479_v10  ;;  %v11277_v37 = vunpack.c.l.b16 %v4455_v11 }
 0xa7d   : > { %v5051_v47 = vpack.c.b16 %v5045_v52, %v5044_v12  ;;  %v11279_v4 = vunpack.c.l.b16 %v4471_v55  ;;  %v5139_v3 = vunpack.c.l.b16 %v4462_v25  ;;  %v4464_v6 = vpack.c.bf16 %v12413_v35, %v12413_v35 }
 0xa7e   : > { %v11286_v19 = vunpack.c.l.b16 %v4470_v34  ;;  %v4465_v15 = vpack.c.bf16 %v12414_v40, %v12414_v40  ;;  %v4480_v11 = vpack.c.bf16 %v12415_v27, %v12415_v27  ;;  %v4481_v55 = vpack.c.bf16 %v12416_v49, %v12416_v49 }
 0xa7f   : > { %v11295_v10 = vunpack.c.l.b16 %v4464_v6  ;;  %v5010_v25 = vpack.c.bf16 %v11124_v20, %v11124_v20  ;;  %v5013_v30 = vpack.c.bf16 %v11204_v13, %v11204_v13  ;;  %v5002_v20 = vpack.c.bf16 %v11142_v31, %v11142_v31 }
 0xa80   : > { %v11301_v23 = vunpack.c.l.b16 %v4465_v15  ;;  %v5327_v49 = vunpack.c.l.b16 %v4480_v11 }
 0xa81   : > { %v11218_v28 = vpop.f32.mrf.mxu2  ;;  %5105 = vmatpush.bf16.xpose.msra.mxu2 %v5087_v58  ;;  %v5230_v58 = vunpack.c.l.b16 %v4468_v50  ;;  %v5914_v11 = vunpack.c.l.b16 %v5002_v20 }
 0xa82   : > { %v11221_v61 = vpop.f32.mrf.mxu3  ;;  %5291 = vmatpush.bf16.xpose.msra.mxu3 %v5273_v43  ;;  %8287 = vmatmul.msk.bf16.vlgmr.msra.gmra.mxu1 %vm2365_vm15, %v5143_v56  ;;  %v12411_v43 = vld [vmem:[#allocation46_spill] sm:$0xff] }
 0xa83   : > { %8295 = vmatmul.msk.bf16.vlgmr.msrb.gmra.mxu0 %vm2365_vm15, %v5329_v53  ;;  %v11225_v8 = vpop.f32.mrf.mxu1  ;;  %v4478_v53 = vpack.c.bf16 %v12410_v36, %v12410_v36  ;;  %v4454_v46 = vpack.c.bf16 %v12411_v43, %v12411_v43  ;;  %v5011_v36 = vpack.c.bf16 %v11148_v33, %v11148_v33 }
 0xa84   : > { %v11227_v48 = vpop.f32.mrf.mxu0  ;;  %v5014_v34 = vpack.c.bf16 %v11225_v8, %v11225_v8  ;;  %v5028_v8 = vpack.c.bf16 %v11181_v29, %v11181_v29 }
 0xa85   : > { %v5325_v45 = vunpack.c.l.b16 %v4478_v53  ;;  %v11284_v51 = vunpack.c.l.b16 %v4454_v46 }
 0xa87   : > { %v5331_v52 = vpack.c.b16 %v5326_v21, %v5325_v45  ;;  %v5052_v2 = vpack.c.b16 %v11277_v37, %v11284_v51  ;;  %v5029_v45 = vpack.c.bf16 %v11207_v14, %v11207_v14  ;;  %v5999_v51 = vunpack.c.l.b16 %v5010_v25 }
 0xa88   : > { %8283 = vmatmul.msk.bf16.vlgmr.msra.gmra.mxu2 %vm2365_vm15, %v5050_v63  ;;  %v5140_v63 = vunpack.c.l.b16 %v4463_v17  ;;  %v5238_v17 = vpack.c.b16 %v11279_v4, %v11286_v19 }
 0xa89   : > { %8291 = vmatmul.msk.bf16.vlgmr.msra.gmra.mxu3 %vm2365_vm15, %v5236_v0  ;;  %v11235_v32 = vpop.f32.mrf.mxu2  ;;  %v5237_v0 = vpack.c.b16 %v5231_v16, %v5230_v58 }
 0xa8a   : > { %v11239_v44 = vpop.f32.mrf.mxu3  ;;  %v5145_v7 = vpack.c.b16 %v5140_v63, %v5139_v3 }
 0xa8b   : > { %v11243_v24 = vpop.f32.mrf.mxu1 }
 0xa8c   : > { %v11245_v59 = vpop.f32.mrf.mxu0  ;;  %v5015_v58 = vpack.c.bf16 %v11243_v24, %v11243_v24  ;;  %v5027_v24 = vpack.c.bf16 %v11153_v26, %v11153_v26 }
 0xa8d   : > { %v5031_v53 = vpack.c.bf16 %v11245_v59, %v11245_v59  ;;  %v5012_v59 = vpack.c.bf16 %v11176_v60, %v11176_v60 }
 0xa8e   : > { %v6004_v3 = vunpack.c.l.b16 %v5015_v58  ;;  %v6172_v58 = vunpack.c.l.b16 %v5029_v45 }
 0xa8f   : > { %v6174_v40 = vunpack.c.l.b16 %v5031_v53  ;;  %v6001_v53 = vunpack.c.l.b16 %v5012_v59 }
 0xa91   : > { %v11255_v42 = vpop.f32.mrf.mxu2 }
 0xa92   : > { %v11259_v5 = vpop.f32.mrf.mxu3  ;;  %8288 = vmatmul.msk.bf16.gmra.mxu1 %vm2365_vm15, %v5144_v18  ;;  %v5007_v60 = vpack.c.bf16 %v11255_v42, %v11255_v42  ;;  %v5022_v42 = vpack.c.bf16 %v11239_v44, %v11239_v44  ;;  %v6000_v44 = vunpack.c.l.b16 %v5011_v36 }
 0xa93   : > { %8296 = vmatmul.msk.bf16.gmra.mxu0 %vm2365_vm15, %v5330_v39  ;;  %v4891_v41 = vpop.f32.mrf.mxu1  ;;  %v5023_v29 = vpack.c.bf16 %v11259_v5, %v11259_v5 }
 0xa94   : > { %v4997_v56 = vpop.f32.mrf.mxu0  ;;  %v5016_v50 = vpack.c.bf16 %v4891_v41, %v4891_v41  ;;  %v5919_v5 = vunpack.c.l.b16 %v5007_v60 }
 0xa95   : > { %v5032_v16 = vpack.c.bf16 %v4997_v56, %v4997_v56 }
 0xa96   : > { %v6005_v43 = vunpack.c.l.b16 %v5016_v50 }
 0xa98   : > { %8284 = vmatmul.msk.bf16.gmra.mxu2 %vm2365_vm15, %v5051_v47  ;;  %v6175_v47 = vunpack.c.l.b16 %v5032_v16 }
 0xa99   : > { %8292 = vmatmul.msk.bf16.gmra.mxu3 %vm2365_vm15, %v5237_v0  ;;  %v4838_v18 = vpop.f32.mrf.mxu2  ;;  %v5030_v0 = vpack.c.bf16 %v11227_v48, %v11227_v48  ;;  %v6002_v48 = vunpack.c.l.b16 %v5013_v30  ;;  %v5026_v30 = vpack.c.bf16 %v11127_v22, %v11127_v22 }
 0xa9a   : > { %v4944_v39 = vpop.f32.mrf.mxu3  ;;  %v5008_v33 = vpack.c.bf16 %v4838_v18, %v4838_v18  ;;  %v6003_v18 = vunpack.c.l.b16 %v5014_v34  ;;  %v5021_v34 = vpack.c.bf16 %v11221_v61, %v11221_v61  ;;  %v6170_v61 = vunpack.c.l.b16 %v5027_v24 }
 0xa9b   : > { %v4893_v9 = vpop.f32.mrf.mxu1  ;;  %v5024_v35 = vpack.c.bf16 %v4944_v39, %v4944_v39  ;;  %v6173_v39 = vunpack.c.l.b16 %v5030_v0  ;;  %v6008_v22 = vpack.c.b16 %v6002_v48, %v6001_v53  ;;  %v5020_v0 = vpack.c.bf16 %v11199_v62, %v11199_v62 }
 0xa9c   : > { %v5017_v12 = vpack.c.bf16 %v4893_v9, %v4893_v9  ;;  %v4999_v41 = vpop.f32.mrf.mxu0  ;;  %v5920_v16 = vunpack.c.l.b16 %v5008_v33  ;;  %v5006_v9 = vpack.c.bf16 %v11235_v32, %v11235_v32  ;;  %v6171_v32 = vunpack.c.l.b16 %v5028_v8  ;;  %v12419_v8 = vld [vmem:[#allocation27_spill] sm:$0xff] }
 0xa9d   : > { %v5033_v56 = vpack.c.bf16 %v4999_v41, %v4999_v41  ;;  %v6009_v41 = vpack.c.b16 %v6004_v3, %v6003_v18  ;;  %v6088_v33 = vunpack.c.l.b16 %v5022_v42  ;;  %v6169_v19 = vunpack.c.l.b16 %v5026_v30 }
 0xa9e   : > { %v6006_v46 = vunpack.c.l.b16 %v5017_v12  ;;  %v6178_v37 = vpack.c.b16 %v6172_v58, %v6171_v32  ;;  %v6087_v36 = vunpack.c.l.b16 %v5021_v34  ;;  %v5328_v24 = vunpack.c.l.b16 %v4481_v55  ;;  %v12418_v55 = vld [vmem:[#allocation49_spill] sm:$0xff] }
 0xa9f   : > { %v6176_v63 = vunpack.c.l.b16 %v5033_v56  ;;  %v5018_v3 = vpack.c.bf16 %v11145_v57, %v11145_v57  ;;  %v4456_v45 = vpack.c.bf16 %v12419_v8, %v12419_v8 }
 0xaa0   : > { %v6010_v21 = vpack.c.b16 %v6006_v46, %v6005_v43  ;;  %v5005_v43 = vpack.c.bf16 %v11218_v28, %v11218_v28  ;;  %v5004_v28 = vpack.c.bf16 %v11194_v54, %v11194_v54  ;;  %v5003_v54 = vpack.c.bf16 %v11170_v38, %v11170_v38 }
 0xaa1   : > { %v6180_v6 = vpack.c.b16 %v6176_v63, %v6175_v47  ;;  %v4840_v13 = vpop.f32.mrf.mxu2  ;;  %v6089_v47 = vunpack.c.l.b16 %v5023_v29  ;;  %v5918_v63 = vunpack.c.l.b16 %v5006_v9  ;;  %v6007_v38 = vpack.c.b16 %v6000_v44, %v5999_v51 }
 0xaa2   : > { %v5009_v26 = vpack.c.bf16 %v4840_v13, %v4840_v13  ;;  %v4946_v15 = vpop.f32.mrf.mxu3  ;;  %8289 = vmatmul.msk.bf16.gmra.mxu1 %vm2365_vm15, %v5145_v7  ;;  %v6090_v7 = vunpack.c.l.b16 %v5024_v35  ;;  %v5916_v25 = vunpack.c.l.b16 %v5004_v28  ;;  %v6177_v35 = vpack.c.b16 %v6170_v61, %v6169_v19 }
 0xaa3   : > { %v5025_v50 = vpack.c.bf16 %v4946_v15, %v4946_v15  ;;  %8297 = vmatmul.msk.bf16.gmra.mxu0 %vm2365_vm15, %v5331_v52  ;;  %6031 = vmatpush.bf16.msrb.mxu1 %v6010_v21  ;;  %v6179_v52 = vpack.c.b16 %v6174_v40, %v6173_v39  ;;  %v5924_v4 = vpack.c.b16 %v5919_v5, %v5918_v63  ;;  %v12417_v21 = vld [vmem:[#allocation32_spill] sm:$0xff]  ;;  %v5915_v31 = vunpack.c.l.b16 %v5003_v54 }
 0xaa4   : > { %v5921_v14 = vunpack.c.l.b16 %v5009_v26  ;;  %6201 = vmatpush.bf16.msra.mxu0 %v6180_v6  ;;  %v6094_v62 = vpack.c.b16 %v6089_v47, %v6088_v33  ;;  %v4457_v59 = vpack.c.bf16 %v12417_v21, %v12417_v21  ;;  %v4473_v6 = vpack.c.bf16 %v12418_v55, %v12418_v55  ;;  %v12420_v15 = vld [vmem:[#allocation28_spill] sm:$0xff] }
 0xaa5   : > { %v6091_v12 = vunpack.c.l.b16 %v5025_v50  ;;  %v5146_v40 = vpack.c.b16 %v11301_v23, %v11295_v10  ;;  %v4472_v48 = vpack.c.bf16 %v12420_v15, %v12420_v15  ;;  %v5332_v27 = vpack.c.b16 %v5328_v24, %v5327_v49 }
 0xaa6   : > { %v5925_v56 = vpack.c.b16 %v5921_v14, %v5920_v16  ;;  %v5049_v18 = vunpack.c.l.b16 %v4457_v59  ;;  %v6084_v60 = vunpack.c.l.b16 %v5018_v3  ;;  %v5235_v50 = vunpack.c.l.b16 %v4473_v6 }
 0xaa7   : > { %v6095_v46 = vpack.c.b16 %v6091_v12, %v6090_v7  ;;  %6032 = vmatpush.bf16.msrb.mxu1 %v6009_v41  ;;  %v5922_v39 = vpack.c.b16 %v5915_v31, %v5914_v11  ;;  %v5048_v29 = vunpack.c.l.b16 %v4456_v45  ;;  %v5234_v23 = vunpack.c.l.b16 %v4472_v48 }
 0xaa8   : > { %6202 = vmatpush.bf16.msra.mxu0 %v6179_v52  ;;  %8285 = vmatmul.msk.bf16.gmra.mxu2 %vm2365_vm15, %v5052_v2  ;;  %v5917_v2 = vunpack.c.l.b16 %v5005_v43 }
 0xaa9   : > { %8293 = vmatmul.msk.bf16.gmra.mxu3 %vm2365_vm15, %v5238_v17  ;;  %5946 = vmatpush.bf16.msrb.mxu2 %v5925_v56  ;;  %v5019_v17 = vpack.c.bf16 %v11173_v1, %v11173_v1  ;;  %v6086_v1 = vunpack.c.l.b16 %v5020_v0  ;;  %v5053_v16 = vpack.c.b16 %v5049_v18, %v5048_v29  ;;  %v5239_v14 = vpack.c.b16 %v5235_v50, %v5234_v23 }
 0xaaa   : > { %6116 = vmatpush.bf16.msrb.mxu3 %v6095_v46  ;;  %v5923_v13 = vpack.c.b16 %v5917_v2, %v5916_v25 }
 0xaab   : > { %6033 = vmatpush.bf16.msrb.mxu1 %v6008_v22  ;;  %v6085_v57 = vunpack.c.l.b16 %v5019_v17  ;;  %v6093_v26 = vpack.c.b16 %v6087_v36, %v6086_v1 }
 0xaac   : > { %6203 = vmatpush.bf16.msra.mxu0 %v6178_v37 }
 0xaad   : > { %5947 = vmatpush.bf16.msrb.mxu2 %v5924_v4  ;;  %v6092_v10 = vpack.c.b16 %v6085_v57, %v6084_v60 }
 0xaae   : > { %6117 = vmatpush.bf16.msrb.mxu3 %v6094_v62 }
 0xaaf   : > { %6034 = vmatpush.bf16.msrb.mxu1 %v6007_v38 }
 0xab0   : > { %6204 = vmatpush.bf16.msra.mxu0 %v6177_v35 }
 0xab1   : > { %5948 = vmatpush.bf16.msrb.mxu2 %v5923_v13 }
 0xab2   : > { %6118 = vmatpush.bf16.msrb.mxu3 %v6093_v26  ;;  %8290 = vmatmul.msk.bf16.gmra.mxu1 %vm2365_vm15, %v5146_v40 }
 0xab3   : > { %8298 = vmatmul.msk.bf16.gmra.mxu0 %vm2365_vm15, %v5332_v27 }
 0xab5   : > { %5949 = vmatpush.bf16.msrb.mxu2 %v5922_v39 }
 0xab6   : > { %6119 = vmatpush.bf16.msrb.mxu3 %v6092_v10 }
 0xab8   : > { %8286 = vmatmul.msk.bf16.gmra.mxu2 %vm2365_vm15, %v5053_v16 }
 0xab9   : > { %8294 = vmatmul.msk.bf16.gmra.mxu3 %vm2365_vm15, %v5239_v14 }
 0xaff   : > { %v11384_v9 = vpop.f32.mrf.mxu1 }
 0xb00   : > { %v11386_v7 = vpop.f32.mrf.mxu0  ;;  %v5430_v12 = vsel %vm946_vm0, %v11384_v9, -inf }
 0xb01   : > { %v5478_v41 = vsel %vm946_vm0, %v11386_v7, -inf  ;;  %5431 = vmax.xlane.f32.xlu1 %v5430_v12 }
 0xb02   : > { %5479 = vmax.xlane.f32.xlu2 %v5478_v41 }
 0xb07   : > { %v11392_v58 = vpop.f32.mrf.mxu1 }
 0xb08   : > { %v11394_v42 = vpop.f32.mrf.mxu0  ;;  %v5433_v56 = vsel %vm946_vm0, %v11392_v58, -inf }
 0xb09   : > { %v5481_v52 = vsel %vm946_vm0, %v11394_v42, -inf }
 0xb0a   : > { %5482 = vmax.xlane.f32.xlu0 %v5481_v52  ;;  %5434 = vmax.xlane.f32.xlu2 %v5433_v56 }
 0xb0b   : > { %v11400_v53 = vpop.f32.mrf.mxu2 }
 0xb0c   : > { %v11402_v43 = vpop.f32.mrf.mxu3  ;;  %v5406_v32 = vsel %vm946_vm0, %v11400_v53, -inf }
 0xb0d   : > { %v5454_v30 = vsel %vm946_vm0, %v11402_v43, -inf }
 0xb0f   : > { %v11404_v5 = vpop.f32.mrf.mxu1 }
 0xb10   : > { %v11406_v46 = vpop.f32.mrf.mxu0  ;;  %v5436_v61 = vsel %vm946_vm0, %v11404_v5, -inf }
 0xb11   : > { %v5484_v59 = vsel %vm946_vm0, %v11406_v46, -inf }
 0xb12   : > { %5455 = vmax.xlane.f32.xlu2 %v5454_v30  ;;  %5407 = vmax.xlane.f32.xlu0 %v5406_v32 }
 0xb13   : > { %v11412_v34 = vpop.f32.mrf.mxu2 }
 0xb14   : > { %v11414_v47 = vpop.f32.mrf.mxu3  ;;  %v5409_v44 = vsel %vm946_vm0, %v11412_v34, -inf }
 0xb15   : > { %5410 = vmax.xlane.f32.xlu1 %v5409_v44  ;;  %v5457_v51 = vsel %vm946_vm0, %v11414_v47, -inf }
 0xb17   : > { %v11420_v63 = vpop.f32.mrf.mxu1 }
 0xb18   : > { %v11418_v28 = vpop.f32.mrf.mxu0  ;;  %v5439_v37 = vsel %vm946_vm0, %v11420_v63, -inf }
 0xb19   : > { %v5487_v22 = vsel %vm946_vm0, %v11418_v28, -inf }
 0xb1a   : > { %5488 = vmax.xlane.f32.xlu2 %v5487_v22  ;;  %5437 = vmax.xlane.f32.xlu0 %v5436_v61 }
 0xb1b   : > { %v11426_v0 = vpop.f32.mrf.mxu2 }
 0xb1c   : > { %v11428_v33 = vpop.f32.mrf.mxu3  ;;  %v5412_v17 = vsel %vm946_vm0, %v11426_v0, -inf }
 0xb1d   : > { %5440 = vmax.xlane.f32.xlu1 %v5439_v37  ;;  %v5460_v4 = vsel %vm946_vm0, %v11428_v33, -inf }
 0xb1f   : > { %v11454_v38 = vpop.f32.mrf.mxu1 }
 0xb20   : > { %v5442_v3 = vsel %vm946_vm0, %v11454_v38, -inf  ;;  %v11462_v1 = vpop.f32.mrf.mxu0 }
 0xb21   : > { %v5490_v48 = vsel %vm946_vm0, %v11462_v1, -inf }
 0xb22   : > { %5458 = vmax.xlane.f32.xlu0 %v5457_v51 }
 0xb23   : > { %v11434_v54 = vpop.f32.mrf.mxu2 }
 0xb24   : > { %v11436_v2 = vpop.f32.mrf.mxu3  ;;  %v5415_v62 = vsel %vm946_vm0, %v11434_v54, -inf }
 0xb25   : > { %v5463_v19 = vsel %vm946_vm0, %v11436_v2, -inf  ;;  %5461 = vmax.xlane.f32.xlu1 %v5460_v4 }
 0xb26   : > { %5464 = vmax.xlane.f32.xlu2 %v5463_v19 }
 0xb27   : > { %v11472_v31 = vpop.f32.mrf.mxu1 }
 0xb28   : > { %v11474_v13 = vpop.f32.mrf.mxu0  ;;  %v5445_v8 = vsel %vm946_vm0, %v11472_v31, -inf }
 0xb29   : > { %v5493_v57 = vsel %vm946_vm0, %v11474_v13, -inf }
 0xb2a   : > { %5413 = vmax.xlane.f32.xlu0 %v5412_v17 }
 0xb2b   : > { %v11444_v36 = vpop.f32.mrf.mxu2 }
 0xb2c   : > { %v5418_v24 = vsel %vm946_vm0, %v11444_v36, -inf  ;;  %v11450_v20 = vpop.f32.mrf.mxu3 }
 0xb2d   : > { %5416 = vmax.xlane.f32.xlu1 %v5415_v62  ;;  %v5466_v25 = vsel %vm946_vm0, %v11450_v20, -inf }
 0xb2e   : > { %5419 = vmax.xlane.f32.xlu2 %v5418_v24 }
 0xb2f   : > { %v11486_v15 = vpop.f32.mrf.mxu1 }
 0xb30   : > { %v11496_v60 = vpop.f32.mrf.mxu0  ;;  %v5448_v29 = vsel %vm946_vm0, %v11486_v15, -inf }
 0xb31   : > { %v5496_v16 = vsel %vm946_vm0, %v11496_v60, -inf }
 0xb32   : > { %5467 = vmax.xlane.f32.xlu0 %v5466_v25 }
 0xb33   : > { %v11456_v21 = vpop.f32.mrf.mxu2 }
 0xb34   : > { %v11464_v35 = vpop.f32.mrf.mxu3  ;;  %v5421_v49 = vsel %vm946_vm0, %v11456_v21, -inf }
 0xb35   : > { %5485 = vmax.xlane.f32.xlu1 %v5484_v59  ;;  %v5469_v6 = vsel %vm946_vm0, %v11464_v35, -inf }
 0xb36   : > { %5443 = vmax.xlane.f32.xlu2 %v5442_v3 }
 0xb37   : > { %v11498_v50 = vpop.f32.mrf.mxu1 }
 0xb38   : > { %v5451_v10 = vsel %vm946_vm0, %v11498_v50, -inf  ;;  %v11506_v23 = vpop.f32.mrf.mxu0 }
 0xb39   : > { %v5499_v14 = vsel %vm946_vm0, %v11506_v23, -inf }
 0xb3a   : > { %5422 = vmax.xlane.f32.xlu0 %v5421_v49 }
 0xb3b   : > { %v11468_v55 = vpop.f32.mrf.mxu2 }
 0xb3c   : > { %v11480_v40 = vpop.f32.mrf.mxu3  ;;  %v5424_v27 = vsel %vm946_vm0, %v11468_v55, -inf }
 0xb3d   : > { %5470 = vmax.xlane.f32.xlu1 %v5469_v6  ;;  %v5472_v11 = vsel %vm946_vm0, %v11480_v40, -inf }
 0xb42   : > { %5446 = vmax.xlane.f32.xlu0 %v5445_v8 }
 0xb43   : > { %v11478_v45 = vpop.f32.mrf.mxu2 }
 0xb44   : > { %v5427_v26 = vsel %vm946_vm0, %v11478_v45, -inf  ;;  %v11494_v18 = vpop.f32.mrf.mxu3 }
 0xb45   : > { %5494 = vmax.xlane.f32.xlu1 %v5493_v57  ;;  %5428 = vmax.xlane.f32.xlu2 %v5427_v26  ;;  %v5475_v39 = vsel %vm946_vm0, %v11494_v18, -inf }
 0xb4a   : > { %5491 = vmax.xlane.f32.xlu0 %v5490_v48 }
 0xb4d   : > { %5425 = vmax.xlane.f32.xlu1 %v5424_v27  ;;  %5473 = vmax.xlane.f32.xlu2 %v5472_v11 }
 0xb52   : > { %5476 = vmax.xlane.f32.xlu0 %v5475_v39 }
 0xb55   : > { %5449 = vmax.xlane.f32.xlu1 %v5448_v29  ;;  %5452 = vmax.xlane.f32.xlu2 %v5451_v10 }
 0xb5a   : > { %5497 = vmax.xlane.f32.xlu0 %v5496_v16 }
 0xb5d   : > { %5500 = vmax.xlane.f32.xlu1 %v5499_v14 }
 0xb74   : > { %v11512_v12 = vpop.xlane.xlu1 %5431 }
 0xb75   : > { %v11514_v41 = vpop.xlane.xlu2 %5479  ;;  %v5606_v56 = vsub.f32 %v11384_v9, %v11512_v12 }
 0xb76   : > { %v5622_v52 = vsub.f32 %v11386_v7, %v11514_v41 }
 0xb77   : > { %v5646_v32 = vmul.f32 1.442695, %v5606_v56 }
 0xb78   : > { %v5678_v30 = vmul.f32 1.442695, %v5622_v52 }
 0xb7a   : > { %8975 = vpow2.f32 %v5678_v30 }
 0xb7b   : > { %8977 = vpow2.f32 %v5646_v32 }
 0xb7d   : > { %v11520_v44 = vpop.xlane.xlu0 %5482  ;;  %v11522_v22 = vpop.xlane.xlu2 %5434 }
 0xb7e   : > { %v5623_v61 = vsub.f32 %v11394_v42, %v11520_v44  ;;  %v5607_v37 = vsub.f32 %v11392_v58, %v11522_v22 }
 0xb80   : > { %v5680_v51 = vmul.f32 1.442695, %v5623_v61  ;;  %v8976_v4 = vpop.eup %8975  ;;  %v5648_v9 = vmul.f32 1.442695, %v5607_v37 }
 0xb81   : > { %v8978_v19 = vpop.eup %8977  ;;  %v5798_v7 = vsel %vm946_vm0, %v8976_v4, 0.0  ;;  %v5878_v25 = vpack.c.bf16 %v8976_v4, %v8976_v4 }
 0xb82   : > { %8979 = vpow2.f32 %v5680_v51  ;;  %v5750_v17 = vsel %vm946_vm0, %v8978_v19, 0.0  ;;  %5799 = vadd.xlane.f32.xlu2 %v5798_v7  ;;  %v5862_v57 = vpack.c.bf16 %v8978_v19, %v8978_v19 }
 0xb83   : > { %5751 = vadd.xlane.f32.xlu0 %v5750_v17  ;;  %8981 = vpow2.f32 %v5648_v9 }
 0xb84   : > { %v5979_v16 = vunpack.c.l.b16 %v5862_v57 }
 0xb85   : > { %v11530_v62 = vpop.xlane.xlu2 %5455  ;;  %v11532_v24 = vpop.xlane.xlu0 %5407 }
 0xb86   : > { %v5614_v42 = vsub.f32 %v11402_v43, %v11530_v62  ;;  %v5598_v58 = vsub.f32 %v11400_v53, %v11532_v24  ;;  %v6149_v43 = vunpack.c.l.b16 %v5878_v25 }
 0xb88   : > { %v5662_v59 = vmul.f32 1.442695, %v5614_v42  ;;  %v11538_v3 = vpop.xlane.xlu1 %5410  ;;  %v8980_v49 = vpop.eup %8979  ;;  %v5630_v6 = vmul.f32 1.442695, %v5598_v58 }
 0xb89   : > { %v5599_v8 = vsub.f32 %v11412_v34, %v11538_v3  ;;  %v5879_v26 = vpack.c.bf16 %v8980_v49, %v8980_v49  ;;  %v5801_v48 = vsel %vm946_vm0, %v8980_v49, 0.0  ;;  %v8982_v27 = vpop.eup %8981 }
 0xb8a   : > { %8983 = vpow2.f32 %v5662_v59  ;;  %v5863_v29 = vpack.c.bf16 %v8982_v27, %v8982_v27  ;;  %v5753_v53 = vsel %vm946_vm0, %v8982_v27, 0.0 }
 0xb8b   : > { %v5632_v11 = vmul.f32 1.442695, %v5599_v8  ;;  %v6150_v39 = vunpack.c.l.b16 %v5879_v26  ;;  %5802 = vadd.xlane.f32.xlu0 %v5801_v48  ;;  %8985 = vpow2.f32 %v5630_v6  ;;  %5754 = vadd.xlane.f32.xlu1 %v5753_v53 }
 0xb8c   : > { %v5980_v34 = vunpack.c.l.b16 %v5863_v29 }
 0xb8d   : > { %v11544_v10 = vpop.xlane.xlu0 %5437  ;;  %v6157_v14 = vpack.c.b16 %v6150_v39, %v6149_v43  ;;  %8987 = vpow2.f32 %v5632_v11  ;;  %v11551_v61 = vpop.xlane.xlu2 %5488 }
 0xb8e   : > { %v5608_v56 = vsub.f32 %v11404_v5, %v11544_v10  ;;  %v5987_v52 = vpack.c.b16 %v5980_v34, %v5979_v16 }
 0xb8f   : > { %8311 = vmatmul.msk.bf16.vlgmr.msra.gmra.mxu0 %vm946_vm0, %v6157_v14 }
 0xb90   : > { %v11549_v30 = vpop.xlane.xlu1 %5440  ;;  %v8984_v32 = vpop.eup %8983  ;;  %v5650_v37 = vmul.f32 1.442695, %v5608_v56  ;;  %8303 = vmatmul.msk.bf16.vlgmr.msrb.gmra.mxu1 %vm946_vm0, %v5987_v52 }
 0xb91   : > { %v5609_v51 = vsub.f32 %v11420_v63, %v11549_v30  ;;  %v5774_v4 = vsel %vm946_vm0, %v8984_v32, 0.0  ;;  %v8986_v9 = vpop.eup %8985  ;;  %v5870_v34 = vpack.c.bf16 %v8984_v32, %v8984_v32 }
 0xb92   : > { %v5854_v7 = vpack.c.bf16 %v8986_v9, %v8986_v9  ;;  %8989 = vpow2.f32 %v5650_v37  ;;  %v5726_v17 = vsel %vm946_vm0, %v8986_v9, 0.0 }
 0xb93   : > { %v5652_v19 = vmul.f32 1.442695, %v5609_v51  ;;  %v8988_v5 = vpop.eup %8987  ;;  %5775 = vadd.xlane.f32.xlu1 %v5774_v4  ;;  %5727 = vadd.xlane.f32.xlu2 %v5726_v17  ;;  %v6064_v17 = vunpack.c.l.b16 %v5870_v34 }
 0xb94   : > { %v5855_v58 = vpack.c.bf16 %v8988_v5, %v8988_v5  ;;  %v5729_v25 = vsel %vm946_vm0, %v8988_v5, 0.0  ;;  %v5894_v59 = vunpack.c.l.b16 %v5854_v7 }
 0xb95   : > { %v11558_v42 = vpop.xlane.xlu0 %5458  ;;  %8991 = vpow2.f32 %v5652_v19  ;;  %5730 = vadd.xlane.f32.xlu0 %v5729_v25 }
 0xb96   : > { %v5615_v63 = vsub.f32 %v11414_v47, %v11558_v42  ;;  %v5895_v49 = vunpack.c.l.b16 %v5855_v58 }
 0xb98   : > { %v11563_v6 = vpop.xlane.xlu1 %5461  ;;  %v5664_v8 = vmul.f32 1.442695, %v5615_v63  ;;  %v5902_v48 = vpack.c.b16 %v5895_v49, %v5894_v59  ;;  %v8990_v27 = vpop.eup %8989 }
 0xb99   : > { %v11565_v57 = vpop.xlane.xlu2 %5464  ;;  %v5616_v26 = vsub.f32 %v11428_v33, %v11563_v6  ;;  %v5756_v43 = vsel %vm946_vm0, %v8990_v27, 0.0  ;;  %v5864_v53 = vpack.c.bf16 %v8990_v27, %v8990_v27 }
 0xb9a   : > { %8993 = vpow2.f32 %v5664_v8  ;;  %8299 = vmatmul.msk.bf16.vlgmr.msrb.gmra.mxu2 %vm946_vm0, %v5902_v48  ;;  %v5617_v39 = vsub.f32 %v11436_v2, %v11565_v57 }
 0xb9b   : > { %v5666_v11 = vmul.f32 1.442695, %v5616_v26  ;;  %v8992_v47 = vpop.eup %8991  ;;  %5757 = vadd.xlane.f32.xlu2 %v5756_v43  ;;  %v5981_v7 = vunpack.c.l.b16 %v5864_v53 }
 0xb9c   : > { %v5865_v16 = vpack.c.bf16 %v8992_v47, %v8992_v47  ;;  %v5759_v14 = vsel %vm946_vm0, %v8992_v47, 0.0  ;;  %v5668_v4 = vmul.f32 1.442695, %v5617_v39 }
 0xb9d   : > { %v11573_v29 = vpop.xlane.xlu0 %5413  ;;  %8995 = vpow2.f32 %v5666_v11  ;;  %5760 = vadd.xlane.f32.xlu0 %v5759_v14 }
 0xb9e   : > { %v5600_v33 = vsub.f32 %v11426_v0, %v11573_v29  ;;  %v5982_v37 = vunpack.c.l.b16 %v5865_v16  ;;  %v5625_v0 = vsub.f32 %v11418_v28, %v11551_v61 }
 0xba0   : > { %v5634_v56 = vmul.f32 1.442695, %v5600_v33  ;;  %v11578_v52 = vpop.xlane.xlu1 %5416  ;;  %v8994_v51 = vpop.eup %8993  ;;  %v5988_v63 = vpack.c.b16 %v5982_v37, %v5981_v7 }
 0xba1   : > { %v5601_v2 = vsub.f32 %v11434_v54, %v11578_v52  ;;  %v5871_v9 = vpack.c.bf16 %v8994_v51, %v8994_v51  ;;  %v11582_v19 = vpop.xlane.xlu2 %5419  ;;  %v5777_v5 = vsel %vm946_vm0, %v8994_v51, 0.0  ;;  %v5684_v54 = vmul.f32 1.442695, %v5625_v0 }
 0xba2   : > { %8997 = vpow2.f32 %v5634_v56  ;;  %8304 = vmatmul.msk.bf16.gmra.mxu1 %vm946_vm0, %v5988_v63  ;;  %v5602_v48 = vsub.f32 %v11444_v36, %v11582_v19 }
 0xba3   : > { %v5636_v32 = vmul.f32 1.442695, %v5601_v2  ;;  %v6065_v58 = vunpack.c.l.b16 %v5871_v9  ;;  %8999 = vpow2.f32 %v5668_v4  ;;  %v8996_v59 = vpop.eup %8995  ;;  %5778 = vadd.xlane.f32.xlu2 %v5777_v5 }
 0xba4   : > { %v5780_v8 = vsel %vm946_vm0, %v8996_v59, 0.0  ;;  %v5638_v33 = vmul.f32 1.442695, %v5602_v48  ;;  %v5872_v56 = vpack.c.bf16 %v8996_v59, %v8996_v59 }
 0xba5   : > { %v11587_v25 = vpop.xlane.xlu0 %5467  ;;  %v6072_v49 = vpack.c.b16 %v6065_v58, %v6064_v17  ;;  %9001 = vpow2.f32 %v5636_v32  ;;  %5781 = vadd.xlane.f32.xlu0 %v5780_v8 }
 0xba6   : > { %9003 = vpow2.f32 %v5684_v54  ;;  %v5618_v14 = vsub.f32 %v11450_v20, %v11587_v25  ;;  %v6066_v17 = vunpack.c.l.b16 %v5872_v56 }
 0xba7   : > { %8307 = vmatmul.msk.bf16.vlgmr.msrb.gmra.mxu3 %vm946_vm0, %v6072_v49 }
 0xba8   : > { %v11592_v28 = vpop.xlane.xlu1 %5485  ;;  %v11594_v26 = vpop.eup %8997  ;;  %v5670_v0 = vmul.f32 1.442695, %v5618_v14 }
 0xba9   : > { %v5624_v27 = vsub.f32 %v11406_v46, %v11592_v28  ;;  %v11600_v11 = vpop.eup %8999  ;;  %v5856_v43 = vpack.c.bf16 %v11594_v26, %v11594_v26  ;;  %v11604_v53 = vpop.xlane.xlu2 %5443 }
 0xbaa   : > { %v5873_v46 = vpack.c.bf16 %v11600_v11, %v11600_v11  ;;  %v5610_v51 = vsub.f32 %v11454_v38, %v11604_v53 }
 0xbab   : > { %v5682_v47 = vmul.f32 1.442695, %v5624_v27  ;;  %v9002_v39 = vpop.eup %9001  ;;  %v5896_v4 = vunpack.c.l.b16 %v5856_v43 }
 0xbac   : > { %v5857_v16 = vpack.c.bf16 %v9002_v39, %v9002_v39  ;;  %v5735_v36 = vsel %vm946_vm0, %v9002_v39, 0.0  ;;  %v9004_v7 = vpop.eup %9003  ;;  %v6067_v58 = vunpack.c.l.b16 %v5873_v46  ;;  %v5654_v63 = vmul.f32 1.442695, %v5610_v51 }
 0xbad   : > { %v11608_v34 = vpop.xlane.xlu0 %5422  ;;  %9005 = vpow2.f32 %v5682_v47  ;;  %5736 = vadd.xlane.f32.xlu2 %v5735_v36  ;;  %v5881_v59 = vpack.c.bf16 %v9004_v7, %v9004_v7  ;;  %v5807_v48 = vsel %vm946_vm0, %v9004_v7, 0.0 }
 0xbae   : > { %v5603_v37 = vsub.f32 %v11456_v21, %v11608_v34  ;;  %v5897_v2 = vunpack.c.l.b16 %v5857_v16  ;;  %9007 = vpow2.f32 %v5638_v33  ;;  %v6073_v27 = vpack.c.b16 %v6067_v58, %v6066_v17 }
 0xbaf   : > { %v6152_v14 = vunpack.c.l.b16 %v5881_v59 }
 0xbb0   : > { %v5640_v9 = vmul.f32 1.442695, %v5603_v37  ;;  %v11617_v20 = vpop.xlane.xlu1 %5470  ;;  %v5903_v5 = vpack.c.b16 %v5897_v2, %v5896_v4 }
 0xbb1   : > { %v5619_v32 = vsub.f32 %v11464_v35, %v11617_v20 }
 0xbb2   : > { %9009 = vpow2.f32 %v5640_v9  ;;  %8300 = vmatmul.msk.bf16.gmra.mxu2 %vm946_vm0, %v5903_v5 }
 0xbb3   : > { %v5672_v21 = vmul.f32 1.442695, %v5619_v32  ;;  %v9006_v38 = vpop.eup %9005  ;;  %9011 = vpow2.f32 %v5670_v0  ;;  %v5732_v0 = vsel %vm946_vm0, %v11594_v26, 0.0 }
 0xbb4   : > { %v5880_v49 = vpack.c.bf16 %v9006_v38, %v9006_v38  ;;  %v5804_v8 = vsel %vm946_vm0, %v9006_v38, 0.0  ;;  %v11628_v47 = vpop.eup %9007 }
 0xbb5   : > { %v11622_v54 = vpop.xlane.xlu0 %5446  ;;  %9013 = vpow2.f32 %v5672_v21  ;;  %5805 = vadd.xlane.f32.xlu1 %v5804_v8  ;;  %5808 = vadd.xlane.f32.xlu2 %v5807_v48  ;;  %v5858_v4 = vpack.c.bf16 %v11628_v47, %v11628_v47 }
 0xbb6   : > { %v5611_v35 = vsub.f32 %v11472_v31, %v11622_v54  ;;  %9015 = vpow2.f32 %v5654_v63  ;;  %v6151_v43 = vunpack.c.l.b16 %v5880_v49 }
 0xbb7   : > { %8308 = vmatmul.msk.bf16.gmra.mxu3 %vm946_vm0, %v6073_v27  ;;  %v5898_v58 = vunpack.c.l.b16 %v5858_v4 }
 0xbb8   : > { %v5656_v39 = vmul.f32 1.442695, %v5611_v35  ;;  %v11631_v16 = vpop.xlane.xlu1 %5494  ;;  %v11633_v33 = vpop.xlane.xlu2 %5428  ;;  %v6158_v37 = vpack.c.b16 %v6152_v14, %v6151_v43 }
 0xbb9   : > { %v11635_v36 = vpop.eup %9009  ;;  %v5627_v31 = vsub.f32 %v11474_v13, %v11631_v16  ;;  %v5605_v56 = vsub.f32 %v11478_v45, %v11633_v33 }
 0xbba   : > { %v5859_v46 = vpack.c.bf16 %v11635_v36, %v11635_v36  ;;  %v9012_v51 = vpop.eup %9011  ;;  %9017 = vpow2.f32 %v5656_v39  ;;  %8312 = vmatmul.msk.bf16.gmra.mxu0 %vm946_vm0, %v6158_v37 }
 0xbbb   : > { %v5688_v2 = vmul.f32 1.442695, %v5627_v31  ;;  %v11645_v9 = vpop.eup %9013  ;;  %v5644_v5 = vmul.f32 1.442695, %v5605_v56  ;;  %v5874_v63 = vpack.c.bf16 %v9012_v51, %v9012_v51 }
 0xbbc   : > { %v11648_v7 = vpop.eup %9015  ;;  %v5899_v32 = vunpack.c.l.b16 %v5859_v46  ;;  %v5875_v45 = vpack.c.bf16 %v11645_v9, %v11645_v9 }
 0xbbd   : > { %v11650_v13 = vpop.xlane.xlu0 %5491  ;;  %5733 = vadd.xlane.f32.xlu1 %v5732_v0  ;;  %9019 = vpow2.f32 %v5688_v2  ;;  %v5866_v21 = vpack.c.bf16 %v11648_v7, %v11648_v7  ;;  %v6068_v56 = vunpack.c.l.b16 %v5874_v63 }
 0xbbe   : > { %v5626_v17 = vsub.f32 %v11462_v1, %v11650_v13  ;;  %v5904_v1 = vpack.c.b16 %v5899_v32, %v5898_v58  ;;  %9021 = vpow2.f32 %v5644_v5  ;;  %v6069_v43 = vunpack.c.l.b16 %v5875_v45 }
 0xbbf   : > { %v5983_v31 = vunpack.c.l.b16 %v5866_v21 }
 0xbc0   : > { %v5686_v38 = vmul.f32 1.442695, %v5626_v17  ;;  %v11660_v59 = vpop.xlane.xlu1 %5425  ;;  %v11662_v49 = vpop.xlane.xlu2 %5473  ;;  %v6074_v0 = vpack.c.b16 %v6069_v43, %v6068_v56 }
 0xbc1   : > { %v9018_v26 = vpop.eup %9017  ;;  %v5604_v8 = vsub.f32 %v11468_v55, %v11660_v59  ;;  %v5620_v48 = vsub.f32 %v11480_v40, %v11662_v49  ;;  %v5783_v40 = vsel %vm946_vm0, %v11600_v11, 0.0 }
 0xbc2   : > { %v5867_v35 = vpack.c.bf16 %v9018_v26, %v9018_v26  ;;  %v5765_v27 = vsel %vm946_vm0, %v9018_v26, 0.0  ;;  %9023 = vpow2.f32 %v5686_v38  ;;  %8301 = vmatmul.msk.bf16.gmra.mxu2 %vm946_vm0, %v5904_v1  ;;  %v5786_v26 = vsel %vm946_vm0, %v9012_v51, 0.0 }
 0xbc3   : > { %v5642_v39 = vmul.f32 1.442695, %v5604_v8  ;;  %5766 = vadd.xlane.f32.xlu2 %v5765_v27  ;;  %v5674_v14 = vmul.f32 1.442695, %v5620_v48  ;;  %v11670_v37 = vpop.eup %9019 }
 0xbc4   : > { %v5984_v46 = vunpack.c.l.b16 %v5867_v35  ;;  %v11678_v32 = vpop.eup %9021  ;;  %v5883_v45 = vpack.c.bf16 %v11670_v37, %v11670_v37 }
 0xbc5   : > { %v11672_v55 = vpop.xlane.xlu0 %5476  ;;  %9025 = vpow2.f32 %v5642_v39  ;;  %5784 = vadd.xlane.f32.xlu1 %v5783_v40  ;;  %v5861_v8 = vpack.c.bf16 %v11678_v32, %v11678_v32 }
 0xbc6   : > { %v5621_v4 = vsub.f32 %v11494_v18, %v11672_v55  ;;  %v5989_v2 = vpack.c.b16 %v5984_v46, %v5983_v31  ;;  %9027 = vpow2.f32 %v5674_v14  ;;  %v6154_v43 = vunpack.c.l.b16 %v5883_v45 }
 0xbc7   : > { %8309 = vmatmul.msk.bf16.gmra.mxu3 %vm946_vm0, %v6074_v0  ;;  %v5901_v56 = vunpack.c.l.b16 %v5861_v8 }
 0xbc8   : > { %v5676_v5 = vmul.f32 1.442695, %v5621_v4  ;;  %8305 = vmatmul.msk.bf16.gmra.mxu1 %vm946_vm0, %v5989_v2  ;;  %v11684_v17 = vpop.xlane.xlu1 %5449  ;;  %v11686_v11 = vpop.xlane.xlu2 %5452 }
 0xbc9   : > { %v9024_v58 = vpop.eup %9023  ;;  %v5612_v18 = vsub.f32 %v11486_v15, %v11684_v17  ;;  %v5613_v63 = vsub.f32 %v11498_v50, %v11686_v11  ;;  %v5762_v50 = vsel %vm946_vm0, %v11648_v7, 0.0 }
 0xbca   : > { %v5882_v21 = vpack.c.bf16 %v9024_v58, %v9024_v58  ;;  %v5810_v38 = vsel %vm946_vm0, %v9024_v58, 0.0  ;;  %9029 = vpow2.f32 %v5676_v5 }
 0xbcb   : > { %v5658_v48 = vmul.f32 1.442695, %v5612_v18  ;;  %5811 = vadd.xlane.f32.xlu0 %v5810_v38  ;;  %5787 = vadd.xlane.f32.xlu2 %v5786_v26  ;;  %v9026_v1 = vpop.eup %9025  ;;  %v5660_v35 = vmul.f32 1.442695, %v5613_v63 }
 0xbcc   : > { %v6153_v27 = vunpack.c.l.b16 %v5882_v21  ;;  %v5860_v15 = vpack.c.bf16 %v9026_v1, %v9026_v1  ;;  %v9028_v14 = vpop.eup %9027  ;;  %v5744_v58 = vsel %vm946_vm0, %v9026_v1, 0.0 }
 0xbcd   : > { %v11696_v39 = vpop.xlane.xlu0 %5497  ;;  %9031 = vpow2.f32 %v5658_v48  ;;  %5763 = vadd.xlane.f32.xlu1 %v5762_v50  ;;  %v5876_v40 = vpack.c.bf16 %v9028_v14, %v9028_v14 }
 0xbce   : > { %v5628_v51 = vsub.f32 %v11496_v60, %v11696_v39  ;;  %v6159_v31 = vpack.c.b16 %v6154_v43, %v6153_v27  ;;  %v5900_v46 = vunpack.c.l.b16 %v5860_v15  ;;  %9033 = vpow2.f32 %v5660_v35 }
 0xbcf   : > { %v5738_v60 = vsel %vm946_vm0, %v11628_v47, 0.0  ;;  %v6070_v21 = vunpack.c.l.b16 %v5876_v40  ;;  %v5789_v43 = vsel %vm946_vm0, %v11645_v9, 0.0  ;;  %v5747_v9 = vsel %vm946_vm0, %v11678_v32, 0.0 }
 0xbd0   : > { %v5690_v4 = vmul.f32 1.442695, %v5628_v51  ;;  %8313 = vmatmul.msk.bf16.gmra.mxu0 %vm946_vm0, %v6159_v31  ;;  %v11703_v2 = vpop.xlane.xlu1 %5500  ;;  %v9030_v0 = vpop.eup %9029  ;;  %v5905_v45 = vpack.c.b16 %v5901_v56, %v5900_v46  ;;  %v5813_v46 = vsel %vm946_vm0, %v11670_v37, 0.0  ;;  %v5526_v32 = vsub.f32 -inf, %v11514_v41 }
 0xbd1   : > { %v5629_v7 = vsub.f32 %v11506_v23, %v11703_v2  ;;  %v5877_v5 = vpack.c.bf16 %v9030_v0, %v9030_v0  ;;  %v5741_v23 = vsel %vm946_vm0, %v11635_v36, 0.0  ;;  %v5795_v15 = vsel %vm946_vm0, %v9030_v0, 0.0 }
 0xbd2   : > { %9035 = vpow2.f32 %v5690_v4  ;;  %8302 = vmatmul.msk.bf16.gmra.mxu2 %vm946_vm0, %v5905_v45  ;;  %v5792_v0 = vsel %vm946_vm0, %v9028_v14, 0.0  ;;  %v5527_v14 = vsub.f32 -inf, %v11520_v44  ;;  %v5502_v44 = vsub.f32 -inf, %v11532_v24 }
 0xbd3   : > { %v5692_v18 = vmul.f32 1.442695, %v5629_v7  ;;  %5739 = vadd.xlane.f32.xlu0 %v5738_v60  ;;  %5745 = vadd.xlane.f32.xlu2 %v5744_v58  ;;  %v9032_v63 = vpop.eup %9031  ;;  %v6071_v38 = vunpack.c.l.b16 %v5877_v5  ;;  %v5510_v60 = vsub.f32 -inf, %v11512_v12  ;;  %v5582_v58 = vmul.f32 1.442695, %v5526_v32 }
 0xbd4   : > { %v5868_v26 = vpack.c.bf16 %v9032_v63, %v9032_v63  ;;  %v9034_v8 = vpop.eup %9033  ;;  %v5768_v45 = vsel %vm946_vm0, %v9032_v63, 0.0  ;;  %v5511_v63 = vsub.f32 -inf, %v11522_v22  ;;  %v8623_v22 = vld [vmem:[%s12421_s1 + $0x10] sm:$0xff] }
 0xbd5   : > { %9037 = vpow2.f32 %v5692_v18  ;;  %5742 = vadd.xlane.f32.xlu1 %v5741_v23  ;;  %v6075_v48 = vpack.c.b16 %v6071_v38, %v6070_v21  ;;  %v5869_v47 = vpack.c.bf16 %v9034_v8, %v9034_v8  ;;  %v5771_v37 = vsel %vm946_vm0, %v9034_v8, 0.0  ;;  %v8621_v23 = vld [vmem:[%s12421_s1] sm:$0xff]  ;;  %v8622_v8 = vld [vmem:[%s12421_s1 + $0x8] sm:$0xff]  ;;  %6541 = vmatpush.bf16.msra.mxu3 %v8623_v22 }
 0xbd6   : > { %v5985_v35 = vunpack.c.l.b16 %v5868_v26  ;;  %v5550_v18 = vmul.f32 1.442695, %v5510_v60  ;;  %9039 = vpow2.f32 %v5582_v58  ;;  %v5584_v21 = vmul.f32 1.442695, %v5527_v14  ;;  %6407 = vmatpush.bf16.msra.mxu2 %v8621_v23  ;;  %6474 = vmatpush.bf16.msra.mxu1 %v8622_v8 }
 0xbd7   : > { %8310 = vmatmul.msk.bf16.gmra.mxu3 %vm946_vm0, %v6075_v48  ;;  %v5986_v27 = vunpack.c.l.b16 %v5869_v47  ;;  %v5552_v38 = vmul.f32 1.442695, %v5511_v63  ;;  %v8624_v48 = vld [vmem:[%s12421_s1 + $0x18] sm:$0xff]  ;;  %v5519_v22 = vsub.f32 -inf, %v11558_v42  ;;  %s12422_s1 = sld [smem:[#allocation15_spill]] }
 0xbd8   : > { %v9036_v1 = vpop.eup %9035  ;;  %9041 = vpow2.f32 %v5550_v18  ;;  %6608 = vmatpush.bf16.msrb.mxu0 %v8624_v48 }
 0xbd9   : > { %v5884_v50 = vpack.c.bf16 %v9036_v1, %v9036_v1  ;;  %v5990_v51 = vpack.c.b16 %v5986_v27, %v5985_v35  ;;  %v5816_v7 = vsel %vm946_vm0, %v9036_v1, 0.0  ;;  %9043 = vpow2.f32 %v5584_v21 }
 0xbda   : > { %9045 = vpow2.f32 %v5552_v38 }
 0xbdb   : > { %5790 = vadd.xlane.f32.xlu0 %v5789_v43  ;;  %5796 = vadd.xlane.f32.xlu2 %v5795_v15  ;;  %v9038_v36 = vpop.eup %9037  ;;  %v6155_v56 = vunpack.c.l.b16 %v5884_v50 }
 0xbdc   : > { %v5885_v31 = vpack.c.bf16 %v9038_v36, %v9038_v36  ;;  %8306 = vmatmul.msk.bf16.gmra.mxu1 %vm946_vm0, %v5990_v51  ;;  %v5819_v5 = vsel %vm946_vm0, %v9038_v36, 0.0  ;;  %v9040_v12 = vpop.eup %9039  ;;  %v5534_v51 = vmul.f32 1.442695, %v5502_v44  ;;  %v5503_v36 = vsub.f32 -inf, %v11538_v3 }
 0xbdd   : > { %5814 = vadd.xlane.f32.xlu1 %v5813_v46  ;;  %v5718_v35 = vmul.f32 0.0, %v9040_v12 }
 0xbde   : > { %v6156_v40 = vunpack.c.l.b16 %v5885_v31  ;;  %v9042_v41 = vpop.eup %9041 }
 0xbdf   : > { %v9044_v1 = vpop.eup %9043  ;;  %v5702_v27 = vmul.f32 0.0, %v9042_v41 }
 0xbe0   : > { %v6160_v4 = vpack.c.b16 %v6156_v40, %v6155_v56  ;;  %v9046_v50 = vpop.eup %9045  ;;  %v5719_v56 = vmul.f32 0.0, %v9044_v1  ;;  %v5512_v40 = vsub.f32 -inf, %v11544_v10  ;;  %v5518_v10 = vsub.f32 -inf, %v11530_v62 }
 0xbe1   : > { %v5703_v24 = vmul.f32 0.0, %v9046_v50 }
 0xbe2   : > { %8314 = vmatmul.msk.bf16.gmra.mxu0 %vm946_vm0, %v6160_v4  ;;  %v5554_v32 = vmul.f32 1.442695, %v5512_v40 }
 0xbe3   : > { %5817 = vadd.xlane.f32.xlu2 %v5816_v7  ;;  %5748 = vadd.xlane.f32.xlu0 %v5747_v9 }
 0xbe5   : > { %5793 = vadd.xlane.f32.xlu1 %v5792_v0  ;;  %v5536_v0 = vmul.f32 1.442695, %v5503_v36 }
 0xbeb   : > { %5769 = vadd.xlane.f32.xlu0 %v5768_v45  ;;  %v5513_v45 = vsub.f32 -inf, %v11549_v30 }
 0xbed   : > { %5772 = vadd.xlane.f32.xlu1 %v5771_v37  ;;  %v5556_v18 = vmul.f32 1.442695, %v5513_v45  ;;  %v5504_v45 = vsub.f32 -inf, %v11573_v29 }
 0xbf3   : > { %5820 = vadd.xlane.f32.xlu0 %v5819_v5 }
 0xbf5   : > { %v5800_v47 = vpop.xlane.xlu2 %5799 }
 0xbf6   : > { %v5752_v26 = vpop.xlane.xlu0 %5751  ;;  %v5846_v43 = vadd.f32 %v5800_v47, %v5718_v35  ;;  %v5566_v47 = vmul.f32 1.442695, %v5518_v10 }
 0xbf7   : > { %v5830_v46 = vadd.f32 %v5752_v26, %v5702_v27 }
 0xbf8   : > { %9047 = vrcp.f32 %v5846_v43 }
 0xbf9   : > { %9049 = vpow2.f32 %v5534_v51 }
 0xbfa   : > { %9051 = vrcp.f32 %v5830_v46 }
 0xbfe   : > { %v5803_v31 = vpop.xlane.xlu0 %5802  ;;  %v5755_v4 = vpop.xlane.xlu1 %5754 }
 0xbff   : > { %v5847_v7 = vadd.f32 %v5803_v31, %v5719_v56  ;;  %v5831_v37 = vadd.f32 %v5755_v4, %v5703_v24  ;;  %v9048_v14 = vpop.eup %9047 }
 0xc00   : > { %v9050_v63 = vpop.eup %9049 }
 0xc01   : > { %9053 = vrcp.f32 %v5847_v7  ;;  %v9052_v38 = vpop.eup %9051  ;;  %v5694_v12 = vmul.f32 0.0, %v9050_v63  ;;  %v5520_v63 = vsub.f32 -inf, %v11563_v6 }
 0xc02   : > { %9055 = vpow2.f32 %v5536_v0 }
 0xc03   : > { %9057 = vrcp.f32 %v5831_v37  ;;  %v5570_v6 = vmul.f32 1.442695, %v5520_v63 }
 0xc04   : > { %9059 = vpow2.f32 %v5554_v32 }
 0xc05   : > { %9061 = vpow2.f32 %v5556_v18 }
 0xc06   : > { %v5728_v15 = vpop.xlane.xlu2 %5727  ;;  %9063 = vpow2.f32 %v5566_v47  ;;  %v5505_v47 = vsub.f32 -inf, %v11578_v52  ;;  %v5506_v52 = vsub.f32 -inf, %v11582_v19 }
 0xc07   : > { %v9054_v48 = vpop.eup %9053  ;;  %v5822_v43 = vadd.f32 %v5728_v15, %v5694_v12 }
 0xc08   : > { %v5731_v30 = vpop.xlane.xlu0 %5730  ;;  %v9056_v44 = vpop.eup %9055  ;;  %v5542_v19 = vmul.f32 1.442695, %v5506_v52 }
 0xc09   : > { %v5695_v46 = vmul.f32 0.0, %v9056_v44  ;;  %9065 = vrcp.f32 %v5822_v43 }
 0xc0c   : > { %v6206_v9 = vpop.f32.mrf.mxu0 }
 0xc0d   : > { %v6036_v5 = vpop.f32.mrf.mxu1  ;;  %v6250_v60 = vadd.f32 %v6206_v9, %v5718_v35 }
 0xc0e   : > { %v6234_v3 = vadd.f32 %v6036_v5, %v5702_v27  ;;  %v5758_v58 = vpop.xlane.xlu2 %5757  ;;  %v9058_v27 = vpop.eup %9057 }
 0xc0f   : > { %v6314_v21 = vmul.f32 %v9048_v14, %v6250_v60  ;;  %v9060_v50 = vpop.eup %9059 }
 0xc10   : > { %v6298_v23 = vmul.f32 %v9052_v38, %v6234_v3  ;;  %v9062_v0 = vpop.eup %9061  ;;  %v5704_v42 = vmul.f32 0.0, %v9060_v50  ;;  %v5529_v3 = vsub.f32 -inf, %v11551_v61  ;;  %v5761_v14 = vpop.xlane.xlu0 %5760  ;;  %v5540_v50 = vmul.f32 1.442695, %v5505_v47 }
 0xc11   : > { %v6346_v35 = vpack.c.bf16 %v6314_v21, %v6314_v21  ;;  %v9064_v18 = vpop.eup %9063  ;;  %v5776_v21 = vpop.xlane.xlu1 %5775  ;;  %v5705_v29 = vmul.f32 0.0, %v9062_v0  ;;  %v5514_v0 = vsub.f32 -inf, %v11604_v53 }
 0xc12   : > { %v6330_v51 = vpack.c.bf16 %v6298_v23, %v6298_v23  ;;  %v5832_v32 = vadd.f32 %v5758_v58, %v5704_v42  ;;  %v9066_v58 = vpop.eup %9065  ;;  %v5710_v44 = vmul.f32 0.0, %v9064_v18 }
 0xc13   : > { %v6571_v40 = vunpack.c.l.b16 %v6346_v35  ;;  %v5833_v61 = vadd.f32 %v5761_v14, %v5705_v29 }
 0xc14   : > { %v6208_v26 = vpop.f32.mrf.mxu0  ;;  %v6437_v37 = vunpack.c.l.b16 %v6330_v51 }
 0xc15   : > { %v6251_v8 = vadd.f32 %v6208_v26, %v5719_v56  ;;  %v6038_v41 = vpop.f32.mrf.mxu1  ;;  %v5568_v56 = vmul.f32 1.442695, %v5519_v22  ;;  %v5538_v26 = vmul.f32 1.442695, %v5504_v45 }
 0xc16   : > { %v6235_v62 = vadd.f32 %v6038_v41, %v5703_v24  ;;  %v5779_v9 = vpop.xlane.xlu2 %5778  ;;  %v5823_v24 = vadd.f32 %v5731_v30, %v5695_v46  ;;  %v5528_v30 = vsub.f32 -inf, %v11592_v28 }
 0xc17   : > { %v6315_v1 = vmul.f32 %v9054_v48, %v6251_v8  ;;  %9067 = vpow2.f32 %v5568_v56  ;;  %v5588_v8 = vmul.f32 1.442695, %v5529_v3  ;;  %v5521_v48 = vsub.f32 -inf, %v11565_v57 }
 0xc18   : > { %v6299_v36 = vmul.f32 %v9058_v27, %v6235_v62  ;;  %9069 = vrcp.f32 %v5823_v24  ;;  %v5586_v28 = vmul.f32 1.442695, %v5528_v30  ;;  %v5838_v62 = vadd.f32 %v5776_v21, %v5710_v44 }
 0xc19   : > { %v6347_v31 = vpack.c.bf16 %v6315_v1, %v6315_v1  ;;  %9071 = vrcp.f32 %v5832_v32  ;;  %v5572_v43 = vmul.f32 1.442695, %v5521_v48  ;;  %v5507_v32 = vsub.f32 -inf, %v11608_v34 }
 0xc1a   : > { %v6331_v4 = vpack.c.bf16 %v6299_v36, %v6299_v36  ;;  %9073 = vpow2.f32 %v5538_v26  ;;  %v5558_v21 = vmul.f32 1.442695, %v5514_v0 }
 0xc1b   : > { %v6572_v7 = vunpack.c.l.b16 %v6347_v31  ;;  %9075 = vrcp.f32 %v5833_v61 }
 0xc1c   : > { %v6438_v5 = vunpack.c.l.b16 %v6331_v4  ;;  %9077 = vpow2.f32 %v5588_v8 }
 0xc1d   : > { %v6579_v15 = vpack.c.b16 %v6572_v7, %v6571_v40  ;;  %v5951_v60 = vpop.f32.mrf.mxu2  ;;  %v9068_v22 = vpop.eup %9067  ;;  %9079 = vpow2.f32 %v5570_v6  ;;  %v5522_v7 = vsub.f32 -inf, %v11587_v25 }
 0xc1e   : > { %v6445_v10 = vpack.c.b16 %v6438_v5, %v6437_v37  ;;  %v6226_v38 = vadd.f32 %v5951_v60, %v5694_v12  ;;  %v9070_v27 = vpop.eup %9069  ;;  %v5711_v36 = vmul.f32 0.0, %v9068_v22  ;;  %9081 = vpow2.f32 %v5586_v28 }
 0xc1f   : > { %8343 = vmatmul.msk.bf16.vlgmr.msrb.gmra.mxu0 %vm2365_vm15, %v6579_v15  ;;  %v6041_v23 = vpop.f32.mrf.mxu1  ;;  %v9072_v57 = vpop.eup %9071  ;;  %9083 = vrcp.f32 %v5838_v62 }
 0xc20   : > { %8327 = vmatmul.msk.bf16.vlgmr.msra.gmra.mxu1 %vm2365_vm15, %v6445_v10  ;;  %v11750_v41 = vpop.xlane.xlu2 %5736  ;;  %v6290_v12 = vmul.f32 %v9066_v58, %v6226_v38  ;;  %v6236_v35 = vadd.f32 %v6041_v23, %v5704_v42  ;;  %v5839_v45 = vadd.f32 %v5779_v9, %v5711_v36  ;;  %v9074_v37 = vpop.eup %9073  ;;  %9085 = vpow2.f32 %v5540_v50 }
 0xc21   : > { %v9076_v15 = vpop.eup %9075  ;;  %9087 = vpow2.f32 %v5572_v43  ;;  %v5574_v9 = vmul.f32 1.442695, %v5522_v7  ;;  %v5523_v38 = vsub.f32 -inf, %v11617_v20  ;;  %v5696_v61 = vmul.f32 0.0, %v9074_v37 }
 0xc22   : > { %v6322_v31 = vpack.c.bf16 %v6290_v12, %v6290_v12  ;;  %v6300_v40 = vmul.f32 %v9072_v57, %v6236_v35  ;;  %v9078_v3 = vpop.eup %9077  ;;  %9089 = vrcp.f32 %v5839_v45  ;;  %v5544_v23 = vmul.f32 1.442695, %v5507_v32  ;;  %v5782_v35 = vpop.xlane.xlu0 %5781 }
 0xc23   : > { %v9080_v63 = vpop.eup %9079  ;;  %9091 = vpow2.f32 %v5542_v19  ;;  %v5576_v20 = vmul.f32 1.442695, %v5523_v38 }
 0xc24   : > { %v6370_v60 = vunpack.c.l.b16 %v6322_v31  ;;  %v6332_v14 = vpack.c.bf16 %v6300_v40, %v6300_v40  ;;  %v9082_v26 = vpop.eup %9081  ;;  %9093 = vpow2.f32 %v5574_v9  ;;  %v5712_v28 = vmul.f32 0.0, %v9080_v63 }
 0xc25   : > { %v5953_v1 = vpop.f32.mrf.mxu2  ;;  %v9084_v34 = vpop.eup %9083  ;;  %9095 = vpow2.f32 %v5558_v21 }
 0xc26   : > { %v6227_v51 = vadd.f32 %v5953_v1, %v5695_v46  ;;  %v9086_v48 = vpop.eup %9085  ;;  %v6439_v47 = vunpack.c.l.b16 %v6332_v14  ;;  %v5840_v31 = vadd.f32 %v5782_v35, %v5712_v28  ;;  %v5508_v14 = vsub.f32 -inf, %v11660_v59 }
 0xc27   : > { %v6043_v42 = vpop.f32.mrf.mxu1  ;;  %v9088_v22 = vpop.eup %9087  ;;  %v5697_v57 = vmul.f32 0.0, %v9086_v48 }
 0xc28   : > { %v5806_v56 = vpop.xlane.xlu1 %5805  ;;  %v6291_v4 = vmul.f32 %v9070_v27, %v6227_v51  ;;  %v6237_v5 = vadd.f32 %v6043_v42, %v5705_v29  ;;  %v5809_v18 = vpop.xlane.xlu2 %5808  ;;  %v5515_v29 = vsub.f32 -inf, %v11622_v54  ;;  %v5720_v54 = vmul.f32 0.0, %v9082_v26 }
 0xc29   : > { %v9090_v50 = vpop.eup %9089  ;;  %v5531_v51 = vsub.f32 -inf, %v11631_v16  ;;  %v5825_v42 = vadd.f32 %v11750_v41, %v5697_v57  ;;  %v5530_v16 = vsub.f32 -inf, %v11650_v13  ;;  %v5524_v13 = vsub.f32 -inf, %v11662_v49 }
 0xc2a   : > { %v6121_v24 = vpop.f32.mrf.mxu3  ;;  %v6323_v46 = vpack.c.bf16 %v6291_v4, %v6291_v4  ;;  %v6301_v25 = vmul.f32 %v9076_v15, %v6237_v5  ;;  %v5560_v1 = vmul.f32 1.442695, %v5515_v29  ;;  %v5848_v52 = vadd.f32 %v5806_v56, %v5720_v54  ;;  %v9092_v45 = vpop.eup %9091 }
 0xc2b   : > { %v6242_v53 = vadd.f32 %v6121_v24, %v5710_v44  ;;  %v11765_v56 = vmul.f32 0.0, %v9088_v22  ;;  %v9094_v37 = vpop.eup %9093  ;;  %v5509_v5 = vsub.f32 -inf, %v11633_v33  ;;  %v5590_v9 = vmul.f32 1.442695, %v5530_v16 }
 0xc2c   : > { %v6371_v10 = vunpack.c.l.b16 %v6323_v46  ;;  %v6333_v58 = vpack.c.bf16 %v6301_v25, %v6301_v25  ;;  %v5592_v46 = vmul.f32 1.442695, %v5531_v51  ;;  %v11778_v48 = vmul.f32 0.0, %v9092_v45 }
 0xc2d   : > { %v6306_v44 = vmul.f32 %v9084_v34, %v6242_v53  ;;  %v5548_v26 = vmul.f32 1.442695, %v5509_v5 }
 0xc2e   : > { %v6378_v30 = vpack.c.b16 %v6371_v10, %v6370_v60  ;;  %v6440_v6 = vunpack.c.l.b16 %v6333_v58  ;;  %v9096_v60 = vpop.eup %9095 }
 0xc2f   : > { %v6338_v40 = vpack.c.bf16 %v6306_v44, %v6306_v44  ;;  %v5706_v22 = vmul.f32 0.0, %v9096_v60 }
 0xc30   : > { %v5734_v8 = vpop.xlane.xlu1 %5733  ;;  %8319 = vmatmul.msk.bf16.vlgmr.msra.gmra.mxu2 %vm2365_vm15, %v6378_v30  ;;  %v6446_v27 = vpack.c.b16 %v6440_v6, %v6439_v47  ;;  %v5546_v30 = vmul.f32 1.442695, %v5508_v14 }
 0xc31   : > { %v5824_v12 = vadd.f32 %v5734_v8, %v5696_v61  ;;  %v6504_v41 = vunpack.c.l.b16 %v6338_v40  ;;  %v11776_v8 = vmul.f32 0.0, %v9094_v37 }
 0xc32   : > { %v6123_v62 = vpop.f32.mrf.mxu3  ;;  %8328 = vmatmul.msk.bf16.gmra.mxu1 %vm2365_vm15, %v6446_v27 }
 0xc33   : > { %v6243_v43 = vadd.f32 %v6123_v62, %v5711_v36  ;;  %9097 = vrcp.f32 %v5824_v12  ;;  %v5721_v36 = vmul.f32 0.0, %v9078_v3 }
 0xc34   : > { %9099 = vpow2.f32 %v5544_v23  ;;  %v5578_v23 = vmul.f32 1.442695, %v5524_v13 }
 0xc35   : > { %v6307_v4 = vmul.f32 %v9090_v50, %v6243_v43  ;;  %v5956_v0 = vpop.f32.mrf.mxu2  ;;  %9101 = vpow2.f32 %v5576_v20  ;;  %v5849_v15 = vadd.f32 %v5809_v18, %v5721_v36 }
 0xc36   : > { %v11761_v7 = vpop.xlane.xlu2 %5766  ;;  %9103 = vpow2.f32 %v5560_v1  ;;  %v6228_v21 = vadd.f32 %v5956_v0, %v5696_v61 }
 0xc37   : > { %v6339_v24 = vpack.c.bf16 %v6307_v4, %v6307_v4  ;;  %9105 = vrcp.f32 %v5848_v52  ;;  %v6211_v19 = vpop.f32.mrf.mxu0 }
 0xc38   : > { %v5785_v32 = vpop.xlane.xlu1 %5784  ;;  %9107 = vrcp.f32 %v5840_v31  ;;  %v6252_v18 = vadd.f32 %v6211_v19, %v5720_v54 }
 0xc39   : > { %v6505_v3 = vunpack.c.l.b16 %v6339_v24  ;;  %v9098_v10 = vpop.eup %9097  ;;  %9109 = vrcp.f32 %v5825_v42  ;;  %v5841_v25 = vadd.f32 %v5785_v32, %v11765_v56 }
 0xc3a   : > { %v6126_v53 = vpop.f32.mrf.mxu3  ;;  %v9100_v63 = vpop.eup %9099  ;;  %9111 = vrcp.f32 %v5849_v15  ;;  %v6292_v58 = vmul.f32 %v9098_v10, %v6228_v21 }
 0xc3b   : > { %v6512_v33 = vpack.c.b16 %v6505_v3, %v6504_v41  ;;  %v11771_v38 = vpop.eup %9101  ;;  %v6244_v59 = vadd.f32 %v6126_v53, %v5712_v28  ;;  %9113 = vpow2.f32 %v5592_v46  ;;  %v5525_v28 = vsub.f32 -inf, %v11672_v55 }
 0xc3c   : > { %v9104_v29 = vpop.eup %9103  ;;  %9115 = vrcp.f32 %v5841_v25  ;;  %v6324_v27 = vpack.c.bf16 %v6292_v58, %v6292_v58  ;;  %v11785_v40 = vmul.f32 0.0, %v9100_v63  ;;  %v5517_v41 = vsub.f32 -inf, %v11686_v11 }
 0xc3d   : > { %8335 = vmatmul.msk.bf16.vlgmr.msra.gmra.mxu3 %vm2365_vm15, %v6512_v33  ;;  %v9106_v49 = vpop.eup %9105  ;;  %v5958_v61 = vpop.f32.mrf.mxu2  ;;  %9117 = vpow2.f32 %v5590_v9  ;;  %v11781_v35 = vmul.f32 0.0, %v9104_v29  ;;  %v5580_v24 = vmul.f32 1.442695, %v5525_v28  ;;  %v5715_v28 = vmul.f32 0.0, %v11771_v38 }
 0xc3e   : > { %v11773_v34 = vpop.xlane.xlu0 %5811  ;;  %v9108_v47 = vpop.eup %9107  ;;  %v6316_v6 = vmul.f32 %v9106_v49, %v6252_v18  ;;  %v6229_v12 = vadd.f32 %v5958_v61, %v5697_v57  ;;  %9119 = vpow2.f32 %v5548_v26 }
 0xc3f   : > { %v5788_v44 = vpop.xlane.xlu2 %5787  ;;  %v9110_v20 = vpop.eup %9109  ;;  %v6308_v54 = vmul.f32 %v9108_v47, %v6244_v59  ;;  %9121 = vpow2.f32 %v5546_v30  ;;  %v5835_v52 = vadd.f32 %v11761_v7, %v11781_v35  ;;  %v6372_v7 = vunpack.c.l.b16 %v6324_v27 }
 0xc40   : > { %v6213_v62 = vpop.f32.mrf.mxu0  ;;  %v5764_v1 = vpop.xlane.xlu1 %5763  ;;  %v6293_v43 = vmul.f32 %v9110_v20, %v6229_v12  ;;  %9123 = vpow2.f32 %v5578_v23  ;;  %v6348_v55 = vpack.c.bf16 %v6316_v6, %v6316_v6  ;;  %v5532_v23 = vsub.f32 -inf, %v11696_v39 }
 0xc41   : > { %v6253_v50 = vadd.f32 %v6213_v62, %v5721_v36  ;;  %v9112_v51 = vpop.eup %9111  ;;  %v5834_v57 = vadd.f32 %v5764_v1, %v5706_v22  ;;  %v5516_v36 = vsub.f32 -inf, %v11684_v17  ;;  %v6340_v37 = vpack.c.bf16 %v6308_v54, %v6308_v54 }
 0xc42   : > { %v6128_v31 = vpop.f32.mrf.mxu3  ;;  %v11787_v4 = vpop.eup %9113  ;;  %v6325_v0 = vpack.c.bf16 %v6293_v43, %v6293_v43  ;;  %v6573_v13 = vunpack.c.l.b16 %v6348_v55  ;;  %v5564_v54 = vmul.f32 1.442695, %v5517_v41  ;;  %v5594_v27 = vmul.f32 1.442695, %v5532_v23 }
 0xc43   : > { %v6317_v45 = vmul.f32 %v9112_v51, %v6253_v50  ;;  %v6245_v42 = vadd.f32 %v6128_v31, %v11765_v56  ;;  %v9116_v16 = vpop.eup %9115  ;;  %9125 = vrcp.f32 %v5834_v57  ;;  %v5842_v56 = vadd.f32 %v5788_v44, %v11776_v8 }
 0xc44   : > { %v9118_v5 = vpop.eup %9117  ;;  %v6373_v15 = vunpack.c.l.b16 %v6325_v0  ;;  %9127 = vrcp.f32 %v5835_v52  ;;  %v5562_v33 = vmul.f32 1.442695, %v5516_v36  ;;  %v6506_v21 = vunpack.c.l.b16 %v6340_v37 }
 0xc45   : > { %v6046_v46 = vpop.f32.mrf.mxu1  ;;  %v6349_v19 = vpack.c.bf16 %v6317_v45, %v6317_v45  ;;  %v6309_v32 = vmul.f32 %v9116_v16, %v6245_v42  ;;  %v11791_v14 = vpop.eup %9119  ;;  %v5722_v18 = vmul.f32 0.0, %v9118_v5  ;;  %v5533_v0 = vsub.f32 -inf, %v11703_v2 }
 0xc46   : > { %v5740_v60 = vpop.xlane.xlu0 %5739  ;;  %v5961_v10 = vpop.f32.mrf.mxu2  ;;  %v6379_v25 = vpack.c.b16 %v6373_v15, %v6372_v7  ;;  %v6238_v29 = vadd.f32 %v6046_v46, %v5706_v22 }
 0xc47   : > { %v5826_v3 = vadd.f32 %v5740_v60, %v11778_v48  ;;  %v9122_v17 = vpop.eup %9121  ;;  %v6574_v53 = vunpack.c.l.b16 %v6349_v19  ;;  %v6341_v63 = vpack.c.bf16 %v6309_v32, %v6309_v32  ;;  %v5746_v30 = vpop.xlane.xlu2 %5745  ;;  %v5850_v47 = vadd.f32 %v11773_v34, %v5722_v18 }
 0xc48   : > { %v11796_v9 = vpop.eup %9123  ;;  %v5743_v26 = vpop.xlane.xlu1 %5742  ;;  %8320 = vmatmul.msk.bf16.gmra.mxu2 %vm2365_vm15, %v6379_v25  ;;  %v6230_v62 = vadd.f32 %v5961_v10, %v11778_v48  ;;  %v5700_v43 = vmul.f32 0.0, %v9122_v17 }
 0xc49   : > { %9129 = vrcp.f32 %v5826_v3  ;;  %v6580_v59 = vpack.c.b16 %v6574_v53, %v6573_v13  ;;  %v6507_v11 = vunpack.c.l.b16 %v6341_v63  ;;  %v5827_v58 = vadd.f32 %v5743_v26, %v11785_v40  ;;  %v9126_v49 = vpop.eup %9125 }
 0xc4a   : > { %9131 = vrcp.f32 %v5842_v56  ;;  %v6131_v61 = vpop.f32.mrf.mxu3  ;;  %v6302_v44 = vmul.f32 %v9126_v49, %v6238_v29  ;;  %v9128_v12 = vpop.eup %9127  ;;  %v5828_v16 = vadd.f32 %v5746_v30, %v5700_v43  ;;  %v5716_v29 = vmul.f32 0.0, %v11796_v9 }
 0xc4b   : > { %v6513_v6 = vpack.c.b16 %v6507_v11, %v6506_v21  ;;  %9133 = vrcp.f32 %v5827_v58  ;;  %8344 = vmatmul.msk.bf16.gmra.mxu0 %vm2365_vm15, %v6580_v59  ;;  %v6246_v50 = vadd.f32 %v6131_v61, %v11776_v8 }
 0xc4c   : > { %9135 = vpow2.f32 %v5580_v24  ;;  %v6334_v57 = vpack.c.bf16 %v6302_v44, %v6302_v44 }
 0xc4d   : > { %v6048_v22 = vpop.f32.mrf.mxu1  ;;  %v6216_v20 = vpop.f32.mrf.mxu0  ;;  %9137 = vpow2.f32 %v5562_v33  ;;  %8336 = vmatmul.msk.bf16.gmra.mxu3 %vm2365_vm15, %v6513_v6 }
 0xc4e   : > { %v6239_v39 = vadd.f32 %v6048_v22, %v11781_v35  ;;  %v5791_v1 = vpop.xlane.xlu0 %5790  ;;  %v5963_v52 = vpop.f32.mrf.mxu2  ;;  %9139 = vrcp.f32 %v5850_v47  ;;  %v5723_v35 = vmul.f32 0.0, %v11787_v4  ;;  %v6441_v19 = vunpack.c.l.b16 %v6334_v57 }
 0xc4f   : > { %v9130_v34 = vpop.eup %9129  ;;  %v5843_v51 = vadd.f32 %v5791_v1, %v5715_v28  ;;  %v6231_v48 = vadd.f32 %v5963_v52, %v11785_v40  ;;  %v6254_v32 = vadd.f32 %v6216_v20, %v5722_v18  ;;  %v5797_v60 = vpop.xlane.xlu2 %5796  ;;  %v5596_v40 = vmul.f32 1.442695, %v5533_v0 }
 0xc50   : > { %v6294_v31 = vmul.f32 %v9130_v34, %v6230_v62  ;;  %v6303_v38 = vmul.f32 %v9128_v12, %v6239_v39  ;;  %v9132_v55 = vpop.eup %9131  ;;  %v5815_v45 = vpop.xlane.xlu1 %5814  ;;  %v5701_v4 = vmul.f32 0.0, %v11791_v14 }
 0xc51   : > { %9141 = vrcp.f32 %v5843_v51  ;;  %v9134_v42 = vpop.eup %9133  ;;  %v6310_v37 = vmul.f32 %v9132_v55, %v6246_v50  ;;  %v5851_v5 = vadd.f32 %v5815_v45, %v5723_v35 }
 0xc52   : > { %9143 = vpow2.f32 %v5564_v54  ;;  %v6335_v24 = vpack.c.bf16 %v6303_v38, %v6303_v38  ;;  %v9136_v8 = vpop.eup %9135  ;;  %v6326_v36 = vpack.c.bf16 %v6294_v31, %v6294_v31  ;;  %v6295_v46 = vmul.f32 %v9134_v42, %v6231_v48  ;;  %v6133_v7 = vpop.f32.mrf.mxu3 }
 0xc53   : > { %v9138_v15 = vpop.eup %9137  ;;  %9145 = vpow2.f32 %v5594_v27  ;;  %v6247_v10 = vadd.f32 %v6133_v7, %v5715_v28  ;;  %v6342_v53 = vpack.c.bf16 %v6310_v37, %v6310_v37  ;;  %v5717_v14 = vmul.f32 0.0, %v9136_v8 }
 0xc54   : > { %v6442_v2 = vunpack.c.l.b16 %v6335_v24  ;;  %v6327_v41 = vpack.c.bf16 %v6295_v46, %v6295_v46  ;;  %9147 = vrcp.f32 %v5851_v5  ;;  %v9140_v56 = vpop.eup %9139  ;;  %v6374_v25 = vunpack.c.l.b16 %v6326_v36 }
 0xc55   : > { %9149 = vrcp.f32 %v5828_v16  ;;  %v6218_v33 = vpop.f32.mrf.mxu0  ;;  %v6318_v18 = vmul.f32 %v9140_v56, %v6254_v32  ;;  %v6508_v12 = vunpack.c.l.b16 %v6342_v53  ;;  %v5845_v22 = vadd.f32 %v5797_v60, %v5717_v14 }
 0xc56   : > { %v6447_v3 = vpack.c.b16 %v6442_v2, %v6441_v19  ;;  %v5749_v17 = vpop.xlane.xlu0 %5748  ;;  %v6375_v63 = vunpack.c.l.b16 %v6327_v41  ;;  %v5966_v26 = vpop.f32.mrf.mxu2  ;;  %9151 = vpow2.f32 %v5596_v40  ;;  %v6255_v61 = vadd.f32 %v6218_v33, %v5723_v35 }
 0xc57   : > { %v9142_v13 = vpop.eup %9141  ;;  %v5829_v21 = vadd.f32 %v5749_v17, %v5701_v4  ;;  %v6232_v47 = vadd.f32 %v5966_v26, %v5700_v43  ;;  %v6350_v54 = vpack.c.bf16 %v6318_v18, %v6318_v18  ;;  %v5708_v1 = vmul.f32 0.0, %v9138_v15  ;;  %v5818_v50 = vpop.xlane.xlu2 %5817 }
 0xc58   : > { %v9144_v59 = vpop.eup %9143  ;;  %v6311_v11 = vmul.f32 %v9142_v13, %v6247_v10  ;;  %8329 = vmatmul.msk.bf16.gmra.mxu1 %vm2365_vm15, %v6447_v3  ;;  %v6380_v30 = vpack.c.b16 %v6375_v63, %v6374_v25  ;;  %v5794_v58 = vpop.xlane.xlu1 %5793 }
 0xc59   : > { %v9146_v49 = vpop.eup %9145  ;;  %v5844_v6 = vadd.f32 %v5794_v58, %v5716_v29  ;;  %9153 = vrcp.f32 %v5829_v21  ;;  %v6051_v39 = vpop.f32.mrf.mxu1  ;;  %v6575_v55 = vunpack.c.l.b16 %v6350_v54  ;;  %v5709_v35 = vmul.f32 0.0, %v9144_v59 }
 0xc5a   : > { %v6343_v23 = vpack.c.bf16 %v6311_v11, %v6311_v11  ;;  %v9148_v44 = vpop.eup %9147  ;;  %v6136_v20 = vpop.f32.mrf.mxu3  ;;  %8321 = vmatmul.msk.bf16.gmra.mxu2 %vm2365_vm15, %v6380_v30  ;;  %v5724_v57 = vmul.f32 0.0, %v9146_v49  ;;  %v6240_v40 = vadd.f32 %v6051_v39, %v5708_v1 }
 0xc5b   : > { %v9150_v28 = vpop.eup %9149  ;;  %v6319_v9 = vmul.f32 %v9148_v44, %v6255_v61  ;;  %9155 = vrcp.f32 %v5844_v6  ;;  %v6248_v16 = vadd.f32 %v6136_v20, %v5716_v29 }
 0xc5c   : > { %v6509_v62 = vunpack.c.l.b16 %v6343_v23  ;;  %v6296_v51 = vmul.f32 %v9150_v28, %v6232_v47  ;;  %v9152_v52 = vpop.eup %9151  ;;  %9157 = vrcp.f32 %v5845_v22  ;;  %v5852_v42 = vadd.f32 %v5818_v50, %v5724_v57 }
 0xc5d   : > { %v6351_v27 = vpack.c.bf16 %v6319_v9, %v6319_v9  ;;  %v5725_v41 = vmul.f32 0.0, %v9152_v52 }
 0xc5e   : > { %v6514_v34 = vpack.c.b16 %v6509_v62, %v6508_v12  ;;  %v5770_v43 = vpop.xlane.xlu0 %5769  ;;  %v5968_v38 = vpop.f32.mrf.mxu2  ;;  %v6328_v46 = vpack.c.bf16 %v6296_v51, %v6296_v51 }
 0xc5f   : > { %v5836_v31 = vadd.f32 %v5770_v43, %v5708_v1  ;;  %v6576_v0 = vunpack.c.l.b16 %v6351_v27  ;;  %v6233_v48 = vadd.f32 %v5968_v38, %v5701_v4  ;;  %v9154_v45 = vpop.eup %9153  ;;  %v6221_v24 = vpop.f32.mrf.mxu0 }
 0xc60   : > { %8337 = vmatmul.msk.bf16.gmra.mxu3 %vm2365_vm15, %v6514_v34  ;;  %v5773_v8 = vpop.xlane.xlu1 %5772  ;;  %v6376_v4 = vunpack.c.l.b16 %v6328_v46  ;;  %v6256_v21 = vadd.f32 %v6221_v24, %v5724_v57  ;;  %v11822_v57 = vld [vmem:[%s12422_s1] ss:$0 sm:$0xff]  ;;  %s12432_s1 = sld [smem:[#allocation18_spill]] }
 0xc61   : > { %9159 = vrcp.f32 %v5836_v31  ;;  %v9156_v36 = vpop.eup %9155  ;;  %v6581_v37 = vpack.c.b16 %v6576_v0, %v6575_v55  ;;  %v6297_v5 = vmul.f32 %v9154_v45, %v6233_v48  ;;  %v5837_v7 = vadd.f32 %v5773_v8, %v5709_v35  ;;  %v6053_v10 = vpop.f32.mrf.mxu1 }
 0xc62   : > { %v6312_v15 = vmul.f32 %v9156_v36, %v6248_v16  ;;  %v6138_v19 = vpop.f32.mrf.mxu3  ;;  %v9158_v60 = vpop.eup %9157  ;;  %v6241_v59 = vadd.f32 %v6053_v10, %v5709_v35  ;;  %v12423_v35 = vld [vmem:[#allocation37_spill] sm:$0xff] }
 0xc63   : > { %v6329_v2 = vpack.c.bf16 %v6297_v5, %v6297_v5  ;;  %9161 = vrcp.f32 %v5837_v7  ;;  %v6249_v32 = vadd.f32 %v6138_v19, %v5717_v14  ;;  %8345 = vmatmul.msk.bf16.gmra.mxu0 %vm2365_vm15, %v6581_v37 }
 0xc64   : > { %9163 = vrcp.f32 %v5852_v42  ;;  %v6344_v56 = vpack.c.bf16 %v6312_v15, %v6312_v15  ;;  %v12424_v15 = vld [vmem:[#allocation38_spill] sm:$0xff] }
 0xc65   : > { %v6377_v3 = vunpack.c.l.b16 %v6329_v2  ;;  %v6313_v17 = vmul.f32 %v9158_v60, %v6249_v32 }
 0xc66   : > { %v5821_v13 = vpop.xlane.xlu0 %5820  ;;  %v6510_v11 = vunpack.c.l.b16 %v6344_v56 }
 0xc67   : > { %v9160_v25 = vpop.eup %9159  ;;  %v5853_v53 = vadd.f32 %v5821_v13, %v5725_v41  ;;  %v6381_v33 = vpack.c.b16 %v6377_v3, %v6376_v4  ;;  %v6345_v26 = vpack.c.bf16 %v6313_v17, %v6313_v17  ;;  %v6223_v49 = vpop.f32.mrf.mxu0  ;;  %v12425_v17 = vld [vmem:[#allocation39_spill] sm:$0xff] }
 0xc68   : > { %v6304_v63 = vmul.f32 %v9160_v25, %v6240_v40  ;;  %v6257_v6 = vadd.f32 %v6223_v49, %v5725_v41 }
 0xc69   : > { %9165 = vrcp.f32 %v5853_v53  ;;  %v9162_v18 = vpop.eup %9161  ;;  %v6511_v29 = vunpack.c.l.b16 %v6345_v26 }
 0xc6a   : > { %v9164_v14 = vpop.eup %9163  ;;  %v6336_v30 = vpack.c.bf16 %v6304_v63, %v6304_v63  ;;  %v6305_v58 = vmul.f32 %v9162_v18, %v6241_v59  ;;  %8322 = vmatmul.msk.bf16.gmra.mxu2 %vm2365_vm15, %v6381_v33 }
 0xc6b   : > { %v6320_v23 = vmul.f32 %v9164_v14, %v6256_v21  ;;  %v6515_v61 = vpack.c.b16 %v6511_v29, %v6510_v11  ;;  %v12426_v11 = vld [vmem:[#allocation40_spill] sm:$0xff] }
 0xc6c   : > { %v6337_v47 = vpack.c.bf16 %v6305_v58, %v6305_v58  ;;  %v6443_v12 = vunpack.c.l.b16 %v6336_v30 }
 0xc6d   : > { %v6352_v20 = vpack.c.bf16 %v6320_v23, %v6320_v23 }
 0xc6e   : > { %v6444_v22 = vunpack.c.l.b16 %v6337_v47 }
 0xc6f   : > { %v9166_v44 = vpop.eup %9165  ;;  %v6577_v9 = vunpack.c.l.b16 %v6352_v20 }
 0xc70   : > { %v6321_v28 = vmul.f32 %v9166_v44, %v6257_v6  ;;  %8338 = vmatmul.msk.bf16.gmra.mxu3 %vm2365_vm15, %v6515_v61  ;;  %v6448_v54 = vpack.c.b16 %v6444_v22, %v6443_v12  ;;  %v12427_v22 = vld [vmem:[#allocation33_spill] sm:$0xff] }
 0xc72   : > { %v6353_v62 = vpack.c.bf16 %v6321_v28, %v6321_v28  ;;  %8330 = vmatmul.msk.bf16.gmra.mxu1 %vm2365_vm15, %v6448_v54 }
 0xc74   : > { %v6578_v39 = vunpack.c.l.b16 %v6353_v62 }
 0xc76   : > { %v6582_v1 = vpack.c.b16 %v6578_v39, %v6577_v9 }
 0xc78   : > { %8346 = vmatmul.msk.bf16.gmra.mxu0 %vm2365_vm15, %v6582_v1 }
 0xc9c   : > { %v6610_v50 = vpop.f32.mrf.mxu0 }
 0xc9d   : > { %v6476_v34 = vpop.f32.mrf.mxu1 }
 0xca4   : > { %v6612_v42 = vpop.f32.mrf.mxu0 }
 0xca5   : > { %v6478_v31 = vpop.f32.mrf.mxu1 }
 0xcaf   : > { %v6481_v36 = vpop.f32.mrf.mxu1 }
 0xcb3   : > { %v6409_v27 = vpop.f32.mrf.mxu2 }
 0xcb4   : > { %v6630_v51 = vadd.f32 %v6476_v34, %v6409_v27 }
 0xcb7   : > { %v6483_v56 = vpop.f32.mrf.mxu1 }
 0xcbb   : > { %v6411_v55 = vpop.f32.mrf.mxu2 }
 0xcbc   : > { %v6631_v48 = vadd.f32 %v6478_v31, %v6411_v55 }
 0xcc0   : > { %v6543_v43 = vpop.f32.mrf.mxu3 }
 0xcc1   : > { %v6638_v52 = vadd.f32 %v6630_v51, %v6543_v43  ;;  %v12428_v51 = vld [vmem:[#allocation34_spill] sm:$0xff] }
 0xcc3   : > { %v6646_v38 = vadd.f32 %v6638_v52, %v6610_v50 }
 0xcc5   : > { %v6657_v0 = vadd.f32 %v11822_v57, %v6646_v38 }
 0xcc7   : > { %v11826_v45 = vadd.f32 %v6657_v0, %v12423_v35  ;;  %v12429_v35 = vld [vmem:[#allocation35_spill] sm:$0xff] }
 0xcc8   : > { %v6545_v16 = vpop.f32.mrf.mxu3  ;;  %v6615_v2 = vpop.f32.mrf.mxu0 }
 0xcc9   : > { %v6639_v24 = vadd.f32 %v6631_v48, %v6545_v16  ;;  %v6675_v8 = vsel %vm946_vm0, %v11826_v45, 0.0 }
 0xcca   : > { %6676 = vadd.xlane.f32.xlu1 %v6675_v8 }
 0xccb   : > { %v6647_v37 = vadd.f32 %v6639_v24, %v6612_v42  ;;  %v6414_v46 = vpop.f32.mrf.mxu2 }
 0xccc   : > { %v6632_v7 = vadd.f32 %v6481_v36, %v6414_v46 }
 0xccd   : > { %v6658_v5 = vadd.f32 %v11822_v57, %v6647_v37 }
 0xccf   : > { %v11832_v19 = vadd.f32 %v6658_v5, %v12424_v15  ;;  %v12430_v15 = vld [vmem:[#allocation31_spill] sm:$0xff] }
 0xcd0   : > { %v6548_v32 = vpop.f32.mrf.mxu3  ;;  %v6617_v33 = vpop.f32.mrf.mxu0 }
 0xcd1   : > { %v6640_v60 = vadd.f32 %v6632_v7, %v6548_v32  ;;  %v6678_v40 = vsel %vm946_vm0, %v11832_v19, 0.0 }
 0xcd2   : > { %6679 = vadd.xlane.f32.xlu2 %v6678_v40 }
 0xcd3   : > { %v6648_v41 = vadd.f32 %v6640_v60, %v6615_v2  ;;  %v6416_v4 = vpop.f32.mrf.mxu2 }
 0xcd4   : > { %v6633_v10 = vadd.f32 %v6483_v56, %v6416_v4 }
 0xcd5   : > { %v6659_v3 = vadd.f32 %v11822_v57, %v6648_v41  ;;  %v6486_v26 = vpop.f32.mrf.mxu1 }
 0xcd7   : > { %v11838_v13 = vadd.f32 %v6659_v3, %v12425_v17 }
 0xcd8   : > { %v6550_v25 = vpop.f32.mrf.mxu3 }
 0xcd9   : > { %v6641_v53 = vadd.f32 %v6633_v10, %v6550_v25  ;;  %v6681_v63 = vsel %vm946_vm0, %v11838_v13, 0.0  ;;  %v12431_v10 = vld [vmem:[#allocation36_spill] sm:$0xff] }
 0xcda   : > { %6682 = vadd.xlane.f32.xlu0 %v6681_v63 }
 0xcdb   : > { %v6649_v21 = vadd.f32 %v6641_v53, %v6617_v33 }
 0xcdd   : > { %v6660_v59 = vadd.f32 %v11822_v57, %v6649_v21  ;;  %v6419_v18 = vpop.f32.mrf.mxu2  ;;  %v6488_v6 = vpop.f32.mrf.mxu1 }
 0xcde   : > { %v6634_v14 = vadd.f32 %v6486_v26, %v6419_v18 }
 0xcdf   : > { %v11844_v29 = vadd.f32 %v6660_v59, %v12426_v11 }
 0xce0   : > { %v6620_v58 = vpop.f32.mrf.mxu0 }
 0xce1   : > { %v6684_v30 = vsel %vm946_vm0, %v11844_v29, 0.0 }
 0xce2   : > { %6685 = vadd.xlane.f32.xlu1 %v6684_v30 }
 0xce3   : > { %v6553_v49 = vpop.f32.mrf.mxu3 }
 0xce4   : > { %v6642_v23 = vadd.f32 %v6634_v14, %v6553_v49 }
 0xce5   : > { %v6421_v47 = vpop.f32.mrf.mxu2 }
 0xce6   : > { %v6650_v61 = vadd.f32 %v6642_v23, %v6620_v58  ;;  %v6635_v12 = vadd.f32 %v6488_v6, %v6421_v47 }
 0xce8   : > { %v6661_v44 = vadd.f32 %v11822_v57, %v6650_v61  ;;  %v6622_v9 = vpop.f32.mrf.mxu0 }
 0xcea   : > { %v11850_v20 = vadd.f32 %v6661_v44, %v12427_v22 }
 0xceb   : > { %v6555_v28 = vpop.f32.mrf.mxu3 }
 0xcec   : > { %v6643_v54 = vadd.f32 %v6635_v12, %v6555_v28  ;;  %v6687_v62 = vsel %vm946_vm0, %v11850_v20, 0.0 }
 0xced   : > { %6688 = vadd.xlane.f32.xlu2 %v6687_v62  ;;  %v6424_v34 = vpop.f32.mrf.mxu2 }
 0xcee   : > { %v6651_v39 = vadd.f32 %v6643_v54, %v6622_v9 }
 0xcef   : > { %v6491_v27 = vpop.f32.mrf.mxu1 }
 0xcf0   : > { %v6662_v1 = vadd.f32 %v11822_v57, %v6651_v39  ;;  %v6636_v50 = vadd.f32 %v6491_v27, %v6424_v34 }
 0xcf2   : > { %v11856_v43 = vadd.f32 %v6662_v1, %v12428_v51 }
 0xcf3   : > { %v6558_v52 = vpop.f32.mrf.mxu3 }
 0xcf4   : > { %v6644_v31 = vadd.f32 %v6636_v50, %v6558_v52  ;;  %v6690_v38 = vsel %vm946_vm0, %v11856_v43, 0.0 }
 0xcf5   : > { %6691 = vadd.xlane.f32.xlu0 %v6690_v38  ;;  %v6625_v55 = vpop.f32.mrf.mxu0  ;;  %v6426_v8 = vpop.f32.mrf.mxu2  ;;  %v8632_v38 = vld [vmem:[%s12432_s1 + $0x34] sm:$0xf0] }
 0xcf6   : > { %v6652_v0 = vadd.f32 %v6644_v31, %v6625_v55  ;;  %v8373_v31 = vld [vmem:[%s12432_s1 + $0x30] sm:$0xf]  ;;  %v8631_v55 = vld [vmem:[%s12432_s1 + $0x34] sm:$0xf] }
 0xcf7   : > { %v6493_v24 = vpop.f32.mrf.mxu1 }
 0xcf8   : > { %v6663_v48 = vadd.f32 %v11822_v57, %v6652_v0  ;;  %v6637_v36 = vadd.f32 %v6493_v24, %v6426_v8  ;;  %v8413_v24 = vld [vmem:[%s12433_s3 + $0x30] sm:$0xf]  ;;  %v8640_v8 = vld [vmem:[%s12433_s3 + $0x34] sm:$0xf0] }
 0xcfa   : > { %v11862_v42 = vadd.f32 %v6663_v48, %v12429_v35  ;;  %v8374_v35 = vor.u32 %v8632_v38, %v8373_v31  ;;  %v8359_v31 = vld [vmem:[%s12432_s1 + $0x18] sm:$0xf0]  ;;  %v8397_v38 = vld [vmem:[%s12433_s3 + $0x10] sm:$0xf] }
 0xcfb   : > { %v6560_v37 = vpop.f32.mrf.mxu3 }
 0xcfc   : > { %v6693_v16 = vsel %vm946_vm0, %v11862_v42, 0.0  ;;  %v6645_v46 = vadd.f32 %v6637_v36, %v6560_v37  ;;  %6947 = vmatpush.bf16.msrb.mxu2 %v8374_v35  ;;  %v8635_v35 = vld [vmem:[%s12433_s3 + $0x14] sm:$0xf] }
 0xcfd   : > { %6694 = vadd.xlane.f32.xlu0 %v6693_v16  ;;  %v6627_v5 = vpop.f32.mrf.mxu0  ;;  %v8375_v16 = vld [vmem:[%s12432_s1 + $0x38] sm:$0xf0] }
 0xcfe   : > { %v6653_v32 = vadd.f32 %v6645_v46, %v6627_v5  ;;  %v8378_v46 = vor.u32 %v8631_v55, %v8375_v16  ;;  %v8414_v5 = vor.u32 %v8640_v8, %v8413_v24  ;;  %v8636_v55 = vld [vmem:[%s12433_s3 + $0x14] sm:$0xf0]  ;;  %v8399_v16 = vld [vmem:[%s12433_s3 + $0x18] sm:$0xf0] }
 0xcff   : > { %v8402_v8 = vor.u32 %v8635_v35, %v8399_v16 }
 0xd00   : > { %v6664_v41 = vadd.f32 %v11822_v57, %v6653_v32  ;;  %6976 = vmatpush.bf16.msrb.mxu1 %v8378_v46  ;;  %7059 = vmatpush.bf16.msrb.mxu3 %v8414_v5 }
 0xd02   : > { %v11876_v17 = vadd.f32 %v6664_v41, %v12431_v10 }
 0xd04   : > { %v6696_v63 = vsel %vm946_vm0, %v11876_v17, 0.0 }
 0xd3d   : > { %v6677_v7 = vpop.xlane.xlu1 %6676 }
 0xd3e   : > { %v6699_v2 = vmul.f32 %v6677_v7, %v12430_v15  ;;  %v8639_v7 = vld [vmem:[%s12433_s3 + $0x34] sm:$0xf] }
 0xd40   : > { %v11868_v60 = vsub.f32 %v11826_v45, %v6699_v2  ;;  %v8415_v2 = vld [vmem:[%s12433_s3 + $0x38] sm:$0xf0] }
 0xd41   : > { %v8418_v32 = vor.u32 %v8639_v7, %v8415_v2  ;;  %v8349_v2 = vld [vmem:[%s12432_s1] sm:$0xf] }
 0xd42   : > { %v6715_v40 = vmul.f32 %v11868_v60, %v11868_v60 }
 0xd43   : > { %7088 = vmatpush.bf16.msra.mxu0 %v8418_v32  ;;  %v8626_v32 = vld [vmem:[%s12432_s1 + $0x4] sm:$0xf0] }
 0xd44   : > { %v6723_v4 = vsel %vm946_vm0, %v6715_v40, 0.0 }
 0xd45   : > { %6724 = vadd.xlane.f32.xlu1 %v6723_v4  ;;  %v6680_v56 = vpop.xlane.xlu2 %6679 }
 0xd46   : > { %v6700_v3 = vmul.f32 %v6680_v56, %v12430_v15 }
 0xd48   : > { %v11879_v25 = vsub.f32 %v11832_v19, %v6700_v3 }
 0xd4a   : > { %v6716_v53 = vmul.f32 %v11879_v25, %v11879_v25 }
 0xd4c   : > { %v6726_v57 = vsel %vm946_vm0, %v6716_v53, 0.0 }
 0xd4d   : > { %v6683_v33 = vpop.xlane.xlu0 %6682  ;;  %6697 = vadd.xlane.f32.xlu1 %v6696_v63  ;;  %6727 = vadd.xlane.f32.xlu2 %v6726_v57  ;;  %v8365_v63 = vld [vmem:[%s12432_s1 + $0x20] sm:$0xf]  ;;  %v8630_v57 = vld [vmem:[%s12432_s1 + $0x24] sm:$0xf0] }
 0xd4e   : > { %v6701_v21 = vmul.f32 %v6683_v33, %v12430_v15 }
 0xd50   : > { %v11888_v26 = vsub.f32 %v11838_v13, %v6701_v21 }
 0xd52   : > { %v6717_v59 = vmul.f32 %v11888_v26, %v11888_v26 }
 0xd54   : > { %v6729_v18 = vsel %vm946_vm0, %v6717_v59, 0.0  ;;  %v8366_v59 = vor.u32 %v8630_v57, %v8365_v63 }
 0xd55   : > { %v6686_v11 = vpop.xlane.xlu1 %6685  ;;  %6730 = vadd.xlane.f32.xlu2 %v6729_v18  ;;  %v8629_v18 = vld [vmem:[%s12432_s1 + $0x24] sm:$0xf] }
 0xd56   : > { %v6702_v14 = vmul.f32 %v6686_v11, %v12430_v15  ;;  %v8367_v11 = vld [vmem:[%s12432_s1 + $0x28] sm:$0xf0]  ;;  %6948 = vmatpush.bf16.msrb.mxu2 %v8366_v59  ;;  %v8634_v59 = vld [vmem:[%s12433_s3 + $0x4] sm:$0xf0] }
 0xd58   : > { %v11895_v30 = vsub.f32 %v11844_v29, %v6702_v14 }
 0xd5a   : > { %v6718_v58 = vmul.f32 %v11895_v30, %v11895_v30 }
 0xd5c   : > { %v6732_v49 = vsel %vm946_vm0, %v6718_v58, 0.0  ;;  %v8370_v58 = vor.u32 %v8629_v18, %v8367_v11  ;;  %v8633_v18 = vld [vmem:[%s12433_s3 + $0x4] sm:$0xf] }
 0xd5d   : > { %6733 = vadd.xlane.f32.xlu0 %v6732_v49  ;;  %v8405_v49 = vld [vmem:[%s12433_s3 + $0x20] sm:$0xf] }
 0xd5e   : > { %6977 = vmatpush.bf16.msrb.mxu1 %v8370_v58 }
 0xd60   : > { %v6689_v23 = vpop.xlane.xlu2 %6688 }
 0xd61   : > { %v6703_v61 = vmul.f32 %v6689_v23, %v12430_v15  ;;  %v8638_v23 = vld [vmem:[%s12433_s3 + $0x24] sm:$0xf0] }
 0xd63   : > { %v11902_v47 = vsub.f32 %v11850_v20, %v6703_v61  ;;  %v8637_v61 = vld [vmem:[%s12433_s3 + $0x24] sm:$0xf] }
 0xd65   : > { %v6719_v6 = vmul.f32 %v11902_v47, %v11902_v47 }
 0xd67   : > { %v6735_v44 = vsel %vm946_vm0, %v6719_v6, 0.0 }
 0xd68   : > { %v6692_v12 = vpop.xlane.xlu0 %6691  ;;  %6736 = vadd.xlane.f32.xlu1 %v6735_v44  ;;  %v8406_v44 = vor.u32 %v8638_v23, %v8405_v49  ;;  %v8391_v49 = vld [vmem:[%s12433_s3 + $0x8] sm:$0xf0] }
 0xd69   : > { %v6704_v22 = vmul.f32 %v6692_v12, %v12430_v15  ;;  %v8407_v12 = vld [vmem:[%s12433_s3 + $0x28] sm:$0xf0] }
 0xd6a   : > { %7060 = vmatpush.bf16.msrb.mxu3 %v8406_v44 }
 0xd6b   : > { %v11909_v28 = vsub.f32 %v11856_v43, %v6704_v22  ;;  %v8357_v22 = vld [vmem:[%s12432_s1 + $0x10] sm:$0xf] }
 0xd6d   : > { %v6720_v54 = vmul.f32 %v11909_v28, %v11909_v28 }
 0xd6f   : > { %v6738_v62 = vsel %vm946_vm0, %v6720_v54, 0.0 }
 0xd70   : > { %v6695_v9 = vpop.xlane.xlu0 %6694  ;;  %6739 = vadd.xlane.f32.xlu2 %v6738_v62 }
 0xd71   : > { %v6705_v39 = vmul.f32 %v6695_v9, %v12430_v15  ;;  %v8410_v9 = vor.u32 %v8637_v61, %v8407_v12 }
 0xd73   : > { %v11916_v1 = vsub.f32 %v11862_v42, %v6705_v39  ;;  %v8628_v39 = vld [vmem:[%s12432_s1 + $0x14] sm:$0xf0]  ;;  %7089 = vmatpush.bf16.msra.mxu0 %v8410_v9 }
 0xd75   : > { %v6721_v34 = vmul.f32 %v11916_v1, %v11916_v1 }
 0xd77   : > { %v6741_v27 = vsel %vm946_vm0, %v6721_v34, 0.0  ;;  %v8627_v34 = vld [vmem:[%s12432_s1 + $0x14] sm:$0xf]  ;;  %7090 = vmatpush.bf16.msra.mxu0 %v8402_v8 }
 0xd78   : > { %6742 = vadd.xlane.f32.xlu0 %v6741_v27 }
 0xdb8   : > { %v6725_v50 = vpop.xlane.xlu1 %6724 }
 0xdb9   : > { %v6747_v51 = vmul.f32 %v6725_v50, %v12430_v15 }
 0xdbb   : > { %v11922_v52 = vadd.f32 1e-05, %v6747_v51  ;;  %v8358_v51 = vor.u32 %v8628_v39, %v8357_v22 }
 0xdbd   : > { %9167 = vrsqrt.f32 %v11922_v52  ;;  %vm6769_vm11 = vweird.f32 %v11922_v52  ;;  %6949 = vmatpush.bf16.msrb.mxu2 %v8358_v51 }
 0xdc0   : > { %v6698_v0 = vpop.xlane.xlu1 %6697  ;;  %v6728_v48 = vpop.xlane.xlu2 %6727 }
 0xdc1   : > { %v6706_v36 = vmul.f32 %v6698_v0, %v12430_v15  ;;  %v6748_v37 = vmul.f32 %v6728_v48, %v12430_v15  ;;  %v8362_v0 = vor.u32 %v8627_v34, %v8359_v31  ;;  %v8398_v48 = vor.u32 %v8636_v55, %v8397_v38 }
 0xdc3   : > { %v11935_v40 = vpop.eup %9167  ;;  %v11938_v41 = vsub.f32 %v11876_v17, %v6706_v36  ;;  %v11940_v4 = vadd.f32 1e-05, %v6748_v37  ;;  %6978 = vmatpush.bf16.msrb.mxu1 %v8362_v0  ;;  %7061 = vmatpush.bf16.msrb.mxu3 %v8398_v48 }
 0xdc4   : > { %v6764_v56 = vmul.f32 %v11935_v40, %v11922_v52  ;;  %vm6770_vm15 = vweird.f32 %v11935_v40  ;;  %v11987_v52 = vld [vmem:[%s12434_s5] ss:$0 sm:$0xff]  ;;  %s12437_s5 = sld [smem:[#allocation17_spill]] }
 0xdc5   : > { %9169 = vrsqrt.f32 %v11940_v4  ;;  %v6722_v3 = vmul.f32 %v11938_v41, %v11938_v41  ;;  %vm11979_vm12 = vmor %vm6769_vm11, %vm6770_vm15  ;;  %vm6779_vm14 = vweird.f32 %v11940_v4 }
 0xdc6   : > { %v6765_v10 = vmul.f32 %v11935_v40, %v6764_v56  ;;  %v8625_v56 = vld [vmem:[%s12432_s1 + $0x4] sm:$0xf] }
 0xdc7   : > { %v6744_v53 = vsel %vm946_vm0, %v6722_v3, 0.0 }
 0xdc8   : > { %v6766_v33 = vmul.f32 0.5, %v6765_v10  ;;  %6745 = vadd.xlane.f32.xlu1 %v6744_v53  ;;  %v6731_v21 = vpop.xlane.xlu2 %6730  ;;  %v8350_v10 = vor.u32 %v8626_v32, %v8349_v2  ;;  %v8351_v53 = vld [vmem:[%s12432_s1 + $0x8] sm:$0xf0]  ;;  %s12439_s1 = sld [smem:[#allocation21_spill]] }
 0xdc9   : > { %v6749_v14 = vmul.f32 %v6731_v21, %v12430_v15  ;;  %v8354_v21 = vor.u32 %v8625_v56, %v8351_v53 }
 0xdca   : > { %v6767_v6 = vsub.f32 1.5, %v6766_v33  ;;  %6950 = vmatpush.bf16.msrb.mxu2 %v8350_v10 }
 0xdcb   : > { %v11959_v54 = vpop.eup %9169  ;;  %v11961_v62 = vadd.f32 1e-05, %v6749_v14  ;;  %6979 = vmatpush.bf16.msrb.mxu1 %v8354_v21 }
 0xdcc   : > { %v6768_v27 = vmul.f32 %v11935_v40, %v6767_v6  ;;  %v6774_v50 = vmul.f32 %v11959_v54, %v11940_v4  ;;  %vm6780_vm13 = vweird.f32 %v11959_v54  ;;  %v12007_v6 = vld [vmem:[%s12437_s5] ss:$0 sm:$0xff]  ;;  %s12438_s5 = sld [smem:[#allocation22_spill]] }
 0xdcd   : > { %9171 = vrsqrt.f32 %v11961_v62  ;;  %vm6781_vm1 = vmor %vm6779_vm14, %vm6780_vm13  ;;  %vm6789_vm3 = vweird.f32 %v11961_v62 }
 0xdce   : > { %v6775_v24 = vmul.f32 %v11959_v54, %v6774_v50  ;;  %v6772_v37 = vsel %vm11979_vm12, %v11935_v40, %v6768_v27  ;;  %v8389_v40 = vld [vmem:[%s12433_s3] sm:$0xf] }
 0xdcf   : > { %v6843_v57 = vmul.f32 %v6772_v37, %v11868_v60  ;;  %v8390_v58 = vor.u32 %v8634_v59, %v8389_v40  ;;  %v8394_v60 = vor.u32 %v8633_v18, %v8391_v49 }
 0xdd0   : > { %v6776_v46 = vmul.f32 0.5, %v6775_v24  ;;  %v6734_v5 = vpop.xlane.xlu0 %6733 }
 0xdd1   : > { %v6750_v7 = vmul.f32 %v6734_v5, %v12430_v15  ;;  %7062 = vmatpush.bf16.msrb.mxu3 %v8390_v58  ;;  %v6854_v44 = vmul.f32 %v11987_v52, %v6843_v57  ;;  %7091 = vmatpush.bf16.msra.mxu0 %v8394_v60 }
 0xdd2   : > { %v6777_v3 = vsub.f32 1.5, %v6776_v46 }
 0xdd3   : > { %v9172_v63 = vpop.eup %9171  ;;  %v6758_v33 = vadd.f32 1e-05, %v6750_v7  ;;  %v6865_v27 = vadd.f32 %v12007_v6, %v6854_v44 }
 0xdd4   : > { %v6778_v11 = vmul.f32 %v11959_v54, %v6777_v3  ;;  %v6784_v14 = vmul.f32 %v9172_v63, %v11961_v62  ;;  %vm6790_vm2 = vweird.f32 %v9172_v63 }
 0xdd5   : > { %9173 = vrsqrt.f32 %v6758_v33  ;;  %vm6791_vm4 = vmor %vm6789_vm3, %vm6790_vm2  ;;  %vm6799_vm6 = vweird.f32 %v6758_v33 }
 0xdd6   : > { %v6782_v23 = vsel %vm6781_vm1, %v11959_v54, %v6778_v11  ;;  %v6785_v61 = vmul.f32 %v9172_v63, %v6784_v14 }
 0xdd7   : > { %v6844_v4 = vmul.f32 %v6782_v23, %v11879_v25 }
 0xdd8   : > { %v6786_v12 = vmul.f32 0.5, %v6785_v61 }
 0xdd9   : > { %v6855_v22 = vmul.f32 %v11987_v52, %v6844_v4 }
 0xdda   : > { %v6787_v9 = vsub.f32 1.5, %v6786_v12 }
 0xddb   : > { %v6737_v39 = vpop.xlane.xlu1 %6736  ;;  %v9174_v34 = vpop.eup %9173  ;;  %v6866_v50 = vadd.f32 %v12007_v6, %v6855_v22 }
 0xddc   : > { %v6751_v54 = vmul.f32 %v6737_v39, %v12430_v15  ;;  %v6788_v51 = vmul.f32 %v9172_v63, %v6787_v9  ;;  %v6794_v31 = vmul.f32 %v9174_v34, %v6758_v33  ;;  %vm6800_vm5 = vweird.f32 %v9174_v34 }
 0xddd   : > { %v6881_v38 = vpack.c.bf16 %v6866_v50, %v6865_v27  ;;  %vm6801_vm7 = vmor %vm6799_vm6, %vm6800_vm5 }
 0xdde   : > { %v6759_v55 = vadd.f32 1e-05, %v6751_v54  ;;  %v6795_v25 = vmul.f32 %v9174_v34, %v6794_v31  ;;  %v6792_v0 = vsel %vm6791_vm4, %v9172_v63, %v6788_v51 }
 0xddf   : > { %8379 = vmatmul.msk.bf16.vlgmr.msrb.gmra.mxu2 %vm946_vm0, %v6881_v38  ;;  %8383 = vmatmul.msk.bf16.vlgmr.msrb.gmra.mxu1 %vm946_vm0, %v6881_v38  ;;  %v6845_v24 = vmul.f32 %v6792_v0, %v11888_v26 }
 0xde0   : > { %9175 = vrsqrt.f32 %v6759_v55  ;;  %v6796_v48 = vmul.f32 0.5, %v6795_v25  ;;  %8419 = vmatmul.msk.bf16.vlgmr.msrb.gmra.mxu3 %vm946_vm0, %v6881_v38  ;;  %8423 = vmatmul.msk.bf16.vlgmr.msra.gmra.mxu0 %vm946_vm0, %v6881_v38  ;;  %vm6809_vm9 = vweird.f32 %v6759_v55 }
 0xde1   : > { %v6856_v2 = vmul.f32 %v11987_v52, %v6845_v24 }
 0xde2   : > { %v6797_v35 = vsub.f32 1.5, %v6796_v48 }
 0xde3   : > { %v6740_v16 = vpop.xlane.xlu2 %6739  ;;  %v6867_v26 = vadd.f32 %v12007_v6, %v6856_v2  ;;  %v8648_v2 = vld [vmem:[%s12438_s5 + $0x38] sm:$0xff] }
 0xde4   : > { %v6752_v62 = vmul.f32 %v6740_v16, %v12430_v15  ;;  %v6798_v8 = vmul.f32 %v9174_v34, %v6797_v35  ;;  %7413 = vmatpush.bf16.msra.mxu2 %v8648_v2 }
 0xde6   : > { %v9176_v36 = vpop.eup %9175  ;;  %v6760_v37 = vadd.f32 1e-05, %v6752_v62  ;;  %v6802_v46 = vsel %vm6801_vm7, %v9174_v34, %v6798_v8 }
 0xde7   : > { %v6804_v5 = vmul.f32 %v9176_v36, %v6759_v55  ;;  %v6846_v7 = vmul.f32 %v6802_v46, %v11895_v30  ;;  %vm6810_vm8 = vweird.f32 %v9176_v36 }
 0xde8   : > { %9177 = vrsqrt.f32 %v6760_v37  ;;  %vm6811_vm10 = vmor %vm6809_vm9, %vm6810_vm8  ;;  %vm6819_vm11 = vweird.f32 %v6760_v37 }
 0xde9   : > { %v6805_v32 = vmul.f32 %v9176_v36, %v6804_v5  ;;  %v6857_v56 = vmul.f32 %v11987_v52, %v6846_v7 }
 0xdeb   : > { %v6806_v3 = vmul.f32 0.5, %v6805_v32  ;;  %v6868_v10 = vadd.f32 %v12007_v6, %v6857_v56 }
 0xded   : > { %v6807_v53 = vsub.f32 1.5, %v6806_v3  ;;  %v6882_v63 = vpack.c.bf16 %v6868_v10, %v6867_v26  ;;  %v8647_v10 = vld [vmem:[%s12438_s5 + $0x30] sm:$0xff] }
 0xdee   : > { %v9178_v40 = vpop.eup %9177  ;;  %7414 = vmatpush.bf16.msra.mxu2 %v8647_v10 }
 0xdef   : > { %v6808_v57 = vmul.f32 %v9176_v36, %v6807_v53  ;;  %v6814_v33 = vmul.f32 %v9178_v40, %v6760_v37  ;;  %8380 = vmatmul.msk.bf16.gmra.mxu2 %vm946_vm0, %v6882_v63  ;;  %8384 = vmatmul.msk.bf16.gmra.mxu1 %vm946_vm0, %v6882_v63  ;;  %vm6820_vm15 = vweird.f32 %v9178_v40  ;;  %v8653_v53 = vld [vmem:[%s12438_s5 + $0x60] sm:$0xff] }
 0xdf0   : > { %8420 = vmatmul.msk.bf16.gmra.mxu3 %vm946_vm0, %v6882_v63  ;;  %8424 = vmatmul.msk.bf16.gmra.mxu0 %vm946_vm0, %v6882_v63  ;;  %vm6821_vm12 = vmor %vm6819_vm11, %vm6820_vm15 }
 0xdf1   : > { %v6815_v30 = vmul.f32 %v9178_v40, %v6814_v33  ;;  %v6812_v21 = vsel %vm6811_vm10, %v9176_v36, %v6808_v57  ;;  %v8656_v36 = vld [vmem:[%s12438_s5 + $0x78] sm:$0xff]  ;;  %v8646_v57 = vld [vmem:[%s12438_s5 + $0x28] sm:$0xff] }
 0xdf2   : > { %v6847_v11 = vmul.f32 %v6812_v21, %v11902_v47  ;;  %v6743_v47 = vpop.xlane.xlu0 %6742  ;;  %7442 = vmatpush.bf16.msra.mxu1 %v8656_v36  ;;  %7415 = vmatpush.bf16.msra.mxu2 %v8646_v57 }
 0xdf3   : > { %v6816_v59 = vmul.f32 0.5, %v6815_v30 }
 0xdf4   : > { %v6858_v60 = vmul.f32 %v11987_v52, %v6847_v11 }
 0xdf5   : > { %v6817_v18 = vsub.f32 1.5, %v6816_v59  ;;  %v8652_v59 = vld [vmem:[%s12438_s5 + $0x58] sm:$0xff] }
 0xdf6   : > { %v6869_v61 = vadd.f32 %v12007_v6, %v6858_v60 }
 0xdf7   : > { %v6818_v14 = vmul.f32 %v9178_v40, %v6817_v18 }
 0xdf9   : > { %v6822_v58 = vsel %vm6821_vm12, %v9178_v40, %v6818_v14 }
 0xdfa   : > { %v6848_v49 = vmul.f32 %v6822_v58, %v11909_v28  ;;  %v6753_v28 = vmul.f32 %v6743_v47, %v12430_v15  ;;  %v8645_v58 = vld [vmem:[%s12438_s5 + $0x20] sm:$0xff] }
 0xdfb   : > { %7416 = vmatpush.bf16.msra.mxu2 %v8645_v58 }
 0xdfc   : > { %v6859_v23 = vmul.f32 %v11987_v52, %v6848_v49  ;;  %v6761_v12 = vadd.f32 1e-05, %v6753_v28 }
 0xdfe   : > { %v6870_v44 = vadd.f32 %v12007_v6, %v6859_v23  ;;  %9179 = vrsqrt.f32 %v6761_v12  ;;  %vm6829_vm14 = vweird.f32 %v6761_v12 }
 0xe00   : > { %v6883_v4 = vpack.c.bf16 %v6870_v44, %v6869_v61  ;;  %v8651_v61 = vld [vmem:[%s12438_s5 + $0x50] sm:$0xff] }
 0xe02   : > { %8381 = vmatmul.msk.bf16.gmra.mxu2 %vm946_vm0, %v6883_v4  ;;  %8385 = vmatmul.msk.bf16.gmra.mxu1 %vm946_vm0, %v6883_v4 }
 0xe03   : > { %8421 = vmatmul.msk.bf16.gmra.mxu3 %vm946_vm0, %v6883_v4  ;;  %8425 = vmatmul.msk.bf16.gmra.mxu0 %vm946_vm0, %v6883_v4 }
 0xe04   : > { %v9180_v22 = vpop.eup %9179 }
 0xe05   : > { %v6824_v9 = vmul.f32 %v9180_v22, %v6761_v12  ;;  %vm6830_vm13 = vweird.f32 %v9180_v22  ;;  %v8644_v12 = vld [vmem:[%s12438_s5 + $0x18] sm:$0xff] }
 0xe06   : > { %vm6831_vm1 = vmor %vm6829_vm14, %vm6830_vm13  ;;  %7417 = vmatpush.bf16.msra.mxu2 %v8644_v12 }
 0xe07   : > { %v6825_v39 = vmul.f32 %v9180_v22, %v6824_v9 }
 0xe09   : > { %v6826_v54 = vmul.f32 0.5, %v6825_v39 }
 0xe0b   : > { %v6827_v51 = vsub.f32 1.5, %v6826_v54 }
 0xe0d   : > { %v6828_v38 = vmul.f32 %v9180_v22, %v6827_v51 }
 0xe0f   : > { %v6832_v0 = vsel %vm6831_vm1, %v9180_v22, %v6828_v38  ;;  %v8643_v38 = vld [vmem:[%s12438_s5 + $0x10] sm:$0xff] }
 0xe10   : > { %v6849_v16 = vmul.f32 %v6832_v0, %v11916_v1  ;;  %v7009_v1 = vld [vmem:[%s12439_s1] sm:$0x3]  ;;  %s12440_s1 = sld [smem:[#allocation19_spill]]  ;;  %7418 = vmatpush.bf16.msra.mxu2 %v8643_v38 }
 0xe11   : > { %v12064_v26 = vperm.slane %v7009_v1, 0 }
 0xe12   : > { %v6860_v8 = vmul.f32 %v11987_v52, %v6849_v16 }
 0xe14   : > { %v6871_v46 = vadd.f32 %v12007_v6, %v6860_v8  ;;  %v8642_v8 = vld [vmem:[%s12438_s5 + $0x8] sm:$0xff] }
 0xe15   : > { %7419 = vmatpush.bf16.msra.mxu2 %v8642_v8 }
 0xe16   : > { %v6885_v36 = vld [vmem:[%s12440_s1] sm:$0x3]  ;;  %s12295_s1 = sand.u32 1, %s9269_s16  }
 0xe17   : > { %v12117_v10 = vperm.slane %v6885_v36, 1  ;;  %s7696_s3 = sshll.u32 %s12295_s1, 6 }
 0xe3b   : > { %v6746_v34 = vpop.xlane.xlu1 %6745 }
 0xe3c   : > { %v6754_v27 = vmul.f32 %v6746_v34, %v12430_v15 }
 0xe3e   : > { %v6762_v50 = vadd.f32 1e-05, %v6754_v27  ;;  %v8650_v27 = vld [vmem:[%s12438_s5 + $0x48] sm:$0xff] }
 0xe40   : > { %9181 = vrsqrt.f32 %v6762_v50  ;;  %vm6839_vm3 = vweird.f32 %v6762_v50 }
 0xe46   : > { %v9182_v31 = vpop.eup %9181 }
 0xe47   : > { %v6834_v55 = vmul.f32 %v9182_v31, %v6762_v50  ;;  %vm6840_vm2 = vweird.f32 %v9182_v31 }
 0xe48   : > { %vm6841_vm4 = vmor %vm6839_vm3, %vm6840_vm2 }
 0xe49   : > { %v6835_v25 = vmul.f32 %v9182_v31, %v6834_v55 }
 0xe4b   : > { %v6836_v48 = vmul.f32 0.5, %v6835_v25 }
 0xe4d   : > { %v6837_v35 = vsub.f32 1.5, %v6836_v48 }
 0xe4f   : > { %v6838_v15 = vmul.f32 %v9182_v31, %v6837_v35  ;;  %v8649_v35 = vld [vmem:[%s12438_s5 + $0x40] sm:$0xff] }
 0xe51   : > { %v6842_v24 = vsel %vm6841_vm4, %v9182_v31, %v6838_v15 }
 0xe52   : > { %v6850_v62 = vmul.f32 %v6842_v24, %v11938_v41  ;;  %v12053_v41 = vperm.slane %v7009_v1, 1 }
 0xe54   : > { %v6861_v37 = vmul.f32 %v11987_v52, %v6850_v62  ;;  %v8655_v52 = vld [vmem:[%s12438_s5 + $0x70] sm:$0xff] }
 0xe55   : > { %7443 = vmatpush.bf16.msra.mxu1 %v8655_v52 }
 0xe56   : > { %v6872_v5 = vadd.f32 %v12007_v6, %v6861_v37  ;;  %v8654_v6 = vld [vmem:[%s12438_s5 + $0x68] sm:$0xff] }
 0xe58   : > { %v6884_v7 = vpack.c.bf16 %v6872_v5, %v6871_v46 }
 0xe59   : > { %7444 = vmatpush.bf16.msra.mxu1 %v8654_v6 }
 0xe5a   : > { %8382 = vmatmul.msk.bf16.gmra.mxu2 %vm946_vm0, %v6884_v7  ;;  %8386 = vmatmul.msk.bf16.gmra.mxu1 %vm946_vm0, %v6884_v7 }
 0xe5b   : > { %8422 = vmatmul.msk.bf16.gmra.mxu3 %vm946_vm0, %v6884_v7  ;;  %8426 = vmatmul.msk.bf16.gmra.mxu0 %vm946_vm0, %v6884_v7 }
 0xe5c   : > { %v6981_v44 = vpop.f32.mrf.mxu1 }
 0xe5d   : > { %v7093_v32 = vpop.f32.mrf.mxu0  ;;  %7445 = vmatpush.bf16.msra.mxu1 %v8653_v53 }
 0xe5e   : > { %v12061_v56 = vadd.f32 %v7093_v32, %v12053_v41 }
 0xe60   : > { %v7130_v3 = vmul.f32 0.044715, %v12061_v56  ;;  %v7114_v53 = vmul.f32 0.5, %v12061_v56 }
 0xe61   : > { %7446 = vmatpush.bf16.msra.mxu1 %v8652_v59 }
 0xe62   : > { %v7146_v40 = vmul.f32 %v7130_v3, %v12061_v56  ;;  %v12099_v55 = vpop.f32.mrf.mxu2 }
 0xe63   : > { %v7064_v63 = vpop.f32.mrf.mxu3 }
 0xe64   : > { %v7162_v33 = vmul.f32 %v7146_v40, %v12061_v56  ;;  %v12072_v30 = vadd.f32 %v7064_v63, %v12064_v26  ;;  %v6983_v37 = vpop.f32.mrf.mxu1  ;;  %v8641_v40 = vld [vmem:[%s12438_s5] sm:$0xff]  ;;  %s12206_s5 = scalar_lea.vmem [#allocation2], %s7696_s3  ;;  %s8661_s3 = sshll.u32 %s9493_s0, 6 }
 0xe65   : > { %v7095_v21 = vpop.f32.mrf.mxu0  ;;  %7447 = vmatpush.bf16.msra.mxu1 %v8651_v61  ;;  %7420 = vmatpush.bf16.msra.mxu2 %v8641_v40  ;;  %s7596_s1 = scalar_lea.hbm %s9470_s12, %s8661_s3  ;;  %s9235_s3 = scalar_lea.hbm %s9470_s12, 128 }
 0xe66   : > { %v7178_v18 = vadd.f32 %v7162_v33, %v12061_v56  ;;  %v7129_v11 = vmul.f32 0.044715, %v12072_v30  ;;  %v12078_v14 = vadd.f32 %v7095_v21, %v12053_v41  ;;  %s7599_s6 = sshll.u32 %s7596_s1, 4  ;;  %s7600_s6 = int_to_ptr.hbm [resolvable:$true] %s7599_s6 }
 0xe67   : > { %s9229_s0 = sshra.s32 %s7600_s6, 4  ;;  %s9230_s0 = int_to_ptr.hbm [resolvable:$true] %s9229_s0 }
 0xe68   : > { %v7194_v49 = vmul.f32 0.7978846, %v7178_v18  ;;  %v7145_v60 = vmul.f32 %v7129_v11, %v12072_v30  ;;  %v7132_v23 = vmul.f32 0.044715, %v12078_v14  ;;  %v7116_v18 = vmul.f32 0.5, %v12078_v14  ;;  %s9231_s11 = scalar_lea.hbm %s9230_s0, 64  ;;  %p9236_p0 = scmp.lt.s32.totalorder %s9230_s0, %s9470_s12 }
 0xe69   : > { %7448 = vmatpush.bf16.msra.mxu1 %v8650_v27  ;;  %p9232_p11 = scmp.ne.s32.totalorder %s9230_s0, %s9231_s11  ;;  %p9237_p1 = scmp.lt.s32.totalorder %s9235_s3, %s9231_s11 }
 0xe6a   : > { %v7161_v4 = vmul.f32 %v7145_v60, %v12072_v30  ;;  %v7148_v47 = vmul.f32 %v7132_v23, %v12078_v14  ;;  %9183 = vtanh.f32 %v7194_v49  ;;  %v6954_v49 = vpop.f32.mrf.mxu2  ;;  %v6982_v23 = vadd.f32 %v6981_v44, %v12117_v10 }
 0xe6b   : > { %v7066_v28 = vpop.f32.mrf.mxu3  ;;  %p9233_p12 = pnand %p9232_p11, %p9510_p5  ;;  %p9238_p2 = por %p9237_p1, %p9236_p0 }
 0xe6c   : > { %v7177_v22 = vadd.f32 %v7161_v4, %v12072_v30  ;;  %v7164_v9 = vmul.f32 %v7148_v47, %v12078_v14  ;;  %v12090_v39 = vadd.f32 %v7066_v28, %v12064_v26  ;;  %v6984_v4 = vadd.f32 %v6983_v37, %v12117_v10 }
 0xe6d   : > { %v7098_v34 = vpop.f32.mrf.mxu0  ;;  %7449 = vmatpush.bf16.msra.mxu1 %v8649_v35  ;;  %p9234_p13 = pneg %p9233_p12 }
 0xe6e   : > { %v7193_v50 = vmul.f32 0.7978846, %v7177_v22  ;;  %v7180_v54 = vadd.f32 %v7164_v9, %v12078_v14  ;;  %v7131_v51 = vmul.f32 0.044715, %v12090_v39  ;;  %v12096_v31 = vadd.f32 %v7098_v34, %v12053_v41 }
 0xe6f   : > { %v12134_v9 = vperm.slane %v6885_v36, 0  ;;  %v7113_v34 = vmul.f32 0.5, %v12072_v30  ;;  %p9239_p3 = pnand %p9238_p2, %p9234_p13 }
 0xe70   : > { %v7196_v25 = vmul.f32 0.7978846, %v7180_v54  ;;  %v7147_v0 = vmul.f32 %v7131_v51, %v12090_v39  ;;  %9185 = vtanh.f32 %v7193_v50  ;;  %v7134_v48 = vmul.f32 0.044715, %v12096_v31  ;;  %v9184_v16 = vpop.eup %9183  ;;  %v6986_v54 = vpop.f32.mrf.mxu1 }
 0xe71   : > { %v7226_v1 = vadd.f32 1.0, %v9184_v16  ;;  %v6953_v8 = vadd.f32 %v12099_v55, %v12134_v9  ;;  %v6955_v36 = vadd.f32 %v6954_v49, %v12134_v9 }
 0xe72   : > { %9187 = vtanh.f32 %v7196_v25  ;;  %v7163_v15 = vmul.f32 %v7147_v0, %v12090_v39  ;;  %v7150_v24 = vmul.f32 %v7134_v48, %v12096_v31  ;;  %v7115_v48 = vmul.f32 0.5, %v12090_v39 }
 0xe73   : > { %v7069_v62 = vpop.f32.mrf.mxu3  ;;  %v7242_v59 = vmul.f32 %v7226_v1, %v7114_v53 }
 0xe74   : > { %v7179_v46 = vadd.f32 %v7163_v15, %v12090_v39  ;;  %v12110_v5 = vadd.f32 %v7069_v62, %v12064_v26  ;;  %v7166_v7 = vmul.f32 %v7150_v24, %v12096_v31 }
 0xe75   : > { %v7100_v52 = vpop.f32.mrf.mxu0  ;;  %v7258_v27 = vmul.f32 %v7242_v59, %v6982_v23 }
 0xe76   : > { %v7195_v2 = vmul.f32 0.7978846, %v7179_v46  ;;  %v7133_v32 = vmul.f32 0.044715, %v12110_v5  ;;  %v12115_v6 = vadd.f32 %v7100_v52, %v12053_v41  ;;  %v9186_v3 = vpop.eup %9185  ;;  %v7182_v63 = vadd.f32 %v7166_v7, %v12096_v31 }
 0xe77   : > { %v7225_v61 = vadd.f32 1.0, %v9186_v3 }
 0xe78   : > { %v9188_v57 = vpop.eup %9187  ;;  %9189 = vtanh.f32 %v7195_v2  ;;  %v7149_v33 = vmul.f32 %v7133_v32, %v12110_v5  ;;  %v7136_v21 = vmul.f32 0.044715, %v12115_v6  ;;  %v7198_v58 = vmul.f32 0.7978846, %v7182_v63  ;;  %v6957_v2 = vpop.f32.mrf.mxu2 }
 0xe79   : > { %v7228_v11 = vadd.f32 1.0, %v9188_v57  ;;  %v7241_v0 = vmul.f32 %v7225_v61, %v7113_v34  ;;  %v7120_v23 = vmul.f32 0.5, %v12115_v6 }
 0xe7a   : > { %v7165_v60 = vmul.f32 %v7149_v33, %v12110_v5  ;;  %v7152_v56 = vmul.f32 %v7136_v21, %v12115_v6  ;;  %9191 = vtanh.f32 %v7198_v58  ;;  %v6988_v58 = vpop.f32.mrf.mxu1 }
 0xe7b   : > { %v7244_v47 = vmul.f32 %v7228_v11, %v7116_v18  ;;  %v7071_v28 = vpop.f32.mrf.mxu3  ;;  %v7257_v7 = vmul.f32 %v7241_v0, %v6953_v8  ;;  %v7118_v18 = vmul.f32 0.5, %v12096_v31  ;;  %v6989_v31 = vadd.f32 %v6988_v58, %v12117_v10 }
 0xe7c   : > { %v7168_v12 = vmul.f32 %v7152_v56, %v12115_v6  ;;  %v12131_v22 = vadd.f32 %v7071_v28, %v12064_v26  ;;  %v7181_v14 = vadd.f32 %v7165_v60, %v12110_v5 }
 0xe7d   : > { %v7260_v44 = vmul.f32 %v7244_v47, %v6984_v4 }
 0xe7e   : > { %v9190_v50 = vpop.eup %9189  ;;  %v7135_v51 = vmul.f32 0.044715, %v12131_v22  ;;  %v7184_v38 = vadd.f32 %v7168_v12, %v12115_v6  ;;  %v7197_v25 = vmul.f32 0.7978846, %v7181_v14  ;;  %v6987_v14 = vadd.f32 %v6986_v54, %v12117_v10 }
 0xe7f   : > { %v7227_v35 = vadd.f32 1.0, %v9190_v50  ;;  %v7306_v15 = vpack.c.bf16 %v7260_v44, %v7258_v27  ;;  %v7117_v6 = vmul.f32 0.5, %v12110_v5 }
 0xe80   : > { %v7103_v16 = vpop.f32.mrf.mxu0  ;;  %v7151_v24 = vmul.f32 %v7135_v51, %v12131_v22  ;;  %v7200_v30 = vmul.f32 0.7978846, %v7184_v38  ;;  %9193 = vtanh.f32 %v7197_v25  ;;  %v9192_v46 = vpop.eup %9191 }
 0xe81   : > { %v12142_v62 = vadd.f32 %v7103_v16, %v12053_v41  ;;  %v7243_v37 = vmul.f32 %v7227_v35, %v7115_v48  ;;  %7450 = vmatmul.bf16.vlgmr.msra.gmra.mxu1 %v7306_v15  ;;  %v7230_v40 = vadd.f32 1.0, %v9192_v46  ;;  %v6959_v48 = vpop.f32.mrf.mxu2 }
 0xe82   : > { %v7167_v39 = vmul.f32 %v7151_v24, %v12131_v22  ;;  %9195 = vtanh.f32 %v7200_v30  ;;  %v7119_v24 = vmul.f32 0.5, %v12131_v22  ;;  %v6960_v5 = vadd.f32 %v6959_v48, %v12134_v9 }
 0xe83   : > { %v7138_v1 = vmul.f32 0.044715, %v12142_v62  ;;  %v7259_v52 = vmul.f32 %v7243_v37, %v6955_v36  ;;  %v7246_v4 = vmul.f32 %v7230_v40, %v7118_v18  ;;  %v6991_v36 = vpop.f32.mrf.mxu1 }
 0xe84   : > { %v7183_v3 = vadd.f32 %v7167_v39, %v12131_v22 }
 0xe85   : > { %v7154_v32 = vmul.f32 %v7138_v1, %v12142_v62  ;;  %v7305_v55 = vpack.c.bf16 %v7259_v52, %v7257_v7  ;;  %v7262_v38 = vmul.f32 %v7246_v4, %v6987_v14  ;;  %v6958_v1 = vadd.f32 %v6957_v2, %v12134_v9 }
 0xe86   : > { %v7074_v53 = vpop.f32.mrf.mxu3  ;;  %v7199_v33 = vmul.f32 0.7978846, %v7183_v3  ;;  %v9194_v21 = vpop.eup %9193  ;;  %v7122_v2 = vmul.f32 0.5, %v12142_v62 }
 0xe87   : > { %v7170_v63 = vmul.f32 %v7154_v32, %v12142_v62  ;;  %v12153_v57 = vadd.f32 %v7074_v53, %v12064_v26  ;;  %7421 = vmatmul.bf16.vlgmr.msra.gmra.mxu2 %v7305_v55  ;;  %v7229_v27 = vadd.f32 1.0, %v9194_v21 }
 0xe88   : > { %v7105_v59 = vpop.f32.mrf.mxu0  ;;  %v9196_v11 = vpop.eup %9195  ;;  %9197 = vtanh.f32 %v7199_v33 }
 0xe89   : > { %v7137_v49 = vmul.f32 0.044715, %v12153_v57  ;;  %v7106_v60 = vadd.f32 %v7105_v59, %v12053_v41  ;;  %v7186_v56 = vadd.f32 %v7170_v63, %v12142_v62  ;;  %v7232_v61 = vadd.f32 1.0, %v9196_v11  ;;  %v6962_v63 = vpop.f32.mrf.mxu2 }
 0xe8a   : > { %v7245_v8 = vmul.f32 %v7229_v27, %v7117_v6 }
 0xe8b   : > { %v7153_v47 = vmul.f32 %v7137_v49, %v12153_v57  ;;  %v7140_v28 = vmul.f32 0.044715, %v7106_v60  ;;  %v7202_v12 = vmul.f32 0.7978846, %v7186_v56  ;;  %v7248_v34 = vmul.f32 %v7232_v61, %v7120_v23  ;;  %v6993_v58 = vpop.f32.mrf.mxu1 }
 0xe8c   : > { %v7261_v3 = vmul.f32 %v7245_v8, %v6958_v1  ;;  %v7124_v49 = vmul.f32 0.5, %v7106_v60  ;;  %v6992_v61 = vadd.f32 %v6991_v36, %v12117_v10  ;;  %v6994_v4 = vadd.f32 %v6993_v58, %v12117_v10  ;;  %v8660_v58 = vld [vmem:[%s9460_s27 + $0x18] sm:$0xff] }
 0xe8d   : > { %v7169_v44 = vmul.f32 %v7153_v47, %v12153_v57  ;;  %v7156_v50 = vmul.f32 %v7140_v28, %v7106_v60  ;;  %v7264_v25 = vmul.f32 %v7248_v34, %v6989_v31  ;;  %9199 = vtanh.f32 %v7202_v12  ;;  %7535 = vmatpush.bf16.msra.mxu3 %v8660_v58 }
 0xe8e   : > { %v7076_v51 = vpop.f32.mrf.mxu3  ;;  %v9198_v0 = vpop.eup %9197  ;;  %v7121_v31 = vmul.f32 0.5, %v12153_v57 }
 0xe8f   : > { %v7172_v35 = vmul.f32 %v7156_v50, %v7106_v60  ;;  %v7077_v16 = vadd.f32 %v7076_v51, %v12064_v26  ;;  %v7185_v54 = vadd.f32 %v7169_v44, %v12153_v57  ;;  %v7308_v15 = vpack.c.bf16 %v7264_v25, %v7262_v38 }
 0xe90   : > { %v7231_v30 = vadd.f32 1.0, %v9198_v0 }
 0xe91   : > { %v7139_v37 = vmul.f32 0.044715, %v7077_v16  ;;  %v7188_v46 = vadd.f32 %v7172_v35, %v7106_v60  ;;  %v7201_v39 = vmul.f32 0.7978846, %v7185_v54  ;;  %7455 = vmatmul.bf16.gmra.mxu1 %v7308_v15  ;;  %v6964_v27 = vpop.f32.mrf.mxu2  ;;  %v7123_v62 = vmul.f32 0.5, %v7077_v16 }
 0xe92   : > { %v7247_v7 = vmul.f32 %v7231_v30, %v7119_v24  ;;  %v6963_v60 = vadd.f32 %v6962_v63, %v12134_v9  ;;  %v6965_v38 = vadd.f32 %v6964_v27, %v12134_v9 }
 0xe93   : > { %v7155_v52 = vmul.f32 %v7139_v37, %v7077_v16  ;;  %v7204_v32 = vmul.f32 0.7978846, %v7188_v46  ;;  %9201 = vtanh.f32 %v7201_v39  ;;  %v9200_v55 = vpop.eup %9199 }
 0xe94   : > { %v7263_v53 = vmul.f32 %v7247_v7, %v6960_v5  ;;  %v7234_v21 = vadd.f32 1.0, %v9200_v55 }
 0xe95   : > { %v7171_v40 = vmul.f32 %v7155_v52, %v7077_v16  ;;  %9203 = vtanh.f32 %v7204_v32 }
 0xe96   : > { %v7307_v22 = vpack.c.bf16 %v7263_v53, %v7261_v3  ;;  %v7250_v23 = vmul.f32 %v7234_v21, %v7122_v2 }
 0xe97   : > { %v7187_v33 = vadd.f32 %v7171_v40, %v7077_v16 }
 0xe98   : > { %7426 = vmatmul.bf16.gmra.mxu2 %v7307_v22  ;;  %v7266_v12 = vmul.f32 %v7250_v23, %v6992_v61 }
 0xe99   : > { %v7203_v59 = vmul.f32 0.7978846, %v7187_v33  ;;  %v9202_v18 = vpop.eup %9201 }
 0xe9a   : > { %v7233_v28 = vadd.f32 1.0, %v9202_v18 }
 0xe9b   : > { %v9204_v11 = vpop.eup %9203  ;;  %9205 = vtanh.f32 %v7203_v59 }
 0xe9c   : > { %v7236_v56 = vadd.f32 1.0, %v9204_v11  ;;  %v7249_v51 = vmul.f32 %v7233_v28, %v7121_v31 }
 0xe9e   : > { %v7252_v47 = vmul.f32 %v7236_v56, %v7124_v49  ;;  %v7265_v6 = vmul.f32 %v7249_v51, %v6963_v60 }
 0xea0   : > { %v7268_v14 = vmul.f32 %v7252_v47, %v6994_v4 }
 0xea1   : > { %v9206_v34 = vpop.eup %9205 }
 0xea2   : > { %v7310_v44 = vpack.c.bf16 %v7268_v14, %v7266_v12  ;;  %v7235_v50 = vadd.f32 1.0, %v9206_v34 }
 0xea4   : > { %7460 = vmatmul.bf16.gmra.mxu1 %v7310_v44  ;;  %v7251_v25 = vmul.f32 %v7235_v50, %v7123_v62 }
 0xea6   : > { %v7267_v0 = vmul.f32 %v7251_v25, %v6965_v38  ;;  %v8658_v25 = vld [vmem:[%s9460_s27 + $0x8] sm:$0xff] }
 0xea8   : > { %v7309_v48 = vpack.c.bf16 %v7267_v0, %v7265_v6 }
 0xeaa   : > { %7431 = vmatmul.bf16.gmra.mxu2 %v7309_v48 }
 0xed7   : > { %v6996_v40 = vpop.f32.mrf.mxu1 }
 0xed8   : > { %v7108_v35 = vpop.f32.mrf.mxu0  ;;  %v6997_v31 = vadd.f32 %v6996_v40, %v12117_v10 }
 0xed9   : > { %v7109_v54 = vadd.f32 %v7108_v35, %v12053_v41 }
 0xedb   : > { %v7142_v57 = vmul.f32 0.044715, %v7109_v54  ;;  %v7126_v61 = vmul.f32 0.5, %v7109_v54 }
 0xedd   : > { %v7158_v15 = vmul.f32 %v7142_v57, %v7109_v54  ;;  %v6967_v2 = vpop.f32.mrf.mxu2 }
 0xede   : > { %v7079_v24 = vpop.f32.mrf.mxu3  ;;  %v6968_v57 = vadd.f32 %v6967_v2, %v12134_v9 }
 0xedf   : > { %v7174_v30 = vmul.f32 %v7158_v15, %v7109_v54  ;;  %v7080_v16 = vadd.f32 %v7079_v24, %v12064_v26  ;;  %v6998_v47 = vpop.f32.mrf.mxu1 }
 0xee0   : > { %v7110_v8 = vpop.f32.mrf.mxu0  ;;  %v6999_v34 = vadd.f32 %v6998_v47, %v12117_v10 }
 0xee1   : > { %v7141_v36 = vmul.f32 0.044715, %v7080_v16  ;;  %v7111_v37 = vadd.f32 %v7110_v8, %v12053_v41  ;;  %v7190_v46 = vadd.f32 %v7174_v30, %v7109_v54  ;;  %v7125_v51 = vmul.f32 0.5, %v7080_v16  ;;  %v8657_v54 = vld [vmem:[%s9460_s27] sm:$0xff] }
 0xee3   : > { %v7157_v39 = vmul.f32 %v7141_v36, %v7080_v16  ;;  %v7144_v1 = vmul.f32 0.044715, %v7111_v37  ;;  %v7206_v5 = vmul.f32 0.7978846, %v7190_v46  ;;  %v7128_v28 = vmul.f32 0.5, %v7111_v37 }
 0xee5   : > { %v7173_v7 = vmul.f32 %v7157_v39, %v7080_v16  ;;  %v7160_v52 = vmul.f32 %v7144_v1, %v7111_v37  ;;  %9207 = vtanh.f32 %v7206_v5  ;;  %v6969_v38 = vpop.f32.mrf.mxu2 }
 0xee6   : > { %v7081_v32 = vpop.f32.mrf.mxu3  ;;  %v6970_v15 = vadd.f32 %v6969_v38, %v12134_v9 }
 0xee7   : > { %v7176_v3 = vmul.f32 %v7160_v52, %v7111_v37  ;;  %v7082_v53 = vadd.f32 %v7081_v32, %v12064_v26  ;;  %v7189_v55 = vadd.f32 %v7173_v7, %v7080_v16  ;;  %v8659_v26 = vld [vmem:[%s9460_s27 + $0x10] sm:$0xff] }
 0xee8   : > { %7536 = vmatpush.bf16.msra.mxu3 %v8659_v26 }
 0xee9   : > { %v7143_v22 = vmul.f32 0.044715, %v7082_v53  ;;  %v7192_v63 = vadd.f32 %v7176_v3, %v7111_v37  ;;  %v7205_v33 = vmul.f32 0.7978846, %v7189_v55  ;;  %v7127_v0 = vmul.f32 0.5, %v7082_v53 }
 0xeea   : > { %v8745_v37 = vld [vmem:[%s9455_s20] ss:$0 sm:$0xff] }
 0xeeb   : > { %v7159_v21 = vmul.f32 %v7143_v22, %v7082_v53  ;;  %v7208_v41 = vmul.f32 0.7978846, %v7192_v63  ;;  %9209 = vtanh.f32 %v7205_v33  ;;  %v9208_v59 = vpop.eup %9207 }
 0xeec   : > { %v7238_v49 = vadd.f32 1.0, %v9208_v59  ;;  %7537 = vmatpush.bf16.msra.mxu3 %v8658_v25 }
 0xeed   : > { %v7175_v18 = vmul.f32 %v7159_v21, %v7082_v53  ;;  %9211 = vtanh.f32 %v7208_v41 }
 0xeee   : > { %v7254_v14 = vmul.f32 %v7238_v49, %v7126_v61 }
 0xeef   : > { %v7191_v11 = vadd.f32 %v7175_v18, %v7082_v53 }
 0xef0   : > { %v7270_v62 = vmul.f32 %v7254_v14, %v6997_v31  ;;  %7538 = vmatpush.bf16.msra.mxu3 %v8657_v54 }
 0xef1   : > { %v7207_v56 = vmul.f32 0.7978846, %v7191_v11  ;;  %v9210_v23 = vpop.eup %9209 }
 0xef2   : > { %v7237_v44 = vadd.f32 1.0, %v9210_v23 }
 0xef3   : > { %v9212_v4 = vpop.eup %9211  ;;  %9213 = vtanh.f32 %v7207_v56 }
 0xef4   : > { %v7240_v12 = vadd.f32 1.0, %v9212_v4  ;;  %v7253_v35 = vmul.f32 %v7237_v44, %v7125_v51  ;;  %v7560_v51 = vld [vmem:[%s9530_s28] sm:$0xff] }
 0xef6   : > { %v7256_v27 = vmul.f32 %v7240_v12, %v7128_v28  ;;  %v7269_v24 = vmul.f32 %v7253_v35, %v6968_v57 }
 0xef8   : > { %v7272_v50 = vmul.f32 %v7256_v27, %v6999_v34 }
 0xef9   : > { %v9214_v60 = vpop.eup %9213 }
 0xefa   : > { %v7312_v6 = vpack.c.bf16 %v7272_v50, %v7270_v62  ;;  %v7239_v48 = vadd.f32 1.0, %v9214_v60  ;;  %v8746_v62 = vld [vmem:[%s12441_s4] ss:$0 sm:$0xff]  ;;  %s7597_s4 = sshll.u32 %s12206_s5, 4  ;;  %s7598_s4 = int_to_ptr.vmem [resolvable:$true] %s7597_s4 }
 0xefc   : > { %7465 = vmatmul.bf16.gmra.mxu1 %v7312_v6  ;;  %v7255_v10 = vmul.f32 %v7239_v48, %v7127_v0  ;;  %v7562_v48 = vld [vmem:[%s9530_s28 + $0x10] sm:$0xff] }
 0xefe   : > { %v7271_v30 = vmul.f32 %v7255_v10, %v6970_v15  ;;  %v7451_v8 = vpop.f32.mrf.mxu1  ;;  %v7563_v15 = vld [vmem:[%s9530_s28 + $0x18] sm:$0xff] }
 0xf00   : > { %v7311_v16 = vpack.c.bf16 %v7271_v30, %v7269_v24 }
 0xf02   : > { %7436 = vmatmul.bf16.gmra.mxu2 %v7311_v16  ;;  %v7564_v16 = vld [vmem:[%s9530_s28 + $0x20] sm:$0xff] }
 0xf06   : > { %v7453_v39 = vpop.f32.mrf.mxu1 }
 0xf0a   : > { %v7422_v36 = vpop.f32.mrf.mxu2 }
 0xf0b   : > { %v7423_v46 = vadd.f32 %v8745_v37, %v7422_v36 }
 0xf0d   : > { %v7452_v5 = vadd.f32 %v7451_v8, %v7423_v46  ;;  %v7565_v46 = vld [vmem:[%s9530_s28 + $0x28] sm:$0xff] }
 0xf0e   : > { %v7456_v53 = vpop.f32.mrf.mxu1 }
 0xf0f   : > { %v7471_v32 = vadd.f32 %v7452_v5, %v11826_v45 }
 0xf12   : > { %v7424_v1 = vpop.f32.mrf.mxu2 }
 0xf13   : > { %v7425_v7 = vadd.f32 %v8745_v37, %v7424_v1 }
 0xf15   : > { %v7454_v52 = vadd.f32 %v7453_v39, %v7425_v7  ;;  %v7566_v7 = vld [vmem:[%s9530_s28 + $0x30] sm:$0xff] }
 0xf16   : > { %v7458_v21 = vpop.f32.mrf.mxu1 }
 0xf17   : > { %v7472_v9 = vadd.f32 %v7454_v52, %v11832_v19 }
 0xf19   : > { %v7487_v3 = vpack.c.bf16 %v7472_v9, %v7471_v32 }
 0xf1b   : > { %v7427_v55 = vpop.f32.mrf.mxu2  ;;  %8507 = vmatmul.msk.bf16.vlgmr.msra.gmra.mxu3 %vm946_vm0, %v7487_v3  ;;  %v7567_v3 = vld [vmem:[%s9530_s28 + $0x38] sm:$0xff] }
 0xf1c   : > { %v7428_v40 = vadd.f32 %v8745_v37, %v7427_v55 }
 0xf1e   : > { %v7457_v63 = vadd.f32 %v7456_v53, %v7428_v40 }
 0xf20   : > { %v7473_v59 = vadd.f32 %v7457_v63, %v11838_v13 }
 0xf21   : > { %v7461_v45 = vpop.f32.mrf.mxu1 }
 0xf23   : > { %v7429_v22 = vpop.f32.mrf.mxu2 }
 0xf24   : > { %v7430_v33 = vadd.f32 %v8745_v37, %v7429_v22 }
 0xf26   : > { %v7459_v41 = vadd.f32 %v7458_v21, %v7430_v33 }
 0xf28   : > { %v7474_v18 = vadd.f32 %v7459_v41, %v11844_v29 }
 0xf29   : > { %v7463_v26 = vpop.f32.mrf.mxu1 }
 0xf2a   : > { %v7488_v2 = vpack.c.bf16 %v7474_v18, %v7473_v59 }
 0xf2c   : > { %8508 = vmatmul.msk.bf16.gmra.mxu3 %vm946_vm0, %v7488_v2 }
 0xf2d   : > { %v7432_v19 = vpop.f32.mrf.mxu2 }
 0xf2e   : > { %v7433_v11 = vadd.f32 %v8745_v37, %v7432_v19 }
 0xf30   : > { %v7462_v49 = vadd.f32 %v7461_v45, %v7433_v11 }
 0xf32   : > { %v7475_v61 = vadd.f32 %v7462_v49, %v11850_v20 }
 0xf35   : > { %v7434_v58 = vpop.f32.mrf.mxu2 }
 0xf36   : > { %v7435_v56 = vadd.f32 %v8745_v37, %v7434_v58 }
 0xf38   : > { %v7464_v23 = vadd.f32 %v7463_v26, %v7435_v56 }
 0xf3a   : > { %v7476_v4 = vadd.f32 %v7464_v23, %v11856_v43 }
 0xf3c   : > { %v7489_v13 = vpack.c.bf16 %v7476_v4, %v7475_v61 }
 0xf3e   : > { %8509 = vmatmul.msk.bf16.gmra.mxu3 %vm946_vm0, %v7489_v13 }
 0xf79   : > { %v7466_v29 = vpop.f32.mrf.mxu1 }
 0xf81   : > { %v7468_v34 = vpop.f32.mrf.mxu1 }
 0xf85   : > { %v7437_v47 = vpop.f32.mrf.mxu2 }
 0xf86   : > { %v7438_v28 = vadd.f32 %v8745_v37, %v7437_v47 }
 0xf88   : > { %v7467_v14 = vadd.f32 %v7466_v29, %v7438_v28 }
 0xf8a   : > { %v7477_v20 = vadd.f32 %v7467_v14, %v11862_v42 }
 0xf8d   : > { %v7439_v12 = vpop.f32.mrf.mxu2 }
 0xf8e   : > { %v7440_v31 = vadd.f32 %v8745_v37, %v7439_v12 }
 0xf90   : > { %v7469_v27 = vadd.f32 %v7468_v34, %v7440_v31 }
 0xf92   : > { %v7478_v44 = vadd.f32 %v7469_v27, %v11876_v17  ;;  %v7561_v17 = vld [vmem:[%s9530_s28 + $0x8] sm:$0xff] }
 0xf94   : > { %v7490_v43 = vpack.c.bf16 %v7478_v44, %v7477_v20 }
 0xf96   : > { %8510 = vmatmul.msk.bf16.gmra.mxu3 %vm946_vm0, %v7490_v43 }
 0xf9e   : > { %v7540_v50 = vpop.f32.mrf.mxu3 }
 0xf9f   : > { %v7541_v60 = vadd.f32 %v8746_v62, %v7540_v50 }
 0xfa1   : > { %v7568_v38 = vadd.f32 %v7560_v51, %v7541_v60 }
 0xfa3   : > { %7576 = vst.msk [vmem:[%s12206_s5] sm:$0xff] %vm946_vm0, %v7568_v38 }
 0xfa6   : > { %v7542_v42 = vpop.f32.mrf.mxu3 }
 0xfa7   : > { %v7543_v25 = vadd.f32 %v8746_v62, %v7542_v42 }
 0xfa9   : > { %v7569_v6 = vadd.f32 %v7561_v17, %v7543_v25 }
 0xfab   : > { %7577 = vst.msk [vmem:[%s12206_s5 + $0x8] sm:$0xff] %vm946_vm0, %v7569_v6 }
 0xfaf   : > { %v7545_v0 = vpop.f32.mrf.mxu3 }
 0xfb0   : > { %v7546_v35 = vadd.f32 %v8746_v62, %v7545_v0 }
 0xfb2   : > { %v7570_v54 = vadd.f32 %v7562_v48, %v7546_v35 }
 0xfb4   : > { %7578 = vst.msk [vmem:[%s12206_s5 + $0x10] sm:$0xff] %vm946_vm0, %v7570_v54 }
 0xfb7   : > { %v7547_v57 = vpop.f32.mrf.mxu3 }
 0xfb8   : > { %v7548_v10 = vadd.f32 %v8746_v62, %v7547_v57 }
 0xfba   : > { %v7571_v24 = vadd.f32 %v7563_v15, %v7548_v10 }
 0xfbc   : > { %7579 = vst.msk [vmem:[%s12206_s5 + $0x18] sm:$0xff] %vm946_vm0, %v7571_v24 }
 0xfc1   : > { %v7550_v30 = vpop.f32.mrf.mxu3 }
 0xfc2   : > { %v7551_v8 = vadd.f32 %v8746_v62, %v7550_v30 }
 0xfc4   : > { %v7572_v36 = vadd.f32 %v7564_v16, %v7551_v8 }
 0xfc6   : > { %7580 = vst.msk [vmem:[%s12206_s5 + $0x20] sm:$0xff] %vm946_vm0, %v7572_v36 }
 0xfc9   : > { %v7552_v37 = vpop.f32.mrf.mxu3 }
 0xfca   : > { %v7553_v39 = vadd.f32 %v8746_v62, %v7552_v37 }
 0xfcc   : > { %v7573_v1 = vadd.f32 %v7565_v46, %v7553_v39 }
 0xfce   : > { %7581 = vst.msk [vmem:[%s12206_s5 + $0x28] sm:$0xff] %vm946_vm0, %v7573_v1 }
0x1019   : > { %v7555_v5 = vpop.f32.mrf.mxu3 }
0x101a   : > { %v7556_v52 = vadd.f32 %v8746_v62, %v7555_v5 }
0x101c   : > { %v7574_v32 = vadd.f32 %v7566_v7, %v7556_v52 }
0x101e   : > { %7582 = vst.msk [vmem:[%s12206_s5 + $0x30] sm:$0xff] %vm946_vm0, %v7574_v32 }
0x1021   : > { %v7557_v9 = vpop.f32.mrf.mxu3 }
0x1022   : > { %v7558_v53 = vadd.f32 %v8746_v62, %v7557_v9 }
0x1024   : > { %v7575_v55 = vadd.f32 %v7567_v3, %v7558_v53 }
0x1026   : > { %7583 = vst.msk [vmem:[%s12206_s5 + $0x38] sm:$0xff] %vm946_vm0, %v7575_v55 }
0x1027   : > { %9242 = shalt.err (!%p9239_p3)
}
0x1028   : > { %s9310_s28 = smov 128   ;;  %s9311_s1 = smov 8  }
0x1029   : > { %8662 = dma.vmem_to_hbm [thread:$0]  (%p9510_p5), %s7598_s4, 1024, %s7600_s6, %s7585_s9, %s9310_s28, %s9310_s28, %s9311_s1  }
0x102a PF: > { %p8668_p4 = scmp.ge.s32.totalorder %s9277_s22, 2  ;;  %s7614_s8 = sand.u32 1, %s9265_s15  }
0x102b   : > { %s7615_s5 = scalar_lea.sflag [#allocation3], %s7614_s8 }
0x102c   : > { %p8665_p7 = pnand %p8668_p4, %p9514_p6 }
0x102e   : > { %p8666_p8 = pneg %p8665_p7 }
0x1030   : > { %9260 = dma.done.wait (%p8666_p8), %s7615_s5, 1024  }
0x1031   : > { %9262 = vsyncadd (%p8666_p8), %s7615_s5, 4294966272  ;;  %p71_p9 = scmp.ge.s32.totalorder %s9497_s26, 4   ;;  %s12443_s15 = smov %s9269_s16 }
0x1032   : > { %s12444_s16 = smov %s9273_s18  ;;  %s12445_s18 = smov %s9508_s2 }
0x1033   : > { %s12446_s22 = smov %s9497_s26  ;;  %73 = sbr.rel (!%p71_p9) target bundleno = 62 (0x3e), region = 205 }
0x1038   :  { %7621 = vsyncpa [#allocation3], 1 }
0x1039   :  { %7623 = vsyncpa [#allocation3 + $0x1], 1 }

</bundles_post_ra>
